<compile_context>
chip_gen: v5e
topology: v5e:2x2
jax: 0.10.0
libtpu: 0.0.40
codegen_flags: <defaults>
</compile_context>

<pallas_src>
import functools
import math

import numpy as np
import jax
import jax.numpy as jnp
from jax.experimental import pallas as pl
from jax.experimental.pallas import tpu as pltpu


_VMEM_LIMIT = 64 * 1024 * 1024  # raise scoped-VMEM cap (v5e default is 16 MiB)


# ----------------------------------------------------------------------------
# Helpers
# ----------------------------------------------------------------------------
def _pick_block_rows(R, cap=2048):
    """Row-block for per-token kernels: multiple of 8, <= cap, dividing R when
    possible, and leaving >= 2 grid steps (v7x megacore) when R allows."""
    if R <= 8:
        return R
    upper = min(cap, R)
    if R >= 256:
        upper = min(upper, R // 2)       # keep at least 2 grid steps
    upper = max(8, (upper // 8) * 8)
    for cand in range(upper, 7, -8):     # multiples of 8, descending
        if R % cand == 0:
            return cand
    return upper                          # non-divisor fallback (cdiv grid)


# ----------------------------------------------------------------------------
# Fused norm1 + window-partition + window-attention + proj + window-reverse
# ----------------------------------------------------------------------------
def _window_attention_kernel(x_ref, g1_ref, b1_ref, qkvw_ref, qkvb_ref,
                             projw_ref, projb_ref, o_ref, *,
                             ws, num_heads, head_dim, eps, valid_dims):
    _, _, Wp, C = x_ref.shape            # block: (ws, ws, Wp, C)
    nw = Wp // ws                        # windows per block
    N = ws * ws * ws
    rows = nw * N

    # ---- in-VMEM window partition: (s, h, wi*ws + w, C) -> (wi, s*h*w, C) ---
    x = x_ref[...].astype(jnp.float32)
    x = x.reshape(ws, ws, nw, ws, C)
    x = x.transpose(2, 0, 1, 3, 4)       # (wi, s, h, w, C)
    x = x.reshape(nw, N, C)

    # ---- fused norm1 (per-token, commutes with the partition) ----
    mean = jnp.mean(x, axis=-1, keepdims=True)
    var = jnp.mean((x - mean) ** 2, axis=-1, keepdims=True)
    x = (x - mean) * jax.lax.rsqrt(var + eps) * g1_ref[...] + b1_ref[...]

    if valid_dims is not None:
        # Padded path: zero pad tokens *after* LN so they enter attention as
        # exactly 0, matching the reference "norm1 -> zero-pad" ordering.
        S, H, W = valid_dims
        si = pl.program_id(1)
        hj = pl.program_id(2)
        widx = jax.lax.broadcasted_iota(jnp.int32, (nw, N), 0)
        tok = jax.lax.broadcasted_iota(jnp.int32, (nw, N), 1)
        s_coord = si * ws + tok // (ws * ws)
        h_coord = hj * ws + (tok // ws) % ws
        w_coord = widx * ws + tok % ws
        valid = ((s_coord < S) & (h_coord < H) & (w_coord < W))[..., None]
        x = jnp.where(valid, x, 0.0)

    # ---- QKV: one (rows, C) @ (C, 3C) MXU matmul (bf16 operands, f32 acc).
    #      Softmax scale and position embedding are folded into qkvw / qkvb
    #      by the wrapper. ----
    xb = x.astype(jnp.bfloat16).reshape(rows, C)
    qkv = jnp.dot(xb, qkvw_ref[...], preferred_element_type=jnp.float32)
    qkv = qkv.reshape(nw, N, 3 * C) + qkvb_ref[...]
    q = qkv[..., 0:C]
    k = qkv[..., C:2 * C]
    v = qkv[..., 2 * C:3 * C]

    # ---- heads (unrolled): each head's output feeds its own 8-row slice of
    #      the projection weight and accumulates in f32 (no lane concat). ----
    acc = jnp.zeros((rows, C), jnp.float32)
    for h in range(num_heads):
        lo = h * head_dim
        hi = lo + head_dim
        qh = q[..., lo:hi].astype(jnp.bfloat16)
        kh = k[..., lo:hi].astype(jnp.bfloat16)
        vh = v[..., lo:hi].astype(jnp.bfloat16)
        s = jnp.einsum('wnd,wmd->wnm', qh, kh,
                       preferred_element_type=jnp.float32)     # (nw, N, N) f32
        # q is pre-scaled, head_dim=8 and s stays f32 -> skip the row-max
        # subtraction (saves one cross-lane reduce per score tile).
        p = jnp.exp(s)
        denom = jnp.sum(p, axis=-1, keepdims=True)              # (nw, N, 1)
        oh = jnp.einsum('wnm,wmd->wnd', p.astype(jnp.bfloat16), vh,
                        preferred_element_type=jnp.float32)     # (nw, N, hd)
        oh = oh * pl.reciprocal(denom, approx=True)
        acc = acc + jnp.dot(oh.reshape(rows, head_dim).astype(jnp.bfloat16),
                            projw_ref[lo:hi, :],
                            preferred_element_type=jnp.float32)
    out = acc + projb_ref[...]

    # ---- in-VMEM window reverse: (wi, s*h*w, C) -> (s, h, wi*ws + w, C) ----
    out = out.reshape(nw, ws, ws, ws, C)
    out = out.transpose(1, 2, 0, 3, 4)
    o_ref[...] = out.reshape(ws, ws, Wp, C).astype(o_ref.dtype)


def window_attention_pallas(x5, g1, b1, qkv_w_bf, qkv_bias, proj_w_bf, proj_b,
                            *, ws, num_heads, valid_dims=None,
                            out_dtype=jnp.bfloat16):
    B, Sp, Hp, Wp, C = x5.shape
    N = ws ** 3
    head_dim = C // num_heads
    grid = (B, Sp // ws, Hp // ws)

    n_windows = B * (Sp // ws) * (Hp // ws) * (Wp // ws)
    flops = n_windows * (2 * N * C * 3 * C
                         + 4 * num_heads * N * N * head_dim
                         + 2 * N * C * C)
    transcendentals = n_windows * num_heads * N * N
    bytes_accessed = (x5.size * 4 + B * Sp * Hp * Wp * C * 2
                      + (C * 3 * C + N * 3 * C + C * C + 3 * C) * 4)

    kernel = functools.partial(_window_attention_kernel, ws=ws,
                               num_heads=num_heads, head_dim=head_dim,
                               eps=1e-5, valid_dims=valid_dims)
    block = (None, ws, ws, Wp, C)        # last two dims == full dims -> legal
    idx = lambda b, si, hj: (b, si, hj, 0, 0)
    rep = lambda b, si, hj: (0, 0)
    return pl.pallas_call(
        kernel,
        out_shape=jax.ShapeDtypeStruct((B, Sp, Hp, Wp, C), out_dtype),
        grid=grid,
        in_specs=[
            pl.BlockSpec(block, idx),
            pl.BlockSpec((1, C), rep),
            pl.BlockSpec((1, C), rep),
            pl.BlockSpec((C, 3 * C), rep),
            pl.BlockSpec((N, 3 * C), rep),
            pl.BlockSpec((C, C), rep),
            pl.BlockSpec((1, C), rep),
        ],
        out_specs=pl.BlockSpec(block, idx),
        compiler_params=pltpu.CompilerParams(
            dimension_semantics=("parallel", "parallel", "parallel"),
            vmem_limit_bytes=_VMEM_LIMIT),
        cost_estimate=pl.CostEstimate(flops=flops,
                                      transcendentals=transcendentals,
                                      bytes_accessed=bytes_accessed),
    )(x5, g1.reshape(1, C), b1.reshape(1, C), qkv_w_bf, qkv_bias,
      proj_w_bf, proj_b.reshape(1, C))


# ----------------------------------------------------------------------------
# residual + norm2 + MLP + residual (fused)
# ----------------------------------------------------------------------------
def _residual_mlp_kernel(sc_ref, att_ref, g2_ref, b2_ref,
                         w1_ref, b1_ref, w2_ref, b2b_ref, o_ref, *, eps):
    # residual 1 (attention output arrives in bf16; residual math in f32)
    x1 = sc_ref[...] + att_ref[...].astype(jnp.float32)
    # norm2 (f32 statistics)
    mean = jnp.mean(x1, axis=-1, keepdims=True)
    var = jnp.mean((x1 - mean) ** 2, axis=-1, keepdims=True)
    xn = (x1 - mean) * jax.lax.rsqrt(var + eps) * g2_ref[...] + b2_ref[...]
    # MLP: fc1 -> exact GELU (erf) -> fc2 (bf16 MXU operands, f32 accumulate)
    h = jnp.dot(xn.astype(jnp.bfloat16), w1_ref[...],
                preferred_element_type=jnp.float32) + b1_ref[...]
    h = 0.5 * h * (1.0 + jax.lax.erf(h * (1.0 / math.sqrt(2.0))))
    m = jnp.dot(h.astype(jnp.bfloat16), w2_ref[...],
                preferred_element_type=jnp.float32) + b2b_ref[...]
    # residual 2
    o_ref[...] = (x1 + m).astype(o_ref.dtype)


def residual_mlp_pallas(shortcut2d, attn2d, g2, b2, w1_bf, b1, w2_bf, b2b,
                        *, block_rows=None, eps=1e-5):
    R, C = shortcut2d.shape
    Hd = w1_bf.shape[1]
    if block_rows is None:
        block_rows = _pick_block_rows(R)
    grid = (pl.cdiv(R, block_rows),)

    flops = 4 * R * C * Hd
    transcendentals = R * Hd
    bytes_accessed = (R * C * 4 + R * C * 2 + R * C * 4
                      + 2 * C * Hd * 2 + (2 * C + Hd) * 4)

    # NOTE: no input_output_aliases -- x is a non-donated jit parameter, so
    # aliasing would force XLA to insert a defensive copy (extra HBM pass).
    # TODO(synk): measure a lane-dense (R/4, 128) I/O variant and
    # pipeline_mode=pl.Buffered(3) on v7x if vld/vst or exposed DMA dominate.
    return pl.pallas_call(
        functools.partial(_residual_mlp_kernel, eps=eps),
        out_shape=jax.ShapeDtypeStruct((R, C), shortcut2d.dtype),
        grid=grid,
        in_specs=[
            pl.BlockSpec((block_rows, C), lambda i: (i, 0)),
            pl.BlockSpec((block_rows, C), lambda i: (i, 0)),
            pl.BlockSpec((1, C), lambda i: (0, 0)),
            pl.BlockSpec((1, C), lambda i: (0, 0)),
            pl.BlockSpec((C, Hd), lambda i: (0, 0)),
            pl.BlockSpec((1, Hd), lambda i: (0, 0)),
            pl.BlockSpec((Hd, C), lambda i: (0, 0)),
            pl.BlockSpec((1, C), lambda i: (0, 0)),
        ],
        out_specs=pl.BlockSpec((block_rows, C), lambda i: (i, 0)),
        compiler_params=pltpu.CompilerParams(
            dimension_semantics=("parallel",),
            vmem_limit_bytes=_VMEM_LIMIT),
        cost_estimate=pl.CostEstimate(flops=flops,
                                      transcendentals=transcendentals,
                                      bytes_accessed=bytes_accessed),
    )(shortcut2d, attn2d, g2.reshape(1, C), b2.reshape(1, C),
      w1_bf, b1.reshape(1, Hd), w2_bf, b2b.reshape(1, C))


# ----------------------------------------------------------------------------
# Glue (plain JAX, XLA): only reshape / pad / slice remain outside Pallas
# ----------------------------------------------------------------------------
def window_partition_jax(x, ws):       # used by the pure-JAX reference only
    B, S, H, W, C = x.shape
    x = x.reshape(B, S // ws, ws, H // ws, ws, W // ws, ws, C)
    return x.transpose(0, 1, 3, 5, 2, 4, 6, 7).reshape(-1, ws, ws, ws, C)


def window_reverse_jax(windows, ws, S, H, W):
    B = windows.shape[0] // (S * H * W // ws // ws // ws)
    x = windows.reshape(B, S // ws, H // ws, W // ws, ws, ws, ws, -1)
    return x.transpose(0, 1, 4, 2, 5, 3, 6, 7).reshape(B, S, H, W, -1)


def _swin_block_forward(x, params, *, input_resolution, window_size, num_heads):
    B, L, C = x.shape
    S, H, W = input_resolution
    ws = window_size
    assert L == S * H * W, "input feature has wrong size"
    hd = C // num_heads
    scale = hd ** (-0.5)

    pad_r = (ws - W % ws) % ws
    pad_b = (ws - H % ws) % ws
    pad_g = (ws - S % ws) % ws
    no_pad = (pad_r == 0 and pad_b == 0 and pad_g == 0)

    # Fold the softmax scale into the Q columns of the QKV weight/bias and the
    # position embedding into a per-row (N, 3C) bias:
    #   (x + pos) @ W + b, then q *= scale   ==   x @ W' + (pos @ W' + b')
    col_scale = jnp.concatenate([jnp.full((C,), scale, jnp.float32),
                                 jnp.ones((2 * C,), jnp.float32)])
    qkv_w_s = params["qkv_w"] * col_scale[None, :]
    qkv_bias = (jnp.dot(params["pos"], qkv_w_s,
                        precision=jax.lax.Precision.HIGHEST)
                + params["qkv_b"] * col_scale)                 # (N, 3C), f32

    qkv_w_bf = qkv_w_s.astype(jnp.bfloat16)
    proj_w_bf = params["proj_w"].astype(jnp.bfloat16)
    fc1_w_bf = params["fc1_w"].astype(jnp.bfloat16)
    fc2_w_bf = params["fc2_w"].astype(jnp.bfloat16)

    shortcut = x
    x5 = x.reshape(B, S, H, W, C)                   # free (contiguous view)
    if not no_pad:
        x5 = jnp.pad(x5, ((0, 0), (0, pad_g), (0, pad_b), (0, pad_r), (0, 0)))

    # norm1 + window partition + attention + proj + window reverse, one kernel.
    attn5 = window_attention_pallas(
        x5, params["norm1_g"], params["norm1_b"], qkv_w_bf, qkv_bias,
        proj_w_bf, params["proj_b"], ws=ws, num_heads=num_heads,
        valid_dims=None if no_pad else (S, H, W))   # bf16 (B,Sp,Hp,Wp,C)

    if not no_pad:
        attn5 = attn5[:, :S, :H, :W, :]
    attn2d = attn5.reshape(B * L, C)

    # residual + norm2 + MLP + residual (fused Pallas kernel)
    out = residual_mlp_pallas(
        shortcut.reshape(B * L, C), attn2d,
        params["norm2_g"], params["norm2_b"],
        fc1_w_bf, params["fc1_b"], fc2_w_bf, params["fc2_b"])
    return out.reshape(B, L, C)


swin_block_forward = jax.jit(
    _swin_block_forward,
    static_argnames=("input_resolution", "window_size", "num_heads"))


# ----------------------------------------------------------------------------
# Pure-JAX reference (mirrors the PyTorch module) for self-validation
# ----------------------------------------------------------------------------
def reference_forward(x, params, *, input_resolution, window_size, num_heads):
    mm = lambda a, b: jnp.matmul(a, b, precision=jax.lax.Precision.HIGHEST)

    def ln(v, g, b):
        m = jnp.mean(v, -1, keepdims=True)
        va = jnp.mean((v - m) ** 2, -1, keepdims=True)
        return (v - m) / jnp.sqrt(va + 1e-5) * g + b

    B, L, C = x.shape
    S, H, W = input_resolution
    ws = window_size
    hd = C // num_heads

    shortcut = x
    xn = ln(x, params["norm1_g"], params["norm1_b"])
    x5 = xn.reshape(B, S, H, W, C)
    pad_r = (ws - W % ws) % ws
    pad_b = (ws - H % ws) % ws
    pad_g = (ws - S % ws) % ws
    x5 = jnp.pad(x5, ((0, 0), (0, pad_g), (0, pad_b), (0, pad_r), (0, 0)))
    _, Sp, Hp, Wp, _ = x5.shape

    xw = window_partition_jax(x5, ws).reshape(-1, ws ** 3, C)
    xa = xw + params["pos"][None]
    qkv = mm(xa, params["qkv_w"]) + params["qkv_b"]
    qkv = qkv.reshape(-1, ws ** 3, 3, num_heads, hd).transpose(2, 0, 3, 1, 4)
    q, k, v = qkv[0] * hd ** (-0.5), qkv[1], qkv[2]
    attn = jax.nn.softmax(mm(q, jnp.swapaxes(k, -2, -1)), axis=-1)
    o = mm(attn, v).transpose(0, 2, 1, 3).reshape(-1, ws ** 3, C)
    o = mm(o, params["proj_w"]) + params["proj_b"]

    shifted = window_reverse_jax(o.reshape(-1, ws, ws, ws, C), ws, Sp, Hp, Wp)
    xr = shifted[:, :S, :H, :W, :].reshape(B, L, C)

    x1 = shortcut + xr
    xn2 = ln(x1, params["norm2_g"], params["norm2_b"])
    h = jax.nn.gelu(mm(xn2, params["fc1_w"]) + params["fc1_b"], approximate=False)
    m = mm(h, params["fc2_w"]) + params["fc2_b"]
    return x1 + m


# ----------------------------------------------------------------------------
if __name__ == "__main__":
    def run_case(input_resolution):
        B = 2
        dim = 32
        num_heads = 4
        window_size = 4
        S, H, W = input_resolution
        L = S * H * W
        N = window_size ** 3
        hidden = int(dim * 4.0)

        key = jax.random.PRNGKey(0)
        ks = jax.random.split(key, 16)

        def rinit(k, shape, scale=0.1):
            return jax.random.normal(k, shape, jnp.float32) * scale

        # Linear weights stored pre-transposed as (in_features, out_features)
        # so kernels compute x @ W + b.
        params = {
            "norm1_g": 1.0 + rinit(ks[0], (dim,), 0.05),
            "norm1_b": rinit(ks[1], (dim,), 0.05),
            "norm2_g": 1.0 + rinit(ks[2], (dim,), 0.05),
            "norm2_b": rinit(ks[3], (dim,), 0.05),
            "pos": rinit(ks[4], (N, dim)),     # (1, ws^3, dim) parameter, squeezed
            "qkv_w": rinit(ks[5], (dim, 3 * dim)),
            "qkv_b": rinit(ks[6], (3 * dim,)),
            "proj_w": rinit(ks[7], (dim, dim)),
            "proj_b": rinit(ks[8], (dim,)),
            "fc1_w": rinit(ks[9], (dim, hidden)),
            "fc1_b": rinit(ks[10], (hidden,)),
            "fc2_w": rinit(ks[11], (hidden, dim)),
            "fc2_b": rinit(ks[12], (dim,)),
        }

        x = jax.random.normal(ks[13], (B, L, dim), jnp.float32)

        out = swin_block_forward(x, params, input_resolution=input_resolution,
                                 window_size=window_size, num_heads=num_heads)
        out = jax.block_until_ready(out)

        ref = reference_forward(x, params, input_resolution=input_resolution,
                                window_size=window_size, num_heads=num_heads)
        ref = jax.block_until_ready(ref)

        # bf16 MXU operands + bf16 attn output (f32 accumulation, f32 LN and
        # softmax statistics) -> bf16-appropriate tolerance vs. f32 reference.
        np.testing.assert_allclose(np.asarray(out), np.asarray(ref),
                                   rtol=2e-2, atol=2e-2)

    run_case((4, 8, 8))   # aligned path (no spatial padding)
    run_case((4, 6, 6))   # padded path (in-kernel LN + pad-token masking)
    print("KERNEL_OK")
</pallas_src>

<mosaic_0001>
module attributes {stable_mosaic.version = 11 : i64} {
  func.func @_window_attention_kernel(%arg0: i32, %arg1: i32, %arg2: i32, %arg3: memref<1x4x4x8x32xf32, #tpu.memory_space<vmem>>, %arg4: memref<1x32xf32, #tpu.memory_space<vmem>>, %arg5: memref<1x32xf32, #tpu.memory_space<vmem>>, %arg6: memref<32x96xbf16, #tpu.memory_space<vmem>>, %arg7: memref<64x96xf32, #tpu.memory_space<vmem>>, %arg8: memref<32x32xbf16, #tpu.memory_space<vmem>>, %arg9: memref<1x32xf32, #tpu.memory_space<vmem>>, %arg10: memref<1x4x4x8x32xbf16, #tpu.memory_space<vmem>>) attributes {dimension_semantics = [#tpu.dimension_semantics<parallel>, #tpu.dimension_semantics<parallel>, #tpu.dimension_semantics<parallel>], iteration_bounds = array<i64: 2, 1, 2>, scalar_prefetch = 0 : i64, scratch_operands = 0 : i64, tpu.core_type = #tpu.core_type<tc>, window_params = [{transform_indices = @transform_0, window_bounds = array<i64: 1, 4, 4, 8, 32>}, {pipeline_mode = #tpu.pipeline_mode<synchronous>, transform_indices = @transform_1, window_bounds = array<i64: 1, 32>}, {pipeline_mode = #tpu.pipeline_mode<synchronous>, transform_indices = @transform_2, window_bounds = array<i64: 1, 32>}, {pipeline_mode = #tpu.pipeline_mode<synchronous>, transform_indices = @transform_3, window_bounds = array<i64: 32, 96>}, {pipeline_mode = #tpu.pipeline_mode<synchronous>, transform_indices = @transform_4, window_bounds = array<i64: 64, 96>}, {pipeline_mode = #tpu.pipeline_mode<synchronous>, transform_indices = @transform_5, window_bounds = array<i64: 32, 32>}, {pipeline_mode = #tpu.pipeline_mode<synchronous>, transform_indices = @transform_6, window_bounds = array<i64: 1, 32>}, {transform_indices = @transform_7, window_bounds = array<i64: 1, 4, 4, 8, 32>}]} {
    %c0 = arith.constant 0 : index
    %c0_0 = arith.constant 0 : index
    %c0_1 = arith.constant 0 : index
    %c0_2 = arith.constant 0 : index
    %c0_3 = arith.constant 0 : index
    %0 = vector.load %arg3[%c0, %c0_0, %c0_1, %c0_2, %c0_3] : memref<1x4x4x8x32xf32, #tpu.memory_space<vmem>>, vector<1x4x4x8x32xf32>
    %1 = vector.shape_cast %0 : vector<1x4x4x8x32xf32> to vector<4x4x8x32xf32>
    %2 = vector.shape_cast %1 : vector<4x4x8x32xf32> to vector<4x4x2x4x32xf32>
    %3 = tpu.transpose %2, [2, 0, 1, 3, 4] : vector<4x4x2x4x32xf32> -> vector<2x4x4x4x32xf32>
    %4 = vector.shape_cast %3 : vector<2x4x4x4x32xf32> to vector<2x64x32xf32>
    %cst = arith.constant dense<0.000000e+00> : vector<2x64xf32>
    %5 = vector.multi_reduction <add>, %4, %cst [2] : vector<2x64x32xf32> to vector<2x64xf32>
    %6 = vector.shape_cast %5 : vector<2x64xf32> to vector<2x64x1xf32>
    %cst_4 = arith.constant 3.200000e+01 : f32
    %7 = vector.broadcast %cst_4 : f32 to vector<2x64x1xf32>
    %8 = arith.divf %6, %7 : vector<2x64x1xf32>
    %9 = vector.broadcast %8 : vector<2x64x1xf32> to vector<2x64x32xf32>
    %10 = arith.subf %4, %9 : vector<2x64x32xf32>
    %11 = arith.mulf %10, %10 : vector<2x64x32xf32>
    %cst_5 = arith.constant dense<0.000000e+00> : vector<2x64xf32>
    %12 = vector.multi_reduction <add>, %11, %cst_5 [2] : vector<2x64x32xf32> to vector<2x64xf32>
    %13 = vector.shape_cast %12 : vector<2x64xf32> to vector<2x64x1xf32>
    %cst_6 = arith.constant 3.200000e+01 : f32
    %14 = vector.broadcast %cst_6 : f32 to vector<2x64x1xf32>
    %15 = arith.divf %13, %14 : vector<2x64x1xf32>
    %16 = vector.broadcast %8 : vector<2x64x1xf32> to vector<2x64x32xf32>
    %17 = arith.subf %4, %16 : vector<2x64x32xf32>
    %cst_7 = arith.constant 9.99999974E-6 : f32
    %18 = vector.broadcast %cst_7 : f32 to vector<2x64x1xf32>
    %19 = arith.addf %15, %18 : vector<2x64x1xf32>
    %20 = math.rsqrt %19 : vector<2x64x1xf32>
    %21 = vector.broadcast %20 : vector<2x64x1xf32> to vector<2x64x32xf32>
    %22 = arith.mulf %17, %21 : vector<2x64x32xf32>
    %c0_8 = arith.constant 0 : index
    %c0_9 = arith.constant 0 : index
    %23 = vector.load %arg4[%c0_8, %c0_9] : memref<1x32xf32, #tpu.memory_space<vmem>>, vector<1x32xf32>
    %24 = vector.shape_cast %23 : vector<1x32xf32> to vector<1x1x32xf32>
    %25 = vector.broadcast %24 : vector<1x1x32xf32> to vector<2x64x32xf32>
    %26 = arith.mulf %22, %25 : vector<2x64x32xf32>
    %c0_10 = arith.constant 0 : index
    %c0_11 = arith.constant 0 : index
    %27 = vector.load %arg5[%c0_10, %c0_11] : memref<1x32xf32, #tpu.memory_space<vmem>>, vector<1x32xf32>
    %28 = vector.shape_cast %27 : vector<1x32xf32> to vector<1x1x32xf32>
    %29 = vector.broadcast %28 : vector<1x1x32xf32> to vector<2x64x32xf32>
    %30 = arith.addf %26, %29 : vector<2x64x32xf32>
    %31 = arith.truncf %30 : vector<2x64x32xf32> to vector<2x64x32xbf16>
    %32 = vector.shape_cast %31 : vector<2x64x32xbf16> to vector<128x32xbf16>
    %c0_12 = arith.constant 0 : index
    %c0_13 = arith.constant 0 : index
    %33 = vector.load %arg6[%c0_12, %c0_13] : memref<32x96xbf16, #tpu.memory_space<vmem>>, vector<32x96xbf16>
    %cst_14 = arith.constant dense<0.000000e+00> : vector<128x96xf32>
    %34 = tpu.matmul %32, %33, %cst_14 {dimension_numbers = #tpu.dot_dimension_numbers<[1], [0], [0], [1], [0, 0, 1, 1], [], []>} : vector<128x32xbf16>, vector<32x96xbf16>, vector<128x96xf32> -> vector<128x96xf32>
    %35 = vector.shape_cast %34 : vector<128x96xf32> to vector<2x64x96xf32>
    %c0_15 = arith.constant 0 : index
    %c0_16 = arith.constant 0 : index
    %36 = vector.load %arg7[%c0_15, %c0_16] : memref<64x96xf32, #tpu.memory_space<vmem>>, vector<64x96xf32>
    %37 = vector.shape_cast %36 : vector<64x96xf32> to vector<1x64x96xf32>
    %38 = vector.broadcast %37 : vector<1x64x96xf32> to vector<2x64x96xf32>
    %39 = arith.addf %35, %38 : vector<2x64x96xf32>
    %40 = vector.extract_strided_slice %39 {offsets = [0, 0, 0], sizes = [2, 64, 32], strides = [1, 1, 1]} : vector<2x64x96xf32> to vector<2x64x32xf32>
    %41 = vector.extract_strided_slice %39 {offsets = [0, 0, 32], sizes = [2, 64, 32], strides = [1, 1, 1]} : vector<2x64x96xf32> to vector<2x64x32xf32>
    %42 = vector.extract_strided_slice %39 {offsets = [0, 0, 64], sizes = [2, 64, 32], strides = [1, 1, 1]} : vector<2x64x96xf32> to vector<2x64x32xf32>
    %cst_17 = arith.constant 0.000000e+00 : f32
    %43 = vector.broadcast %cst_17 : f32 to vector<128x32xf32>
    %44 = vector.extract_strided_slice %40 {offsets = [0, 0, 0], sizes = [2, 64, 8], strides = [1, 1, 1]} : vector<2x64x32xf32> to vector<2x64x8xf32>
    %45 = arith.truncf %44 : vector<2x64x8xf32> to vector<2x64x8xbf16>
    %46 = vector.extract_strided_slice %41 {offsets = [0, 0, 0], sizes = [2, 64, 8], strides = [1, 1, 1]} : vector<2x64x32xf32> to vector<2x64x8xf32>
    %47 = arith.truncf %46 : vector<2x64x8xf32> to vector<2x64x8xbf16>
    %48 = vector.extract_strided_slice %42 {offsets = [0, 0, 0], sizes = [2, 64, 8], strides = [1, 1, 1]} : vector<2x64x32xf32> to vector<2x64x8xf32>
    %49 = arith.truncf %48 : vector<2x64x8xf32> to vector<2x64x8xbf16>
    "tpu.trace_start"() <{level = 10 : i32, message = "wnd,wmd->wnm"}> : () -> ()
    %cst_18 = arith.constant dense<0.000000e+00> : vector<2x64x64xf32>
    %50 = tpu.matmul %45, %47, %cst_18 {dimension_numbers = #tpu.dot_dimension_numbers<[2], [2], [1], [1], [0, 0, 0, 1, 1, 1], [0], [0]>} : vector<2x64x8xbf16>, vector<2x64x8xbf16>, vector<2x64x64xf32> -> vector<2x64x64xf32>
    "tpu.trace_stop"() : () -> ()
    %51 = math.exp %50 : vector<2x64x64xf32>
    %cst_19 = arith.constant dense<0.000000e+00> : vector<2x64xf32>
    %52 = vector.multi_reduction <add>, %51, %cst_19 [2] : vector<2x64x64xf32> to vector<2x64xf32>
    %53 = vector.shape_cast %52 : vector<2x64xf32> to vector<2x64x1xf32>
    %54 = arith.truncf %51 : vector<2x64x64xf32> to vector<2x64x64xbf16>
    "tpu.trace_start"() <{level = 10 : i32, message = "wnm,wmd->wnd"}> : () -> ()
    %cst_20 = arith.constant dense<0.000000e+00> : vector<2x64x8xf32>
    %55 = tpu.matmul %54, %49, %cst_20 {dimension_numbers = #tpu.dot_dimension_numbers<[2], [1], [1], [2], [0, 0, 0, 1, 1, 2], [0], [0]>} : vector<2x64x64xbf16>, vector<2x64x8xbf16>, vector<2x64x8xf32> -> vector<2x64x8xf32>
    "tpu.trace_stop"() : () -> ()
    %56 = tpu.reciprocal %53 {approx = true} : vector<2x64x1xf32> -> vector<2x64x1xf32>
    %57 = vector.broadcast %56 : vector<2x64x1xf32> to vector<2x64x8xf32>
    %58 = arith.mulf %55, %57 : vector<2x64x8xf32>
    %59 = vector.shape_cast %58 : vector<2x64x8xf32> to vector<128x8xf32>
    %60 = arith.truncf %59 : vector<128x8xf32> to vector<128x8xbf16>
    %c0_21 = arith.constant 0 : index
    %c0_22 = arith.constant 0 : index
    %61 = vector.load %arg8[%c0_21, %c0_22] : memref<32x32xbf16, #tpu.memory_space<vmem>>, vector<8x32xbf16>
    %cst_23 = arith.constant dense<0.000000e+00> : vector<128x32xf32>
    %62 = tpu.matmul %60, %61, %cst_23 {dimension_numbers = #tpu.dot_dimension_numbers<[1], [0], [0], [1], [0, 0, 1, 1], [], []>} : vector<128x8xbf16>, vector<8x32xbf16>, vector<128x32xf32> -> vector<128x32xf32>
    %63 = arith.addf %43, %62 : vector<128x32xf32>
    %64 = vector.extract_strided_slice %40 {offsets = [0, 0, 8], sizes = [2, 64, 8], strides = [1, 1, 1]} : vector<2x64x32xf32> to vector<2x64x8xf32>
    %65 = arith.truncf %64 : vector<2x64x8xf32> to vector<2x64x8xbf16>
    %66 = vector.extract_strided_slice %41 {offsets = [0, 0, 8], sizes = [2, 64, 8], strides = [1, 1, 1]} : vector<2x64x32xf32> to vector<2x64x8xf32>
    %67 = arith.truncf %66 : vector<2x64x8xf32> to vector<2x64x8xbf16>
    %68 = vector.extract_strided_slice %42 {offsets = [0, 0, 8], sizes = [2, 64, 8], strides = [1, 1, 1]} : vector<2x64x32xf32> to vector<2x64x8xf32>
    %69 = arith.truncf %68 : vector<2x64x8xf32> to vector<2x64x8xbf16>
    "tpu.trace_start"() <{level = 10 : i32, message = "wnd,wmd->wnm"}> : () -> ()
    %cst_24 = arith.constant dense<0.000000e+00> : vector<2x64x64xf32>
    %70 = tpu.matmul %65, %67, %cst_24 {dimension_numbers = #tpu.dot_dimension_numbers<[2], [2], [1], [1], [0, 0, 0, 1, 1, 1], [0], [0]>} : vector<2x64x8xbf16>, vector<2x64x8xbf16>, vector<2x64x64xf32> -> vector<2x64x64xf32>
    "tpu.trace_stop"() : () -> ()
    %71 = math.exp %70 : vector<2x64x64xf32>
    %cst_25 = arith.constant dense<0.000000e+00> : vector<2x64xf32>
    %72 = vector.multi_reduction <add>, %71, %cst_25 [2] : vector<2x64x64xf32> to vector<2x64xf32>
    %73 = vector.shape_cast %72 : vector<2x64xf32> to vector<2x64x1xf32>
    %74 = arith.truncf %71 : vector<2x64x64xf32> to vector<2x64x64xbf16>
    "tpu.trace_start"() <{level = 10 : i32, message = "wnm,wmd->wnd"}> : () -> ()
    %cst_26 = arith.constant dense<0.000000e+00> : vector<2x64x8xf32>
    %75 = tpu.matmul %74, %69, %cst_26 {dimension_numbers = #tpu.dot_dimension_numbers<[2], [1], [1], [2], [0, 0, 0, 1, 1, 2], [0], [0]>} : vector<2x64x64xbf16>, vector<2x64x8xbf16>, vector<2x64x8xf32> -> vector<2x64x8xf32>
    "tpu.trace_stop"() : () -> ()
    %76 = tpu.reciprocal %73 {approx = true} : vector<2x64x1xf32> -> vector<2x64x1xf32>
    %77 = vector.broadcast %76 : vector<2x64x1xf32> to vector<2x64x8xf32>
    %78 = arith.mulf %75, %77 : vector<2x64x8xf32>
    %79 = vector.shape_cast %78 : vector<2x64x8xf32> to vector<128x8xf32>
    %80 = arith.truncf %79 : vector<128x8xf32> to vector<128x8xbf16>
    %c8 = arith.constant 8 : index
    %c0_27 = arith.constant 0 : index
    %81 = vector.load %arg8[%c8, %c0_27] : memref<32x32xbf16, #tpu.memory_space<vmem>>, vector<8x32xbf16>
    %cst_28 = arith.constant dense<0.000000e+00> : vector<128x32xf32>
    %82 = tpu.matmul %80, %81, %cst_28 {dimension_numbers = #tpu.dot_dimension_numbers<[1], [0], [0], [1], [0, 0, 1, 1], [], []>} : vector<128x8xbf16>, vector<8x32xbf16>, vector<128x32xf32> -> vector<128x32xf32>
    %83 = arith.addf %63, %82 : vector<128x32xf32>
    %84 = vector.extract_strided_slice %40 {offsets = [0, 0, 16], sizes = [2, 64, 8], strides = [1, 1, 1]} : vector<2x64x32xf32> to vector<2x64x8xf32>
    %85 = arith.truncf %84 : vector<2x64x8xf32> to vector<2x64x8xbf16>
    %86 = vector.extract_strided_slice %41 {offsets = [0, 0, 16], sizes = [2, 64, 8], strides = [1, 1, 1]} : vector<2x64x32xf32> to vector<2x64x8xf32>
    %87 = arith.truncf %86 : vector<2x64x8xf32> to vector<2x64x8xbf16>
    %88 = vector.extract_strided_slice %42 {offsets = [0, 0, 16], sizes = [2, 64, 8], strides = [1, 1, 1]} : vector<2x64x32xf32> to vector<2x64x8xf32>
    %89 = arith.truncf %88 : vector<2x64x8xf32> to vector<2x64x8xbf16>
    "tpu.trace_start"() <{level = 10 : i32, message = "wnd,wmd->wnm"}> : () -> ()
    %cst_29 = arith.constant dense<0.000000e+00> : vector<2x64x64xf32>
    %90 = tpu.matmul %85, %87, %cst_29 {dimension_numbers = #tpu.dot_dimension_numbers<[2], [2], [1], [1], [0, 0, 0, 1, 1, 1], [0], [0]>} : vector<2x64x8xbf16>, vector<2x64x8xbf16>, vector<2x64x64xf32> -> vector<2x64x64xf32>
    "tpu.trace_stop"() : () -> ()
    %91 = math.exp %90 : vector<2x64x64xf32>
    %cst_30 = arith.constant dense<0.000000e+00> : vector<2x64xf32>
    %92 = vector.multi_reduction <add>, %91, %cst_30 [2] : vector<2x64x64xf32> to vector<2x64xf32>
    %93 = vector.shape_cast %92 : vector<2x64xf32> to vector<2x64x1xf32>
    %94 = arith.truncf %91 : vector<2x64x64xf32> to vector<2x64x64xbf16>
    "tpu.trace_start"() <{level = 10 : i32, message = "wnm,wmd->wnd"}> : () -> ()
    %cst_31 = arith.constant dense<0.000000e+00> : vector<2x64x8xf32>
    %95 = tpu.matmul %94, %89, %cst_31 {dimension_numbers = #tpu.dot_dimension_numbers<[2], [1], [1], [2], [0, 0, 0, 1, 1, 2], [0], [0]>} : vector<2x64x64xbf16>, vector<2x64x8xbf16>, vector<2x64x8xf32> -> vector<2x64x8xf32>
    "tpu.trace_stop"() : () -> ()
    %96 = tpu.reciprocal %93 {approx = true} : vector<2x64x1xf32> -> vector<2x64x1xf32>
    %97 = vector.broadcast %96 : vector<2x64x1xf32> to vector<2x64x8xf32>
    %98 = arith.mulf %95, %97 : vector<2x64x8xf32>
    %99 = vector.shape_cast %98 : vector<2x64x8xf32> to vector<128x8xf32>
    %100 = arith.truncf %99 : vector<128x8xf32> to vector<128x8xbf16>
    %c16 = arith.constant 16 : index
    %c0_32 = arith.constant 0 : index
    %101 = vector.load %arg8[%c16, %c0_32] : memref<32x32xbf16, #tpu.memory_space<vmem>>, vector<8x32xbf16>
    %cst_33 = arith.constant dense<0.000000e+00> : vector<128x32xf32>
    %102 = tpu.matmul %100, %101, %cst_33 {dimension_numbers = #tpu.dot_dimension_numbers<[1], [0], [0], [1], [0, 0, 1, 1], [], []>} : vector<128x8xbf16>, vector<8x32xbf16>, vector<128x32xf32> -> vector<128x32xf32>
    %103 = arith.addf %83, %102 : vector<128x32xf32>
    %104 = vector.extract_strided_slice %40 {offsets = [0, 0, 24], sizes = [2, 64, 8], strides = [1, 1, 1]} : vector<2x64x32xf32> to vector<2x64x8xf32>
    %105 = arith.truncf %104 : vector<2x64x8xf32> to vector<2x64x8xbf16>
    %106 = vector.extract_strided_slice %41 {offsets = [0, 0, 24], sizes = [2, 64, 8], strides = [1, 1, 1]} : vector<2x64x32xf32> to vector<2x64x8xf32>
    %107 = arith.truncf %106 : vector<2x64x8xf32> to vector<2x64x8xbf16>
    %108 = vector.extract_strided_slice %42 {offsets = [0, 0, 24], sizes = [2, 64, 8], strides = [1, 1, 1]} : vector<2x64x32xf32> to vector<2x64x8xf32>
    %109 = arith.truncf %108 : vector<2x64x8xf32> to vector<2x64x8xbf16>
    "tpu.trace_start"() <{level = 10 : i32, message = "wnd,wmd->wnm"}> : () -> ()
    %cst_34 = arith.constant dense<0.000000e+00> : vector<2x64x64xf32>
    %110 = tpu.matmul %105, %107, %cst_34 {dimension_numbers = #tpu.dot_dimension_numbers<[2], [2], [1], [1], [0, 0, 0, 1, 1, 1], [0], [0]>} : vector<2x64x8xbf16>, vector<2x64x8xbf16>, vector<2x64x64xf32> -> vector<2x64x64xf32>
    "tpu.trace_stop"() : () -> ()
    %111 = math.exp %110 : vector<2x64x64xf32>
    %cst_35 = arith.constant dense<0.000000e+00> : vector<2x64xf32>
    %112 = vector.multi_reduction <add>, %111, %cst_35 [2] : vector<2x64x64xf32> to vector<2x64xf32>
    %113 = vector.shape_cast %112 : vector<2x64xf32> to vector<2x64x1xf32>
    %114 = arith.truncf %111 : vector<2x64x64xf32> to vector<2x64x64xbf16>
    "tpu.trace_start"() <{level = 10 : i32, message = "wnm,wmd->wnd"}> : () -> ()
    %cst_36 = arith.constant dense<0.000000e+00> : vector<2x64x8xf32>
    %115 = tpu.matmul %114, %109, %cst_36 {dimension_numbers = #tpu.dot_dimension_numbers<[2], [1], [1], [2], [0, 0, 0, 1, 1, 2], [0], [0]>} : vector<2x64x64xbf16>, vector<2x64x8xbf16>, vector<2x64x8xf32> -> vector<2x64x8xf32>
    "tpu.trace_stop"() : () -> ()
    %116 = tpu.reciprocal %113 {approx = true} : vector<2x64x1xf32> -> vector<2x64x1xf32>
    %117 = vector.broadcast %116 : vector<2x64x1xf32> to vector<2x64x8xf32>
    %118 = arith.mulf %115, %117 : vector<2x64x8xf32>
    %119 = vector.shape_cast %118 : vector<2x64x8xf32> to vector<128x8xf32>
    %120 = arith.truncf %119 : vector<128x8xf32> to vector<128x8xbf16>
    %c24 = arith.constant 24 : index
    %c0_37 = arith.constant 0 : index
    %121 = vector.load %arg8[%c24, %c0_37] : memref<32x32xbf16, #tpu.memory_space<vmem>>, vector<8x32xbf16>
    %cst_38 = arith.constant dense<0.000000e+00> : vector<128x32xf32>
    %122 = tpu.matmul %120, %121, %cst_38 {dimension_numbers = #tpu.dot_dimension_numbers<[1], [0], [0], [1], [0, 0, 1, 1], [], []>} : vector<128x8xbf16>, vector<8x32xbf16>, vector<128x32xf32> -> vector<128x32xf32>
    %123 = arith.addf %103, %122 : vector<128x32xf32>
    %c0_39 = arith.constant 0 : index
    %c0_40 = arith.constant 0 : index
    %124 = vector.load %arg9[%c0_39, %c0_40] : memref<1x32xf32, #tpu.memory_space<vmem>>, vector<1x32xf32>
    %125 = vector.broadcast %124 : vector<1x32xf32> to vector<128x32xf32>
    %126 = arith.addf %123, %125 : vector<128x32xf32>
    %127 = vector.shape_cast %126 : vector<128x32xf32> to vector<2x4x4x4x32xf32>
    %128 = tpu.transpose %127, [1, 2, 0, 3, 4] : vector<2x4x4x4x32xf32> -> vector<4x4x2x4x32xf32>
    %129 = vector.shape_cast %128 : vector<4x4x2x4x32xf32> to vector<4x4x8x32xf32>
    %130 = arith.truncf %129 : vector<4x4x8x32xf32> to vector<4x4x8x32xbf16>
    %c0_41 = arith.constant 0 : index
    %c0_42 = arith.constant 0 : index
    %c0_43 = arith.constant 0 : index
    %c0_44 = arith.constant 0 : index
    %c0_45 = arith.constant 0 : index
    %131 = vector.load %arg10[%c0_41, %c0_42, %c0_43, %c0_44, %c0_45] : memref<1x4x4x8x32xbf16, #tpu.memory_space<vmem>>, vector<1x4x4x8x32xbf16>
    %132 = vector.shape_cast %131 : vector<1x4x4x8x32xbf16> to vector<4x4x8x32xbf16>
    %133 = vector.shape_cast %130 : vector<4x4x8x32xbf16> to vector<1x4x4x8x32xbf16>
    tpu.vector_store %arg10[%c0_41, %c0_42, %c0_43, %c0_44, %c0_45], %133 {strides = array<i32>} : memref<1x4x4x8x32xbf16, #tpu.memory_space<vmem>>, vector<1x4x4x8x32xbf16>,
    return
  }
  func.func @transform_0(%arg0: i32, %arg1: i32, %arg2: i32) -> (i32, i32, i32, i32, i32) {
    %c0_i32 = arith.constant 0 : i32
    %c0_i32_0 = arith.constant 0 : i32
    %c0_i32_1 = arith.constant 0 : i32
    return %arg0, %arg1, %arg2, %c0_i32, %c0_i32_0 : i32, i32, i32, i32, i32
  }
  func.func @transform_1(%arg0: i32, %arg1: i32, %arg2: i32) -> (i32, i32) {
    %c0_i32 = arith.constant 0 : i32
    %c0_i32_0 = arith.constant 0 : i32
    %c0_i32_1 = arith.constant 0 : i32
    return %c0_i32, %c0_i32_0 : i32, i32
  }
  func.func @transform_2(%arg0: i32, %arg1: i32, %arg2: i32) -> (i32, i32) {
    %c0_i32 = arith.constant 0 : i32
    %c0_i32_0 = arith.constant 0 : i32
    %c0_i32_1 = arith.constant 0 : i32
    return %c0_i32, %c0_i32_0 : i32, i32
  }
  func.func @transform_3(%arg0: i32, %arg1: i32, %arg2: i32) -> (i32, i32) {
    %c0_i32 = arith.constant 0 : i32
    %c0_i32_0 = arith.constant 0 : i32
    %c0_i32_1 = arith.constant 0 : i32
    return %c0_i32, %c0_i32_0 : i32, i32
  }
  func.func @transform_4(%arg0: i32, %arg1: i32, %arg2: i32) -> (i32, i32) {
    %c0_i32 = arith.constant 0 : i32
    %c0_i32_0 = arith.constant 0 : i32
    %c0_i32_1 = arith.constant 0 : i32
    return %c0_i32, %c0_i32_0 : i32, i32
  }
  func.func @transform_5(%arg0: i32, %arg1: i32, %arg2: i32) -> (i32, i32) {
    %c0_i32 = arith.constant 0 : i32
    %c0_i32_0 = arith.constant 0 : i32
    %c0_i32_1 = arith.constant 0 : i32
    return %c0_i32, %c0_i32_0 : i32, i32
  }
  func.func @transform_6(%arg0: i32, %arg1: i32, %arg2: i32) -> (i32, i32) {
    %c0_i32 = arith.constant 0 : i32
    %c0_i32_0 = arith.constant 0 : i32
    %c0_i32_1 = arith.constant 0 : i32
    return %c0_i32, %c0_i32_0 : i32, i32
  }
  func.func @transform_7(%arg0: i32, %arg1: i32, %arg2: i32) -> (i32, i32, i32, i32, i32) {
    %c0_i32 = arith.constant 0 : i32
    %c0_i32_0 = arith.constant 0 : i32
    %c0_i32_1 = arith.constant 0 : i32
    return %arg0, %arg1, %arg2, %c0_i32, %c0_i32_0 : i32, i32, i32, i32, i32
  }
}

module attributes {stable_mosaic.version = 11 : i64} {
  func.func @_residual_mlp_kernel(%arg0: i32, %arg1: memref<256x32xf32, #tpu.memory_space<vmem>>, %arg2: memref<256x32xbf16, #tpu.memory_space<vmem>>, %arg3: memref<1x32xf32, #tpu.memory_space<vmem>>, %arg4: memref<1x32xf32, #tpu.memory_space<vmem>>, %arg5: memref<32x128xbf16, #tpu.memory_space<vmem>>, %arg6: memref<1x128xf32, #tpu.memory_space<vmem>>, %arg7: memref<128x32xbf16, #tpu.memory_space<vmem>>, %arg8: memref<1x32xf32, #tpu.memory_space<vmem>>, %arg9: memref<256x32xf32, #tpu.memory_space<vmem>>) attributes {dimension_semantics = [#tpu.dimension_semantics<parallel>], iteration_bounds = array<i64: 2>, scalar_prefetch = 0 : i64, scratch_operands = 0 : i64, tpu.core_type = #tpu.core_type<tc>, window_params = [{transform_indices = @transform_0, window_bounds = array<i64: 256, 32>}, {transform_indices = @transform_1, window_bounds = array<i64: 256, 32>}, {pipeline_mode = #tpu.pipeline_mode<synchronous>, transform_indices = @transform_2, window_bounds = array<i64: 1, 32>}, {pipeline_mode = #tpu.pipeline_mode<synchronous>, transform_indices = @transform_3, window_bounds = array<i64: 1, 32>}, {pipeline_mode = #tpu.pipeline_mode<synchronous>, transform_indices = @transform_4, window_bounds = array<i64: 32, 128>}, {pipeline_mode = #tpu.pipeline_mode<synchronous>, transform_indices = @transform_5, window_bounds = array<i64: 1, 128>}, {pipeline_mode = #tpu.pipeline_mode<synchronous>, transform_indices = @transform_6, window_bounds = array<i64: 128, 32>}, {pipeline_mode = #tpu.pipeline_mode<synchronous>, transform_indices = @transform_7, window_bounds = array<i64: 1, 32>}, {transform_indices = @transform_8, window_bounds = array<i64: 256, 32>}]} {
    %c0 = arith.constant 0 : index
    %c0_0 = arith.constant 0 : index
    %0 = vector.load %arg1[%c0, %c0_0] : memref<256x32xf32, #tpu.memory_space<vmem>>, vector<256x32xf32>
    %c0_1 = arith.constant 0 : index
    %c0_2 = arith.constant 0 : index
    %1 = vector.load %arg2[%c0_1, %c0_2] : memref<256x32xbf16, #tpu.memory_space<vmem>>, vector<256x32xbf16>
    %2 = arith.extf %1 : vector<256x32xbf16> to vector<256x32xf32>
    %3 = arith.addf %0, %2 : vector<256x32xf32>
    %cst = arith.constant dense<0.000000e+00> : vector<256xf32>
    %4 = vector.multi_reduction <add>, %3, %cst [1] : vector<256x32xf32> to vector<256xf32>
    %5 = vector.shape_cast %4 : vector<256xf32> to vector<256x1xf32>
    %cst_3 = arith.constant 3.200000e+01 : f32
    %6 = vector.broadcast %cst_3 : f32 to vector<256x1xf32>
    %7 = arith.divf %5, %6 : vector<256x1xf32>
    %8 = vector.broadcast %7 : vector<256x1xf32> to vector<256x32xf32>
    %9 = arith.subf %3, %8 : vector<256x32xf32>
    %10 = arith.mulf %9, %9 : vector<256x32xf32>
    %cst_4 = arith.constant dense<0.000000e+00> : vector<256xf32>
    %11 = vector.multi_reduction <add>, %10, %cst_4 [1] : vector<256x32xf32> to vector<256xf32>
    %12 = vector.shape_cast %11 : vector<256xf32> to vector<256x1xf32>
    %cst_5 = arith.constant 3.200000e+01 : f32
    %13 = vector.broadcast %cst_5 : f32 to vector<256x1xf32>
    %14 = arith.divf %12, %13 : vector<256x1xf32>
    %15 = vector.broadcast %7 : vector<256x1xf32> to vector<256x32xf32>
    %16 = arith.subf %3, %15 : vector<256x32xf32>
    %cst_6 = arith.constant 9.99999974E-6 : f32
    %17 = vector.broadcast %cst_6 : f32 to vector<256x1xf32>
    %18 = arith.addf %14, %17 : vector<256x1xf32>
    %19 = math.rsqrt %18 : vector<256x1xf32>
    %20 = vector.broadcast %19 : vector<256x1xf32> to vector<256x32xf32>
    %21 = arith.mulf %16, %20 : vector<256x32xf32>
    %c0_7 = arith.constant 0 : index
    %c0_8 = arith.constant 0 : index
    %22 = vector.load %arg3[%c0_7, %c0_8] : memref<1x32xf32, #tpu.memory_space<vmem>>, vector<1x32xf32>
    %23 = vector.broadcast %22 : vector<1x32xf32> to vector<256x32xf32>
    %24 = arith.mulf %21, %23 : vector<256x32xf32>
    %c0_9 = arith.constant 0 : index
    %c0_10 = arith.constant 0 : index
    %25 = vector.load %arg4[%c0_9, %c0_10] : memref<1x32xf32, #tpu.memory_space<vmem>>, vector<1x32xf32>
    %26 = vector.broadcast %25 : vector<1x32xf32> to vector<256x32xf32>
    %27 = arith.addf %24, %26 : vector<256x32xf32>
    %28 = arith.truncf %27 : vector<256x32xf32> to vector<256x32xbf16>
    %c0_11 = arith.constant 0 : index
    %c0_12 = arith.constant 0 : index
    %29 = vector.load %arg5[%c0_11, %c0_12] : memref<32x128xbf16, #tpu.memory_space<vmem>>, vector<32x128xbf16>
    %cst_13 = arith.constant dense<0.000000e+00> : vector<256x128xf32>
    %30 = tpu.matmul %28, %29, %cst_13 {dimension_numbers = #tpu.dot_dimension_numbers<[1], [0], [0], [1], [0, 0, 1, 1], [], []>} : vector<256x32xbf16>, vector<32x128xbf16>, vector<256x128xf32> -> vector<256x128xf32>
    %c0_14 = arith.constant 0 : index
    %c0_15 = arith.constant 0 : index
    %31 = vector.load %arg6[%c0_14, %c0_15] : memref<1x128xf32, #tpu.memory_space<vmem>>, vector<1x128xf32>
    %32 = vector.broadcast %31 : vector<1x128xf32> to vector<256x128xf32>
    %33 = arith.addf %30, %32 : vector<256x128xf32>
    %cst_16 = arith.constant 5.000000e-01 : f32
    %34 = vector.broadcast %cst_16 : f32 to vector<256x128xf32>
    %35 = arith.mulf %34, %33 : vector<256x128xf32>
    %cst_17 = arith.constant 0.707106769 : f32
    %36 = vector.broadcast %cst_17 : f32 to vector<256x128xf32>
    %37 = arith.mulf %33, %36 : vector<256x128xf32>
    %38 = math.erf %37 : vector<256x128xf32>
    %cst_18 = arith.constant 1.000000e+00 : f32
    %39 = vector.broadcast %cst_18 : f32 to vector<256x128xf32>
    %40 = arith.addf %39, %38 : vector<256x128xf32>
    %41 = arith.mulf %35, %40 : vector<256x128xf32>
    %42 = arith.truncf %41 : vector<256x128xf32> to vector<256x128xbf16>
    %c0_19 = arith.constant 0 : index
    %c0_20 = arith.constant 0 : index
    %43 = vector.load %arg7[%c0_19, %c0_20] : memref<128x32xbf16, #tpu.memory_space<vmem>>, vector<128x32xbf16>
    %cst_21 = arith.constant dense<0.000000e+00> : vector<256x32xf32>
    %44 = tpu.matmul %42, %43, %cst_21 {dimension_numbers = #tpu.dot_dimension_numbers<[1], [0], [0], [1], [0, 0, 1, 1], [], []>} : vector<256x128xbf16>, vector<128x32xbf16>, vector<256x32xf32> -> vector<256x32xf32>
    %c0_22 = arith.constant 0 : index
    %c0_23 = arith.constant 0 : index
    %45 = vector.load %arg8[%c0_22, %c0_23] : memref<1x32xf32, #tpu.memory_space<vmem>>, vector<1x32xf32>
    %46 = vector.broadcast %45 : vector<1x32xf32> to vector<256x32xf32>
    %47 = arith.addf %44, %46 : vector<256x32xf32>
    %48 = arith.addf %3, %47 : vector<256x32xf32>
    %c0_24 = arith.constant 0 : index
    %c0_25 = arith.constant 0 : index
    %49 = vector.load %arg9[%c0_24, %c0_25] : memref<256x32xf32, #tpu.memory_space<vmem>>, vector<256x32xf32>
    tpu.vector_store %arg9[%c0_24, %c0_25], %48 {strides = array<i32>} : memref<256x32xf32, #tpu.memory_space<vmem>>, vector<256x32xf32>,
    return
  }
  func.func @transform_0(%arg0: i32) -> (i32, i32) {
    %c0_i32 = arith.constant 0 : i32
    %c0_i32_0 = arith.constant 0 : i32
    return %arg0, %c0_i32 : i32, i32
  }
  func.func @transform_1(%arg0: i32) -> (i32, i32) {
    %c0_i32 = arith.constant 0 : i32
    %c0_i32_0 = arith.constant 0 : i32
    return %arg0, %c0_i32 : i32, i32
  }
  func.func @transform_2(%arg0: i32) -> (i32, i32) {
    %c0_i32 = arith.constant 0 : i32
    %c0_i32_0 = arith.constant 0 : i32
    %c0_i32_1 = arith.constant 0 : i32
    return %c0_i32, %c0_i32_0 : i32, i32
  }
  func.func @transform_3(%arg0: i32) -> (i32, i32) {
    %c0_i32 = arith.constant 0 : i32
    %c0_i32_0 = arith.constant 0 : i32
    %c0_i32_1 = arith.constant 0 : i32
    return %c0_i32, %c0_i32_0 : i32, i32
  }
  func.func @transform_4(%arg0: i32) -> (i32, i32) {
    %c0_i32 = arith.constant 0 : i32
    %c0_i32_0 = arith.constant 0 : i32
    %c0_i32_1 = arith.constant 0 : i32
    return %c0_i32, %c0_i32_0 : i32, i32
  }
  func.func @transform_5(%arg0: i32) -> (i32, i32) {
    %c0_i32 = arith.constant 0 : i32
    %c0_i32_0 = arith.constant 0 : i32
    %c0_i32_1 = arith.constant 0 : i32
    return %c0_i32, %c0_i32_0 : i32, i32
  }
  func.func @transform_6(%arg0: i32) -> (i32, i32) {
    %c0_i32 = arith.constant 0 : i32
    %c0_i32_0 = arith.constant 0 : i32
    %c0_i32_1 = arith.constant 0 : i32
    return %c0_i32, %c0_i32_0 : i32, i32
  }
  func.func @transform_7(%arg0: i32) -> (i32, i32) {
    %c0_i32 = arith.constant 0 : i32
    %c0_i32_0 = arith.constant 0 : i32
    %c0_i32_1 = arith.constant 0 : i32
    return %c0_i32, %c0_i32_0 : i32, i32
  }
  func.func @transform_8(%arg0: i32) -> (i32, i32) {
    %c0_i32 = arith.constant 0 : i32
    %c0_i32_0 = arith.constant 0 : i32
    return %arg0, %c0_i32 : i32, i32
  }
}

</mosaic_0001>

<bundles_post_ra>
// kernel: mul.9
= control target key start
LH: loop header
LB: loop body
LE: loop exit
PB: predicated region body
PF: predicated region fallthrough
CT: control target
= control target key end

     0   :  { %s34_s0 = inlined_call_operand.vmem [shape: f32[96], index: 0, kind: input, shape index: {}]   ;;  %s35_s1 = inlined_call_operand.vmem [shape: f32[96], index: 1, kind: input, shape index: {}]   ;;  %s36_s2 = inlined_call_operand.vmem [shape: f32[96], index: 2, kind: output, shape index: {}]  }
   0x1   :  { %v3_v0 = vld [vmem:[%s34_s0] sm:$0x1] }
   0x2   :  { %v4_v1 = vld [vmem:[%s35_s1] sm:$0x1] }
   0x3   :  { %v7_v2 = vmul.f32 %v4_v1, %v3_v0 }
   0x5   :  { %9 = vst [vmem:[%s36_s2] sm:$0x1] %v7_v2 }

// kernel: _swin_block_forward.3
= control target key start
LH: loop header
LB: loop body
LE: loop exit
PB: predicated region body
PF: predicated region fallthrough
CT: control target
= control target key end

     0   :  { %s3538_s27 = smov 0   ;;  %s5943_s0 = inlined_call_operand.vmem [shape: f32[512,32], index: 0, kind: input, shape index: {}]   ;;  %s5944_s1 = inlined_call_operand.vmem [shape: bf16[512,32], index: 1, kind: input, shape index: {}]   ;;  %s5945_s2 = inlined_call_operand.vmem [shape: f32[1,32], index: 2, kind: input, shape index: {}]   ;;  %s5946_s3 = inlined_call_operand.vmem [shape: f32[1,32], index: 3, kind: input, shape index: {}]   ;;  %s5947_s4 = inlined_call_operand.vmem [shape: bf16[32,128], index: 4, kind: input, shape index: {}]   ;;  %s5948_s5 = inlined_call_operand.vmem [shape: f32[1,128], index: 5, kind: input, shape index: {}]   ;;  %s5949_s6 = inlined_call_operand.vmem [shape: bf16[128,32], index: 6, kind: input, shape index: {}]   ;;  %s5950_s7 = inlined_call_operand.vmem [shape: f32[1,32], index: 7, kind: input, shape index: {}]   ;;  %s5951_s8 = inlined_call_operand.vmem [shape: f32[512,32], index: 8, kind: output, shape index: {}]  }
   0x1 LB: > { %s3130_s28 = sadd.s32 4294967295, %s3490_s27   ;;  %p3134_p0 = scmp.ge.s32.totalorder %s3490_s27, 1  ;;  %s3490_s27 = sphi %s3538_s27, %s18_s27  }
   0x2   : > { %p274_p1 = scmp.lt.s32.totalorder %s3490_s27, 3 }
   0x4   : > { %p275_p2 = pnand %p3134_p0, %p274_p1 }
   0x6   : > { %278 = sbr.rel (%p275_p2) target bundleno = 1184 (0x4a0), region = 52 }
   0xb   : > { %s3135_s29 = sshll.u32 %s3130_s28, 5  ;;  %vm460_vm0 = vcmask 261120   ;;  %v3492_v32 = vmov 32.0  }
   0xc   : > { %p314_p3 = scmp.lt.s32.totalorder %s3135_s29, 63  ;;  %3343 = vrcp.f32 %v3492_v32 }
   0xe   : > { %s6116_s29 = smov (!%p314_p3, %s3135_s29), 63 }
   0xf   : > { %s3136_s30 = sshll.u32 %s6116_s29, 3  ;;  %s3138_s9 = sshll.u32 %s6116_s29, 2 }
  0x10   : > { %s3555_s12 = scalar_lea.vmem %s5943_s0, %s3136_s30  ;;  %s3560_s15 = scalar_lea.vmem %s5944_s1, %s3138_s9 }
  0x11   : > { %v334_v0 = vld [vmem:[%s3555_s12 + $0x10] sm:$0xff]  ;;  %v3305_v1 = vld [vmem:[%s3560_s15 + $0x8] sm:$0xff]   ;;  %v332_v3 = vld [vmem:[%s3555_s12] sm:$0xff]  ;;  %s4908_s16 = scalar_lea.vmem %s5951_s8, %s3136_s30 }
  0x12   : > { %v3247_v2 = vunpack.c.l.bf16 %v3305_v1  ;;  %v3242_v4 = vld [vmem:[%s3560_s15] sm:$0xff]   ;;  %v3306_v7 = vld [vmem:[%s3560_s15 + $0x10] sm:$0xff]   ;;  %v3248_v9 = vunpack.c.h.bf16 %v3305_v1  ;;  %v335_v12 = vld [vmem:[%s3555_s12 + $0x18] sm:$0xff]  ;;  %v3344_v33 = vpop.eup %3343 }
  0x13   : > { %v3243_v5 = vunpack.c.l.bf16 %v3242_v4  ;;  %v336_v6 = vld [vmem:[%s3555_s12 + $0x20] sm:$0xff]  ;;  %v3251_v10 = vunpack.c.l.bf16 %v3306_v7  ;;  %v3244_v13 = vunpack.c.h.bf16 %v3242_v4  ;;  %v333_v15 = vld [vmem:[%s3555_s12 + $0x8] sm:$0xff]  ;;  %v3252_v17 = vunpack.c.h.bf16 %v3306_v7  ;;  %v3307_v24 = vld [vmem:[%s3560_s15 + $0x18] sm:$0xff]  }
  0x14   : > { %v3568_v8 = vadd.f32 %v3247_v2, %v334_v0  ;;  %v337_v19 = vld [vmem:[%s3555_s12 + $0x28] sm:$0xff]  ;;  %v3581_v20 = vadd.f32 %v3248_v9, %v335_v12  ;;  %v3255_v28 = vunpack.c.l.bf16 %v3307_v24  ;;  %v338_v29 = vld [vmem:[%s3555_s12 + $0x30] sm:$0xff]  ;;  %v558_v34 = vmul.f32 32.0, %v3344_v33  ;;  %v339_v46 = vld [vmem:[%s3555_s12 + $0x38] sm:$0xff] }
  0x15   : > { %v3570_v11 = vadd.f32 %v3243_v5, %v332_v3  ;;  %v3576_v16 = vadd.f32 %v3251_v10, %v336_v6  ;;  %v3585_v22 = vadd.f32 %v3244_v13, %v333_v15  ;;  %v3587_v23 = vadd.f32 %v3252_v17, %v337_v19  ;;  %v3308_v56 = vld [vmem:[%s3560_s15 + $0x20] sm:$0xff]   ;;  %v3309_v9 = vld [vmem:[%s3560_s15 + $0x28] sm:$0xff]   ;;  %v343_v17 = vld [vmem:[%s3555_s12 + $0x58] sm:$0xff] }
  0x16   : > { %5983 = vst [vmem:[#allocation2_spill] sm:$0xff] %v3568_v8  ;;  %v467_v14 = vsel %vm460_vm0, %v3568_v8, 0.0  ;;  %v470_v25 = vsel %vm460_vm0, %v3581_v20, 0.0  ;;  %v3597_v30 = vadd.f32 %v3255_v28, %v338_v29  ;;  %v559_v35 = vsub.f32 1.0, %v558_v34  ;;  %v340_v2 = vld [vmem:[%s3555_s12 + $0x40] sm:$0xff]  ;;  %v3310_v28 = vld [vmem:[%s3560_s15 + $0x30] sm:$0xff]  }
  0x17   : > { %5984 = vst [vmem:[#allocation3_spill] sm:$0xff] %v3570_v11  ;;  %468 = vadd.xlane.f32.xlu1 %v467_v14  ;;  %v461_v18 = vsel %vm460_vm0, %v3570_v11, 0.0  ;;  %v473_v21 = vsel %vm460_vm0, %v3576_v16, 0.0  ;;  %v464_v26 = vsel %vm460_vm0, %v3585_v22, 0.0  ;;  %v476_v27 = vsel %vm460_vm0, %v3587_v23, 0.0 }
  0x18   : > { %5985 = vst [vmem:[#allocation4_spill] sm:$0xff] %v3576_v16  ;;  %462 = vadd.xlane.f32.xlu0 %v461_v18  ;;  %474 = vadd.xlane.f32.xlu2 %v473_v21  ;;  %v479_v31 = vsel %vm460_vm0, %v3597_v30, 0.0  ;;  %v560_v36 = vmul.f32 %v3344_v33, %v559_v35  ;;  %vm562_vm1 = vweird.f32 %v3344_v33  ;;  %v3256_v45 = vunpack.c.h.bf16 %v3307_v24  ;;  %v341_v21 = vld [vmem:[%s3555_s12 + $0x48] sm:$0xff] }
  0x19   : > { %5986 = vst [vmem:[#allocation5_spill] sm:$0xff] %v3581_v20  ;;  %v3259_v0 = vunpack.c.l.bf16 %v3308_v56  ;;  %v3264_v12 = vunpack.c.h.bf16 %v3309_v9  ;;  %v3260_v18 = vunpack.c.h.bf16 %v3308_v56  ;;  %v3263_v35 = vunpack.c.l.bf16 %v3309_v9 }
  0x1a   : > { %5987 = vst [vmem:[#allocation6_spill] sm:$0xff] %v3585_v22  ;;  %v561_v37 = vadd.f32 %v3344_v33, %v560_v36  ;;  %v3615_v54 = vadd.f32 %v3256_v45, %v339_v46  ;;  %v344_v36 = vld [vmem:[%s3555_s12 + $0x60] sm:$0xff]  ;;  %v3268_v46 = vunpack.c.h.bf16 %v3310_v28 }
  0x1b   : > { %5988 = vst [vmem:[#allocation7_spill] sm:$0xff] %v3587_v23  ;;  %v3642_v6 = vadd.f32 %v3259_v0, %v340_v2  ;;  %v3656_v24 = vadd.f32 %v3264_v12, %v343_v17  ;;  %v3231_v0 = vld [vmem:[%s5947_s4] sm:$0xff] }
  0x1c   : > { %5989 = vst [vmem:[#allocation8_spill] sm:$0xff] %v3597_v30  ;;  %v3601_v38 = vsel %vm562_vm1, %v3344_v33, %v561_v37  ;;  %v482_v62 = vsel %vm460_vm0, %v3615_v54, 0.0  ;;  %v342_v37 = vld [vmem:[%s3555_s12 + $0x50] sm:$0xff] }
  0x1d   : > { %5990 = vst [vmem:[#allocation9_spill] sm:$0xff] %v3615_v54  ;;  %v485_v14 = vsel %vm460_vm0, %v3642_v6, 0.0  ;;  %v494_v29 = vsel %vm460_vm0, %v3656_v24, 0.0 }
  0x1e   : > { %5991 = vst [vmem:[#allocation10_spill] sm:$0xff] %v3642_v6 }
  0x1f   : > { %471 = vadd.xlane.f32.xlu1 %v470_v25  ;;  %5992 = vst [vmem:[#allocation11_spill] sm:$0xff] %v3656_v24 }
  0x20   : > { %465 = vadd.xlane.f32.xlu0 %v464_v26  ;;  %477 = vadd.xlane.f32.xlu2 %v476_v27  ;;  %v3661_v27 = vadd.f32 %v3260_v18, %v341_v21 }
  0x22   : > { %5993 = vst [vmem:[#allocation12_spill] sm:$0xff] %v3661_v27  ;;  %v488_v34 = vsel %vm460_vm0, %v3661_v27, 0.0 }
  0x28   : > { %480 = vadd.xlane.f32.xlu2 %v479_v31  ;;  %v3267_v31 = vunpack.c.l.bf16 %v3310_v28 }
  0x8a   : > { %v469_v39 = vpop.xlane.xlu1 %468 }
  0x8b   : > { %v463_v40 = vpop.xlane.xlu0 %462  ;;  %v475_v42 = vpop.xlane.xlu2 %474  ;;  %v566_v52 = vmul.f32 %v3601_v38, %v469_v39  ;;  %v3674_v39 = vadd.f32 %v3267_v31, %v344_v36 }
  0x8c   : > { %v564_v41 = vmul.f32 %v3601_v38, %v463_v40  ;;  %v568_v51 = vmul.f32 %v3601_v38, %v475_v42 }
  0x8d   : > { %v3630_v61 = vsub.f32 %v3568_v8, %v566_v52  ;;  %5994 = vst [vmem:[#allocation13_spill] sm:$0xff] %v3674_v39  ;;  %v497_v42 = vsel %vm460_vm0, %v3674_v39, 0.0  ;;  %v346_v52 = vld [vmem:[%s3555_s12 + $0x70] sm:$0xff] }
  0x8e   : > { %v3605_v43 = vsub.f32 %v3570_v11, %v564_v41  ;;  %v3625_v58 = vsub.f32 %v3576_v16, %v568_v51  ;;  %v3678_v41 = vadd.f32 %v3263_v35, %v342_v37 }
  0x8f   : > { %v630_v7 = vmul.f32 %v3630_v61, %v3630_v61 }
  0x90   : > { %v628_v44 = vmul.f32 %v3605_v43, %v3605_v43  ;;  %v632_v4 = vmul.f32 %v3625_v58, %v3625_v58  ;;  %5995 = vst [vmem:[#allocation14_spill] sm:$0xff] %v3678_v41  ;;  %v491_v45 = vsel %vm460_vm0, %v3678_v41, 0.0 }
  0x91   : > { %v666_v15 = vsel %vm460_vm0, %v630_v7, 0.0 }
  0x92   : > { %v472_v47 = vpop.xlane.xlu1 %471  ;;  %v660_v48 = vsel %vm460_vm0, %v628_v44, 0.0  ;;  %v672_v10 = vsel %vm460_vm0, %v632_v4, 0.0 }
  0x93   : > { %v567_v49 = vmul.f32 %v3601_v38, %v472_v47  ;;  %661 = vadd.xlane.f32.xlu0 %v660_v48  ;;  %v466_v50 = vpop.xlane.xlu0 %465  ;;  %v478_v60 = vpop.xlane.xlu2 %477  ;;  %v345_v47 = vld [vmem:[%s3555_s12 + $0x68] sm:$0xff] }
  0x94   : > { %v565_v53 = vmul.f32 %v3601_v38, %v466_v50  ;;  %v569_v5 = vmul.f32 %v3601_v38, %v478_v60  ;;  %v3686_v48 = vadd.f32 %v3268_v46, %v345_v47  ;;  %v347_v47 = vld [vmem:[%s3555_s12 + $0x78] sm:$0xff] }
  0x95   : > { %v3618_v55 = vsub.f32 %v3581_v20, %v567_v49  ;;  %v3689_v49 = vld [vmem:[%s3560_s15 + $0x38] sm:$0xff]  }
  0x96   : > { %v3622_v57 = vsub.f32 %v3585_v22, %v565_v53  ;;  %v3649_v13 = vsub.f32 %v3587_v23, %v569_v5  ;;  %5996 = vst [vmem:[#allocation15_spill] sm:$0xff] %v3686_v48  ;;  %v500_v50 = vsel %vm460_vm0, %v3686_v48, 0.0  ;;  %v3271_v51 = vunpack.c.l.bf16 %v3689_v49 }
  0x97   : > { %v631_v59 = vmul.f32 %v3618_v55, %v3618_v55 }
  0x98   : > { %v629_v63 = vmul.f32 %v3622_v57, %v3622_v57  ;;  %v633_v26 = vmul.f32 %v3649_v13, %v3649_v13  ;;  %v3695_v53 = vadd.f32 %v3271_v51, %v346_v52 }
  0x99   : > { %v669_v1 = vsel %vm460_vm0, %v631_v59, 0.0  ;;  %v3232_v59 = vld [vmem:[%s5947_s4 + $0x8] sm:$0xff] }
  0x9a   : > { %670 = vadd.xlane.f32.xlu2 %v669_v1  ;;  %v663_v3 = vsel %vm460_vm0, %v629_v63, 0.0  ;;  %v675_v33 = vsel %vm460_vm0, %v633_v26, 0.0  ;;  %5997 = vst [vmem:[#allocation16_spill] sm:$0xff] %v3695_v53  ;;  %v503_v56 = vsel %vm460_vm0, %v3695_v53, 0.0  ;;  %1334 = vmatpush.bf16.msra.mxu0 %v3232_v59 }
  0x9b   : > { %483 = vadd.xlane.f32.xlu0 %v482_v62  ;;  %664 = vadd.xlane.f32.xlu1 %v663_v3  ;;  %v481_v19 = vpop.xlane.xlu2 %480 }
  0x9c   : > { %v570_v25 = vmul.f32 %v3601_v38, %v481_v19  ;;  %3320 = vmatpush.bf16.msra.mxu3 %v3232_v59 }
  0x9e   : > { %v3667_v32 = vsub.f32 %v3597_v30, %v570_v25  ;;  %1335 = vmatpush.bf16.msra.mxu0 %v3231_v0 }
  0xa0   : > { %v634_v40 = vmul.f32 %v3667_v32, %v3667_v32  ;;  %3321 = vmatpush.bf16.msra.mxu3 %v3231_v0 }
  0xa2   : > { %673 = vadd.xlane.f32.xlu2 %v672_v10  ;;  %v678_v44 = vsel %vm460_vm0, %v634_v40, 0.0 }
  0xa3   : > { %486 = vadd.xlane.f32.xlu0 %v485_v14  ;;  %667 = vadd.xlane.f32.xlu1 %v666_v15 }
  0xaa   : > { %495 = vadd.xlane.f32.xlu2 %v494_v29 }
  0xab   : > { %676 = vadd.xlane.f32.xlu0 %v675_v33  ;;  %489 = vadd.xlane.f32.xlu1 %v488_v34 }
  0xb2   : > { %498 = vadd.xlane.f32.xlu2 %v497_v42 }
  0xb3   : > { %679 = vadd.xlane.f32.xlu0 %v678_v44  ;;  %492 = vadd.xlane.f32.xlu1 %v491_v45  ;;  %v3272_v44 = vunpack.c.h.bf16 %v3689_v49 }
  0xbb   : > { %501 = vadd.xlane.f32.xlu0 %v500_v50 }
  0xc3   : > { %504 = vadd.xlane.f32.xlu0 %v503_v56 }
 0x106   : > { %v662_v60 = vpop.xlane.xlu0 %661 }
 0x107   : > { %v756_v62 = vmul.f32 %v662_v60, %v3601_v38 }
 0x109   : > { %v788_v63 = vadd.f32 1e-05, %v756_v62 }
 0x10b   : > { %3345 = vrsqrt.f32 %v788_v63  ;;  %vm826_vm3 = vweird.f32 %v788_v63 }
 0x10d   : > { %v671_v1 = vpop.xlane.xlu2 %670 }
 0x10e   : > { %v759_v2 = vmul.f32 %v671_v1, %v3601_v38  ;;  %v665_v3 = vpop.xlane.xlu1 %664  ;;  %v484_v4 = vpop.xlane.xlu0 %483 }
 0x10f   : > { %v757_v5 = vmul.f32 %v665_v3, %v3601_v38  ;;  %v571_v7 = vmul.f32 %v3601_v38, %v484_v4  ;;  %v3746_v3 = vld [vmem:[%s3560_s15 + $0x48] sm:$0xff]  }
 0x110   : > { %v3709_v9 = vadd.f32 1e-05, %v759_v2  ;;  %v3743_v2 = vadd.f32 %v3272_v44, %v347_v47 }
 0x111   : > { %v3346_v10 = vpop.eup %3345  ;;  %v789_v12 = vadd.f32 1e-05, %v757_v5  ;;  %v3712_v14 = vsub.f32 %v3615_v54, %v571_v7 }
 0x112   : > { %v821_v15 = vmul.f32 %v3346_v10, %v788_v63  ;;  %3347 = vrsqrt.f32 %v3709_v9  ;;  %vm827_vm2 = vweird.f32 %v3346_v10  ;;  %6000 = vst [vmem:[#allocation17_spill] sm:$0xff] %v3743_v2  ;;  %vm856_vm8 = vweird.f32 %v3709_v9 }
 0x113   : > { %3349 = vrsqrt.f32 %v789_v12  ;;  %v635_v17 = vmul.f32 %v3712_v14, %v3712_v14  ;;  %vm3737_vm4 = vmor %vm826_vm3, %vm827_vm2  ;;  %vm836_vm6 = vweird.f32 %v789_v12 }
 0x114   : > { %v822_v18 = vmul.f32 %v3346_v10, %v821_v15 }
 0x115   : > { %v674_v19 = vpop.xlane.xlu2 %673  ;;  %v681_v21 = vsel %vm460_vm0, %v635_v17, 0.0 }
 0x116   : > { %v823_v25 = vmul.f32 0.5, %v822_v18  ;;  %v668_v26 = vpop.xlane.xlu1 %667  ;;  %682 = vadd.xlane.f32.xlu1 %v681_v21  ;;  %v487_v28 = vpop.xlane.xlu0 %486  ;;  %v760_v36 = vmul.f32 %v674_v19, %v3601_v38  ;;  %v3279_v19 = vunpack.c.l.bf16 %v3746_v3  ;;  %v3764_v21 = vld [vmem:[%s3560_s15 + $0x40] sm:$0xff]  }
 0x117   : > { %v758_v29 = vmul.f32 %v668_v26, %v3601_v38  ;;  %v572_v31 = vmul.f32 %v3601_v38, %v487_v28 }
 0x118   : > { %v3720_v33 = vpop.eup %3347  ;;  %v824_v34 = vsub.f32 1.5, %v823_v25  ;;  %v3735_v52 = vadd.f32 1e-05, %v760_v36  ;;  %v506_v36 = vsel %vm460_vm0, %v3743_v2, 0.0 }
 0x119   : > { %v3350_v35 = vpop.eup %3349  ;;  %v3723_v37 = vadd.f32 1e-05, %v758_v29  ;;  %v3726_v40 = vsub.f32 %v3642_v6, %v572_v31  ;;  %v851_v46 = vmul.f32 %v3720_v33, %v3709_v9  ;;  %vm857_vm9 = vweird.f32 %v3720_v33 }
 0x11a   : > { %v831_v42 = vmul.f32 %v3350_v35, %v789_v12  ;;  %v825_v45 = vmul.f32 %v3346_v10, %v824_v34  ;;  %vm837_vm5 = vweird.f32 %v3350_v35  ;;  %v3774_v12 = vld [vmem:[%s5945_s2] ss:$0 sm:$0xff]  ;;  %vm3820_vm11 = vmor %vm856_vm8, %vm857_vm9  ;;  %vm866_vm1 = vweird.f32 %v3735_v52 }
 0x11b   : > { %3351 = vrsqrt.f32 %v3723_v37  ;;  %v636_v51 = vmul.f32 %v3726_v40, %v3726_v40  ;;  %v852_v4 = vmul.f32 %v3720_v33, %v851_v46  ;;  %vm838_vm7 = vmor %vm836_vm6, %vm837_vm5  ;;  %v3275_v46 = vunpack.c.l.bf16 %v3764_v21 }
 0x11c   : > { %v832_v50 = vmul.f32 %v3350_v35, %v831_v42  ;;  %v829_v63 = vsel %vm3737_vm4, %v3346_v10, %v825_v45  ;;  %3353 = vrsqrt.f32 %v3735_v52  ;;  %v350_v42 = vld [vmem:[%s3555_s12 + $0x90] sm:$0xff]  ;;  %vm846_vm12 = vweird.f32 %v3723_v37 }
 0x11d   : > { %v496_v56 = vpop.xlane.xlu2 %495  ;;  %v684_v0 = vsel %vm460_vm0, %v636_v51, 0.0  ;;  %v1140_v25 = vmul.f32 %v829_v63, %v3605_v43  ;;  %v853_v31 = vmul.f32 0.5, %v852_v4  ;;  %v348_v51 = vld [vmem:[%s3555_s12 + $0x80] sm:$0xff] }
 0x11e   : > { %v833_v49 = vmul.f32 0.5, %v832_v50  ;;  %v575_v60 = vmul.f32 %v3601_v38, %v496_v56  ;;  %v490_v62 = vpop.xlane.xlu1 %489  ;;  %v677_v1 = vpop.xlane.xlu0 %676  ;;  %685 = vadd.xlane.f32.xlu1 %v684_v0  ;;  %v3798_v0 = vadd.f32 %v3279_v19, %v350_v42 }
 0x11f   : > { %v573_v5 = vmul.f32 %v3601_v38, %v490_v62  ;;  %v761_v7 = vmul.f32 %v677_v1, %v3601_v38  ;;  %v3796_v62 = vld [vmem:[%s5946_s3] ss:$0 sm:$0xff]  ;;  %v854_v1 = vsub.f32 1.5, %v853_v31 }
 0x120   : > { %v834_v15 = vsub.f32 1.5, %v833_v49  ;;  %v3754_v17 = vsub.f32 %v3656_v24, %v575_v60  ;;  %6001 = vst [vmem:[#allocation18_spill] sm:$0xff] %v3798_v0  ;;  %v515_v9 = vsel %vm460_vm0, %v3798_v0, 0.0 }
 0x121   : > { %v3756_v18 = vpop.eup %3351  ;;  %v3760_v10 = vsub.f32 %v3661_v27, %v573_v5  ;;  %v3769_v29 = vadd.f32 1e-05, %v761_v7  ;;  %v3806_v7 = vadd.f32 %v3275_v46, %v348_v51  ;;  %v855_v31 = vmul.f32 %v3720_v33, %v854_v1 }
 0x122   : > { %v835_v26 = vmul.f32 %v3350_v35, %v834_v15  ;;  %v841_v28 = vmul.f32 %v3756_v18, %v3723_v37  ;;  %v639_v34 = vmul.f32 %v3754_v17, %v3754_v17  ;;  %vm847_vm10 = vweird.f32 %v3756_v18 }
 0x123   : > { %v637_v43 = vmul.f32 %v3760_v10, %v3760_v10  ;;  %3355 = vrsqrt.f32 %v3769_v29  ;;  %6002 = vst [vmem:[#allocation19_spill] sm:$0xff] %v3806_v7  ;;  %vm3829_vm13 = vmor %vm846_vm12, %vm847_vm10  ;;  %v3280_v46 = vunpack.c.h.bf16 %v3746_v3  ;;  %v3276_v51 = vunpack.c.h.bf16 %v3764_v21 }
 0x124   : > { %v839_v44 = vsel %vm838_vm7, %v3350_v35, %v835_v26  ;;  %v842_v45 = vmul.f32 %v3756_v18, %v841_v28  ;;  %v693_v50 = vsel %vm460_vm0, %v639_v34, 0.0  ;;  %v1176_v35 = vmul.f32 %v3774_v12, %v1140_v25 }
 0x125   : > { %v1141_v47 = vmul.f32 %v839_v44, %v3622_v57  ;;  %694 = vadd.xlane.f32.xlu0 %v693_v50  ;;  %v687_v59 = vsel %vm460_vm0, %v637_v43, 0.0  ;;  %v3800_v57 = vpop.eup %3353  ;;  %v859_v3 = vsel %vm3820_vm11, %v3720_v33, %v855_v31  ;;  %vm876_vm14 = vweird.f32 %v3769_v29 }
 0x126   : > { %v843_v56 = vmul.f32 0.5, %v842_v45  ;;  %v493_v49 = vpop.xlane.xlu1 %492  ;;  %v3790_v60 = vpop.xlane.xlu0 %679  ;;  %688 = vadd.xlane.f32.xlu2 %v687_v59  ;;  %507 = vadd.xlane.f32.xlu1 %v506_v36  ;;  %v1212_v28 = vadd.f32 %v3796_v62, %v1176_v35  ;;  %v861_v43 = vmul.f32 %v3800_v57, %v3735_v52  ;;  %v509_v45 = vsel %vm460_vm0, %v3806_v7, 0.0  ;;  %v349_v35 = vld [vmem:[%s3555_s12 + $0x88] sm:$0xff] }
 0x127   : > { %v574_v63 = vmul.f32 %v3601_v38, %v493_v49  ;;  %v1177_v4 = vmul.f32 %v3774_v12, %v1141_v47  ;;  %v499_v49 = vpop.xlane.xlu2 %498  ;;  %v3859_v33 = vadd.f32 %v3276_v51, %v349_v35  ;;  %vm867_vm2 = vweird.f32 %v3800_v57 }
 0x128   : > { %v844_v5 = vsub.f32 1.5, %v843_v56  ;;  %v351_v56 = vld [vmem:[%s3555_s12 + $0x98] sm:$0xff]  ;;  %vm3899_vm4 = vmor %vm866_vm1, %vm867_vm2 }
 0x129   : > { %v3810_v15 = vsub.f32 %v3678_v41, %v574_v63  ;;  %v1213_v19 = vadd.f32 %v3796_v62, %v1177_v4  ;;  %v3813_v25 = vpop.eup %3355  ;;  %v3853_v4 = vadd.f32 %v3280_v46, %v351_v56  ;;  %6008 = vst [vmem:[#allocation21_spill] sm:$0xff] %v3859_v33  ;;  %v352_v46 = vld [vmem:[%s3555_s12 + $0xa0] sm:$0xff] }
 0x12a   : > { %v845_v26 = vmul.f32 %v3756_v18, %v844_v5  ;;  %v871_v36 = vmul.f32 %v3813_v25, %v3769_v29  ;;  %vm877_vm15 = vweird.f32 %v3813_v25 }
 0x12b   : > { %v1244_v44 = vpack.c.bf16 %v1213_v19, %v1212_v28  ;;  %v638_v37 = vmul.f32 %v3810_v15, %v3810_v15  ;;  %6007 = vst [vmem:[#allocation20_spill] sm:$0xff] %v3853_v4  ;;  %v3314_v28 = vld [vmem:[%s3560_s15 + $0x50] sm:$0xff]   ;;  %vm3891_vm3 = vmor %vm876_vm14, %vm877_vm15 }
 0x12c   : > { %v849_v47 = vsel %vm3829_vm13, %v3756_v18, %v845_v26  ;;  %v872_v50 = vmul.f32 %v3813_v25, %v871_v36  ;;  %v862_v18 = vmul.f32 %v3800_v57, %v861_v43  ;;  %v576_v26 = vmul.f32 %v3601_v38, %v499_v49  ;;  %v3315_v49 = vld [vmem:[%s3560_s15 + $0x58] sm:$0xff]  }
 0x12d   : > { %3149 = vmatmul.msk.bf16.vlgmr.msra.gmra.mxu0 %vm460_vm0, %v1244_v44  ;;  %516 = vadd.xlane.f32.xlu0 %v515_v9  ;;  %v690_v1 = vsel %vm460_vm0, %v638_v37, 0.0  ;;  %v1142_v21 = vmul.f32 %v849_v47, %v3630_v61  ;;  %v1143_v9 = vmul.f32 %v859_v3, %v3618_v55  ;;  %v518_v61 = vsel %vm460_vm0, %v3853_v4, 0.0 }
 0x12e   : > { %v502_v59 = vpop.xlane.xlu0 %501  ;;  %510 = vadd.xlane.f32.xlu1 %v509_v45  ;;  %691 = vadd.xlane.f32.xlu2 %v690_v1  ;;  %v873_v5 = vmul.f32 0.5, %v872_v50  ;;  %v863_v31 = vmul.f32 0.5, %v862_v18  ;;  %v3283_v36 = vunpack.c.l.bf16 %v3314_v28  ;;  %v3869_v44 = vsub.f32 %v3674_v39, %v576_v26 }
 0x12f   : > { %v577_v63 = vmul.f32 %v3601_v38, %v502_v59  ;;  %v1178_v43 = vmul.f32 %v3774_v12, %v1142_v21  ;;  %v512_v45 = vsel %vm460_vm0, %v3859_v33, 0.0  ;;  %v1179_v50 = vmul.f32 %v3774_v12, %v1143_v9 }
 0x130   : > { %v874_v42 = vsub.f32 1.5, %v873_v5  ;;  %v864_v37 = vsub.f32 1.5, %v863_v31  ;;  %v3881_v59 = vadd.f32 %v3283_v36, %v352_v46  ;;  %v640_v3 = vmul.f32 %v3869_v44, %v3869_v44  ;;  %v355_v31 = vld [vmem:[%s3555_s12 + $0xb8] sm:$0xff] }
 0x131   : > { %v3856_v19 = vsub.f32 %v3686_v48, %v577_v63  ;;  %v1214_v56 = vadd.f32 %v3796_v62, %v1178_v43  ;;  %v1215_v18 = vadd.f32 %v3796_v62, %v1179_v50  ;;  %v3288_v21 = vunpack.c.h.bf16 %v3315_v49  ;;  %v3238_v48 = vld [vmem:[%s5949_s6 + $0x28] sm:$0xff] }
 0x132   : > { %6009 = vst [vmem:[#allocation22_spill] sm:$0xff] %v3881_v59  ;;  %v875_v35 = vmul.f32 %v3813_v25, %v874_v42  ;;  %v865_v1 = vmul.f32 %v3800_v57, %v864_v37  ;;  %v521_v9 = vsel %vm460_vm0, %v3881_v59, 0.0  ;;  %v3284_v36 = vunpack.c.h.bf16 %v3314_v28  ;;  %v353_v42 = vld [vmem:[%s3555_s12 + $0xa8] sm:$0xff] }
 0x133   : > { %v641_v34 = vmul.f32 %v3856_v19, %v3856_v19  ;;  %v1245_v26 = vpack.c.bf16 %v1215_v18, %v1214_v56  ;;  %v354_v56 = vld [vmem:[%s3555_s12 + $0xb0] sm:$0xff] }
 0x135   : > { %v699_v55 = vsel %vm460_vm0, %v641_v34, 0.0  ;;  %v879_v34 = vsel %vm3891_vm3, %v3813_v25, %v875_v35  ;;  %v3919_v25 = vadd.f32 %v3284_v36, %v353_v42 }
 0x136   : > { %700 = vadd.xlane.f32.xlu0 %v699_v55  ;;  %v505_v47 = vpop.xlane.xlu0 %504  ;;  %519 = vadd.xlane.f32.xlu1 %v518_v61  ;;  %v696_v61 = vsel %vm460_vm0, %v640_v3, 0.0  ;;  %v3916_v55 = vadd.f32 %v3288_v21, %v355_v31  ;;  %v1145_v46 = vmul.f32 %v879_v34, %v3649_v13 }
 0x137   : > { %v578_v51 = vmul.f32 %v3601_v38, %v505_v47  ;;  %513 = vadd.xlane.f32.xlu2 %v512_v45  ;;  %v869_v45 = vsel %vm3899_vm4, %v3800_v57, %v865_v1  ;;  %6015 = vst [vmem:[#allocation24_spill] sm:$0xff] %v3919_v25  ;;  %v524_v37 = vsel %vm460_vm0, %v3919_v25, 0.0 }
 0x138   : > { %6014 = vst [vmem:[#allocation23_spill] sm:$0xff] %v3916_v55  ;;  %v1144_v47 = vmul.f32 %v869_v45, %v3625_v58  ;;  %v530_v28 = vsel %vm460_vm0, %v3916_v55, 0.0  ;;  %v1181_v50 = vmul.f32 %v3774_v12, %v1145_v46 }
 0x139   : > { %v3887_v29 = vsub.f32 %v3695_v53, %v578_v51  ;;  %v3287_v51 = vunpack.c.l.bf16 %v3315_v49  ;;  %v762_v49 = vmul.f32 %v3790_v60, %v3601_v38 }
 0x13a   : > { %v1180_v57 = vmul.f32 %v3774_v12, %v1144_v47  ;;  %v1217_v13 = vadd.f32 %v3796_v62, %v1181_v50 }
 0x13b   : > { %v642_v63 = vmul.f32 %v3887_v29, %v3887_v29  ;;  %v3930_v35 = vadd.f32 %v3287_v51, %v354_v56  ;;  %v794_v18 = vadd.f32 1e-05, %v762_v49 }
 0x13c   : > { %v1216_v58 = vadd.f32 %v3796_v62, %v1180_v57 }
 0x13d   : > { %v702_v43 = vsel %vm460_vm0, %v642_v63, 0.0  ;;  %3150 = vmatmul.msk.bf16.gmra.mxu0 %vm460_vm0, %v1245_v26  ;;  %6016 = vst [vmem:[#allocation25_spill] sm:$0xff] %v3930_v35  ;;  %v527_v52 = vsel %vm460_vm0, %v3930_v35, 0.0  ;;  %3357 = vrsqrt.f32 %v794_v18  ;;  %vm886_vm5 = vweird.f32 %v794_v18 }
 0x13e   : > { %703 = vadd.xlane.f32.xlu0 %v702_v43  ;;  %522 = vadd.xlane.f32.xlu1 %v521_v9  ;;  %v1246_v3 = vpack.c.bf16 %v1217_v13, %v1216_v58 }
 0x13f   : > { %697 = vadd.xlane.f32.xlu2 %v696_v61 }
 0x143   : > { %v3358_v1 = vpop.eup %3357 }
 0x144   : > { %v881_v63 = vmul.f32 %v3358_v1, %v794_v18  ;;  %vm887_vm6 = vweird.f32 %v3358_v1 }
 0x145   : > { %vm3942_vm7 = vmor %vm886_vm5, %vm887_vm6 }
 0x146   : > { %531 = vadd.xlane.f32.xlu0 %v530_v28  ;;  %v882_v5 = vmul.f32 %v3358_v1, %v881_v63 }
 0x147   : > { %525 = vadd.xlane.f32.xlu2 %v524_v37 }
 0x148   : > { %v883_v31 = vmul.f32 0.5, %v882_v5 }
 0x14a   : > { %v884_v34 = vsub.f32 1.5, %v883_v31 }
 0x14c   : > { %v885_v45 = vmul.f32 %v3358_v1, %v884_v34 }
 0x14d   : > { %3151 = vmatmul.msk.bf16.gmra.mxu0 %vm460_vm0, %v1246_v3 }
 0x14e   : > { %v889_v37 = vsel %vm3942_vm7, %v3358_v1, %v885_v45 }
 0x14f   : > { %528 = vadd.xlane.f32.xlu2 %v527_v52  ;;  %v1146_v18 = vmul.f32 %v889_v37, %v3667_v32 }
 0x189   : > { %v683_v21 = vpop.xlane.xlu1 %682 }
 0x18a   : > { %v763_v26 = vmul.f32 %v683_v21, %v3601_v38 }
 0x18c   : > { %v795_v9 = vadd.f32 1e-05, %v763_v26 }
 0x18e   : > { %3359 = vrsqrt.f32 %v795_v9  ;;  %vm896_vm8 = vweird.f32 %v795_v9 }
 0x191   : > { %v686_v61 = vpop.xlane.xlu1 %685 }
 0x192   : > { %v764_v43 = vmul.f32 %v686_v61, %v3601_v38 }
 0x194   : > { %v3360_v36 = vpop.eup %3359  ;;  %v3940_v60 = vadd.f32 1e-05, %v764_v43  ;;  %v1182_v43 = vmul.f32 %v3774_v12, %v1146_v18 }
 0x195   : > { %v891_v42 = vmul.f32 %v3360_v36, %v795_v9  ;;  %vm897_vm9 = vweird.f32 %v3360_v36 }
 0x196   : > { %3361 = vrsqrt.f32 %v3940_v60  ;;  %vm898_vm10 = vmor %vm896_vm8, %vm897_vm9  ;;  %vm906_vm11 = vweird.f32 %v3940_v60 }
 0x197   : > { %v892_v47 = vmul.f32 %v3360_v36, %v891_v42 }
 0x198   : > { %v695_v50 = vpop.xlane.xlu0 %694 }
 0x199   : > { %v893_v28 = vmul.f32 0.5, %v892_v47  ;;  %v689_v51 = vpop.xlane.xlu2 %688  ;;  %v508_v57 = vpop.xlane.xlu1 %507  ;;  %v767_v56 = vmul.f32 %v695_v50, %v3601_v38  ;;  %v3975_v47 = vld [vmem:[%s3560_s15 + $0x60] sm:$0xff]  }
 0x19a   : > { %v765_v58 = vmul.f32 %v689_v51, %v3601_v38  ;;  %v579_v3 = vmul.f32 %v3601_v38, %v508_v57  ;;  %v3292_v18 = vunpack.c.h.bf16 %v3975_v47 }
 0x19b   : > { %v894_v13 = vsub.f32 1.5, %v893_v28  ;;  %v3952_v52 = vadd.f32 1e-05, %v767_v56 }
 0x19c   : > { %v3954_v49 = vpop.eup %3361  ;;  %v3957_v21 = vadd.f32 1e-05, %v765_v58  ;;  %v3960_v1 = vsub.f32 %v3743_v2, %v579_v3  ;;  %v1218_v3 = vadd.f32 %v3796_v62, %v1182_v43  ;;  %v357_v43 = vld [vmem:[%s3555_s12 + $0xc8] sm:$0xff] }
 0x19d   : > { %v895_v63 = vmul.f32 %v3360_v36, %v894_v13  ;;  %v901_v5 = vmul.f32 %v3954_v49, %v3940_v60  ;;  %3363 = vrsqrt.f32 %v3952_v52  ;;  %vm907_vm12 = vweird.f32 %v3954_v49  ;;  %v4026_v60 = vld [vmem:[%s3560_s15 + $0x68] sm:$0xff]  }
 0x19e   : > { %3365 = vrsqrt.f32 %v3957_v21  ;;  %v643_v9 = vmul.f32 %v3960_v1, %v3960_v1  ;;  %vm4016_vm13 = vmor %vm906_vm11, %vm907_vm12  ;;  %vm916_vm15 = vweird.f32 %v3957_v21  ;;  %vm936_vm2 = vweird.f32 %v3952_v52 }
 0x19f   : > { %v899_v26 = vsel %vm898_vm10, %v3360_v36, %v895_v63  ;;  %v902_v31 = vmul.f32 %v3954_v49, %v901_v5 }
 0x1a0   : > { %v1147_v32 = vmul.f32 %v899_v26, %v3712_v14  ;;  %v705_v34 = vsel %vm460_vm0, %v643_v9, 0.0  ;;  %v517_v61 = vpop.xlane.xlu0 %516 }
 0x1a1   : > { %v903_v42 = vmul.f32 0.5, %v902_v31  ;;  %706 = vadd.xlane.f32.xlu1 %v705_v34  ;;  %v511_v45 = vpop.xlane.xlu1 %510  ;;  %v582_v46 = vmul.f32 %v3601_v38, %v517_v61  ;;  %v692_v28 = vpop.xlane.xlu2 %691  ;;  %v4005_v61 = vld [vmem:[%s5948_s5] ss:$0 sm:$0xff] }
 0x1a2   : > { %v1183_v36 = vmul.f32 %v3774_v12, %v1147_v32  ;;  %v580_v50 = vmul.f32 %v3601_v38, %v511_v45  ;;  %v766_v37 = vmul.f32 %v692_v28, %v3601_v38 }
 0x1a3   : > { %v3978_v14 = vpop.eup %3363  ;;  %v3982_v51 = vsub.f32 %v3798_v0, %v582_v46  ;;  %v904_v13 = vsub.f32 1.5, %v903_v42 }
 0x1a4   : > { %v1219_v57 = vadd.f32 %v3796_v62, %v1183_v36  ;;  %v3366_v56 = vpop.eup %3365  ;;  %v3986_v58 = vsub.f32 %v3806_v7, %v580_v50  ;;  %v3993_v5 = vadd.f32 1e-05, %v766_v37  ;;  %v931_v26 = vmul.f32 %v3978_v14, %v3952_v52 }
 0x1a5   : > { %v911_v63 = vmul.f32 %v3366_v56, %v3957_v21  ;;  %v646_v31 = vmul.f32 %v3982_v51, %v3982_v51  ;;  %v905_v42 = vmul.f32 %v3954_v49, %v904_v13  ;;  %vm917_vm14 = vweird.f32 %v3366_v56 }
 0x1a6   : > { %v1247_v9 = vpack.c.bf16 %v1219_v57, %v1218_v3  ;;  %v644_v32 = vmul.f32 %v3986_v58, %v3986_v58  ;;  %3367 = vrsqrt.f32 %v3993_v5  ;;  %v932_v13 = vmul.f32 %v3978_v14, %v931_v26  ;;  %vm918_vm1 = vmor %vm916_vm15, %vm917_vm14 }
 0x1a7   : > { %v912_v34 = vmul.f32 %v3366_v56, %v911_v63  ;;  %v714_v46 = vsel %vm460_vm0, %v646_v31, 0.0  ;;  %v909_v26 = vsel %vm4016_vm13, %v3954_v49, %v905_v42  ;;  %v358_v42 = vld [vmem:[%s3555_s12 + $0xd0] sm:$0xff]  ;;  %vm937_vm3 = vweird.f32 %v3978_v14 }
 0x1a8   : > { %3152 = vmatmul.msk.bf16.gmra.mxu0 %vm460_vm0, %v1247_v9  ;;  %v708_v45 = vsel %vm460_vm0, %v644_v32, 0.0  ;;  %715 = vadd.xlane.f32.xlu0 %v714_v46  ;;  %v4023_v32 = vadd.f32 %v3292_v18, %v357_v43  ;;  %v3291_v18 = vunpack.c.l.bf16 %v3975_v47  ;;  %v933_v28 = vmul.f32 0.5, %v932_v13  ;;  %vm4113_vm5 = vmor %vm936_vm2, %vm937_vm3 }
 0x1a9   : > { %v701_v36 = vpop.xlane.xlu0 %700  ;;  %v913_v50 = vmul.f32 0.5, %v912_v34  ;;  %709 = vadd.xlane.f32.xlu1 %v708_v45  ;;  %v520_v37 = vpop.xlane.xlu1 %519  ;;  %v1148_v21 = vmul.f32 %v909_v26, %v3726_v40  ;;  %vm926_vm6 = vweird.f32 %v3993_v5 }
 0x1aa   : > { %v769_v57 = vmul.f32 %v701_v36, %v3601_v38  ;;  %v514_v3 = vpop.xlane.xlu2 %513  ;;  %v583_v63 = vmul.f32 %v3601_v38, %v520_v37  ;;  %v1337_v9 = vpop.f32.mrf.mxu0  ;;  %6021 = vst [vmem:[#allocation26_spill] sm:$0xff] %v4023_v32  ;;  %v536_v47 = vsel %vm460_vm0, %v4023_v32, 0.0 }
 0x1ab   : > { %v914_v31 = vsub.f32 1.5, %v913_v50  ;;  %v581_v34 = vmul.f32 %v3601_v38, %v514_v3  ;;  %v4032_v46 = vadd.f32 %v4005_v61, %v1337_v9  ;;  %v3295_v3 = vunpack.c.l.bf16 %v4026_v60 }
 0x1ac   : > { %v4029_v45 = vadd.f32 1e-05, %v769_v57  ;;  %v4038_v36 = vsub.f32 %v3853_v4, %v583_v63  ;;  %v4041_v43 = vpop.eup %3367  ;;  %v356_v57 = vld [vmem:[%s3555_s12 + $0xc0] sm:$0xff] }
 0x1ad   : > { %v915_v50 = vmul.f32 %v3366_v56, %v914_v31  ;;  %v4045_v37 = vsub.f32 %v3859_v33, %v581_v34  ;;  %v921_v49 = vmul.f32 %v4041_v43, %v3993_v5  ;;  %v4058_v9 = vmul.f32 0.70710677, %v4032_v46 }
 0x1ae   : > { %3369 = vrsqrt.f32 %v4029_v45  ;;  %v647_v4 = vmul.f32 %v4038_v36, %v4038_v36  ;;  %v4068_v33 = vadd.f32 %v3291_v18, %v356_v57  ;;  %vm927_vm4 = vweird.f32 %v4041_v43 }
 0x1af   : > { %v919_v63 = vsel %vm918_vm1, %v3366_v56, %v915_v50  ;;  %v645_v31 = vmul.f32 %v4045_v37, %v4045_v37  ;;  %v922_v34 = vmul.f32 %v4041_v43, %v921_v49  ;;  %v1481_v40 = vmul.f32 %v4058_v9, %v4058_v9  ;;  %vm4131_vm7 = vmor %vm926_vm6, %vm927_vm4 }
 0x1b0   : > { %v1149_v13 = vmul.f32 %v919_v63, %v3760_v10  ;;  %537 = vadd.xlane.f32.xlu0 %v536_v47  ;;  %v4074_v50 = vadd.f32 %v3295_v3, %v358_v42  ;;  %v934_v10 = vsub.f32 1.5, %v933_v28  ;;  %v717_v7 = vsel %vm460_vm0, %v647_v4, 0.0  ;;  %v3240_v28 = vld [vmem:[%s5949_s6 + $0x38] sm:$0xff] }
 0x1b1   : > { %v4066_v0 = vpop.xlane.xlu0 %703  ;;  %v711_v56 = vsel %vm460_vm0, %v645_v31, 0.0  ;;  %v523_v26 = vpop.xlane.xlu1 %522  ;;  %v923_v49 = vmul.f32 0.5, %v922_v34  ;;  %718 = vadd.xlane.f32.xlu1 %v717_v7  ;;  %v1184_v31 = vmul.f32 %v3774_v12, %v1148_v21  ;;  %v4090_v42 = vmin.f32 %v1481_v40, 16.0  ;;  %2909 = vmatpush.bf16.msra.mxu1 %v3240_v28 }
 0x1b2   : > { %6022 = vst [vmem:[#allocation27_spill] sm:$0xff] %v4074_v50  ;;  %712 = vadd.xlane.f32.xlu2 %v711_v56  ;;  %v698_v63 = vpop.xlane.xlu2 %697  ;;  %v584_v18 = vmul.f32 %v3601_v38, %v523_v26  ;;  %v1339_v57 = vpop.f32.mrf.mxu0  ;;  %v1185_v3 = vmul.f32 %v3774_v12, %v1149_v13  ;;  %v533_v21 = vsel %vm460_vm0, %v4068_v33, 0.0  ;;  %v539_v13 = vsel %vm460_vm0, %v4074_v50, 0.0  ;;  %3322 = vmatpush.bf16.msra.mxu2 %v3240_v28 }
 0x1b3   : > { %v768_v2 = vmul.f32 %v698_v63, %v3601_v38  ;;  %v4080_v53 = vadd.f32 %v4005_v61, %v1339_v57  ;;  %v924_v4 = vsub.f32 1.5, %v923_v49  ;;  %v3296_v56 = vunpack.c.h.bf16 %v4026_v60  ;;  %v3239_v57 = vld [vmem:[%s5949_s6 + $0x30] sm:$0xff] }
 0x1b4   : > { %v4087_v47 = vpop.eup %3369  ;;  %v4093_v7 = vsub.f32 %v3881_v59, %v584_v18  ;;  %v935_v26 = vmul.f32 %v3978_v14, %v934_v10  ;;  %v1220_v10 = vadd.f32 %v3796_v62, %v1184_v31  ;;  %v1221_v18 = vadd.f32 %v3796_v62, %v1185_v3 }
 0x1b5   : > { %v4095_v34 = vadd.f32 1e-05, %v768_v2  ;;  %v925_v40 = vmul.f32 %v4041_v43, %v924_v4  ;;  %v4106_v49 = vmul.f32 0.70710677, %v4080_v53  ;;  %v359_v2 = vld [vmem:[%s3555_s12 + $0xd8] sm:$0xff]  ;;  %v951_v60 = vmul.f32 %v4087_v47, %v4029_v45  ;;  %2910 = vmatpush.bf16.msra.mxu1 %v3239_v57 }
 0x1b6   : > { %v1483_v52 = vmul.f32 2.1237322e-06, %v4090_v42  ;;  %v648_v4 = vmul.f32 %v4093_v7, %v4093_v7  ;;  %v1248_v31 = vpack.c.bf16 %v1221_v18, %v1220_v10  ;;  %v4136_v39 = vadd.f32 %v3296_v56, %v359_v2  ;;  %3323 = vmatpush.bf16.msra.mxu2 %v3239_v57 }
 0x1b7   : > { %3371 = vrsqrt.f32 %v4095_v34  ;;  %v1521_v28 = vmul.f32 %v4106_v49, %v4106_v49  ;;  %v939_v5 = vsel %vm4113_vm5, %v3978_v14, %v935_v26  ;;  %v929_v24 = vsel %vm4131_vm7, %v4041_v43, %v925_v40 }
 0x1b8   : > { %540 = vadd.xlane.f32.xlu0 %v539_v13  ;;  %6027 = vst [vmem:[#allocation28_spill] sm:$0xff] %v4136_v39  ;;  %v720_v6 = vsel %vm460_vm0, %v648_v4, 0.0  ;;  %3153 = vmatmul.msk.bf16.gmra.mxu0 %vm460_vm0, %v1248_v31  ;;  %v1484_v43 = vadd.f32 0.00028619796, %v1483_v52  ;;  %v1150_v26 = vmul.f32 %v929_v24, %v3810_v15  ;;  %v1151_v2 = vmul.f32 %v939_v5, %v3754_v17  ;;  %v3237_v15 = vld [vmem:[%s5949_s6 + $0x20] sm:$0xff] }
 0x1b9   : > { %v532_v59 = vpop.xlane.xlu0 %531  ;;  %v4144_v41 = vmin.f32 %v1521_v28, 16.0  ;;  %721 = vadd.xlane.f32.xlu1 %v720_v6  ;;  %2911 = vmatpush.bf16.msra.mxu1 %v3238_v48  ;;  %v542_v24 = vsel %vm460_vm0, %v4136_v39, 0.0  ;;  %vm956_vm8 = vweird.f32 %v4029_v45  ;;  %vm946_vm9 = vweird.f32 %v4095_v34 }
 0x1ba   : > { %v587_v3 = vmul.f32 %v3601_v38, %v532_v59  ;;  %534 = vadd.xlane.f32.xlu2 %v533_v21  ;;  %v526_v27 = vpop.xlane.xlu2 %525  ;;  %v1342_v10 = vpop.f32.mrf.mxu0  ;;  %v952_v59 = vmul.f32 %v4087_v47, %v951_v60  ;;  %v1485_v57 = vmul.f32 %v1484_v43, %v4090_v42  ;;  %3324 = vmatpush.bf16.msra.mxu2 %v3238_v48  ;;  %vm957_vm11 = vweird.f32 %v4087_v47 }
 0x1bb   : > { %v585_v13 = vmul.f32 %v3601_v38, %v526_v27  ;;  %v4151_v14 = vadd.f32 %v4005_v61, %v1342_v10  ;;  %v1523_v40 = vmul.f32 2.1237322e-06, %v4144_v41  ;;  %vm4234_vm13 = vmor %vm956_vm8, %vm957_vm11 }
 0x1bc   : > { %v4157_v21 = vsub.f32 %v3916_v55, %v587_v3  ;;  %v953_v60 = vmul.f32 0.5, %v952_v59  ;;  %v1186_v3 = vmul.f32 %v3774_v12, %v1150_v26  ;;  %v3318_v26 = vld [vmem:[%s3560_s15 + $0x70] sm:$0xff]  }
 0x1bd   : > { %v4159_v56 = vpop.eup %3371  ;;  %v4164_v6 = vsub.f32 %v3919_v25, %v585_v13  ;;  %v4167_v27 = vmul.f32 0.70710677, %v4151_v14  ;;  %v1524_v4 = vadd.f32 0.00028619796, %v1523_v40  ;;  %2912 = vmatpush.bf16.msra.mxu1 %v3237_v15  ;;  %v361_v25 = vld [vmem:[%s3555_s12 + $0xe8] sm:$0xff]  ;;  %v3300_v23 = vunpack.c.h.bf16 %v3318_v26 }
 0x1be   : > { %6028 = vst [vmem:[#allocation29_spill] sm:$0xff] %v4157_v21  ;;  %v941_v63 = vmul.f32 %v4159_v56, %v4095_v34  ;;  %v651_v28 = vmul.f32 %v4157_v21, %v4157_v21  ;;  %vm947_vm10 = vweird.f32 %v4159_v56  ;;  %3325 = vmatpush.bf16.msra.mxu2 %v3237_v15 }
 0x1bf   : > { %v1561_v18 = vmul.f32 %v4167_v27, %v4167_v27  ;;  %v649_v17 = vmul.f32 %v4164_v6, %v4164_v6  ;;  %v1525_v55 = vmul.f32 %v1524_v4, %v4144_v41  ;;  %vm4214_vm12 = vmor %vm946_vm9, %vm947_vm10  ;;  %v3299_v4 = vunpack.c.l.bf16 %v3318_v26 }
 0x1c0   : > { %v942_v52 = vmul.f32 %v4159_v56, %v941_v63  ;;  %v729_v13 = vsel %vm460_vm0, %v651_v28, 0.0  ;;  %v1187_v63 = vmul.f32 %v3774_v12, %v1151_v2  ;;  %v3236_v2 = vld [vmem:[%s5949_s6 + $0x18] sm:$0xff] }
 0x1c1   : > { %v4186_v31 = vmin.f32 %v1561_v18, 16.0  ;;  %v723_v10 = vsel %vm460_vm0, %v649_v17, 0.0  ;;  %543 = vadd.xlane.f32.xlu1 %v542_v24  ;;  %v954_v18 = vsub.f32 1.5, %v953_v60  ;;  %730 = vadd.xlane.f32.xlu0 %v729_v13  ;;  %v1222_v60 = vadd.f32 %v3796_v62, %v1186_v3  ;;  %v3235_v13 = vld [vmem:[%s5949_s6 + $0x10] sm:$0xff] }
 0x1c2   : > { %v943_v5 = vmul.f32 0.5, %v942_v52  ;;  %v529_v59 = vpop.xlane.xlu2 %528  ;;  %v1344_v43 = vpop.f32.mrf.mxu0  ;;  %724 = vadd.xlane.f32.xlu2 %v723_v10  ;;  %v1486_v52 = vadd.f32 0.0036580483, %v1485_v57  ;;  %2913 = vmatpush.bf16.msra.mxu1 %v3236_v2  ;;  %v1223_v3 = vadd.f32 %v3796_v62, %v1187_v63 }
 0x1c3   : > { %v1563_v48 = vmul.f32 2.1237322e-06, %v4186_v31  ;;  %v586_v40 = vmul.f32 %v3601_v38, %v529_v59  ;;  %v4198_v28 = vadd.f32 %v4005_v61, %v1344_v43  ;;  %v955_v43 = vmul.f32 %v4087_v47, %v954_v18  ;;  %3326 = vmatpush.bf16.msra.mxu2 %v3236_v2 }
 0x1c4   : > { %v944_v17 = vsub.f32 1.5, %v943_v5  ;;  %v360_v5 = vld [vmem:[%s3555_s12 + $0xe0] sm:$0xff]  ;;  %v1487_v34 = vmul.f32 %v1486_v52, %v4090_v42  ;;  %v1526_v18 = vadd.f32 0.0036580483, %v1525_v55  ;;  %v3234_v55 = vld [vmem:[%s5949_s6 + $0x8] sm:$0xff] }
 0x1c5   : > { %v1564_v10 = vadd.f32 0.00028619796, %v1563_v48  ;;  %v4205_v59 = vsub.f32 %v3930_v35, %v586_v40  ;;  %v4219_v15 = vmul.f32 0.70710677, %v4198_v28  ;;  %v1249_v35 = vpack.c.bf16 %v1223_v3, %v1222_v60 }
 0x1c6   : > { %v945_v24 = vmul.f32 %v4159_v56, %v944_v17  ;;  %v4246_v30 = vadd.f32 %v3299_v4, %v360_v5  ;;  %2914 = vmatpush.bf16.msra.mxu1 %v3235_v13  ;;  %v1488_v57 = vadd.f32 0.05243302, %v1487_v34  ;;  %v1494_v34 = vmul.f32 3.8918573e-05, %v4090_v42 }
 0x1c7   : > { %v1601_v48 = vmul.f32 %v4219_v15, %v4219_v15  ;;  %v650_v40 = vmul.f32 %v4205_v59, %v4205_v59  ;;  %v1565_v52 = vmul.f32 %v1564_v10, %v4186_v31  ;;  %v959_v10 = vsel %vm4234_vm13, %v4087_v47, %v955_v43  ;;  %3327 = vmatpush.bf16.msra.mxu2 %v3235_v13 }
 0x1c8   : > { %v949_v17 = vsel %vm4214_vm12, %v4159_v56, %v945_v24  ;;  %6033 = vst [vmem:[#allocation30_spill] sm:$0xff] %v4246_v30  ;;  %3154 = vmatmul.msk.bf16.gmra.mxu0 %vm460_vm0, %v1249_v35  ;;  %v545_v26 = vsel %vm460_vm0, %v4246_v30, 0.0  ;;  %v4261_v24 = vadd.f32 %v3300_v23, %v361_v25  ;;  %v4264_v35 = vld [vmem:[%s3560_s15 + $0x78] sm:$0xff]   ;;  %v1527_v47 = vmul.f32 %v1526_v18, %v4144_v41  ;;  %v3233_v25 = vld [vmem:[%s5949_s6] sm:$0xff]  ;;  %v362_v18 = vld [vmem:[%s3555_s12 + $0xf0] sm:$0xff] }
 0x1c9   : > { %v4243_v54 = vmin.f32 %v1601_v48, 16.0  ;;  %v726_v2 = vsel %vm460_vm0, %v650_v40, 0.0  ;;  %v1152_v4 = vmul.f32 %v949_v17, %v3869_v44  ;;  %v1566_v3 = vadd.f32 0.0036580483, %v1565_v52  ;;  %546 = vadd.xlane.f32.xlu1 %v545_v26 }
 0x1ca   : > { %v1347_v45 = vpop.f32.mrf.mxu0  ;;  %727 = vadd.xlane.f32.xlu2 %v726_v2  ;;  %6034 = vst [vmem:[#allocation31_spill] sm:$0xff] %v4261_v24  ;;  %2915 = vmatpush.bf16.msra.mxu1 %v3234_v55  ;;  %v1153_v48 = vmul.f32 %v959_v10, %v3856_v19  ;;  %v548_v44 = vsel %vm460_vm0, %v4261_v24, 0.0  ;;  %v3303_v13 = vunpack.c.l.bf16 %v4264_v35  ;;  %v1534_v40 = vmul.f32 3.8918573e-05, %v4144_v41 }
 0x1cb   : > { %v4250_v56 = vadd.f32 %v4005_v61, %v1347_v45  ;;  %v1603_v60 = vmul.f32 2.1237322e-06, %v4243_v54  ;;  %3328 = vmatpush.bf16.msra.mxu2 %v3234_v55  ;;  %v1489_v63 = vmul.f32 %v1488_v57, %v4090_v42  ;;  %v1567_v19 = vmul.f32 %v1566_v3, %v4186_v31 }
 0x1cc   : > { %v1188_v17 = vmul.f32 %v3774_v12, %v1152_v4  ;;  %v1528_v52 = vadd.f32 0.05243302, %v1527_v47  ;;  %v1495_v10 = vadd.f32 0.001143296, %v1494_v34  ;;  %v1189_v55 = vmul.f32 %v3774_v12, %v1153_v48 }
 0x1cd   : > { %v4268_v5 = vmul.f32 0.70710677, %v4250_v56  ;;  %v1604_v43 = vadd.f32 0.00028619796, %v1603_v60  ;;  %v1535_v60 = vadd.f32 0.001143296, %v1534_v40  ;;  %v4293_v57 = vadd.f32 %v3303_v13, %v362_v18 }
 0x1ce   : > { %2916 = vmatpush.bf16.msra.mxu1 %v3233_v25  ;;  %v1496_v4 = vmul.f32 %v1495_v10, %v4090_v42  ;;  %v1574_v47 = vmul.f32 3.8918573e-05, %v4186_v31  ;;  %v1568_v34 = vadd.f32 0.05243302, %v1567_v19  ;;  %v1225_v13 = vadd.f32 %v3796_v62, %v1189_v55 }
 0x1cf   : > { %v1641_v23 = vmul.f32 %v4268_v5, %v4268_v5  ;;  %v1605_v2 = vmul.f32 %v1604_v43, %v4243_v54  ;;  %6035 = vst [vmem:[#allocation32_spill] sm:$0xff] %v4293_v57  ;;  %v1536_v3 = vmul.f32 %v1535_v60, %v4144_v41  ;;  %3329 = vmatpush.bf16.msra.mxu2 %v3233_v25  ;;  %v1490_v43 = vadd.f32 0.18741608, %v1489_v63 }
 0x1d0   : > { %v1497_v12 = vadd.f32 0.014752088, %v1496_v4  ;;  %v1575_v10 = vadd.f32 0.001143296, %v1574_v47  ;;  %v551_v63 = vsel %vm460_vm0, %v4293_v57, 0.0 }
 0x1d1   : > { %v4287_v26 = vmin.f32 %v1641_v23, 16.0  ;;  %v1224_v23 = vadd.f32 %v3796_v62, %v1188_v17  ;;  %v1606_v40 = vadd.f32 0.0036580483, %v1605_v2  ;;  %v1537_v18 = vadd.f32 0.014752088, %v1536_v3 }
 0x1d2   : > { %v1349_v45 = vpop.f32.mrf.mxu0  ;;  %549 = vadd.xlane.f32.xlu2 %v548_v44  ;;  %v1529_v44 = vmul.f32 %v1528_v52, %v4144_v41  ;;  %v1498_v19 = vmul.f32 %v1497_v12, %v4090_v42  ;;  %v1614_v17 = vmul.f32 3.8918573e-05, %v4243_v54  ;;  %v1576_v60 = vmul.f32 %v1575_v10, %v4186_v31 }
 0x1d3   : > { %v4290_v16 = vadd.f32 %v4005_v61, %v1349_v45  ;;  %v1643_v48 = vmul.f32 2.1237322e-06, %v4287_v26  ;;  %v1250_v52 = vpack.c.bf16 %v1225_v13, %v1224_v23  ;;  %v1538_v2 = vmul.f32 %v1537_v18, %v4144_v41 }
 0x1d4   : > { %v1654_v4 = vmul.f32 3.8918573e-05, %v4287_v26  ;;  %v1569_v62 = vmul.f32 %v1568_v34, %v4186_v31  ;;  %v1607_v55 = vmul.f32 %v1606_v40, %v4243_v54  ;;  %v1499_v47 = vadd.f32 0.112945676, %v1498_v19 }
 0x1d5   : > { %v4301_v45 = vmul.f32 0.70710677, %v4290_v16  ;;  %v1539_v12 = vadd.f32 0.112945676, %v1538_v2  ;;  %v1577_v20 = vadd.f32 0.014752088, %v1576_v60 }
 0x1d6   : > { %v1615_v8 = vadd.f32 0.001143296, %v1614_v17  ;;  %v1644_v23 = vadd.f32 0.00028619796, %v1643_v48  ;;  %v1500_v18 = vmul.f32 %v1499_v47, %v4090_v42  ;;  %v1655_v10 = vadd.f32 0.001143296, %v1654_v4 }
 0x1d7   : > { %v1681_v25 = vmul.f32 %v4301_v45, %v4301_v45  ;;  %v1530_v22 = vadd.f32 0.18741608, %v1529_v44  ;;  %v1540_v34 = vmul.f32 %v1539_v12, %v4144_v41  ;;  %v1578_v40 = vmul.f32 %v1577_v20, %v4186_v31 }
 0x1d8   : > { %3155 = vmatmul.msk.bf16.gmra.mxu0 %vm460_vm0, %v1250_v52  ;;  %v1570_v19 = vadd.f32 0.18741608, %v1569_v62  ;;  %v1608_v11 = vadd.f32 0.05243302, %v1607_v55  ;;  %v1501_v52 = vadd.f32 0.4994258, %v1500_v18  ;;  %v1645_v60 = vmul.f32 %v1644_v23, %v4287_v26 }
 0x1d9   : > { %v4316_v3 = vmin.f32 %v1681_v25, 16.0  ;;  %v1616_v25 = vmul.f32 %v1615_v8, %v4243_v54  ;;  %v1541_v2 = vadd.f32 0.4994258, %v1540_v34  ;;  %v1579_v17 = vadd.f32 0.112945676, %v1578_v40 }
 0x1da   : > { %552 = vadd.xlane.f32.xlu2 %v551_v63  ;;  %v1656_v63 = vmul.f32 %v1655_v10, %v4287_v26  ;;  %v1502_v4 = vmul.f32 %v1501_v52, %v4090_v42  ;;  %v1491_v62 = vmul.f32 %v1490_v43, %v4090_v42  ;;  %v1531_v55 = vmul.f32 %v1530_v22, %v4144_v41 }
 0x1db   : > { %v1683_v13 = vmul.f32 2.1237322e-06, %v4316_v3  ;;  %v1617_v48 = vadd.f32 0.014752088, %v1616_v25  ;;  %v1542_v47 = vmul.f32 %v1541_v2, %v4144_v41  ;;  %v1580_v20 = vmul.f32 %v1579_v17, %v4186_v31 }
 0x1dc   : > { %v1657_v44 = vadd.f32 0.014752088, %v1656_v63  ;;  %v1571_v12 = vmul.f32 %v1570_v19, %v4186_v31  ;;  %v1503_v18 = vadd.f32 1.0, %v1502_v4  ;;  %v1609_v10 = vmul.f32 %v1608_v11, %v4243_v54 }
 0x1dd   : > { %v1684_v21 = vadd.f32 0.00028619796, %v1683_v13  ;;  %v1618_v8 = vmul.f32 %v1617_v48, %v4243_v54  ;;  %v4334_v23 = vadd.f32 1.0, %v1542_v47  ;;  %v1581_v13 = vadd.f32 0.4994258, %v1580_v20 }
 0x1de   : > { %v1646_v40 = vadd.f32 0.0036580483, %v1645_v60  ;;  %3373 = vrcp.f32 %v1503_v18  ;;  %v1658_v52 = vmul.f32 %v1657_v44, %v4287_v26  ;;  %v1492_v42 = vadd.f32 1.1283791, %v1491_v62 }
 0x1df   : > { %v1619_v34 = vadd.f32 0.112945676, %v1618_v8  ;;  %v1685_v25 = vmul.f32 %v1684_v21, %v4316_v3  ;;  %3375 = vrcp.f32 %v4334_v23  ;;  %v1532_v43 = vadd.f32 1.1283791, %v1531_v55 }
 0x1e0   : > { %v1694_v22 = vmul.f32 3.8918573e-05, %v4316_v3  ;;  %v1572_v41 = vadd.f32 1.1283791, %v1571_v12  ;;  %v1610_v19 = vadd.f32 0.18741608, %v1609_v10  ;;  %v1582_v11 = vmul.f32 %v1581_v13, %v4186_v31 }
 0x1e1   : > { %v1620_v63 = vmul.f32 %v1619_v34, %v4243_v54  ;;  %v1647_v2 = vmul.f32 %v1646_v40, %v4287_v26  ;;  %v1686_v17 = vadd.f32 0.0036580483, %v1685_v25  ;;  %v1659_v48 = vadd.f32 0.112945676, %v1658_v52 }
 0x1e2   : > { %v4344_v21 = vmul.f32 0.5, %v4032_v46  ;;  %v4347_v60 = vmul.f32 0.5, %v4080_v53  ;;  %v4349_v4 = vadd.f32 1.0, %v1582_v11  ;;  %v1493_v20 = vmul.f32 %v1492_v42, %v4058_v9 }
 0x1e3   : > { %v1621_v44 = vadd.f32 0.4994258, %v1620_v63  ;;  %v1533_v31 = vmul.f32 %v1532_v43, %v4106_v49  ;;  %v1660_v8 = vmul.f32 %v1659_v48, %v4287_v26  ;;  %v1695_v62 = vadd.f32 0.001143296, %v1694_v22 }
 0x1e4   : > { %v3374_v47 = vpop.eup %3373  ;;  %v4355_v12 = vmul.f32 %v1572_v41, %v4167_v27  ;;  %v1611_v46 = vmul.f32 %v1610_v19, %v4243_v54  ;;  %3377 = vrcp.f32 %v4349_v4  ;;  %v1648_v53 = vadd.f32 0.05243302, %v1647_v2 }
 0x1e5   : > { %v3376_v55 = vpop.eup %3375  ;;  %v1505_v10 = vmul.f32 %v3374_v47, %v1503_v18  ;;  %v1687_v13 = vmul.f32 %v1686_v17, %v4316_v3  ;;  %v1513_v34 = vand.u32 2147483647, %v1503_v18  ;;  %v1515_v49 = vand.u32 2147483648, %v1503_v18 }
 0x1e6   : > { %v1545_v9 = vmul.f32 %v3376_v55, %v4334_v23  ;;  %v1622_v25 = vmul.f32 %v1621_v44, %v4243_v54  ;;  %v1661_v52 = vadd.f32 0.4994258, %v1660_v8  ;;  %v1553_v27 = vand.u32 2147483647, %v4334_v23 }
 0x1e7   : > { %v1506_v40 = vsub.f32 1.0, %v1505_v10  ;;  %v1555_v43 = vand.u32 2147483648, %v4334_v23  ;;  %v1696_v22 = vmul.f32 %v1695_v62, %v4316_v3  ;;  %vm1510_vm14 = vweird.f32 %v3374_v47 }
 0x1e8   : > { %v1546_v42 = vsub.f32 1.0, %v1545_v9  ;;  %v4365_v19 = vadd.f32 1.0, %v1622_v25  ;;  %v1662_v11 = vmul.f32 %v1661_v52, %v4287_v26  ;;  %vm1509_vm15 = vweird.f32 %v1503_v18 }
 0x1e9   : > { %v1507_v41 = vmul.f32 %v3374_v47, %v1506_v40  ;;  %vm1550_vm1 = vweird.f32 %v3376_v55  ;;  %v1697_v2 = vadd.f32 0.014752088, %v1696_v22  ;;  %vm1514_vm2 = vcmp.eq.f32.partialorder %v1513_v34, 8.507059e+37  ;;  %vm1511_vm4 = vmor %vm1509_vm15, %vm1510_vm14 }
 0x1ea   : > { %v1547_v63 = vmul.f32 %v3376_v55, %v1546_v42  ;;  %v3378_v17 = vpop.eup %3377  ;;  %vm1549_vm3 = vweird.f32 %v4334_v23  ;;  %3379 = vrcp.f32 %v4365_v19  ;;  %v1516_v48 = vor.u32 1.1754944e-38, %v1515_v49 }
 0x1eb   : > { %v1508_v54 = vadd.f32 %v3374_v47, %v1507_v41  ;;  %vm1554_vm5 = vcmp.eq.f32.partialorder %v1553_v27, 8.507059e+37  ;;  %v1585_v8 = vmul.f32 %v3378_v17, %v4349_v4  ;;  %vm1551_vm6 = vmor %vm1549_vm3, %vm1550_vm1  ;;  %v1556_v10 = vor.u32 1.1754944e-38, %v1555_v43 }
 0x1ec   : > { %v1548_v44 = vadd.f32 %v3376_v55, %v1547_v63  ;;  %v4371_v18 = vadd.f32 1.0, %v1662_v11  ;;  %v1698_v9 = vmul.f32 %v1697_v2, %v4316_v3  ;;  %v1593_v23 = vand.u32 2147483647, %v4349_v4 }
 0x1ed   : > { %v1512_v62 = vsel %vm1511_vm4, %v3374_v47, %v1508_v54  ;;  %v1586_v34 = vsub.f32 1.0, %v1585_v8  ;;  %v1595_v49 = vand.u32 2147483648, %v4349_v4  ;;  %v1612_v27 = vadd.f32 1.1283791, %v1611_v46 }
 0x1ee   : > { %v1517_v40 = vsel %vm1514_vm2, %v1516_v48, %v1512_v62  ;;  %v1552_v25 = vsel %vm1551_vm6, %v3376_v55, %v1548_v44  ;;  %3381 = vrcp.f32 %v4371_v18  ;;  %vm1590_vm7 = vweird.f32 %v3378_v17 }
 0x1ef   : > { %v1518_v52 = vmul.f32 %v1517_v40, %v1493_v20  ;;  %v1557_v42 = vsel %vm1554_vm5, %v1556_v10, %v1552_v25  ;;  %v1587_v47 = vmul.f32 %v3378_v17, %v1586_v34  ;;  %v1649_v41 = vmul.f32 %v1648_v53, %v4287_v26 }
 0x1f0   : > { %v1558_v22 = vmul.f32 %v1557_v42, %v1533_v31  ;;  %v3380_v43 = vpop.eup %3379  ;;  %v1688_v11 = vadd.f32 0.05243302, %v1687_v13  ;;  %v1699_v2 = vadd.f32 0.112945676, %v1698_v9  ;;  %vm1589_vm8 = vweird.f32 %v4349_v4 }
 0x1f1   : > { %v3165_v63 = vclamps-f32 %v1518_v52, 1.0  ;;  %v1588_v54 = vadd.f32 %v3378_v17, %v1587_v47  ;;  %v1625_v20 = vmul.f32 %v3380_v43, %v4365_v19  ;;  %vm1591_vm9 = vmor %vm1589_vm8, %vm1590_vm7  ;;  %vm1594_vm10 = vcmp.eq.f32.partialorder %v1593_v23, 8.507059e+37 }
 0x1f2   : > { %v3166_v55 = vclamps-f32 %v1558_v22, 1.0  ;;  %v1596_v44 = vor.u32 1.1754944e-38, %v1595_v49  ;;  %v1700_v31 = vmul.f32 %v1699_v2, %v4316_v3  ;;  %v1633_v53 = vand.u32 2147483647, %v4365_v19 }
 0x1f3   : > { %v2761_v48 = vadd.f32 1.0, %v3165_v63  ;;  %v1592_v8 = vsel %vm1591_vm9, %v3378_v17, %v1588_v54  ;;  %v1626_v62 = vsub.f32 1.0, %v1625_v20  ;;  %vm1630_vm11 = vweird.f32 %v3380_v43 }
 0x1f4   : > { %v2762_v46 = vadd.f32 1.0, %v3166_v55  ;;  %v3382_v13 = vpop.eup %3381  ;;  %v1597_v10 = vsel %vm1594_vm10, %v1596_v44, %v1592_v8  ;;  %v1635_v9 = vand.u32 2147483648, %v4365_v19  ;;  %v1701_v40 = vadd.f32 0.4994258, %v1700_v31 }
 0x1f5   : > { %v2793_v4 = vmul.f32 %v2761_v48, %v4344_v21  ;;  %v1627_v34 = vmul.f32 %v3380_v43, %v1626_v62  ;;  %v1665_v23 = vmul.f32 %v3382_v13, %v4371_v18  ;;  %vm1629_vm12 = vweird.f32 %v4365_v19 }
 0x1f6   : > { %v2794_v25 = vmul.f32 %v2762_v46, %v4347_v60  ;;  %v1702_v17 = vmul.f32 %v1701_v40, %v4316_v3  ;;  %v1598_v42 = vmul.f32 %v1597_v10, %v4355_v12  ;;  %v1650_v47 = vadd.f32 0.18741608, %v1649_v41  ;;  %vm1631_vm13 = vmor %vm1629_vm12, %vm1630_vm11 }
 0x1f7   : > { %v1628_v49 = vadd.f32 %v3380_v43, %v1627_v34  ;;  %v1666_v22 = vsub.f32 1.0, %v1665_v23  ;;  %v1689_v63 = vmul.f32 %v1688_v11, %v4316_v3  ;;  %v1636_v21 = vor.u32 1.1754944e-38, %v1635_v9 }
 0x1f8   : > { %v2825_v52 = vpack.c.bf16 %v2794_v25, %v2793_v4  ;;  %v1703_v2 = vadd.f32 1.0, %v1702_v17  ;;  %v1613_v60 = vmul.f32 %v1612_v27, %v4219_v15  ;;  %vm1634_vm14 = vcmp.eq.f32.partialorder %v1633_v53, 8.507059e+37 }
 0x1f9   : > { %v1632_v55 = vsel %vm1631_vm13, %v3380_v43, %v1628_v49  ;;  %v1667_v19 = vmul.f32 %v3382_v13, %v1666_v22  ;;  %v770_v54 = vmul.f32 %v4066_v0, %v3601_v38  ;;  %v3167_v12 = vclamps-f32 %v1598_v42, 1.0 }
 0x1fa   : > { %2917 = vmatmul.bf16.vlgmr.msra.gmra.mxu1 %v2825_v52  ;;  %v1637_v20 = vsel %vm1634_vm14, %v1636_v21, %v1632_v55  ;;  %3383 = vrcp.f32 %v1703_v2  ;;  %v1651_v41 = vmul.f32 %v1650_v47, %v4287_v26  ;;  %v1690_v11 = vadd.f32 0.18741608, %v1689_v63 }
 0x1fb   : > { %v1638_v48 = vmul.f32 %v1637_v20, %v1613_v60  ;;  %v1668_v31 = vadd.f32 %v3382_v13, %v1667_v19  ;;  %vm1670_vm15 = vweird.f32 %v3382_v13  ;;  %v4395_v46 = vadd.f32 1e-05, %v770_v54 }
 0x1fc   : > { %v1420_v15 = vmul.f32 0.5, %v4198_v28  ;;  %v1675_v27 = vand.u32 2147483648, %v4371_v18  ;;  %v2763_v43 = vadd.f32 1.0, %v3167_v12  ;;  %vm1669_vm1 = vweird.f32 %v4371_v18 }
 0x1fd   : > { %v3168_v44 = vclamps-f32 %v1638_v48, 1.0  ;;  %v1673_v0 = vand.u32 2147483647, %v4371_v18  ;;  %v1652_v53 = vadd.f32 1.1283791, %v1651_v41  ;;  %v1691_v26 = vmul.f32 %v1690_v11, %v4316_v3  ;;  %vm1671_vm2 = vmor %vm1669_vm1, %vm1670_vm15 }
 0x1fe   : > { %v1419_v10 = vmul.f32 0.5, %v4151_v14  ;;  %v1672_v40 = vsel %vm1671_vm2, %v3382_v13, %v1668_v31  ;;  %v1676_v25 = vor.u32 1.1754944e-38, %v1675_v27  ;;  %3385 = vrsqrt.f32 %v4395_v46 }
 0x1ff   : > { %v2764_v8 = vadd.f32 1.0, %v3168_v44  ;;  %vm1674_vm3 = vcmp.eq.f32.partialorder %v1673_v0, 8.507059e+37  ;;  %v1653_v23 = vmul.f32 %v1652_v53, %v4268_v5  ;;  %v1692_v17 = vadd.f32 1.1283791, %v1691_v26 }
 0x200   : > { %v3384_v62 = vpop.eup %3383  ;;  %v2795_v28 = vmul.f32 %v2763_v43, %v1419_v10  ;;  %v1677_v18 = vsel %vm1674_vm3, %v1676_v25, %v1672_v40  ;;  %v1715_v52 = vand.u32 2147483648, %v1703_v2  ;;  %v1713_v3 = vand.u32 2147483647, %v1703_v2 }
 0x201   : > { %v2796_v9 = vmul.f32 %v2764_v8, %v1420_v15  ;;  %v1705_v4 = vmul.f32 %v3384_v62, %v1703_v2  ;;  %vm1710_vm4 = vweird.f32 %v3384_v62  ;;  %v1678_v22 = vmul.f32 %v1677_v18, %v1653_v23 }
 0x202   : > { %vm1709_vm5 = vweird.f32 %v1703_v2  ;;  %v1716_v13 = vor.u32 1.1754944e-38, %v1715_v52  ;;  %v1693_v63 = vmul.f32 %v1692_v17, %v4301_v45  ;;  %vm1714_vm7 = vcmp.eq.f32.partialorder %v1713_v3, 8.507059e+37 }
 0x203   : > { %v1706_v34 = vsub.f32 1.0, %v1705_v4  ;;  %v2826_v42 = vpack.c.bf16 %v2796_v9, %v2795_v28  ;;  %vm1711_vm6 = vmor %vm1709_vm5, %vm1710_vm4  ;;  %v3169_v5 = vclamps-f32 %v1678_v22, 1.0  ;;  %v1422_v48 = vmul.f32 0.5, %v4290_v16 }
 0x204   : > { %v3386_v47 = vpop.eup %3385  ;;  %v1421_v45 = vmul.f32 0.5, %v4250_v56  ;;  %vm966_vm8 = vweird.f32 %v4395_v46 }
 0x205   : > { %v1707_v49 = vmul.f32 %v3384_v62, %v1706_v34  ;;  %v961_v19 = vmul.f32 %v3386_v47, %v4395_v46  ;;  %v2765_v2 = vadd.f32 1.0, %v3169_v5  ;;  %vm967_vm9 = vweird.f32 %v3386_v47 }
 0x206   : > { %vm4418_vm10 = vmor %vm966_vm8, %vm967_vm9 }
 0x207   : > { %v1708_v14 = vadd.f32 %v3384_v62, %v1707_v49  ;;  %v962_v11 = vmul.f32 %v3386_v47, %v961_v19  ;;  %v2797_v15 = vmul.f32 %v2765_v2, %v1421_v45 }
 0x209   : > { %v1712_v21 = vsel %vm1711_vm6, %v3384_v62, %v1708_v14  ;;  %v963_v27 = vmul.f32 0.5, %v962_v11 }
 0x20a   : > { %2922 = vmatmul.bf16.gmra.mxu1 %v2826_v42  ;;  %v1717_v60 = vsel %vm1714_vm7, %v1716_v13, %v1712_v21 }
 0x20b   : > { %v1718_v55 = vmul.f32 %v1717_v60, %v1693_v63  ;;  %v964_v26 = vsub.f32 1.5, %v963_v27 }
 0x20d   : > { %v3170_v54 = vclamps-f32 %v1718_v55, 1.0  ;;  %v965_v40 = vmul.f32 %v3386_v47, %v964_v26 }
 0x20f   : > { %v2766_v41 = vadd.f32 1.0, %v3170_v54  ;;  %v969_v49 = vsel %vm4418_vm10, %v3386_v47, %v965_v40 }
 0x210   : > { %v1154_v47 = vmul.f32 %v969_v49, %v3887_v29  ;;  %v4456_v29 = vld [vmem:[%s5945_s2] ss:$0 sm:$0xff] }
 0x211   : > { %v2798_v31 = vmul.f32 %v2766_v41, %v1422_v48 }
 0x213   : > { %v2827_v43 = vpack.c.bf16 %v2798_v31, %v2797_v15  ;;  %v1190_v15 = vmul.f32 %v4456_v29, %v1154_v47 }
 0x214   : > { %v707_v20 = vpop.xlane.xlu1 %706 }
 0x215   : > { %v771_v12 = vmul.f32 %v707_v20, %v3601_v38 }
 0x217   : > { %v803_v44 = vadd.f32 1e-05, %v771_v12 }
 0x219   : > { %3387 = vrsqrt.f32 %v803_v44  ;;  %vm976_vm11 = vweird.f32 %v803_v44 }
 0x21a   : > { %2927 = vmatmul.bf16.gmra.mxu1 %v2827_v43 }
 0x21b   : > { %v716_v0 = vpop.xlane.xlu0 %715 }
 0x21c   : > { %v710_v8 = vpop.xlane.xlu1 %709  ;;  %v774_v16 = vmul.f32 %v716_v0, %v3601_v38 }
 0x21d   : > { %v772_v62 = vmul.f32 %v710_v8, %v3601_v38 }
 0x21e   : > { %v4416_v4 = vadd.f32 1e-05, %v774_v16  ;;  %v4480_v16 = vld [vmem:[%s5948_s5] ss:$0 sm:$0xff] }
 0x21f   : > { %v3388_v53 = vpop.eup %3387  ;;  %v4411_v10 = vadd.f32 1e-05, %v772_v62 }
 0x220   : > { %v971_v9 = vmul.f32 %v3388_v53, %v803_v44  ;;  %vm977_vm12 = vweird.f32 %v3388_v53  ;;  %vm1006_vm1 = vweird.f32 %v4416_v4 }
 0x221   : > { %3389 = vrsqrt.f32 %v4411_v10  ;;  %vm978_vm13 = vmor %vm976_vm11, %vm977_vm12  ;;  %vm986_vm14 = vweird.f32 %v4411_v10 }
 0x222   : > { %v972_v56 = vmul.f32 %v3388_v53, %v971_v9  ;;  %3391 = vrsqrt.f32 %v4416_v4 }
 0x223   : > { %v538_v34 = vpop.xlane.xlu0 %537 }
 0x224   : > { %v973_v28 = vmul.f32 0.5, %v972_v56  ;;  %v589_v17 = vmul.f32 %v3601_v38, %v538_v34  ;;  %v719_v42 = vpop.xlane.xlu1 %718  ;;  %v4488_v56 = vld [vmem:[%s5946_s3] ss:$0 sm:$0xff] }
 0x225   : > { %v713_v23 = vpop.xlane.xlu2 %712  ;;  %v1352_v18 = vpop.f32.mrf.mxu0  ;;  %v775_v3 = vmul.f32 %v719_v42, %v3601_v38 }
 0x226   : > { %v974_v46 = vsub.f32 1.5, %v973_v28  ;;  %v773_v52 = vmul.f32 %v713_v23, %v3601_v38  ;;  %v4431_v13 = vsub.f32 %v4023_v32, %v589_v17  ;;  %v4434_v63 = vadd.f32 %v4005_v61, %v1352_v18 }
 0x227   : > { %v4436_v21 = vpop.eup %3389  ;;  %v4438_v60 = vadd.f32 1e-05, %v775_v3  ;;  %v1226_v17 = vadd.f32 %v4488_v56, %v1190_v15 }
 0x228   : > { %v975_v22 = vmul.f32 %v3388_v53, %v974_v46  ;;  %v4428_v14 = vadd.f32 1e-05, %v773_v52  ;;  %v981_v19 = vmul.f32 %v4436_v21, %v4411_v10  ;;  %v4447_v54 = vmul.f32 0.70710677, %v4434_v63  ;;  %v4451_v12 = vpop.eup %3391 }
 0x229   : > { %v653_v61 = vmul.f32 %v4431_v13, %v4431_v13  ;;  %v1001_v8 = vmul.f32 %v4451_v12, %v4416_v4  ;;  %vm987_vm15 = vweird.f32 %v4436_v21  ;;  %vm1007_vm2 = vweird.f32 %v4451_v12 }
 0x22a   : > { %v979_v5 = vsel %vm978_vm13, %v3388_v53, %v975_v22  ;;  %3393 = vrsqrt.f32 %v4428_v14  ;;  %v982_v43 = vmul.f32 %v4436_v21, %v981_v19  ;;  %v1721_v0 = vmul.f32 %v4447_v54, %v4447_v54  ;;  %vm4544_vm5 = vmor %vm986_vm14, %vm987_vm15 }
 0x22b   : > { %v1155_v55 = vmul.f32 %v979_v5, %v3960_v1  ;;  %3395 = vrsqrt.f32 %v4438_v60  ;;  %v541_v20 = vpop.xlane.xlu0 %540  ;;  %v735_v11 = vsel %vm460_vm0, %v653_v61, 0.0  ;;  %v1002_v18 = vmul.f32 %v4451_v12, %v1001_v8  ;;  %vm4581_vm9 = vmor %vm1006_vm1, %vm1007_vm2 }
 0x22c   : > { %v722_v41 = vpop.xlane.xlu1 %721  ;;  %v590_v44 = vmul.f32 %v3601_v38, %v541_v20  ;;  %736 = vadd.xlane.f32.xlu1 %v735_v11  ;;  %v4503_v46 = vmin.f32 %v1721_v0, 16.0  ;;  %v983_v52 = vmul.f32 0.5, %v982_v43  ;;  %vm996_vm3 = vweird.f32 %v4428_v14 }
 0x22d   : > { %v535_v48 = vpop.xlane.xlu2 %534  ;;  %v1191_v1 = vmul.f32 %v4456_v29, %v1155_v55  ;;  %v1354_v45 = vpop.f32.mrf.mxu0  ;;  %v776_v31 = vmul.f32 %v722_v41, %v3601_v38  ;;  %vm1016_vm6 = vweird.f32 %v4438_v60 }
 0x22e   : > { %v588_v2 = vmul.f32 %v3601_v38, %v535_v48  ;;  %v4483_v9 = vadd.f32 %v4480_v16, %v1354_v45  ;;  %v4497_v34 = vsub.f32 %v4074_v50, %v590_v44 }
 0x22f   : > { %v4475_v26 = vadd.f32 1e-05, %v776_v31  ;;  %v1227_v40 = vadd.f32 %v4488_v56, %v1191_v1  ;;  %v1003_v1 = vmul.f32 0.5, %v1002_v18  ;;  %v984_v31 = vsub.f32 1.5, %v983_v52 }
 0x230   : > { %v4464_v27 = vpop.eup %3393  ;;  %v4494_v28 = vsub.f32 %v4068_v33, %v588_v2  ;;  %v4506_v42 = vmul.f32 0.70710677, %v4483_v9  ;;  %v654_v19 = vmul.f32 %v4497_v34, %v4497_v34  ;;  %v1723_v2 = vmul.f32 2.1237322e-06, %v4503_v46 }
 0x231   : > { %v4471_v62 = vpop.eup %3395  ;;  %v991_v53 = vmul.f32 %v4464_v27, %v4428_v14  ;;  %3397 = vrsqrt.f32 %v4475_v26  ;;  %v1251_v49 = vpack.c.bf16 %v1227_v40, %v1226_v17  ;;  %v985_v18 = vmul.f32 %v4436_v21, %v984_v31 }
 0x232   : > { %v1011_v25 = vmul.f32 %v4471_v62, %v4438_v60  ;;  %v652_v55 = vmul.f32 %v4494_v28, %v4494_v28  ;;  %v1761_v61 = vmul.f32 %v4506_v42, %v4506_v42  ;;  %v738_v11 = vsel %vm460_vm0, %v654_v19, 0.0 }
 0x233   : > { %v992_v23 = vmul.f32 %v4464_v27, %v991_v53  ;;  %3156 = vmatmul.msk.bf16.gmra.mxu0 %vm460_vm0, %v1251_v49  ;;  %vm997_vm4 = vweird.f32 %v4464_v27  ;;  %vm1017_vm7 = vweird.f32 %v4471_v62  ;;  %vm1026_vm11 = vweird.f32 %v4475_v26 }
 0x234   : > { %v1012_v22 = vmul.f32 %v4471_v62, %v1011_v25  ;;  %v544_v47 = vpop.xlane.xlu1 %543  ;;  %v732_v41 = vsel %vm460_vm0, %v652_v55, 0.0  ;;  %v4523_v15 = vmin.f32 %v1761_v61, 16.0  ;;  %739 = vadd.xlane.f32.xlu1 %v738_v11  ;;  %v1004_v25 = vsub.f32 1.5, %v1003_v1  ;;  %v731_v17 = vpop.xlane.xlu0 %730  ;;  %vm4572_vm8 = vmor %vm996_vm3, %vm997_vm4 }
 0x235   : > { %v993_v3 = vmul.f32 0.5, %v992_v23  ;;  %v725_v5 = vpop.xlane.xlu2 %724  ;;  %v591_v48 = vmul.f32 %v3601_v38, %v544_v47  ;;  %v1357_v44 = vpop.f32.mrf.mxu0  ;;  %733 = vadd.xlane.f32.xlu0 %v732_v41  ;;  %v1724_v23 = vadd.f32 0.00028619796, %v1723_v2  ;;  %v779_v19 = vmul.f32 %v731_v17, %v3601_v38  ;;  %vm4595_vm10 = vmor %vm1016_vm6, %vm1017_vm7 }
 0x236   : > { %v777_v20 = vmul.f32 %v725_v5, %v3601_v38  ;;  %v1013_v0 = vmul.f32 0.5, %v1012_v22  ;;  %v1763_v52 = vmul.f32 2.1237322e-06, %v4523_v15  ;;  %v4542_v10 = vadd.f32 %v4480_v16, %v1357_v44 }
 0x237   : > { %v4521_v45 = vpop.eup %3397  ;;  %v994_v8 = vsub.f32 1.5, %v993_v3  ;;  %v4530_v40 = vsub.f32 %v4136_v39, %v591_v48  ;;  %v3304_v2 = vunpack.c.h.bf16 %v4264_v35  ;;  %v989_v44 = vsel %vm4544_vm5, %v4436_v21, %v985_v18  ;;  %v363_v35 = vld [vmem:[%s3555_s12 + $0xf8] sm:$0xff] }
 0x238   : > { %v4525_v43 = vadd.f32 1e-05, %v777_v20  ;;  %v1021_v53 = vmul.f32 %v4521_v45, %v4475_v26  ;;  %v1014_v22 = vsub.f32 1.5, %v1013_v0  ;;  %v4556_v61 = vmul.f32 0.70710677, %v4542_v10 }
 0x239   : > { %v995_v3 = vmul.f32 %v4464_v27, %v994_v8  ;;  %v655_v55 = vmul.f32 %v4530_v40, %v4530_v40  ;;  %v1725_v20 = vmul.f32 %v1724_v23, %v4503_v46  ;;  %v1005_v31 = vmul.f32 %v4451_v12, %v1004_v25 }
 0x23a   : > { %3399 = vrsqrt.f32 %v4525_v43  ;;  %v1022_v5 = vmul.f32 %v4521_v45, %v1021_v53  ;;  %v1764_v0 = vadd.f32 0.00028619796, %v1763_v52  ;;  %v1015_v14 = vmul.f32 %v4471_v62, %v1014_v22 }
 0x23b   : > { %v741_v1 = vsel %vm460_vm0, %v655_v55, 0.0  ;;  %v999_v21 = vsel %vm4572_vm8, %v4464_v27, %v995_v3  ;;  %v4599_v17 = vadd.f32 1e-05, %v779_v19  ;;  %v1801_v18 = vmul.f32 %v4556_v61, %v4556_v61 }
 0x23c   : > { %742 = vadd.xlane.f32.xlu2 %v741_v1  ;;  %v1023_v25 = vmul.f32 0.5, %v1022_v5  ;;  %v1726_v52 = vadd.f32 0.0036580483, %v1725_v20  ;;  %v4606_v3 = vadd.f32 %v3304_v2, %v363_v35  ;;  %v1156_v22 = vmul.f32 %v989_v44, %v3986_v58 }
 0x23d   : > { %v728_v47 = vpop.xlane.xlu2 %727  ;;  %v1359_v41 = vpop.f32.mrf.mxu0  ;;  %v1009_v60 = vsel %vm4581_vm9, %v4451_v12, %v1005_v31  ;;  %v1157_v5 = vmul.f32 %v999_v21, %v4045_v37  ;;  %v1019_v55 = vsel %vm4595_vm10, %v4471_v62, %v1015_v14  ;;  %v4619_v58 = vmin.f32 %v1801_v18, 16.0 }
 0x23e   : > { %v778_v48 = vmul.f32 %v728_v47, %v3601_v38  ;;  %v1765_v47 = vmul.f32 %v1764_v0, %v4523_v15  ;;  %v1024_v19 = vsub.f32 1.5, %v1023_v25  ;;  %v554_v12 = vsel %vm460_vm0, %v4606_v3, 0.0 }
 0x23f   : > { %v4624_v37 = vadd.f32 %v4480_v16, %v1359_v41  ;;  %v1158_v1 = vmul.f32 %v1009_v60, %v3982_v51  ;;  %v1727_v2 = vmul.f32 %v1726_v52, %v4503_v46  ;;  %555 = vadd.xlane.f32.xlu0 %v554_v12  ;;  %vm1027_vm12 = vweird.f32 %v4521_v45 }
 0x240   : > { %v4562_v11 = vpop.eup %3399  ;;  %v4603_v27 = vadd.f32 1e-05, %v778_v48  ;;  %v547_v48 = vpop.xlane.xlu1 %546  ;;  %v1766_v31 = vadd.f32 0.0036580483, %v1765_v47  ;;  %v1159_v41 = vmul.f32 %v1019_v55, %v4038_v36  ;;  %v1192_v51 = vmul.f32 %v4456_v29, %v1156_v22  ;;  %vm4645_vm13 = vmor %vm1026_vm11, %vm1027_vm12 }
 0x241   : > { %v1031_v23 = vmul.f32 %v4562_v11, %v4525_v43  ;;  %v592_v8 = vmul.f32 %v3601_v38, %v547_v48  ;;  %v4632_v0 = vmul.f32 0.70710677, %v4624_v37  ;;  %v1193_v53 = vmul.f32 %v4456_v29, %v1157_v5 }
 0x242   : > { %3401 = vrsqrt.f32 %v4603_v27  ;;  %v1025_v21 = vmul.f32 %v4521_v45, %v1024_v19  ;;  %v1803_v14 = vmul.f32 2.1237322e-06, %v4619_v58  ;;  %vm1036_vm14 = vweird.f32 %v4525_v43 }
 0x243   : > { %v1032_v49 = vmul.f32 %v4562_v11, %v1031_v23  ;;  %3403 = vrsqrt.f32 %v4599_v17  ;;  %v1841_v25 = vmul.f32 %v4632_v0, %v4632_v0  ;;  %vm1037_vm15 = vweird.f32 %v4562_v11 }
 0x244   : > { %v1194_v36 = vmul.f32 %v4456_v29, %v1158_v1  ;;  %v1728_v52 = vadd.f32 0.05243302, %v1727_v2  ;;  %v4656_v22 = vsub.f32 %v4246_v30, %v592_v8  ;;  %v1228_v5 = vadd.f32 %v4488_v56, %v1192_v51  ;;  %vm4667_vm1 = vmor %vm1036_vm14, %vm1037_vm15 }
 0x245   : > { %v1033_v20 = vmul.f32 0.5, %v1032_v49  ;;  %v550_v62 = vpop.xlane.xlu2 %549  ;;  %v1362_v44 = vpop.f32.mrf.mxu0  ;;  %v1767_v49 = vmul.f32 %v1766_v31, %v4523_v15  ;;  %v4658_v60 = vmin.f32 %v1841_v25, 16.0  ;;  %v1229_v43 = vadd.f32 %v4488_v56, %v1193_v53 }
 0x246   : > { %v1195_v47 = vmul.f32 %v4456_v29, %v1159_v41  ;;  %v1029_v55 = vsel %vm4645_vm13, %v4521_v45, %v1025_v21  ;;  %v1230_v31 = vadd.f32 %v4488_v56, %v1194_v36  ;;  %v656_v51 = vmul.f32 %v4656_v22, %v4656_v22 }
 0x247   : > { %v1034_v35 = vsub.f32 1.5, %v1033_v20  ;;  %v1804_v20 = vadd.f32 0.00028619796, %v1803_v14  ;;  %v1843_v12 = vmul.f32 2.1237322e-06, %v4658_v60  ;;  %v1252_v2 = vpack.c.bf16 %v1229_v43, %v1228_v5 }
 0x248   : > { %v4641_v23 = vpop.eup %3401  ;;  %v1231_v8 = vadd.f32 %v4488_v56, %v1195_v47  ;;  %v1729_v53 = vmul.f32 %v1728_v52, %v4503_v46  ;;  %v4687_v25 = vadd.f32 %v4480_v16, %v1362_v44  ;;  %v1160_v36 = vmul.f32 %v1029_v55, %v4093_v7 }
 0x249   : > { %v4652_v18 = vpop.eup %3403  ;;  %v1035_v26 = vmul.f32 %v4562_v11, %v1034_v35  ;;  %v1041_v48 = vmul.f32 %v4641_v23, %v4603_v27  ;;  %v1844_v45 = vadd.f32 0.00028619796, %v1843_v12  ;;  %v593_v35 = vmul.f32 %v3601_v38, %v550_v62  ;;  %3157 = vmatmul.msk.bf16.gmra.mxu0 %vm460_vm0, %v1252_v2 }
 0x24a   : > { %v1051_v1 = vmul.f32 %v4652_v18, %v4599_v17  ;;  %v1253_v14 = vpack.c.bf16 %v1231_v8, %v1230_v31  ;;  %v1768_v5 = vadd.f32 0.05243302, %v1767_v49  ;;  %v1805_v47 = vmul.f32 %v1804_v20, %v4619_v58 }
 0x24b   : > { %v1039_v21 = vsel %vm4667_vm1, %v4562_v11, %v1035_v26  ;;  %v1042_v62 = vmul.f32 %v4641_v23, %v1041_v48  ;;  %v4692_v43 = vsub.f32 %v4261_v24, %v593_v35  ;;  %v744_v11 = vsel %vm460_vm0, %v656_v51, 0.0 }
 0x24c   : > { %v1052_v52 = vmul.f32 %v4652_v18, %v1051_v1  ;;  %3158 = vmatmul.msk.bf16.vlgmr.msra.gmra.mxu3 %vm460_vm0, %v1253_v14  ;;  %v4699_v44 = vmul.f32 0.70710677, %v4687_v25  ;;  %v1161_v26 = vmul.f32 %v1039_v21, %v4164_v6  ;;  %v1845_v7 = vmul.f32 %v1844_v45, %v4658_v60  ;;  %745 = vadd.xlane.f32.xlu0 %v744_v11 }
 0x24d   : > { %v1364_v41 = vpop.f32.mrf.mxu0  ;;  %v553_v4 = vpop.xlane.xlu2 %552  ;;  %v657_v55 = vmul.f32 %v4692_v43, %v4692_v43  ;;  %v1730_v48 = vadd.f32 0.18741608, %v1729_v53  ;;  %v1769_v12 = vmul.f32 %v1768_v5, %v4523_v15  ;;  %v1043_v1 = vmul.f32 0.5, %v1042_v62 }
 0x24e   : > { %v594_v49 = vmul.f32 %v3601_v38, %v553_v4  ;;  %v1881_v19 = vmul.f32 %v4699_v44, %v4699_v44  ;;  %v4709_v20 = vadd.f32 %v4480_v16, %v1364_v41  ;;  %v1806_v2 = vadd.f32 0.0036580483, %v1805_v47 }
 0x24f   : > { %v747_v8 = vsel %vm460_vm0, %v657_v55, 0.0  ;;  %v1053_v51 = vmul.f32 0.5, %v1052_v52  ;;  %v1846_v21 = vadd.f32 0.0036580483, %v1845_v7  ;;  %v1196_v41 = vmul.f32 %v4456_v29, %v1160_v36 }
 0x250   : > { %v4713_v6 = vsub.f32 %v4293_v57, %v594_v49  ;;  %v4715_v31 = vmin.f32 %v1881_v19, 16.0  ;;  %v4719_v45 = vmul.f32 0.70710677, %v4709_v20  ;;  %748 = vadd.xlane.f32.xlu1 %v747_v8  ;;  %v1197_v53 = vmul.f32 %v4456_v29, %v1161_v26 }
 0x251   : > { %vm1056_vm2 = vweird.f32 %v4599_v17  ;;  %vm1057_vm3 = vweird.f32 %v4652_v18  ;;  %v1044_v52 = vsub.f32 1.5, %v1043_v1  ;;  %vm1046_vm4 = vweird.f32 %v4603_v27 }
 0x252   : > { %v1883_v14 = vmul.f32 2.1237322e-06, %v4715_v31  ;;  %v1921_v4 = vmul.f32 %v4719_v45, %v4719_v45  ;;  %v658_v5 = vmul.f32 %v4713_v6, %v4713_v6  ;;  %v1807_v36 = vmul.f32 %v1806_v2, %v4619_v58  ;;  %vm4772_vm7 = vmor %vm1056_vm2, %vm1057_vm3 }
 0x253   : > { %v1233_v11 = vadd.f32 %v4488_v56, %v1197_v53  ;;  %v1770_v7 = vadd.f32 0.18741608, %v1769_v12  ;;  %v1054_v49 = vsub.f32 1.5, %v1053_v51  ;;  %vm1047_vm5 = vweird.f32 %v4641_v23 }
 0x254   : > { %v4735_v47 = vmin.f32 %v1921_v4, 16.0  ;;  %v750_v26 = vsel %vm460_vm0, %v658_v5, 0.0  ;;  %v1847_v19 = vmul.f32 %v1846_v21, %v4658_v60  ;;  %v1884_v1 = vadd.f32 0.00028619796, %v1883_v14  ;;  %vm4752_vm6 = vmor %vm1046_vm4, %vm1047_vm5 }
 0x255   : > { %v1367_v35 = vpop.f32.mrf.mxu0  ;;  %751 = vadd.xlane.f32.xlu2 %v750_v26  ;;  %v1232_v8 = vadd.f32 %v4488_v56, %v1196_v41  ;;  %v1734_v2 = vmul.f32 3.8918573e-05, %v4503_v46  ;;  %v1774_v12 = vmul.f32 3.8918573e-05, %v4523_v15  ;;  %v1814_v51 = vmul.f32 3.8918573e-05, %v4619_v58 }
 0x256   : > { %v4729_v62 = vadd.f32 %v4480_v16, %v1367_v35  ;;  %v1045_v35 = vmul.f32 %v4641_v23, %v1044_v52  ;;  %v1923_v53 = vmul.f32 2.1237322e-06, %v4735_v47  ;;  %v1808_v4 = vadd.f32 0.05243302, %v1807_v36 }
 0x257   : > { %v1254_v21 = vpack.c.bf16 %v1233_v11, %v1232_v8  ;;  %v1735_v26 = vadd.f32 0.001143296, %v1734_v2  ;;  %v4759_v52 = vmul.f32 %v1730_v48, %v4503_v46  ;;  %v1055_v57 = vmul.f32 %v4652_v18, %v1054_v49 }
 0x258   : > { %v4741_v55 = vmul.f32 0.70710677, %v4729_v62  ;;  %v1775_v36 = vadd.f32 0.001143296, %v1774_v12  ;;  %v4766_v27 = vmul.f32 %v1770_v7, %v4523_v15  ;;  %v1848_v8 = vadd.f32 0.05243302, %v1847_v19 }
 0x259   : > { %v1736_v48 = vmul.f32 %v1735_v26, %v4503_v46  ;;  %v1815_v2 = vadd.f32 0.001143296, %v1814_v51  ;;  %v1885_v49 = vmul.f32 %v1884_v1, %v4715_v31  ;;  %v1924_v7 = vadd.f32 0.00028619796, %v1923_v53 }
 0x25a   : > { %v1961_v41 = vmul.f32 %v4741_v55, %v4741_v55  ;;  %v1809_v17 = vmul.f32 %v1808_v4, %v4619_v58  ;;  %v1776_v26 = vmul.f32 %v1775_v36, %v4523_v15  ;;  %v1059_v51 = vsel %vm4772_vm7, %v4652_v18, %v1055_v57  ;;  %v6054_v57 = vld [vmem:[#allocation29_spill] sm:$0xff] }
 0x25b   : > { %v1737_v19 = vadd.f32 0.014752088, %v1736_v48  ;;  %v1816_v1 = vmul.f32 %v1815_v2, %v4619_v58  ;;  %v1849_v4 = vmul.f32 %v1848_v8, %v4658_v60  ;;  %v1925_v36 = vmul.f32 %v1924_v7, %v4735_v47 }
 0x25c   : > { %3159 = vmatmul.msk.bf16.gmra.mxu3 %vm460_vm0, %v1254_v21  ;;  %v1777_v21 = vadd.f32 0.014752088, %v1776_v26  ;;  %v1163_v18 = vmul.f32 %v1059_v51, %v6054_v57  ;;  %v1810_v50 = vadd.f32 0.18741608, %v1809_v17 }
 0x25d   : > { %v1369_v14 = vpop.f32.mrf.mxu0  ;;  %v1738_v5 = vmul.f32 %v1737_v19, %v4503_v46  ;;  %v1817_v48 = vadd.f32 0.014752088, %v1816_v1  ;;  %v1926_v51 = vadd.f32 0.0036580483, %v1925_v36 }
 0x25e   : > { %v4763_v24 = vadd.f32 %v4480_v16, %v1369_v14  ;;  %v1049_v16 = vsel %vm4752_vm6, %v4641_v23, %v1045_v35  ;;  %v4786_v14 = vmin.f32 %v1961_v41, 16.0  ;;  %v1854_v35 = vmul.f32 3.8918573e-05, %v4658_v60 }
 0x25f   : > { %v1162_v53 = vmul.f32 %v1049_v16, %v4205_v59  ;;  %v1886_v41 = vadd.f32 0.0036580483, %v1885_v49  ;;  %v1739_v39 = vadd.f32 0.112945676, %v1738_v5  ;;  %v1778_v2 = vmul.f32 %v1777_v21, %v4523_v15 }
 0x260   : > { %v4782_v12 = vmul.f32 0.70710677, %v4763_v24  ;;  %v1855_v11 = vadd.f32 0.001143296, %v1854_v35  ;;  %v1963_v30 = vmul.f32 2.1237322e-06, %v4786_v14  ;;  %v1818_v59 = vmul.f32 %v1817_v48, %v4619_v58 }
 0x261   : > { %v1850_v16 = vadd.f32 0.18741608, %v1849_v4  ;;  %v1198_v49 = vmul.f32 %v4456_v29, %v1162_v53  ;;  %v1740_v7 = vmul.f32 %v1739_v39, %v4503_v46  ;;  %v1779_v19 = vadd.f32 0.112945676, %v1778_v2 }
 0x262   : > { %v2001_v23 = vmul.f32 %v4782_v12, %v4782_v12  ;;  %v1856_v8 = vmul.f32 %v1855_v11, %v4658_v60  ;;  %v1887_v26 = vmul.f32 %v1886_v41, %v4715_v31  ;;  %v1819_v1 = vadd.f32 0.112945676, %v1818_v59 }
 0x263   : > { %v1964_v5 = vadd.f32 0.00028619796, %v1963_v30  ;;  %v1199_v17 = vmul.f32 %v4456_v29, %v1163_v18  ;;  %v1780_v21 = vmul.f32 %v1779_v19, %v4523_v15  ;;  %v1811_v48 = vmul.f32 %v1810_v50, %v4619_v58 }
 0x264   : > { %v4803_v32 = vmin.f32 %v2001_v23, 16.0  ;;  %v1857_v35 = vadd.f32 0.014752088, %v1856_v8  ;;  %v1741_v23 = vadd.f32 0.4994258, %v1740_v7  ;;  %v1820_v53 = vmul.f32 %v1819_v1, %v4619_v58 }
 0x265   : > { %v1851_v11 = vmul.f32 %v1850_v16, %v4658_v60  ;;  %v1234_v41 = vadd.f32 %v4488_v56, %v1198_v49  ;;  %v1781_v30 = vadd.f32 0.4994258, %v1780_v21  ;;  %v1888_v57 = vadd.f32 0.05243302, %v1887_v26 }
 0x266   : > { %v2003_v4 = vmul.f32 2.1237322e-06, %v4803_v32  ;;  %v1858_v39 = vmul.f32 %v1857_v35, %v4658_v60  ;;  %v1742_v36 = vmul.f32 %v1741_v23, %v4503_v46  ;;  %v1927_v29 = vmul.f32 %v1926_v51, %v4735_v47 }
 0x267   : > { %v1821_v18 = vadd.f32 0.4994258, %v1820_v53  ;;  %v1965_v50 = vmul.f32 %v1964_v5, %v4786_v14  ;;  %v1235_v59 = vadd.f32 %v4488_v56, %v1199_v17  ;;  %v1782_v7 = vmul.f32 %v1781_v30, %v4523_v15 }
 0x268   : > { %v1859_v2 = vadd.f32 0.112945676, %v1858_v39  ;;  %v4822_v8 = vadd.f32 1.0, %v1742_v36  ;;  %v1732_v16 = vadd.f32 1.1283791, %v4759_v52  ;;  %v1889_v56 = vmul.f32 %v1888_v57, %v4715_v31 }
 0x269   : > { %v2004_v19 = vadd.f32 0.00028619796, %v2003_v4  ;;  %v1822_v49 = vmul.f32 %v1821_v18, %v4619_v58  ;;  %v1772_v26 = vadd.f32 1.1283791, %v4766_v27  ;;  %v1812_v51 = vadd.f32 1.1283791, %v1811_v48 }
 0x26a   : > { %v1860_v46 = vmul.f32 %v1859_v2, %v4658_v60  ;;  %v1255_v1 = vpack.c.bf16 %v1235_v59, %v1234_v41  ;;  %3405 = vrcp.f32 %v4822_v8  ;;  %v1852_v35 = vadd.f32 1.1283791, %v1851_v11 }
 0x26b   : > { %v1928_v5 = vadd.f32 0.05243302, %v1927_v29  ;;  %v4831_v17 = vadd.f32 1.0, %v1782_v7  ;;  %v4834_v15 = vmul.f32 0.5, %v4434_v63  ;;  %v1966_v52 = vadd.f32 0.0036580483, %v1965_v50 }
 0x26c   : > { %3160 = vmatmul.msk.bf16.gmra.mxu3 %vm460_vm0, %v1255_v1  ;;  %v4837_v58 = vadd.f32 1.0, %v1822_v49  ;;  %v1861_v23 = vadd.f32 0.4994258, %v1860_v46  ;;  %v4840_v27 = vmul.f32 %v1732_v16, %v4447_v54  ;;  %v4843_v21 = vmul.f32 0.5, %v4483_v9  ;;  %v4882_v50 = vld [vmem:[%s5950_s7] ss:$0 sm:$0xff] }
 0x26d   : > { %v2005_v48 = vmul.f32 %v2004_v19, %v4803_v32  ;;  %3407 = vrcp.f32 %v4831_v17  ;;  %v4848_v4 = vmul.f32 %v1772_v26, %v4506_v42  ;;  %v1753_v63 = vand.u32 2147483647, %v4822_v8 }
 0x26e   : > { %v1755_v53 = vand.u32 2147483648, %v4822_v8  ;;  %3409 = vrcp.f32 %v4837_v58  ;;  %v4854_v39 = vmul.f32 %v1812_v51, %v4556_v61  ;;  %v4857_v54 = vmul.f32 %v1852_v35, %v4632_v0 }
 0x26f   : > { %v4859_v9 = vadd.f32 0.18741608, %v1889_v56  ;;  %v1894_v11 = vmul.f32 3.8918573e-05, %v4715_v31  ;;  %v4863_v42 = vmul.f32 %v1928_v5, %v4735_v47  ;;  %v4866_v36 = vmul.f32 %v1966_v52, %v4786_v14 }
 0x270   : > { %v3406_v41 = vpop.eup %3405  ;;  %v1793_v30 = vand.u32 2147483647, %v4831_v17  ;;  %v1862_v57 = vmul.f32 %v1861_v23, %v4658_v60  ;;  %v4870_v61 = vadd.f32 0.0036580483, %v2005_v48  ;;  %vm1749_vm8 = vweird.f32 %v4822_v8 }
 0x271   : > { %v1745_v0 = vmul.f32 %v3406_v41, %v4822_v8  ;;  %v1795_v29 = vand.u32 2147483648, %v4831_v17  ;;  %vm4875_vm9 = vcmp.eq.f32.partialorder %v1753_v63, 8.507059e+37  ;;  %v1756_v2 = vor.u32 1.1754944e-38, %v1755_v53 }
 0x272   : > { %v1835_v60 = vand.u32 2147483648, %v4837_v58  ;;  %v4885_v59 = vadd.f32 1.0, %v1862_v57  ;;  %vm1789_vm10 = vweird.f32 %v4831_v17  ;;  %v1895_v19 = vadd.f32 0.001143296, %v1894_v11 }
 0x273   : > { %v3408_v7 = vpop.eup %3407  ;;  %v1746_v16 = vsub.f32 1.0, %v1745_v0  ;;  %v1934_v49 = vmul.f32 3.8918573e-05, %v4735_v47  ;;  %vm4892_vm11 = vcmp.eq.f32.partialorder %v1793_v30, 8.507059e+37  ;;  %vm1829_vm12 = vweird.f32 %v4837_v58 }
 0x274   : > { %v4889_v46 = vpop.eup %3409  ;;  %v1785_v26 = vmul.f32 %v3408_v7, %v4831_v17  ;;  %v1833_v1 = vand.u32 2147483647, %v4837_v58  ;;  %3411 = vrcp.f32 %v4885_v59  ;;  %vm1750_vm13 = vweird.f32 %v3406_v41 }
 0x275   : > { %v1747_v35 = vmul.f32 %v3406_v41, %v1746_v16  ;;  %v1796_v56 = vor.u32 1.1754944e-38, %v1795_v29  ;;  %v1825_v52 = vmul.f32 %v4889_v46, %v4837_v58  ;;  %v1836_v63 = vor.u32 1.1754944e-38, %v1835_v60  ;;  %vm1751_vm14 = vmor %vm1749_vm8, %vm1750_vm13  ;;  %v6059_v60 = vld [vmem:[#allocation3_spill] sm:$0xff] }
 0x276   : > { %v1786_v23 = vsub.f32 1.0, %v1785_v26  ;;  %v1974_v53 = vmul.f32 3.8918573e-05, %v4786_v14  ;;  %v1896_v57 = vmul.f32 %v1895_v19, %v4715_v31  ;;  %v1935_v0 = vadd.f32 0.001143296, %v1934_v49 }
 0x277   : > { %v2918_v5 = vpop.f32.mrf.mxu1  ;;  %v1748_v11 = vadd.f32 %v3406_v41, %v1747_v35  ;;  %v1826_v30 = vsub.f32 1.0, %v1825_v52  ;;  %vm1790_vm15 = vweird.f32 %v3408_v7  ;;  %vm1830_vm1 = vweird.f32 %v4889_v46 }
 0x278   : > { %v2919_v48 = vadd.f32 %v4882_v50, %v2918_v5  ;;  %v1787_v29 = vmul.f32 %v3408_v7, %v1786_v23  ;;  %vm4915_vm2 = vcmp.eq.f32.partialorder %v1833_v1, 8.507059e+37  ;;  %vm1869_vm3 = vweird.f32 %v4885_v59  ;;  %vm1791_vm4 = vmor %vm1789_vm10, %vm1790_vm15 }
 0x279   : > { %v1752_v35 = vsel %vm1751_vm14, %v3406_v41, %v1748_v11  ;;  %v1827_v5 = vmul.f32 %v4889_v46, %v1826_v30  ;;  %v1897_v19 = vadd.f32 0.014752088, %v1896_v57  ;;  %v1936_v49 = vmul.f32 %v1935_v0, %v4735_v47  ;;  %vm4942_vm5 = vmor %vm1829_vm12, %vm1830_vm1 }
 0x27a   : > { %v2998_v16 = vadd.f32 %v2919_v48, %v6059_v60  ;;  %v3412_v8 = vpop.eup %3411  ;;  %v1757_v52 = vsel %vm4875_vm9, %v1756_v2, %v1752_v35  ;;  %v1788_v23 = vadd.f32 %v3408_v7, %v1787_v29  ;;  %v1873_v1 = vand.u32 2147483647, %v4885_v59 }
 0x27b   : > { %v1975_v48 = vadd.f32 0.001143296, %v1974_v53  ;;  %v1758_v60 = vmul.f32 %v1757_v52, %v4840_v27  ;;  %v1828_v41 = vadd.f32 %v4889_v46, %v1827_v5  ;;  %v1865_v11 = vmul.f32 %v3412_v8, %v4885_v59 }
 0x27c   : > { %3030 = vst.msk [vmem:[%s4908_s16] sm:$0xff] %vm460_vm0, %v2998_v16  ;;  %v1875_v30 = vand.u32 2147483648, %v4885_v59  ;;  %v1792_v18 = vsel %vm1791_vm4, %v3408_v7, %v1788_v23  ;;  %v1898_v2 = vmul.f32 %v1897_v19, %v4715_v31  ;;  %v1937_v57 = vadd.f32 0.014752088, %v1936_v49  ;;  %v6064_v23 = vld [vmem:[#allocation6_spill] sm:$0xff] }
 0x27d   : > { %v1976_v0 = vmul.f32 %v1975_v48, %v4786_v14  ;;  %v3171_v29 = vclamps-f32 %v1758_v60, 1.0  ;;  %v1797_v27 = vsel %vm4892_vm11, %v1796_v56, %v1792_v18  ;;  %v1866_v16 = vsub.f32 1.0, %v1865_v11 }
 0x27e   : > { %v2014_v7 = vmul.f32 3.8918573e-05, %v4803_v32  ;;  %v1798_v35 = vmul.f32 %v1797_v27, %v4848_v4  ;;  %v1832_v51 = vsel %vm4942_vm5, %v4889_v46, %v1828_v41  ;;  %v1899_v56 = vadd.f32 0.112945676, %v1898_v2 }
 0x27f   : > { %v2920_v53 = vpop.f32.mrf.mxu1  ;;  %v2767_v19 = vadd.f32 1.0, %v3171_v29  ;;  %v1867_v49 = vmul.f32 %v3412_v8, %v1866_v16  ;;  %vm1870_vm6 = vweird.f32 %v3412_v8  ;;  %v1938_v58 = vmul.f32 %v1937_v57, %v4735_v47 }
 0x280   : > { %v2921_v5 = vadd.f32 %v4882_v50, %v2920_v53  ;;  %v3172_v52 = vclamps-f32 %v1798_v35, 1.0  ;;  %v1900_v60 = vmul.f32 %v1899_v56, %v4715_v31  ;;  %v1977_v11 = vadd.f32 0.014752088, %v1976_v0  ;;  %vm1871_vm7 = vmor %vm1869_vm3, %vm1870_vm6 }
 0x281   : > { %v1837_v4 = vsel %vm4915_vm2, %v1836_v63, %v1832_v51  ;;  %v1868_v18 = vadd.f32 %v3412_v8, %v1867_v49  ;;  %v1876_v27 = vor.u32 1.1754944e-38, %v1875_v30  ;;  %v1939_v53 = vadd.f32 0.112945676, %v1938_v58  ;;  %v6065_v49 = vld [vmem:[#allocation2_spill] sm:$0xff] }
 0x282   : > { %v2999_v48 = vadd.f32 %v2921_v5, %v6064_v23  ;;  %v2768_v17 = vadd.f32 1.0, %v3172_v52  ;;  %v1901_v46 = vadd.f32 0.4994258, %v1900_v60  ;;  %v1978_v41 = vmul.f32 %v1977_v11, %v4786_v14 }
 0x283   : > { %v2015_v2 = vadd.f32 0.001143296, %v2014_v7  ;;  %v2799_v57 = vmul.f32 %v2767_v19, %v4834_v15  ;;  %v1872_v29 = vsel %vm1871_vm7, %v3412_v8, %v1868_v18  ;;  %vm1874_vm8 = vcmp.eq.f32.partialorder %v1873_v1, 8.507059e+37 }
 0x284   : > { %3031 = vst.msk [vmem:[%s4908_s16 + $0x8] sm:$0xff] %vm460_vm0, %v2999_v48  ;;  %v1940_v26 = vmul.f32 %v1939_v53, %v4735_v47  ;;  %v2800_v63 = vmul.f32 %v2768_v17, %v4843_v21  ;;  %v1877_v30 = vsel %vm1874_vm8, %v1876_v27, %v1872_v29  ;;  %v1902_v0 = vmul.f32 %v1901_v46, %v4715_v31 }
 0x285   : > { %v1979_v16 = vadd.f32 0.112945676, %v1978_v41  ;;  %v1838_v35 = vmul.f32 %v1837_v4, %v4854_v39  ;;  %v1878_v59 = vmul.f32 %v1877_v30, %v4857_v54  ;;  %v2016_v7 = vmul.f32 %v2015_v2, %v4803_v32 }
 0x286   : > { %v1941_v51 = vadd.f32 0.4994258, %v1940_v26  ;;  %v2828_v56 = vpack.c.bf16 %v2800_v63, %v2799_v57  ;;  %v4970_v8 = vadd.f32 1.0, %v1902_v0  ;;  %v2007_v39 = vmul.f32 %v4870_v61, %v4803_v32 }
 0x287   : > { %v2923_v5 = vpop.f32.mrf.mxu1  ;;  %v1980_v21 = vmul.f32 %v1979_v16, %v4786_v14  ;;  %v2017_v19 = vadd.f32 0.014752088, %v2016_v7  ;;  %v3174_v54 = vclamps-f32 %v1878_v59, 1.0  ;;  %v1891_v52 = vmul.f32 %v4859_v9, %v4715_v31 }
 0x288   : > { %v2924_v15 = vadd.f32 %v4882_v50, %v2923_v5  ;;  %v1942_v1 = vmul.f32 %v1941_v51, %v4735_v47  ;;  %2932 = vmatmul.bf16.gmra.mxu1 %v2828_v56  ;;  %3413 = vrcp.f32 %v4970_v8  ;;  %v1930_v23 = vadd.f32 0.18741608, %v4863_v42 }
 0x289   : > { %v1981_v60 = vadd.f32 0.4994258, %v1980_v21  ;;  %v1968_v11 = vadd.f32 0.05243302, %v4866_v36  ;;  %v3173_v4 = vclamps-f32 %v1838_v35, 1.0  ;;  %v2018_v61 = vmul.f32 %v2017_v19, %v4803_v32 }
 0x28a   : > { %v3000_v58 = vadd.f32 %v2924_v15, %v6065_v49  ;;  %v4981_v48 = vadd.f32 1.0, %v1942_v1  ;;  %v2008_v18 = vadd.f32 0.05243302, %v2007_v39  ;;  %v2770_v27 = vadd.f32 1.0, %v3174_v54 }
 0x28b   : > { %v1982_v53 = vmul.f32 %v1981_v60, %v4786_v14  ;;  %v2019_v17 = vadd.f32 0.112945676, %v2018_v61  ;;  %v1426_v31 = vmul.f32 0.5, %v4624_v37  ;;  %v1892_v9 = vadd.f32 1.1283791, %v1891_v52 }
 0x28c   : > { %3032 = vst.msk [vmem:[%s4908_s16 + $0x10] sm:$0xff] %vm460_vm0, %v3000_v58  ;;  %3415 = vrcp.f32 %v4981_v48  ;;  %v1931_v42 = vmul.f32 %v1930_v23, %v4735_v47  ;;  %v1969_v36 = vmul.f32 %v1968_v11, %v4786_v14  ;;  %v2769_v2 = vadd.f32 1.0, %v3173_v4  ;;  %v6066_v47 = vld [vmem:[#allocation5_spill] sm:$0xff] }
 0x28d   : > { %v4993_v29 = vadd.f32 1.0, %v1982_v53  ;;  %v1425_v26 = vmul.f32 0.5, %v4542_v10  ;;  %v2020_v30 = vmul.f32 %v2019_v17, %v4803_v32  ;;  %v2009_v37 = vmul.f32 %v2008_v18, %v4803_v32 }
 0x28e   : > { %v3414_v41 = vpop.eup %3413  ;;  %v2802_v0 = vmul.f32 %v2770_v27, %v1426_v31  ;;  %v1893_v59 = vmul.f32 %v1892_v9, %v4699_v44  ;;  %v1915_v51 = vand.u32 2147483648, %v4970_v8  ;;  %v1932_v56 = vadd.f32 1.1283791, %v1931_v42  ;;  %v6067_v9 = vld [vmem:[#allocation4_spill] sm:$0xff] }
 0x28f   : > { %v2925_v46 = vpop.f32.mrf.mxu1  ;;  %v1905_v63 = vmul.f32 %v3414_v41, %v4970_v8  ;;  %3417 = vrcp.f32 %v4993_v29  ;;  %v2021_v7 = vadd.f32 0.4994258, %v2020_v30  ;;  %v1970_v10 = vadd.f32 0.18741608, %v1969_v36 }
 0x290   : > { %v2926_v57 = vadd.f32 %v4882_v50, %v2925_v46  ;;  %v2801_v15 = vmul.f32 %v2769_v2, %v1425_v26  ;;  %vm1910_vm9 = vweird.f32 %v3414_v41  ;;  %v1913_v19 = vand.u32 2147483647, %v4970_v8 }
 0x291   : > { %v1906_v5 = vsub.f32 1.0, %v1905_v63  ;;  %v2022_v39 = vmul.f32 %v2021_v7, %v4803_v32  ;;  %v2010_v54 = vadd.f32 0.18741608, %v2009_v37  ;;  %vm1909_vm10 = vweird.f32 %v4970_v8 }
 0x292   : > { %v3001_v16 = vadd.f32 %v2926_v57, %v6066_v47  ;;  %v3416_v35 = vpop.eup %3415  ;;  %v2829_v49 = vpack.c.bf16 %v2802_v0, %v2801_v15  ;;  %v1916_v52 = vor.u32 1.1754944e-38, %v1915_v51  ;;  %v1955_v23 = vand.u32 2147483648, %v4981_v48  ;;  %vm1911_vm11 = vmor %vm1909_vm10, %vm1910_vm9 }
 0x293   : > { %v1945_v21 = vmul.f32 %v3416_v35, %v4981_v48  ;;  %v1907_v1 = vmul.f32 %v3414_v41, %v1906_v5  ;;  %v5010_v11 = vadd.f32 1.0, %v2022_v39  ;;  %vm1950_vm12 = vweird.f32 %v3416_v35  ;;  %v6070_v39 = vld [vmem:[#allocation7_spill] sm:$0xff] }
 0x294   : > { %3033 = vst.msk [vmem:[%s4908_s16 + $0x18] sm:$0xff] %vm460_vm0, %v3001_v16  ;;  %v1953_v18 = vand.u32 2147483647, %v4981_v48  ;;  %vm1914_vm13 = vcmp.eq.f32.partialorder %v1913_v19, 8.507059e+37  ;;  %vm1949_vm14 = vweird.f32 %v4981_v48  ;;  %v1427_v46 = vmul.f32 0.5, %v4687_v25 }
 0x295   : > { %v1946_v44 = vsub.f32 1.0, %v1945_v21  ;;  %v1908_v58 = vadd.f32 %v3414_v41, %v1907_v1  ;;  %v5012_v4 = vpop.eup %3417  ;;  %3419 = vrcp.f32 %v5010_v11  ;;  %vm1951_vm15 = vmor %vm1949_vm14, %vm1950_vm12  ;;  %v1956_v2 = vor.u32 1.1754944e-38, %v1955_v23 }
 0x296   : > { %v1985_v8 = vmul.f32 %v5012_v4, %v4993_v29  ;;  %v1933_v57 = vmul.f32 %v1932_v56, %v4719_v45  ;;  %v1971_v26 = vmul.f32 %v1970_v10, %v4786_v14  ;;  %vm1954_vm1 = vcmp.eq.f32.partialorder %v1953_v18, 8.507059e+37 }
 0x297   : > { %v2928_v60 = vpop.f32.mrf.mxu1  ;;  %v1947_v61 = vmul.f32 %v3416_v35, %v1946_v44  ;;  %v1912_v53 = vsel %vm1911_vm11, %v3414_v41, %v1908_v58  ;;  %v2011_v37 = vmul.f32 %v2010_v54, %v4803_v32  ;;  %v1428_v25 = vmul.f32 0.5, %v4709_v20 }
 0x298   : > { %v2929_v27 = vadd.f32 %v4882_v50, %v2928_v60  ;;  %2937 = vmatmul.bf16.gmra.mxu1 %v2829_v49  ;;  %v1917_v17 = vsel %vm1914_vm13, %v1916_v52, %v1912_v53  ;;  %v1986_v41 = vsub.f32 1.0, %v1985_v8  ;;  %vm1990_vm2 = vweird.f32 %v5012_v4 }
 0x299   : > { %v1948_v31 = vadd.f32 %v3416_v35, %v1947_v61  ;;  %v1918_v36 = vmul.f32 %v1917_v17, %v1893_v59  ;;  %vm1989_vm3 = vweird.f32 %v4993_v29  ;;  %v1993_v5 = vand.u32 2147483647, %v4993_v29 }
 0x29a   : > { %v3002_v42 = vadd.f32 %v2929_v27, %v6067_v9  ;;  %v1987_v47 = vmul.f32 %v5012_v4, %v1986_v41  ;;  %v1995_v32 = vand.u32 2147483648, %v4993_v29  ;;  %v1972_v10 = vadd.f32 1.1283791, %v1971_v26  ;;  %vm5037_vm4 = vmor %vm1989_vm3, %vm1990_vm2 }
 0x29b   : > { %v1952_v63 = vsel %vm1951_vm15, %v3416_v35, %v1948_v31  ;;  %v3175_v48 = vclamps-f32 %v1918_v36, 1.0  ;;  %v3420_v59 = vpop.eup %3419  ;;  %v2012_v15 = vadd.f32 1.1283791, %v2011_v37  ;;  %vm1994_vm5 = vcmp.eq.f32.partialorder %v1993_v5, 8.507059e+37 }
 0x29c   : > { %3034 = vst.msk [vmem:[%s4908_s16 + $0x20] sm:$0xff] %vm460_vm0, %v3002_v42  ;;  %v1957_v0 = vsel %vm1954_vm1, %v1956_v2, %v1952_v63  ;;  %v1988_v35 = vadd.f32 %v5012_v4, %v1987_v47  ;;  %v2025_v20 = vmul.f32 %v3420_v59, %v5010_v11  ;;  %v2033_v44 = vand.u32 2147483647, %v5010_v11 }
 0x29d   : > { %v1958_v16 = vmul.f32 %v1957_v0, %v1933_v57  ;;  %v2771_v7 = vadd.f32 1.0, %v3175_v48  ;;  %v2035_v58 = vand.u32 2147483648, %v5010_v11  ;;  %vm2030_vm6 = vweird.f32 %v3420_v59 }
 0x29e   : > { %v1992_v29 = vsel %vm5037_vm4, %v5012_v4, %v1988_v35  ;;  %v2026_v49 = vsub.f32 1.0, %v2025_v20  ;;  %v1973_v18 = vmul.f32 %v1972_v10, %v4741_v55  ;;  %vm2029_vm7 = vweird.f32 %v5010_v11 }
 0x29f   : > { %v737_v30 = vpop.xlane.xlu1 %736  ;;  %v2930_v14 = vpop.f32.mrf.mxu1  ;;  %v3176_v51 = vclamps-f32 %v1958_v16, 1.0  ;;  %v2803_v52 = vmul.f32 %v2771_v7, %v1427_v46  ;;  %vm2031_vm8 = vmor %vm2029_vm7, %vm2030_vm6  ;;  %v2036_v8 = vor.u32 1.1754944e-38, %v2035_v58  ;;  %v2013_v31 = vmul.f32 %v2012_v15, %v4782_v12 }
 0x2a0   : > { %v781_v45 = vmul.f32 %v737_v30, %v3601_v38  ;;  %v2931_v56 = vadd.f32 %v4882_v50, %v2930_v14  ;;  %v1996_v50 = vor.u32 1.1754944e-38, %v1995_v32  ;;  %v2027_v60 = vmul.f32 %v3420_v59, %v2026_v49 }
 0x2a1   : > { %v2772_v19 = vadd.f32 1.0, %v3176_v51  ;;  %vm2034_vm9 = vcmp.eq.f32.partialorder %v2033_v44, 8.507059e+37  ;;  %v1430_v0 = vmul.f32 0.5, %v4763_v24  ;;  %v1429_v35 = vmul.f32 0.5, %v4729_v62 }
 0x2a2   : > { %v5041_v1 = vadd.f32 1e-05, %v781_v45  ;;  %v3003_v54 = vadd.f32 %v2931_v56, %v6070_v39  ;;  %v1997_v61 = vsel %vm1994_vm5, %v1996_v50, %v1992_v29  ;;  %v2028_v4 = vadd.f32 %v3420_v59, %v2027_v60 }
 0x2a3   : > { %v2804_v23 = vmul.f32 %v2772_v19, %v1428_v25  ;;  %v1998_v9 = vmul.f32 %v1997_v61, %v1973_v18  ;;  %v5066_v25 = vld [vmem:[%s5948_s5] ss:$0 sm:$0xff] }
 0x2a4   : > { %3035 = vst.msk [vmem:[%s4908_s16 + $0x28] sm:$0xff] %vm460_vm0, %v3003_v54  ;;  %3421 = vrsqrt.f32 %v5041_v1  ;;  %v2032_v42 = vsel %vm2031_vm8, %v3420_v59, %v2028_v4  ;;  %vm1076_vm10 = vweird.f32 %v5041_v1 }
 0x2a5   : > { %v2830_v27 = vpack.c.bf16 %v2804_v23, %v2803_v52  ;;  %v2037_v46 = vsel %vm2034_vm9, %v2036_v8, %v2032_v42  ;;  %v3177_v57 = vclamps-f32 %v1998_v9, 1.0 }
 0x2a6   : > { %v2038_v2 = vmul.f32 %v2037_v46, %v2013_v31 }
 0x2a7   : > { %v740_v41 = vpop.xlane.xlu1 %739  ;;  %v2773_v47 = vadd.f32 1.0, %v3177_v57 }
 0x2a8   : > { %v734_v53 = vpop.xlane.xlu0 %733  ;;  %2942 = vmatmul.bf16.gmra.mxu1 %v2830_v27  ;;  %v3178_v26 = vclamps-f32 %v2038_v2, 1.0  ;;  %v782_v11 = vmul.f32 %v740_v41, %v3601_v38 }
 0x2a9   : > { %v780_v17 = vmul.f32 %v734_v53, %v3601_v38  ;;  %v2805_v51 = vmul.f32 %v2773_v47, %v1429_v35 }
 0x2aa   : > { %v5056_v55 = vpop.eup %3421  ;;  %v2774_v63 = vadd.f32 1.0, %v3178_v26  ;;  %v5071_v45 = vadd.f32 1e-05, %v782_v11 }
 0x2ab   : > { %v812_v36 = vadd.f32 1e-05, %v780_v17  ;;  %v1071_v30 = vmul.f32 %v5056_v55, %v5041_v1  ;;  %vm1077_vm11 = vweird.f32 %v5056_v55 }
 0x2ac   : > { %v2806_v5 = vmul.f32 %v2774_v63, %v1430_v0  ;;  %vm5104_vm12 = vmor %vm1076_vm10, %vm1077_vm11  ;;  %vm1086_vm3 = vweird.f32 %v5071_v45 }
 0x2ad   : > { %3423 = vrsqrt.f32 %v812_v36  ;;  %v1072_v32 = vmul.f32 %v5056_v55, %v1071_v30  ;;  %vm1066_vm14 = vweird.f32 %v812_v36 }
 0x2ae   : > { %v2831_v10 = vpack.c.bf16 %v2806_v5, %v2805_v51 }
 0x2af   : > { %v743_v12 = vpop.xlane.xlu2 %742  ;;  %v1073_v15 = vmul.f32 0.5, %v1072_v32 }
 0x2b0   : > { %v1372_v37 = vpop.f32.mrf.mxu0  ;;  %v783_v48 = vmul.f32 %v743_v12, %v3601_v38 }
 0x2b1   : > { %v5069_v16 = vadd.f32 %v5066_v25, %v1372_v37  ;;  %v1074_v29 = vsub.f32 1.5, %v1073_v15 }
 0x2b2   : > { %v5073_v59 = vadd.f32 1e-05, %v783_v48  ;;  %v556_v20 = vpop.xlane.xlu0 %555 }
 0x2b3   : > { %v3424_v14 = vpop.eup %3423  ;;  %v5079_v7 = vmul.f32 0.70710677, %v5069_v16  ;;  %v595_v21 = vmul.f32 %v3601_v38, %v556_v20  ;;  %v1075_v61 = vmul.f32 %v5056_v55, %v1074_v29  ;;  %v5166_v29 = vld [vmem:[%s5946_s3] ss:$0 sm:$0xff] }
 0x2b4   : > { %v1061_v24 = vmul.f32 %v3424_v14, %v812_v36  ;;  %3425 = vrsqrt.f32 %v5073_v59  ;;  %vm1067_vm13 = vweird.f32 %v3424_v14  ;;  %vm1096_vm1 = vweird.f32 %v5073_v59 }
 0x2b5   : > { %3427 = vrsqrt.f32 %v5071_v45  ;;  %v5084_v62 = vsub.f32 %v4606_v3, %v595_v21  ;;  %v2041_v39 = vmul.f32 %v5079_v7, %v5079_v7  ;;  %v1079_v17 = vsel %vm5104_vm12, %v5056_v55, %v1075_v61  ;;  %vm1068_vm15 = vmor %vm1066_vm14, %vm1067_vm13 }
 0x2b6   : > { %v1062_v56 = vmul.f32 %v3424_v14, %v1061_v24  ;;  %v1165_v11 = vmul.f32 %v1079_v17, %v4431_v13 }
 0x2b7   : > { %v659_v50 = vmul.f32 %v5084_v62, %v5084_v62  ;;  %v5098_v52 = vmin.f32 %v2041_v39, 16.0 }
 0x2b8   : > { %v1063_v19 = vmul.f32 0.5, %v1062_v56  ;;  %2947 = vmatmul.bf16.gmra.mxu1 %v2831_v10  ;;  %v1374_v23 = vpop.f32.mrf.mxu0 }
 0x2b9   : > { %v753_v60 = vsel %vm460_vm0, %v659_v50, 0.0  ;;  %v5109_v27 = vadd.f32 %v5066_v25, %v1374_v23  ;;  %v2043_v8 = vmul.f32 2.1237322e-06, %v5098_v52  ;;  %v2054_v26 = vmul.f32 3.8918573e-05, %v5098_v52 }
 0x2ba   : > { %v5088_v54 = vpop.eup %3425  ;;  %v1064_v44 = vsub.f32 1.5, %v1063_v19  ;;  %754 = vadd.xlane.f32.xlu0 %v753_v60 }
 0x2bb   : > { %v5090_v49 = vpop.eup %3427  ;;  %v1091_v58 = vmul.f32 %v5088_v54, %v5073_v59  ;;  %v5119_v46 = vmul.f32 0.70710677, %v5109_v27  ;;  %v2044_v57 = vadd.f32 0.00028619796, %v2043_v8  ;;  %v2055_v12 = vadd.f32 0.001143296, %v2054_v26 }
 0x2bc   : > { %v1081_v18 = vmul.f32 %v5090_v49, %v5071_v45  ;;  %v1065_v4 = vmul.f32 %v3424_v14, %v1064_v44  ;;  %vm1097_vm2 = vweird.f32 %v5088_v54  ;;  %vm1087_vm4 = vweird.f32 %v5090_v49 }
 0x2bd   : > { %v1092_v53 = vmul.f32 %v5088_v54, %v1091_v58  ;;  %v2081_v37 = vmul.f32 %v5119_v46, %v5119_v46  ;;  %v2045_v47 = vmul.f32 %v2044_v57, %v5098_v52  ;;  %vm5159_vm5 = vmor %vm1096_vm1, %vm1097_vm2 }
 0x2be   : > { %v1082_v31 = vmul.f32 %v5090_v49, %v1081_v18  ;;  %v1069_v2 = vsel %vm1068_vm15, %v3424_v14, %v1065_v4  ;;  %v2056_v14 = vmul.f32 %v2055_v12, %v5098_v52  ;;  %vm5178_vm6 = vmor %vm1086_vm3, %vm1087_vm4 }
 0x2bf   : > { %v746_v9 = vpop.xlane.xlu0 %745  ;;  %v1093_v41 = vmul.f32 0.5, %v1092_v53  ;;  %v1164_v36 = vmul.f32 %v1069_v2, %v4494_v28  ;;  %v5138_v28 = vld [vmem:[%s5945_s2] ss:$0 sm:$0xff]  ;;  %v5146_v56 = vmin.f32 %v2081_v37, 16.0  ;;  %v2046_v15 = vadd.f32 0.0036580483, %v2045_v47 }
 0x2c0   : > { %v784_v42 = vmul.f32 %v746_v9, %v3601_v38  ;;  %v1083_v55 = vmul.f32 0.5, %v1082_v31  ;;  %v1201_v5 = vmul.f32 %v5138_v28, %v1165_v11  ;;  %v2057_v51 = vadd.f32 0.014752088, %v2056_v14 }
 0x2c1   : > { %v1094_v0 = vsub.f32 1.5, %v1093_v41  ;;  %v1200_v20 = vmul.f32 %v5138_v28, %v1164_v36  ;;  %v2083_v18 = vmul.f32 2.1237322e-06, %v5146_v56  ;;  %v2047_v53 = vmul.f32 %v2046_v15, %v5098_v52 }
 0x2c2   : > { %v5123_v63 = vadd.f32 1e-05, %v784_v42  ;;  %v1084_v32 = vsub.f32 1.5, %v1083_v55  ;;  %v1237_v44 = vadd.f32 %v5166_v29, %v1201_v5  ;;  %v2058_v60 = vmul.f32 %v2057_v51, %v5098_v52 }
 0x2c3   : > { %v749_v30 = vpop.xlane.xlu1 %748  ;;  %v1095_v10 = vmul.f32 %v5088_v54, %v1094_v0  ;;  %v1236_v50 = vadd.f32 %v5166_v29, %v1200_v20  ;;  %v2084_v57 = vadd.f32 0.00028619796, %v2083_v18  ;;  %v2048_v55 = vadd.f32 0.05243302, %v2047_v53 }
 0x2c4   : > { %3429 = vrsqrt.f32 %v5123_v63  ;;  %v785_v48 = vmul.f32 %v749_v30, %v3601_v38  ;;  %v1085_v58 = vmul.f32 %v5090_v49, %v1084_v32  ;;  %v2094_v39 = vmul.f32 3.8918573e-05, %v5146_v56 }
 0x2c5   : > { %v1256_v1 = vpack.c.bf16 %v1237_v44, %v1236_v50  ;;  %v1099_v4 = vsel %vm5159_vm5, %v5088_v54, %v1095_v10  ;;  %v2059_v54 = vadd.f32 0.112945676, %v2058_v60  ;;  %v2085_v0 = vmul.f32 %v2084_v57, %v5146_v56 }
 0x2c6   : > { %v5133_v13 = vadd.f32 1e-05, %v785_v48  ;;  %v1377_v35 = vpop.f32.mrf.mxu0  ;;  %v1089_v9 = vsel %vm5178_vm6, %v5090_v49, %v1085_v58  ;;  %v1167_v41 = vmul.f32 %v1099_v4, %v4530_v40  ;;  %v2049_v5 = vmul.f32 %v2048_v55, %v5098_v52 }
 0x2c7   : > { %v5143_v24 = vadd.f32 %v5066_v25, %v1377_v35  ;;  %3161 = vmatmul.msk.bf16.gmra.mxu3 %vm460_vm0, %v1256_v1  ;;  %v1166_v12 = vmul.f32 %v1089_v9, %v4497_v34  ;;  %v2060_v40 = vmul.f32 %v2059_v54, %v5098_v52  ;;  %vm1106_vm9 = vweird.f32 %v5123_v63 }
 0x2c8   : > { %3431 = vrsqrt.f32 %v5133_v13  ;;  %v1203_v35 = vmul.f32 %v5138_v28, %v1167_v41  ;;  %vm1116_vm7 = vweird.f32 %v5133_v13  ;;  %v2095_v9 = vadd.f32 0.001143296, %v2094_v39 }
 0x2c9   : > { %v5153_v21 = vmul.f32 0.70710677, %v5143_v24  ;;  %v1202_v15 = vmul.f32 %v5138_v28, %v1166_v12  ;;  %v2061_v58 = vadd.f32 0.4994258, %v2060_v40 }
 0x2ca   : > { %v5155_v19 = vpop.eup %3429  ;;  %v1239_v61 = vadd.f32 %v5166_v29, %v1203_v35  ;;  %v2096_v35 = vmul.f32 %v2095_v9, %v5146_v56 }
 0x2cb   : > { %v1101_v23 = vmul.f32 %v5155_v19, %v5123_v63  ;;  %v2121_v59 = vmul.f32 %v5153_v21, %v5153_v21  ;;  %vm1107_vm10 = vweird.f32 %v5155_v19  ;;  %v2062_v54 = vmul.f32 %v2061_v58, %v5098_v52 }
 0x2cc   : > { %vm5252_vm12 = vmor %vm1106_vm9, %vm1107_vm10 }
 0x2cd   : > { %v5187_v8 = vmin.f32 %v2121_v59, 16.0  ;;  %v1102_v42 = vmul.f32 %v5155_v19, %v1101_v23  ;;  %v2086_v23 = vadd.f32 0.0036580483, %v2085_v0 }
 0x2ce   : > { %v5189_v17 = vpop.eup %3431  ;;  %v1379_v45 = vpop.f32.mrf.mxu0 }
 0x2cf   : > { %v1382_v31 = vpop.f32.mrf.mxu3  ;;  %v1111_v2 = vmul.f32 %v5189_v17, %v5133_v13  ;;  %v5203_v11 = vadd.f32 %v5066_v25, %v1379_v45  ;;  %v2123_v49 = vmul.f32 2.1237322e-06, %v5187_v8  ;;  %v1103_v37 = vmul.f32 0.5, %v1102_v42 }
 0x2d0   : > { %v5200_v26 = vadd.f32 %v5066_v25, %v1382_v31  ;;  %vm1117_vm8 = vweird.f32 %v5189_v17  ;;  %v1238_v45 = vadd.f32 %v5166_v29, %v1202_v15  ;;  %v2050_v42 = vadd.f32 0.18741608, %v2049_v5 }
 0x2d1   : > { %v1112_v30 = vmul.f32 %v5189_v17, %v1111_v2  ;;  %v5216_v14 = vmul.f32 0.70710677, %v5203_v11  ;;  %v2124_v32 = vadd.f32 0.00028619796, %v2123_v49  ;;  %v1104_v50 = vsub.f32 1.5, %v1103_v37  ;;  %vm5241_vm11 = vmor %vm1116_vm7, %vm1117_vm8 }
 0x2d2   : > { %v5209_v36 = vmul.f32 0.70710677, %v5200_v26  ;;  %v2087_v41 = vmul.f32 %v2086_v23, %v5146_v56 }
 0x2d3   : > { %v1113_v48 = vmul.f32 0.5, %v1112_v30  ;;  %v2161_v20 = vmul.f32 %v5216_v14, %v5216_v14  ;;  %v2125_v1 = vmul.f32 %v2124_v32, %v5187_v8  ;;  %v1105_v63 = vmul.f32 %v5155_v19, %v1104_v50 }
 0x2d4   : > { %v2201_v47 = vmul.f32 %v5209_v36, %v5209_v36  ;;  %v1257_v30 = vpack.c.bf16 %v1239_v61, %v1238_v45  ;;  %v2051_v32 = vmul.f32 %v2050_v42, %v5098_v52  ;;  %v752_v61 = vpop.xlane.xlu2 %751 }
 0x2d5   : > { %v1114_v34 = vsub.f32 1.5, %v1113_v48  ;;  %v5232_v60 = vmin.f32 %v2161_v20, 16.0  ;;  %v2126_v12 = vadd.f32 0.0036580483, %v2125_v1  ;;  %v5263_v48 = vadd.f32 1.0, %v2062_v54 }
 0x2d6   : > { %v5221_v51 = vmin.f32 %v2201_v47, 16.0  ;;  %v1109_v5 = vsel %vm5252_vm12, %v5155_v19, %v1105_v63  ;;  %v2088_v20 = vadd.f32 0.05243302, %v2087_v41  ;;  %v5290_v1 = vmul.f32 0.5, %v5069_v16 }
 0x2d7   : > { %v1384_v10 = vpop.f32.mrf.mxu3  ;;  %v1115_v18 = vmul.f32 %v5189_v17, %v1114_v34  ;;  %v2163_v31 = vmul.f32 2.1237322e-06, %v5232_v60  ;;  %3162 = vmatmul.msk.bf16.gmra.mxu3 %vm460_vm0, %v1257_v30  ;;  %3433 = vrcp.f32 %v5263_v48  ;;  %v2127_v39 = vmul.f32 %v2126_v12, %v5187_v8 }
 0x2d8   : > { %v5229_v44 = vadd.f32 %v5066_v25, %v1384_v10  ;;  %v2203_v59 = vmul.f32 2.1237322e-06, %v5221_v51  ;;  %v1168_v23 = vmul.f32 %v1109_v5, %v4656_v22  ;;  %v2052_v4 = vadd.f32 1.1283791, %v2051_v32 }
 0x2d9   : > { %v2164_v55 = vadd.f32 0.00028619796, %v2163_v31  ;;  %v1119_v49 = vsel %vm5241_vm11, %v5189_v17, %v1115_v18  ;;  %v5297_v22 = vmul.f32 0.5, %v5109_v27  ;;  %v2128_v9 = vadd.f32 0.05243302, %v2127_v39 }
 0x2da   : > { %v2204_v53 = vadd.f32 0.00028619796, %v2203_v59  ;;  %v5249_v2 = vmul.f32 0.70710677, %v5229_v44  ;;  %v1169_v10 = vmul.f32 %v1119_v49, %v4692_v43  ;;  %v2097_v43 = vadd.f32 0.014752088, %v2096_v35 }
 0x2db   : > { %v2165_v0 = vmul.f32 %v2164_v55, %v5232_v60  ;;  %v786_v54 = vmul.f32 %v752_v61, %v3601_v38  ;;  %v5312_v12 = vmul.f32 %v2052_v4, %v5079_v7  ;;  %vm2069_vm14 = vweird.f32 %v5263_v48 }
 0x2dc   : > { %v2205_v57 = vmul.f32 %v2204_v53, %v5221_v51  ;;  %v2241_v37 = vmul.f32 %v5249_v2, %v5249_v2  ;;  %v2089_v53 = vmul.f32 %v2088_v20, %v5146_v56  ;;  %v1205_v31 = vmul.f32 %v5138_v28, %v1169_v10 }
 0x2dd   : > { %v2166_v15 = vadd.f32 0.0036580483, %v2165_v0  ;;  %v5294_v45 = vpop.eup %3433  ;;  %v2098_v49 = vmul.f32 %v2097_v43, %v5146_v56  ;;  %v2134_v0 = vmul.f32 3.8918573e-05, %v5187_v8  ;;  %v5324_v32 = vadd.f32 1e-05, %v786_v54 }
 0x2de   : > { %v2206_v40 = vadd.f32 0.0036580483, %v2205_v57  ;;  %v5271_v34 = vmin.f32 %v2241_v37, 16.0  ;;  %v1204_v57 = vmul.f32 %v5138_v28, %v1168_v23  ;;  %v2065_v27 = vmul.f32 %v5294_v45, %v5263_v48 }
 0x2df   : > { %v1387_v47 = vpop.f32.mrf.mxu3  ;;  %v2167_v59 = vmul.f32 %v2166_v15, %v5232_v60  ;;  %v2090_v37 = vadd.f32 0.18741608, %v2089_v53  ;;  %v5317_v28 = vmul.f32 0.5, %v5143_v24  ;;  %v5332_v23 = vmul.f32 0.5, %v5200_v26 }
 0x2e0   : > { %v5274_v17 = vadd.f32 %v5066_v25, %v1387_v47  ;;  %v2207_v50 = vmul.f32 %v2206_v40, %v5221_v51  ;;  %v2243_v58 = vmul.f32 2.1237322e-06, %v5271_v34  ;;  %v1241_v40 = vadd.f32 %v5166_v29, %v1205_v31 }
 0x2e1   : > { %v2168_v13 = vadd.f32 0.05243302, %v2167_v59  ;;  %v2129_v47 = vmul.f32 %v2128_v9, %v5187_v8  ;;  %v1240_v10 = vadd.f32 %v5166_v29, %v1204_v57  ;;  %v2066_v24 = vsub.f32 1.0, %v2065_v27 }
 0x2e2   : > { %v5283_v19 = vmul.f32 0.70710677, %v5274_v17  ;;  %v2244_v18 = vadd.f32 0.00028619796, %v2243_v58  ;;  %v2208_v42 = vadd.f32 0.05243302, %v2207_v50  ;;  %v2091_v58 = vmul.f32 %v2090_v37, %v5146_v56 }
 0x2e3   : > { %v2169_v7 = vmul.f32 %v2168_v13, %v5232_v60  ;;  %v2099_v50 = vadd.f32 0.112945676, %v2098_v49  ;;  %v1258_v59 = vpack.c.bf16 %v1241_v40, %v1240_v10  ;;  %v2135_v61 = vadd.f32 0.001143296, %v2134_v0 }
 0x2e4   : > { %v2281_v52 = vmul.f32 %v5283_v19, %v5283_v19  ;;  %v2245_v16 = vmul.f32 %v2244_v18, %v5271_v34  ;;  %v2209_v35 = vmul.f32 %v2208_v42, %v5221_v51  ;;  %v2130_v18 = vadd.f32 0.18741608, %v2129_v47 }
 0x2e5   : > { %v2100_v4 = vmul.f32 %v2099_v50, %v5146_v56  ;;  %v2170_v29 = vadd.f32 0.18741608, %v2169_v7  ;;  %v2136_v9 = vmul.f32 %v2135_v61, %v5187_v8  ;;  %v2174_v42 = vmul.f32 3.8918573e-05, %v5232_v60 }
 0x2e6   : > { %v5299_v63 = vmin.f32 %v2281_v52, 16.0  ;;  %v2246_v20 = vadd.f32 0.0036580483, %v2245_v16  ;;  %v2210_v52 = vadd.f32 0.18741608, %v2209_v35  ;;  %v2067_v16 = vmul.f32 %v5294_v45, %v2066_v24 }
 0x2e7   : > { %v1389_v41 = vpop.f32.mrf.mxu3  ;;  %3163 = vmatmul.msk.bf16.gmra.mxu3 %vm460_vm0, %v1258_v59  ;;  %3435 = vrsqrt.f32 %v5324_v32  ;;  %v2137_v57 = vadd.f32 0.014752088, %v2136_v9  ;;  %v2131_v27 = vmul.f32 %v2130_v18, %v5187_v8  ;;  %vm2070_vm13 = vweird.f32 %v5294_v45 }
 0x2e8   : > { %v2283_v55 = vmul.f32 2.1237322e-06, %v5299_v63  ;;  %v5306_v30 = vadd.f32 %v5066_v25, %v1389_v41  ;;  %v2247_v53 = vmul.f32 %v2246_v20, %v5271_v34  ;;  %v2101_v41 = vadd.f32 0.4994258, %v2100_v4  ;;  %vm5375_vm15 = vmor %vm2069_vm14, %vm2070_vm13 }
 0x2e9   : > { %v2211_v49 = vmul.f32 %v2210_v52, %v5221_v51  ;;  %v2138_v35 = vmul.f32 %v2137_v57, %v5187_v8  ;;  %v2068_v20 = vadd.f32 %v5294_v45, %v2067_v16  ;;  %v2075_v10 = vand.u32 2147483648, %v5263_v48 }
 0x2ea   : > { %v5322_v5 = vmul.f32 0.70710677, %v5306_v30  ;;  %v2284_v15 = vadd.f32 0.00028619796, %v2283_v55  ;;  %v2175_v55 = vadd.f32 0.001143296, %v2174_v42  ;;  %v2102_v47 = vmul.f32 %v2101_v41, %v5146_v56 }
 0x2eb   : > { %v2248_v40 = vadd.f32 0.05243302, %v2247_v53  ;;  %v2139_v59 = vadd.f32 0.112945676, %v2138_v35  ;;  %v2092_v61 = vadd.f32 1.1283791, %v2091_v58 }
 0x2ec   : > { %v2321_v39 = vmul.f32 %v5322_v5, %v5322_v5  ;;  %v2285_v26 = vmul.f32 %v2284_v15, %v5299_v63  ;;  %v2176_v15 = vmul.f32 %v2175_v55, %v5232_v60  ;;  %v5361_v50 = vadd.f32 1.0, %v2102_v47 }
 0x2ed   : > { %v2073_v18 = vand.u32 2147483647, %v5263_v48  ;;  %v5367_v52 = vpop.eup %3435  ;;  %v2132_v4 = vadd.f32 1.1283791, %v2131_v27  ;;  %v5370_v53 = vmul.f32 0.5, %v5203_v11  ;;  %v2072_v48 = vsel %vm5375_vm15, %v5294_v45, %v2068_v20 }
 0x2ee   : > { %v5334_v43 = vmin.f32 %v2321_v39, 16.0  ;;  %v2286_v7 = vadd.f32 0.0036580483, %v2285_v26  ;;  %v2171_v39 = vmul.f32 %v2170_v29, %v5232_v60  ;;  %v2249_v29 = vmul.f32 %v2248_v40, %v5271_v34 }
 0x2ef   : > { %v1392_v31 = vpop.f32.mrf.mxu3  ;;  %3437 = vrcp.f32 %v5361_v50  ;;  %v2212_v58 = vadd.f32 1.1283791, %v2211_v49  ;;  %v2177_v42 = vadd.f32 0.014752088, %v2176_v15  ;;  %v2076_v16 = vor.u32 1.1754944e-38, %v2075_v10 }
 0x2f0   : > { %v2323_v54 = vmul.f32 2.1237322e-06, %v5334_v43  ;;  %v5344_v13 = vadd.f32 %v5066_v25, %v1392_v31  ;;  %v2287_v9 = vmul.f32 %v2286_v7, %v5299_v63  ;;  %v2172_v11 = vadd.f32 1.1283791, %v2171_v39 }
 0x2f1   : > { %v2140_v41 = vmul.f32 %v2139_v59, %v5187_v8  ;;  %v5386_v57 = vmul.f32 %v2092_v61, %v5119_v46  ;;  %v5390_v55 = vmul.f32 %v5367_v52, %v5324_v32  ;;  %vm2074_vm1 = vcmp.eq.f32.partialorder %v2073_v18, 8.507059e+37 }
 0x2f2   : > { %v2324_v37 = vadd.f32 0.00028619796, %v2323_v54  ;;  %v5352_v0 = vmul.f32 0.70710677, %v5344_v13  ;;  %v5395_v49 = vmul.f32 %v2132_v4, %v5153_v21  ;;  %v2250_v45 = vadd.f32 0.18741608, %v2249_v29 }
 0x2f3   : > { %v2141_v40 = vadd.f32 0.4994258, %v2140_v41  ;;  %v2288_v47 = vadd.f32 0.05243302, %v2287_v9  ;;  %v2178_v46 = vmul.f32 %v2177_v42, %v5232_v60  ;;  %v2214_v7 = vmul.f32 3.8918573e-05, %v5221_v51 }
 0x2f4   : > { %v2325_v24 = vmul.f32 %v2324_v37, %v5334_v43  ;;  %v2361_v56 = vmul.f32 %v5352_v0, %v5352_v0  ;;  %v2077_v37 = vsel %vm2074_vm1, %v2076_v16, %v2072_v48  ;;  %v5403_v10 = vmul.f32 %v2212_v58, %v5209_v36 }
 0x2f5   : > { %v3438_v20 = vpop.eup %3437  ;;  %v5406_v15 = vmul.f32 %v2172_v11, %v5216_v14  ;;  %v2142_v39 = vmul.f32 %v2141_v40, %v5187_v8  ;;  %v2179_v61 = vadd.f32 0.112945676, %v2178_v46  ;;  %v2215_v36 = vadd.f32 0.001143296, %v2214_v7 }
 0x2f6   : > { %v2326_v26 = vadd.f32 0.0036580483, %v2325_v24  ;;  %v5392_v27 = vmin.f32 %v2361_v56, 16.0  ;;  %v2105_v59 = vmul.f32 %v3438_v20, %v5361_v50  ;;  %v2251_v56 = vmul.f32 %v2250_v45, %v5271_v34 }
 0x2f7   : > { %v1394_v54 = vpop.f32.mrf.mxu3  ;;  %v5414_v18 = vadd.f32 1.0, %v2142_v39  ;;  %v2254_v4 = vmul.f32 3.8918573e-05, %v5271_v34  ;;  %v2289_v14 = vmul.f32 %v2288_v47, %v5299_v63  ;;  %v2180_v31 = vmul.f32 %v2179_v61, %v5232_v60  ;;  %v5436_v39 = vld [vmem:[%s5950_s7] ss:$0 sm:$0xff] }
 0x2f8   : > { %v5398_v35 = vadd.f32 %v5066_v25, %v1394_v54  ;;  %v2327_v21 = vmul.f32 %v2326_v26, %v5334_v43  ;;  %v2363_v24 = vmul.f32 2.1237322e-06, %v5392_v27  ;;  %v2078_v25 = vmul.f32 %v2077_v37, %v5312_v12 }
 0x2f9   : > { %v2106_v8 = vsub.f32 1.0, %v2105_v59  ;;  %v2113_v12 = vand.u32 2147483647, %v5361_v50  ;;  %v2115_v9 = vand.u32 2147483648, %v5361_v50  ;;  %3439 = vrcp.f32 %v5414_v18 }
 0x2fa   : > { %v5419_v29 = vmul.f32 0.70710677, %v5398_v35  ;;  %v2328_v58 = vadd.f32 0.05243302, %v2327_v21  ;;  %v2364_v48 = vadd.f32 0.00028619796, %v2363_v24  ;;  %vm2110_vm2 = vweird.f32 %v3438_v20 }
 0x2fb   : > { %v3179_v42 = vclamps-f32 %v2078_v25, 1.0  ;;  %v2107_v11 = vmul.f32 %v3438_v20, %v2106_v8  ;;  %v5425_v26 = vadd.f32 1.1283791, %v2251_v56  ;;  %v2181_v54 = vadd.f32 0.4994258, %v2180_v31 }
 0x2fc   : > { %v2216_v16 = vmul.f32 %v2215_v36, %v5221_v51  ;;  %v2255_v41 = vadd.f32 0.001143296, %v2254_v4  ;;  %v2290_v45 = vadd.f32 0.18741608, %v2289_v14  ;;  %v2401_v37 = vmul.f32 %v5419_v29, %v5419_v29 }
 0x2fd   : > { %v2108_v40 = vadd.f32 %v3438_v20, %v2107_v11  ;;  %vm2109_vm3 = vweird.f32 %v5361_v50  ;;  %v2329_v47 = vmul.f32 %v2328_v58, %v5334_v43  ;;  %vm2114_vm5 = vcmp.eq.f32.partialorder %v2113_v12, 8.507059e+37 }
 0x2fe   : > { %vm2111_vm4 = vmor %vm2109_vm3, %vm2110_vm2  ;;  %v2116_v7 = vor.u32 1.1754944e-38, %v2115_v9  ;;  %v2182_v21 = vmul.f32 %v2181_v54, %v5232_v60  ;;  %v2365_v25 = vmul.f32 %v2364_v48, %v5392_v27  ;;  %v2775_v50 = vadd.f32 1.0, %v3179_v42  ;;  %v6083_v60 = vld [vmem:[#allocation8_spill] sm:$0xff] }
 0x2ff   : > { %v2112_v59 = vsel %vm2111_vm4, %v3438_v20, %v2108_v40  ;;  %v3440_v61 = vpop.eup %3439  ;;  %v2217_v4 = vadd.f32 0.014752088, %v2216_v16  ;;  %v2256_v14 = vmul.f32 %v2255_v41, %v5271_v34  ;;  %v5444_v31 = vmin.f32 %v2401_v37, 16.0 }
 0x300   : > { %v2117_v56 = vsel %vm2114_vm5, %v2116_v7, %v2112_v59  ;;  %v5440_v36 = vadd.f32 1.0, %v2182_v21  ;;  %v2145_v12 = vmul.f32 %v3440_v61, %v5414_v18  ;;  %v5449_v9 = vmul.f32 %v2290_v45, %v5299_v63 }
 0x301   : > { %v2118_v58 = vmul.f32 %v2117_v56, %v5386_v57  ;;  %v5451_v20 = vadd.f32 0.18741608, %v2329_v47  ;;  %v2153_v48 = vand.u32 2147483647, %v5414_v18  ;;  %v2807_v11 = vmul.f32 %v2775_v50, %v5290_v1 }
 0x302   : > { %3441 = vrcp.f32 %v5440_v36  ;;  %v2146_v54 = vsub.f32 1.0, %v2145_v12  ;;  %v2294_v16 = vmul.f32 3.8918573e-05, %v5299_v63  ;;  %v2366_v57 = vadd.f32 0.0036580483, %v2365_v25 }
 0x303   : > { %v3180_v42 = vclamps-f32 %v2118_v58, 1.0  ;;  %v2155_v41 = vand.u32 2147483648, %v5414_v18  ;;  %v2218_v45 = vmul.f32 %v2217_v4, %v5221_v51  ;;  %v2257_v37 = vadd.f32 0.014752088, %v2256_v14  ;;  %v6086_v58 = vld [vmem:[#allocation9_spill] sm:$0xff] }
 0x304   : > { %v2403_v40 = vmul.f32 2.1237322e-06, %v5444_v31  ;;  %vm2150_vm6 = vweird.f32 %v3440_v61  ;;  %vm2149_vm7 = vweird.f32 %v5414_v18  ;;  %vm5463_vm8 = vcmp.eq.f32.partialorder %v2153_v48, 8.507059e+37 }
 0x305   : > { %v2933_v46 = vpop.f32.mrf.mxu1  ;;  %v2776_v47 = vadd.f32 1.0, %v3180_v42  ;;  %v2219_v1 = vadd.f32 0.112945676, %v2218_v45  ;;  %v2295_v56 = vadd.f32 0.001143296, %v2294_v16  ;;  %vm2151_vm9 = vmor %vm2149_vm7, %vm2150_vm6  ;;  %v2156_v14 = vor.u32 1.1754944e-38, %v2155_v41 }
 0x306   : > { %v2934_v24 = vadd.f32 %v5436_v39, %v2933_v46  ;;  %v2147_v46 = vmul.f32 %v3440_v61, %v2146_v54  ;;  %v2367_v45 = vmul.f32 %v2366_v57, %v5392_v27  ;;  %vm2189_vm11 = vweird.f32 %v5440_v36 }
 0x307   : > { %v2808_v59 = vmul.f32 %v2776_v47, %v5297_v22  ;;  %v2404_v22 = vadd.f32 0.00028619796, %v2403_v40  ;;  %v2193_v47 = vand.u32 2147483647, %v5440_v36  ;;  %v2374_v40 = vmul.f32 3.8918573e-05, %v5392_v27 }
 0x308   : > { %v3004_v8 = vadd.f32 %v2934_v24, %v6083_v60  ;;  %v2258_v24 = vmul.f32 %v2257_v37, %v5271_v34  ;;  %v2148_v50 = vadd.f32 %v3440_v61, %v2147_v46  ;;  %v3442_v4 = vpop.eup %3441  ;;  %v2220_v60 = vmul.f32 %v2219_v1, %v5221_v51 }
 0x309   : > { %v2832_v48 = vpack.c.bf16 %v2808_v59, %v2807_v11  ;;  %v2185_v54 = vmul.f32 %v3442_v4, %v5440_v36  ;;  %v2296_v11 = vmul.f32 %v2295_v56, %v5299_v63  ;;  %vm2190_vm10 = vweird.f32 %v3442_v4 }
 0x30a   : > { %3036 = vst.msk [vmem:[%s4908_s16 + $0x30] sm:$0xff] %vm460_vm0, %v3004_v8  ;;  %v2259_v18 = vadd.f32 0.112945676, %v2258_v24  ;;  %v2334_v8 = vmul.f32 3.8918573e-05, %v5334_v43  ;;  %v2152_v42 = vsel %vm2151_vm9, %v3440_v61, %v2148_v50  ;;  %v2195_v61 = vand.u32 2147483648, %v5440_v36  ;;  %vm2191_vm13 = vmor %vm2189_vm11, %vm2190_vm10 }
 0x30b   : > { %v2157_v16 = vsel %vm5463_vm8, %v2156_v14, %v2152_v42  ;;  %v2221_v37 = vadd.f32 0.4994258, %v2220_v60  ;;  %2952 = vmatmul.bf16.gmra.mxu1 %v2832_v48  ;;  %v2186_v41 = vsub.f32 1.0, %v2185_v54  ;;  %v2297_v56 = vadd.f32 0.014752088, %v2296_v11 }
 0x30c   : > { %v2260_v46 = vmul.f32 %v2259_v18, %v5271_v34  ;;  %v2335_v57 = vadd.f32 0.001143296, %v2334_v8  ;;  %v2158_v21 = vmul.f32 %v2157_v16, %v5395_v49  ;;  %vm2194_vm12 = vcmp.eq.f32.partialorder %v2193_v47, 8.507059e+37 }
 0x30d   : > { %v2935_v7 = vpop.f32.mrf.mxu1  ;;  %v2187_v1 = vmul.f32 %v3442_v4, %v2186_v41  ;;  %v2196_v49 = vor.u32 1.1754944e-38, %v2195_v61  ;;  %v2375_v8 = vadd.f32 0.001143296, %v2374_v40  ;;  %v5499_v54 = vmul.f32 %v5425_v26, %v5249_v2 }
 0x30e   : > { %v2936_v25 = vadd.f32 %v5436_v39, %v2935_v7  ;;  %v2222_v7 = vmul.f32 %v2221_v37, %v5221_v51  ;;  %v2261_v24 = vadd.f32 0.4994258, %v2260_v46  ;;  %v2336_v18 = vmul.f32 %v2335_v57, %v5334_v43 }
 0x30f   : > { %v2188_v60 = vadd.f32 %v3442_v4, %v2187_v1  ;;  %v3181_v36 = vclamps-f32 %v2158_v21, 1.0  ;;  %v2298_v16 = vmul.f32 %v2297_v56, %v5299_v63  ;;  %v5507_v37 = vmul.f32 %v5451_v20, %v5334_v43 }
 0x310   : > { %v3005_v12 = vadd.f32 %v2936_v25, %v6086_v58  ;;  %v2405_v25 = vmul.f32 %v2404_v22, %v5444_v31  ;;  %v5488_v50 = vadd.f32 1.0, %v2222_v7  ;;  %v2262_v51 = vmul.f32 %v2261_v24, %v5271_v34  ;;  %v6087_v58 = vld [vmem:[#allocation10_spill] sm:$0xff] }
 0x311   : > { %v2192_v48 = vsel %vm2191_vm13, %v3442_v4, %v2188_v60  ;;  %v5502_v34 = vadd.f32 1.1283791, %v5449_v9  ;;  %v5509_v41 = vadd.f32 0.05243302, %v2367_v45  ;;  %v2299_v26 = vadd.f32 0.112945676, %v2298_v16 }
 0x312   : > { %3037 = vst.msk [vmem:[%s4908_s16 + $0x38] sm:$0xff] %vm460_vm0, %v3005_v12  ;;  %3443 = vrcp.f32 %v5488_v50  ;;  %v5495_v42 = vadd.f32 1.0, %v2262_v51  ;;  %v2197_v22 = vsel %vm2194_vm12, %v2196_v49, %v2192_v48  ;;  %v5515_v2 = vadd.f32 0.0036580483, %v2405_v25  ;;  %v6088_v49 = vld [vmem:[#allocation12_spill] sm:$0xff] }
 0x313   : > { %v2198_v4 = vmul.f32 %v2197_v22, %v5406_v15  ;;  %v2337_v9 = vadd.f32 0.014752088, %v2336_v18  ;;  %v2376_v47 = vmul.f32 %v2375_v8, %v5392_v27  ;;  %v2777_v11 = vadd.f32 1.0, %v3181_v36 }
 0x314   : > { %3445 = vrcp.f32 %v5495_v42  ;;  %vm2229_vm14 = vweird.f32 %v5488_v50  ;;  %v2414_v20 = vmul.f32 3.8918573e-05, %v5444_v31  ;;  %v2233_v7 = vand.u32 2147483647, %v5488_v50 }
 0x315   : > { %v2938_v59 = vpop.f32.mrf.mxu1  ;;  %v3182_v46 = vclamps-f32 %v2198_v4, 1.0  ;;  %v2300_v15 = vmul.f32 %v2299_v26, %v5299_v63  ;;  %v2338_v57 = vmul.f32 %v2337_v9, %v5334_v43  ;;  %v2377_v40 = vadd.f32 0.014752088, %v2376_v47 }
 0x316   : > { %v2939_v14 = vadd.f32 %v5436_v39, %v2938_v59  ;;  %v2235_v25 = vand.u32 2147483648, %v5488_v50  ;;  %v2415_v60 = vadd.f32 0.001143296, %v2414_v20  ;;  %v2809_v8 = vmul.f32 %v2777_v11, %v5317_v28 }
 0x317   : > { %v2778_v1 = vadd.f32 1.0, %v3182_v46  ;;  %v2301_v59 = vadd.f32 0.4994258, %v2300_v15  ;;  %v2339_v56 = vadd.f32 0.112945676, %v2338_v57  ;;  %vm2234_vm3 = vcmp.eq.f32.partialorder %v2233_v7, 8.507059e+37 }
 0x318   : > { %v3006_v12 = vadd.f32 %v2939_v14, %v6087_v58  ;;  %v3444_v45 = vpop.eup %3443  ;;  %v2378_v14 = vmul.f32 %v2377_v40, %v5392_v27  ;;  %v2416_v9 = vmul.f32 %v2415_v60, %v5444_v31  ;;  %v2236_v47 = vor.u32 1.1754944e-38, %v2235_v25 }
 0x319   : > { %v2225_v24 = vmul.f32 %v3444_v45, %v5488_v50  ;;  %v2810_v58 = vmul.f32 %v2778_v1, %v5370_v53  ;;  %vm2230_vm15 = vweird.f32 %v3444_v45  ;;  %v2302_v48 = vmul.f32 %v2301_v59, %v5299_v63 }
 0x31a   : > { %3038 = vst.msk [vmem:[%s4908_s16 + $0x40] sm:$0xff] %vm460_vm0, %v3006_v12  ;;  %v3446_v51 = vpop.eup %3445  ;;  %v2340_v22 = vmul.f32 %v2339_v56, %v5334_v43  ;;  %v2379_v26 = vadd.f32 0.112945676, %v2378_v14  ;;  %v2273_v20 = vand.u32 2147483647, %v5495_v42  ;;  %v2275_v63 = vand.u32 2147483648, %v5495_v42  ;;  %vm2231_vm1 = vmor %vm2229_vm14, %vm2230_vm15 }
 0x31b   : > { %v2226_v12 = vsub.f32 1.0, %v2225_v24  ;;  %v2265_v36 = vmul.f32 %v3446_v51, %v5495_v42  ;;  %v2833_v16 = vpack.c.bf16 %v2810_v58, %v2809_v8  ;;  %v5536_v28 = vadd.f32 1.0, %v2302_v48  ;;  %v6089_v14 = vld [vmem:[#allocation14_spill] sm:$0xff] }
 0x31c   : > { %v2341_v53 = vadd.f32 0.4994258, %v2340_v22  ;;  %vm2270_vm2 = vweird.f32 %v3446_v51  ;;  %v2417_v40 = vadd.f32 0.014752088, %v2416_v9  ;;  %vm2269_vm4 = vweird.f32 %v5495_v42 }
 0x31d   : > { %v2940_v61 = vpop.f32.mrf.mxu1  ;;  %v2227_v4 = vmul.f32 %v3444_v45, %v2226_v12  ;;  %v2266_v46 = vsub.f32 1.0, %v2265_v36  ;;  %2957 = vmatmul.bf16.vlgmr.msra.gmra.mxu2 %v2833_v16  ;;  %3447 = vrcp.f32 %v5536_v28  ;;  %vm2271_vm5 = vmor %vm2269_vm4, %vm2270_vm2  ;;  %vm2274_vm6 = vcmp.eq.f32.partialorder %v2273_v20, 8.507059e+37 }
 0x31e   : > { %v2941_v21 = vadd.f32 %v5436_v39, %v2940_v61  ;;  %v2380_v61 = vmul.f32 %v2379_v26, %v5392_v27  ;;  %v2342_v24 = vmul.f32 %v2341_v53, %v5334_v43  ;;  %v2418_v7 = vmul.f32 %v2417_v40, %v5444_v31 }
 0x31f   : > { %v2228_v11 = vadd.f32 %v3444_v45, %v2227_v4  ;;  %v2267_v57 = vmul.f32 %v3446_v51, %v2266_v46  ;;  %v2369_v43 = vmul.f32 %v5509_v41, %v5392_v27  ;;  %v1436_v12 = vmul.f32 0.5, %v5229_v44 }
 0x320   : > { %v3007_v18 = vadd.f32 %v2941_v21, %v6088_v49  ;;  %v2381_v56 = vadd.f32 0.4994258, %v2380_v61  ;;  %v2276_v49 = vor.u32 1.1754944e-38, %v2275_v63  ;;  %v1122_v22 = vmul.f32 %v5367_v52, %v5390_v55  ;;  %v6090_v63 = vld [vmem:[#allocation11_spill] sm:$0xff] }
 0x321   : > { %v2232_v1 = vsel %vm2231_vm1, %v3444_v45, %v2228_v11  ;;  %v2268_v59 = vadd.f32 %v3446_v51, %v2267_v57  ;;  %v2293_v41 = vmul.f32 %v5502_v34, %v5283_v19  ;;  %v2419_v4 = vadd.f32 0.112945676, %v2418_v7 }
 0x322   : > { %3039 = vst.msk [vmem:[%s4908_s16 + $0x48] sm:$0xff] %vm460_vm0, %v3007_v18  ;;  %v2237_v25 = vsel %vm2234_vm3, %v2236_v47, %v2232_v1  ;;  %v5550_v18 = vadd.f32 1.0, %v2342_v24  ;;  %v2382_v45 = vmul.f32 %v2381_v56, %v5392_v27  ;;  %v2332_v26 = vadd.f32 1.1283791, %v5507_v37 }
 0x323   : > { %v2238_v60 = vmul.f32 %v2237_v25, %v5403_v10  ;;  %v2272_v8 = vsel %vm2271_vm5, %v3446_v51, %v2268_v59  ;;  %v3448_v10 = vpop.eup %3447  ;;  %v2407_v51 = vmul.f32 %v5515_v2, %v5444_v31  ;;  %v2370_v2 = vadd.f32 0.18741608, %v2369_v43 }
 0x324   : > { %v2277_v58 = vsel %vm2274_vm6, %v2276_v49, %v2272_v8  ;;  %3449 = vrcp.f32 %v5550_v18  ;;  %v5563_v48 = vadd.f32 1.0, %v2382_v45  ;;  %v2305_v16 = vmul.f32 %v3448_v10, %v5536_v28 }
 0x325   : > { %v2943_v15 = vpop.f32.mrf.mxu1  ;;  %v3183_v42 = vclamps-f32 %v2238_v60, 1.0  ;;  %v2278_v36 = vmul.f32 %v2277_v58, %v5499_v54  ;;  %v2313_v55 = vand.u32 2147483647, %v5536_v28  ;;  %v2408_v53 = vadd.f32 0.05243302, %v2407_v51 }
 0x326   : > { %v2944_v21 = vadd.f32 %v5436_v39, %v2943_v15  ;;  %3451 = vrcp.f32 %v5563_v48  ;;  %v2306_v46 = vsub.f32 1.0, %v2305_v16  ;;  %v2315_v19 = vand.u32 2147483648, %v5536_v28 }
 0x327   : > { %v3184_v44 = vclamps-f32 %v2278_v36, 1.0  ;;  %v2779_v47 = vadd.f32 1.0, %v3183_v42  ;;  %v2420_v20 = vmul.f32 %v2419_v4, %v5444_v31  ;;  %vm2310_vm7 = vweird.f32 %v3448_v10 }
 0x328   : > { %v3008_v50 = vadd.f32 %v2944_v21, %v6089_v14  ;;  %v2307_v15 = vmul.f32 %v3448_v10, %v2306_v46  ;;  %vm2309_vm8 = vweird.f32 %v5536_v28  ;;  %vm2314_vm9 = vcmp.eq.f32.partialorder %v2313_v55, 8.507059e+37 }
 0x329   : > { %v2780_v11 = vadd.f32 1.0, %v3184_v44  ;;  %v2811_v40 = vmul.f32 %v2779_v47, %v5332_v23  ;;  %v2421_v59 = vadd.f32 0.4994258, %v2420_v20  ;;  %vm2311_vm10 = vmor %vm2309_vm8, %vm2310_vm7  ;;  %v2353_v23 = vand.u32 2147483647, %v5550_v18 }
 0x32a   : > { %3040 = vst.msk [vmem:[%s4908_s16 + $0x50] sm:$0xff] %vm460_vm0, %v3008_v50  ;;  %v3450_v37 = vpop.eup %3449  ;;  %v2308_v24 = vadd.f32 %v3448_v10, %v2307_v15  ;;  %v2316_v50 = vor.u32 1.1754944e-38, %v2315_v19  ;;  %v2355_v28 = vand.u32 2147483648, %v5550_v18  ;;  %v2409_v42 = vmul.f32 %v2408_v53, %v5444_v31 }
 0x32b   : > { %v2812_v21 = vmul.f32 %v2780_v11, %v1436_v12  ;;  %v2345_v1 = vmul.f32 %v3450_v37, %v5550_v18  ;;  %vm2350_vm11 = vweird.f32 %v3450_v37  ;;  %v2422_v43 = vmul.f32 %v2421_v59, %v5444_v31 }
 0x32c   : > { %v5585_v56 = vpop.eup %3451  ;;  %v2312_v60 = vsel %vm2311_vm10, %v3448_v10, %v2308_v24  ;;  %v1123_v51 = vmul.f32 0.5, %v1122_v22  ;;  %vm2349_vm12 = vweird.f32 %v5550_v18  ;;  %v2333_v4 = vmul.f32 %v2332_v26, %v5322_v5 }
 0x32d   : > { %v2945_v9 = vpop.f32.mrf.mxu1  ;;  %v755_v34 = vpop.xlane.xlu0 %754  ;;  %v2834_v14 = vpack.c.bf16 %v2812_v21, %v2811_v40  ;;  %v2385_v49 = vmul.f32 %v5585_v56, %v5563_v48  ;;  %v2317_v45 = vsel %vm2314_vm9, %v2316_v50, %v2312_v60  ;;  %v5596_v16 = vadd.f32 1.0, %v2422_v43  ;;  %vm2351_vm13 = vmor %vm2349_vm12, %vm2350_vm11 }
 0x32e   : > { %v2946_v54 = vadd.f32 %v5436_v39, %v2945_v9  ;;  %v787_v57 = vmul.f32 %v755_v34, %v3601_v38  ;;  %v2346_v38 = vsub.f32 1.0, %v2345_v1  ;;  %v2318_v12 = vmul.f32 %v2317_v45, %v2293_v41  ;;  %v6091_v9 = vld [vmem:[#allocation13_spill] sm:$0xff] }
 0x32f   : > { %2962 = vmatmul.bf16.gmra.mxu2 %v2834_v14  ;;  %v2386_v10 = vsub.f32 1.0, %v2385_v49  ;;  %v2356_v47 = vor.u32 1.1754944e-38, %v2355_v28  ;;  %vm2354_vm14 = vcmp.eq.f32.partialorder %v2353_v23, 8.507059e+37  ;;  %v2371_v41 = vmul.f32 %v2370_v2, %v5392_v27 }
 0x330   : > { %v3009_v61 = vadd.f32 %v2946_v54, %v6090_v63  ;;  %v5583_v25 = vadd.f32 1e-05, %v787_v57  ;;  %v2347_v7 = vmul.f32 %v3450_v37, %v2346_v38  ;;  %v3185_v46 = vclamps-f32 %v2318_v12, 1.0 }
 0x331   : > { %v2387_v54 = vmul.f32 %v5585_v56, %v2386_v10  ;;  %v2410_v18 = vadd.f32 0.18741608, %v2409_v42  ;;  %vm2390_vm15 = vweird.f32 %v5585_v56  ;;  %v1124_v19 = vsub.f32 1.5, %v1123_v51 }
 0x332   : > { %3041 = vst.msk [vmem:[%s4908_s16 + $0x58] sm:$0xff] %vm460_vm0, %v3009_v61  ;;  %3453 = vrsqrt.f32 %v5583_v25  ;;  %v2348_v36 = vadd.f32 %v3450_v37, %v2347_v7  ;;  %vm1126_vm1 = vweird.f32 %v5324_v32  ;;  %vm2389_vm2 = vweird.f32 %v5563_v48 }
 0x333   : > { %3455 = vrcp.f32 %v5596_v16  ;;  %v2388_v11 = vadd.f32 %v5585_v56, %v2387_v54  ;;  %v2395_v34 = vand.u32 2147483648, %v5563_v48  ;;  %v2781_v20 = vadd.f32 1.0, %v3185_v46  ;;  %vm5619_vm3 = vmor %vm2389_vm2, %vm2390_vm15 }
 0x334   : > { %v2352_v55 = vsel %vm2351_vm13, %v3450_v37, %v2348_v36  ;;  %v2393_v63 = vand.u32 2147483647, %v5563_v48  ;;  %v1437_v61 = vmul.f32 0.5, %v5274_v17  ;;  %v1438_v15 = vmul.f32 0.5, %v5306_v30  ;;  %v6094_v17 = vld [vmem:[#allocation15_spill] sm:$0xff] }
 0x335   : > { %v2948_v8 = vpop.f32.mrf.mxu1  ;;  %v2357_v53 = vsel %vm2354_vm14, %v2356_v47, %v2352_v55  ;;  %v2372_v57 = vadd.f32 1.1283791, %v2371_v41  ;;  %v2411_v24 = vmul.f32 %v2410_v18, %v5444_v31  ;;  %v2392_v48 = vsel %vm5619_vm3, %v5585_v56, %v2388_v11  ;;  %v3481_v11 = vld [vmem:[%s5946_s3] ss:$0 sm:$0xff] }
 0x336   : > { %v2949_v58 = vadd.f32 %v5436_v39, %v2948_v8  ;;  %v2358_v5 = vmul.f32 %v2357_v53, %v2333_v4  ;;  %vm1127_vm4 = vweird.f32 %v5367_v52  ;;  %v2396_v50 = vor.u32 1.1754944e-38, %v2395_v34 }
 0x337   : > { %v2813_v23 = vmul.f32 %v2781_v20, %v1437_v61  ;;  %vm2394_vm5 = vcmp.eq.f32.partialorder %v2393_v63, 8.507059e+37  ;;  %v1125_v49 = vmul.f32 %v5367_v52, %v1124_v19  ;;  %v2373_v31 = vmul.f32 %v2372_v57, %v5352_v0  ;;  %vm5636_vm6 = vmor %vm1126_vm1, %vm1127_vm4 }
 0x338   : > { %v3010_v44 = vadd.f32 %v2949_v58, %v6091_v9  ;;  %v5602_v22 = vpop.eup %3453  ;;  %v3186_v2 = vclamps-f32 %v2358_v5, 1.0  ;;  %v2397_v8 = vsel %vm2394_vm5, %v2396_v50, %v2392_v48  ;;  %v2412_v7 = vadd.f32 1.1283791, %v2411_v24 }
 0x339   : > { %v1131_v26 = vmul.f32 %v5602_v22, %v5583_v25  ;;  %v3456_v1 = vpop.eup %3455  ;;  %vm1137_vm7 = vweird.f32 %v5602_v22  ;;  %v2435_v42 = vand.u32 2147483648, %v5596_v16  ;;  %v2433_v0 = vand.u32 2147483647, %v5596_v16 }
 0x33a   : > { %3042 = vst.msk [vmem:[%s4908_s16 + $0x60] sm:$0xff] %vm460_vm0, %v3010_v44  ;;  %v2782_v59 = vadd.f32 1.0, %v3186_v2  ;;  %v2425_v38 = vmul.f32 %v3456_v1, %v5596_v16  ;;  %vm2430_vm8 = vweird.f32 %v3456_v1  ;;  %vm1136_vm9 = vweird.f32 %v5583_v25 }
 0x33b   : > { %v1132_v37 = vmul.f32 %v5602_v22, %v1131_v26  ;;  %v2398_v32 = vmul.f32 %v2397_v8, %v2373_v31  ;;  %v1129_v10 = vsel %vm5636_vm6, %v5367_v52, %v1125_v49  ;;  %vm1138_vm10 = vmor %vm1136_vm9, %vm1137_vm7  ;;  %vm2429_vm11 = vweird.f32 %v5596_v16  ;;  %v3480_v16 = vld [vmem:[%s5945_s2] ss:$0 sm:$0xff] }
 0x33c   : > { %v2814_v60 = vmul.f32 %v2782_v59, %v1438_v15  ;;  %v2426_v45 = vsub.f32 1.0, %v2425_v38  ;;  %vm2431_vm12 = vmor %vm2429_vm11, %vm2430_vm8  ;;  %v2436_v36 = vor.u32 1.1754944e-38, %v2435_v42  ;;  %v2413_v4 = vmul.f32 %v2412_v7, %v5419_v29 }
 0x33d   : > { %v2950_v27 = vpop.f32.mrf.mxu1  ;;  %v1133_v14 = vmul.f32 0.5, %v1132_v37  ;;  %vm2434_vm13 = vcmp.eq.f32.partialorder %v2433_v0, 8.507059e+37  ;;  %v1170_v47 = vmul.f32 %v1129_v10, %v4713_v6  ;;  %v3187_v25 = vclamps-f32 %v2398_v32, 1.0 }
 0x33e   : > { %v2951_v40 = vadd.f32 %v5436_v39, %v2950_v27  ;;  %v2835_v43 = vpack.c.bf16 %v2814_v60, %v2813_v23  ;;  %v2427_v12 = vmul.f32 %v3456_v1, %v2426_v45  ;;  %v1440_v29 = vmul.f32 0.5, %v5398_v35  ;;  %v5665_v35 = vld [vmem:[%s5948_s5] ss:$0 sm:$0xff] }
 0x33f   : > { %v1134_v28 = vsub.f32 1.5, %v1133_v14  ;;  %v2783_v41 = vadd.f32 1.0, %v3187_v25  ;;  %v1206_v18 = vmul.f32 %v3480_v16, %v1170_v47 }
 0x340   : > { %v3011_v30 = vadd.f32 %v2951_v40, %v6094_v17  ;;  %2967 = vmatmul.bf16.gmra.mxu2 %v2835_v43  ;;  %v2428_v51 = vadd.f32 %v3456_v1, %v2427_v12 }
 0x341   : > { %v1135_v58 = vmul.f32 %v5602_v22, %v1134_v28 }
 0x342   : > { %3043 = vst.msk [vmem:[%s4908_s16 + $0x68] sm:$0xff] %vm460_vm0, %v3011_v30  ;;  %v2432_v44 = vsel %vm2431_vm12, %v3456_v1, %v2428_v51 }
 0x343   : > { %v1139_v9 = vsel %vm1138_vm10, %v5602_v22, %v1135_v58  ;;  %v2437_v54 = vsel %vm2434_vm13, %v2436_v36, %v2432_v44  ;;  %v1439_v22 = vmul.f32 0.5, %v5344_v13 }
 0x344   : > { %v2438_v46 = vmul.f32 %v2437_v54, %v2413_v4  ;;  %v1171_v55 = vmul.f32 %v1139_v9, %v5084_v62  ;;  %v1242_v62 = vadd.f32 %v3481_v11, %v1206_v18 }
 0x345   : > { %v2815_v6 = vmul.f32 %v2783_v41, %v1439_v22 }
 0x346   : > { %v3188_v52 = vclamps-f32 %v2438_v46, 1.0  ;;  %v1207_v5 = vmul.f32 %v3480_v16, %v1171_v55 }
 0x348   : > { %v2784_v53 = vadd.f32 1.0, %v3188_v52  ;;  %v1243_v19 = vadd.f32 %v3481_v11, %v1207_v5 }
 0x34a   : > { %v2816_v26 = vmul.f32 %v2784_v53, %v1440_v29  ;;  %v1397_v34 = vpop.f32.mrf.mxu3  ;;  %v1259_v2 = vpack.c.bf16 %v1243_v19, %v1242_v62 }
 0x34b   : > { %v5668_v13 = vadd.f32 %v5665_v35, %v1397_v34 }
 0x34c   : > { %v2836_v27 = vpack.c.bf16 %v2816_v26, %v2815_v6  ;;  %3164 = vmatmul.msk.bf16.gmra.mxu3 %vm460_vm0, %v1259_v2 }
 0x34d   : > { %v5674_v63 = vmul.f32 0.70710677, %v5668_v13 }
 0x34f   : > { %v2441_v15 = vmul.f32 %v5674_v63, %v5674_v63 }
 0x350   : > { %2972 = vmatmul.bf16.gmra.mxu2 %v2836_v27 }
 0x351   : > { %v5683_v21 = vmin.f32 %v2441_v15, 16.0 }
 0x352   : > { %v1399_v20 = vpop.f32.mrf.mxu3 }
 0x353   : > { %v5671_v37 = vadd.f32 %v5665_v35, %v1399_v20  ;;  %v2443_v59 = vmul.f32 2.1237322e-06, %v5683_v21  ;;  %v2454_v28 = vmul.f32 3.8918573e-05, %v5683_v21 }
 0x355   : > { %v5677_v61 = vmul.f32 0.70710677, %v5671_v37  ;;  %v2444_v50 = vadd.f32 0.00028619796, %v2443_v59  ;;  %v2455_v56 = vadd.f32 0.001143296, %v2454_v28 }
 0x357   : > { %v2481_v57 = vmul.f32 %v5677_v61, %v5677_v61  ;;  %v2445_v49 = vmul.f32 %v2444_v50, %v5683_v21  ;;  %v2456_v7 = vmul.f32 %v2455_v56, %v5683_v21 }
 0x359   : > { %v5685_v1 = vmin.f32 %v2481_v57, 16.0  ;;  %v2446_v43 = vadd.f32 0.0036580483, %v2445_v49  ;;  %v2457_v32 = vadd.f32 0.014752088, %v2456_v7 }
 0x35a   : > { %v1402_v40 = vpop.f32.mrf.mxu3 }
 0x35b   : > { %v5688_v24 = vadd.f32 %v5665_v35, %v1402_v40  ;;  %v2483_v14 = vmul.f32 2.1237322e-06, %v5685_v1  ;;  %v2458_v10 = vmul.f32 %v2457_v32, %v5683_v21  ;;  %v2494_v51 = vmul.f32 3.8918573e-05, %v5685_v1 }
 0x35c   : > { %v2447_v36 = vmul.f32 %v2446_v43, %v5683_v21 }
 0x35d   : > { %v5693_v48 = vmul.f32 0.70710677, %v5688_v24  ;;  %v2484_v38 = vadd.f32 0.00028619796, %v2483_v14  ;;  %v2459_v25 = vadd.f32 0.112945676, %v2458_v10 }
 0x35e   : > { %v2495_v54 = vadd.f32 0.001143296, %v2494_v51  ;;  %v2448_v55 = vadd.f32 0.05243302, %v2447_v36 }
 0x35f   : > { %v2521_v23 = vmul.f32 %v5693_v48, %v5693_v48  ;;  %v2485_v31 = vmul.f32 %v2484_v38, %v5685_v1  ;;  %v2460_v46 = vmul.f32 %v2459_v25, %v5683_v21 }
 0x360   : > { %v2496_v16 = vmul.f32 %v2495_v54, %v5685_v1  ;;  %v2449_v11 = vmul.f32 %v2448_v55, %v5683_v21 }
 0x361   : > { %v5706_v8 = vmin.f32 %v2521_v23, 16.0  ;;  %v2486_v42 = vadd.f32 0.0036580483, %v2485_v31  ;;  %v2461_v53 = vadd.f32 0.4994258, %v2460_v46 }
 0x362   : > { %v1404_v17 = vpop.f32.mrf.mxu3  ;;  %v2497_v22 = vadd.f32 0.014752088, %v2496_v16  ;;  %v2450_v59 = vadd.f32 0.18741608, %v2449_v11 }
 0x363   : > { %v5696_v30 = vadd.f32 %v5665_v35, %v1404_v17  ;;  %v2523_v58 = vmul.f32 2.1237322e-06, %v5706_v8  ;;  %v2487_v4 = vmul.f32 %v2486_v42, %v5685_v1  ;;  %v2462_v26 = vmul.f32 %v2461_v53, %v5683_v21 }
 0x364   : > { %v2534_v6 = vmul.f32 3.8918573e-05, %v5706_v8  ;;  %v2498_v34 = vmul.f32 %v2497_v22, %v5685_v1  ;;  %v2451_v7 = vmul.f32 %v2450_v59, %v5683_v21  ;;  %v1442_v59 = vmul.f32 0.5, %v5671_v37 }
 0x365   : > { %v5701_v60 = vmul.f32 0.70710677, %v5696_v30  ;;  %v2524_v9 = vadd.f32 0.00028619796, %v2523_v58  ;;  %v2488_v52 = vadd.f32 0.05243302, %v2487_v4 }
 0x366   : > { %v5736_v20 = vadd.f32 1.0, %v2462_v26  ;;  %v2535_v15 = vadd.f32 0.001143296, %v2534_v6  ;;  %v2499_v40 = vadd.f32 0.112945676, %v2498_v34 }
 0x367   : > { %v2561_v45 = vmul.f32 %v5701_v60, %v5701_v60  ;;  %v2525_v41 = vmul.f32 %v2524_v9, %v5706_v8  ;;  %v2489_v62 = vmul.f32 %v2488_v52, %v5685_v1  ;;  %v2452_v54 = vadd.f32 1.1283791, %v2451_v7 }
 0x368   : > { %3457 = vrcp.f32 %v5736_v20  ;;  %v2500_v50 = vmul.f32 %v2499_v40, %v5685_v1  ;;  %v2536_v28 = vmul.f32 %v2535_v15, %v5706_v8  ;;  %vm2469_vm15 = vweird.f32 %v5736_v20  ;;  %v6097_v15 = vld [vmem:[#allocation16_spill] sm:$0xff] }
 0x369   : > { %v5712_v12 = vmin.f32 %v2561_v45, 16.0  ;;  %v2526_v19 = vadd.f32 0.0036580483, %v2525_v41  ;;  %v2490_v14 = vadd.f32 0.18741608, %v2489_v62  ;;  %v2475_v26 = vand.u32 2147483648, %v5736_v20 }
 0x36a   : > { %v1407_v0 = vpop.f32.mrf.mxu3  ;;  %v2501_v31 = vadd.f32 0.4994258, %v2500_v50  ;;  %v2537_v45 = vadd.f32 0.014752088, %v2536_v28  ;;  %v2473_v62 = vand.u32 2147483647, %v5736_v20 }
 0x36b   : > { %v2563_v44 = vmul.f32 2.1237322e-06, %v5712_v12  ;;  %v5720_v47 = vadd.f32 %v5665_v35, %v1407_v0  ;;  %v2527_v17 = vmul.f32 %v2526_v19, %v5706_v8  ;;  %v2574_v56 = vmul.f32 3.8918573e-05, %v5712_v12 }
 0x36c   : > { %v2491_v43 = vmul.f32 %v2490_v14, %v5685_v1  ;;  %v2502_v58 = vmul.f32 %v2501_v31, %v5685_v1  ;;  %v2538_v51 = vmul.f32 %v2537_v45, %v5706_v8  ;;  %v5785_v31 = vmul.f32 0.5, %v5668_v13 }
 0x36d   : > { %v2564_v18 = vadd.f32 0.00028619796, %v2563_v44  ;;  %v5726_v29 = vmul.f32 0.70710677, %v5720_v47  ;;  %v2528_v42 = vadd.f32 0.05243302, %v2527_v17  ;;  %v2453_v45 = vmul.f32 %v2452_v54, %v5674_v63 }
 0x36e   : > { %v3458_v0 = vpop.eup %3457  ;;  %v2575_v36 = vadd.f32 0.001143296, %v2574_v56  ;;  %v5760_v44 = vadd.f32 1.0, %v2502_v58  ;;  %v2539_v21 = vadd.f32 0.112945676, %v2538_v51  ;;  %v2476_v56 = vor.u32 1.1754944e-38, %v2475_v26 }
 0x36f   : > { %v2565_v27 = vmul.f32 %v2564_v18, %v5712_v12  ;;  %v2601_v2 = vmul.f32 %v5726_v29, %v5726_v29  ;;  %v2465_v9 = vmul.f32 %v3458_v0, %v5736_v20  ;;  %v2492_v1 = vadd.f32 1.1283791, %v2491_v43 }
 0x370   : > { %v2576_v25 = vmul.f32 %v2575_v36, %v5712_v12  ;;  %v2529_v55 = vmul.f32 %v2528_v42, %v5706_v8  ;;  %3459 = vrcp.f32 %v5760_v44  ;;  %vm2470_vm14 = vweird.f32 %v3458_v0 }
 0x371   : > { %v2566_v38 = vadd.f32 0.0036580483, %v2565_v27  ;;  %v5744_v23 = vmin.f32 %v2601_v2, 16.0  ;;  %v2466_v46 = vsub.f32 1.0, %v2465_v9  ;;  %v2540_v22 = vmul.f32 %v2539_v21, %v5706_v8  ;;  %vm5775_vm1 = vmor %vm2469_vm15, %vm2470_vm14 }
 0x372   : > { %v1409_v5 = vpop.f32.mrf.mxu3  ;;  %v2577_v6 = vadd.f32 0.014752088, %v2576_v25  ;;  %v2530_v27 = vadd.f32 0.18741608, %v2529_v55  ;;  %v2493_v43 = vmul.f32 %v2492_v1, %v5677_v61  ;;  %vm2474_vm2 = vcmp.eq.f32.partialorder %v2473_v62, 8.507059e+37 }
 0x373   : > { %v5739_v57 = vadd.f32 %v5665_v35, %v1409_v5  ;;  %v2567_v32 = vmul.f32 %v2566_v38, %v5712_v12  ;;  %v2603_v10 = vmul.f32 2.1237322e-06, %v5744_v23  ;;  %v2467_v53 = vmul.f32 %v3458_v0, %v2466_v46 }
 0x374   : > { %v2541_v19 = vadd.f32 0.4994258, %v2540_v22  ;;  %v2614_v34 = vmul.f32 3.8918573e-05, %v5744_v23  ;;  %v2578_v14 = vmul.f32 %v2577_v6, %v5712_v12  ;;  %v2531_v63 = vmul.f32 %v2530_v27, %v5706_v8 }
 0x375   : > { %v5748_v49 = vmul.f32 0.70710677, %v5739_v57  ;;  %v2568_v52 = vadd.f32 0.05243302, %v2567_v32  ;;  %v2604_v41 = vadd.f32 0.00028619796, %v2603_v10  ;;  %v2468_v11 = vadd.f32 %v3458_v0, %v2467_v53 }
 0x376   : > { %v2542_v20 = vmul.f32 %v2541_v19, %v5706_v8  ;;  %v2615_v38 = vadd.f32 0.001143296, %v2614_v34  ;;  %v3460_v28 = vpop.eup %3459  ;;  %v2579_v7 = vadd.f32 0.112945676, %v2578_v14  ;;  %v2513_v21 = vand.u32 2147483647, %v5760_v44 }
 0x377   : > { %v2641_v4 = vmul.f32 %v5748_v49, %v5748_v49  ;;  %v2605_v2 = vmul.f32 %v2604_v41, %v5744_v23  ;;  %v2472_v50 = vsel %vm5775_vm1, %v3458_v0, %v2468_v11  ;;  %v2569_v42 = vmul.f32 %v2568_v52, %v5712_v12  ;;  %v6100_v52 = vld [vmem:[#allocation17_spill] sm:$0xff] }
 0x378   : > { %v2505_v58 = vmul.f32 %v3460_v28, %v5760_v44  ;;  %v2477_v0 = vsel %vm2474_vm2, %v2476_v56, %v2472_v50  ;;  %v5793_v32 = vadd.f32 1.0, %v2542_v20  ;;  %v2580_v10 = vmul.f32 %v2579_v7, %v5712_v12 }
 0x379   : > { %v5765_v18 = vmin.f32 %v2641_v4, 16.0  ;;  %v2616_v13 = vmul.f32 %v2615_v38, %v5744_v23  ;;  %v2606_v51 = vadd.f32 0.0036580483, %v2605_v2  ;;  %v2515_v25 = vand.u32 2147483648, %v5760_v44 }
 0x37a   : > { %v2506_v9 = vsub.f32 1.0, %v2505_v58  ;;  %3461 = vrcp.f32 %v5793_v32  ;;  %v2478_v54 = vmul.f32 %v2477_v0, %v2453_v45  ;;  %vm2510_vm3 = vweird.f32 %v3460_v28 }
 0x37b   : > { %v2643_v17 = vmul.f32 2.1237322e-06, %v5765_v18  ;;  %v2581_v46 = vadd.f32 0.4994258, %v2580_v10  ;;  %v2570_v55 = vadd.f32 0.18741608, %v2569_v42  ;;  %v2607_v53 = vmul.f32 %v2606_v51, %v5744_v23 }
 0x37c   : > { %v2507_v1 = vmul.f32 %v3460_v28, %v2506_v9  ;;  %v2617_v41 = vadd.f32 0.014752088, %v2616_v13  ;;  %vm2509_vm4 = vweird.f32 %v5760_v44  ;;  %v2516_v26 = vor.u32 1.1754944e-38, %v2515_v25 }
 0x37d   : > { %v2644_v36 = vadd.f32 0.00028619796, %v2643_v17  ;;  %v2582_v22 = vmul.f32 %v2581_v46, %v5712_v12  ;;  %vm2511_vm5 = vmor %vm2509_vm4, %vm2510_vm3  ;;  %v3189_v62 = vclamps-f32 %v2478_v54, 1.0  ;;  %vm2514_vm6 = vcmp.eq.f32.partialorder %v2513_v21, 8.507059e+37 }
 0x37e   : > { %v2618_v6 = vmul.f32 %v2617_v41, %v5744_v23  ;;  %v2532_v2 = vadd.f32 1.1283791, %v2531_v63  ;;  %v2571_v50 = vmul.f32 %v2570_v55, %v5712_v12  ;;  %v2608_v20 = vadd.f32 0.05243302, %v2607_v53 }
 0x37f   : > { %v5811_v34 = vadd.f32 1.0, %v2582_v22  ;;  %v2785_v56 = vadd.f32 1.0, %v3189_v62  ;;  %v2553_v0 = vand.u32 2147483647, %v5793_v32  ;;  %v2555_v37 = vand.u32 2147483648, %v5793_v32 }
 0x380   : > { %v3462_v27 = vpop.eup %3461  ;;  %v2619_v44 = vadd.f32 0.112945676, %v2618_v6  ;;  %v2533_v58 = vmul.f32 %v2532_v2, %v5693_v48  ;;  %v2572_v63 = vadd.f32 1.1283791, %v2571_v50  ;;  %vm2549_vm8 = vweird.f32 %v5793_v32 }
 0x381   : > { %v2545_v17 = vmul.f32 %v3462_v27, %v5793_v32  ;;  %3463 = vrcp.f32 %v5811_v34  ;;  %vm2550_vm7 = vweird.f32 %v3462_v27  ;;  %v2817_v48 = vmul.f32 %v2785_v56, %v5785_v31  ;;  %v5835_v31 = vld [vmem:[%s5950_s7] ss:$0 sm:$0xff] }
 0x382   : > { %v2609_v25 = vmul.f32 %v2608_v20, %v5744_v23  ;;  %vm2551_vm9 = vmor %vm2549_vm8, %vm2550_vm7  ;;  %v2556_v54 = vor.u32 1.1754944e-38, %v2555_v37  ;;  %vm2554_vm10 = vcmp.eq.f32.partialorder %v2553_v0, 8.507059e+37  ;;  %v2593_v22 = vand.u32 2147483647, %v5811_v34 }
 0x383   : > { %v2546_v7 = vsub.f32 1.0, %v2545_v17  ;;  %vm2589_vm12 = vweird.f32 %v5811_v34 }
 0x384   : > { %vm2594_vm14 = vcmp.eq.f32.partialorder %v2593_v22, 8.507059e+37 }
 0x385   : > { %v2547_v13 = vmul.f32 %v3462_v27, %v2546_v7 }
 0x388   : > { %v2953_v16 = vpop.f32.mrf.mxu1 }
 0x389   : > { %v2954_v5 = vadd.f32 %v5436_v39, %v2953_v16  ;;  %v2654_v16 = vmul.f32 3.8918573e-05, %v5765_v18 }
 0x38b   : > { %v3012_v40 = vadd.f32 %v2954_v5, %v6097_v15  ;;  %v2645_v5 = vmul.f32 %v2644_v36, %v5765_v18  ;;  %v2655_v11 = vadd.f32 0.001143296, %v2654_v16 }
 0x38d   : > { %3044 = vst.msk [vmem:[%s4908_s16 + $0x70] sm:$0xff] %vm460_vm0, %v3012_v40  ;;  %v2656_v40 = vmul.f32 %v2655_v11, %v5765_v18  ;;  %v2646_v38 = vadd.f32 0.0036580483, %v2645_v5  ;;  %v2595_v5 = vand.u32 2147483648, %v5811_v34 }
 0x38f   : > { %v2657_v42 = vadd.f32 0.014752088, %v2656_v40  ;;  %v2647_v51 = vmul.f32 %v2646_v38, %v5765_v18 }
 0x390   : > { %v2955_v4 = vpop.f32.mrf.mxu1 }
 0x391   : > { %v2956_v61 = vadd.f32 %v5436_v39, %v2955_v4  ;;  %v2508_v39 = vadd.f32 %v3460_v28, %v2507_v1  ;;  %v2658_v12 = vmul.f32 %v2657_v42, %v5765_v18  ;;  %v3464_v4 = vpop.eup %3463 }
 0x392   : > { %v2585_v1 = vmul.f32 %v3464_v4, %v5811_v34  ;;  %vm2590_vm11 = vweird.f32 %v3464_v4 }
 0x393   : > { %v3013_v8 = vadd.f32 %v2956_v61, %v6100_v52  ;;  %v2512_v19 = vsel %vm2511_vm5, %v3460_v28, %v2508_v39  ;;  %v2620_v28 = vmul.f32 %v2619_v44, %v5744_v23  ;;  %v2548_v61 = vadd.f32 %v3462_v27, %v2547_v13  ;;  %vm2591_vm13 = vmor %vm2589_vm12, %vm2590_vm11 }
 0x394   : > { %v2517_v15 = vsel %vm2514_vm6, %v2516_v26, %v2512_v19  ;;  %v2659_v21 = vadd.f32 0.112945676, %v2658_v12  ;;  %v2586_v53 = vsub.f32 1.0, %v2585_v1  ;;  %v2648_v39 = vadd.f32 0.05243302, %v2647_v51  ;;  %v6101_v26 = vld [vmem:[#allocation19_spill] sm:$0xff] }
 0x395   : > { %3045 = vst.msk [vmem:[%s4908_s16 + $0x78] sm:$0xff] %vm460_vm0, %v3013_v8  ;;  %v2518_v14 = vmul.f32 %v2517_v15, %v2493_v43  ;;  %v2621_v43 = vadd.f32 0.4994258, %v2620_v28  ;;  %v2552_v8 = vsel %vm2551_vm9, %v3462_v27, %v2548_v61  ;;  %v2573_v15 = vmul.f32 %v2572_v63, %v5701_v60 }
 0x396   : > { %v2660_v32 = vmul.f32 %v2659_v21, %v5765_v18  ;;  %v2557_v16 = vsel %vm2554_vm10, %v2556_v54, %v2552_v8  ;;  %v2587_v62 = vmul.f32 %v3464_v4, %v2586_v53  ;;  %v2610_v44 = vadd.f32 0.18741608, %v2609_v25 }
 0x397   : > { %v3190_v45 = vclamps-f32 %v2518_v14, 1.0  ;;  %v2622_v36 = vmul.f32 %v2621_v43, %v5744_v23  ;;  %v2558_v11 = vmul.f32 %v2557_v16, %v2533_v58  ;;  %v2649_v40 = vmul.f32 %v2648_v39, %v5765_v18  ;;  %v6102_v58 = vld [vmem:[#allocation21_spill] sm:$0xff]  ;;  %v6103_v16 = vld [vmem:[#allocation18_spill] sm:$0xff] }
 0x398   : > { %v2661_v19 = vadd.f32 0.4994258, %v2660_v32  ;;  %v2588_v27 = vadd.f32 %v3464_v4, %v2587_v62  ;;  %v2611_v60 = vmul.f32 %v2610_v44, %v5744_v23  ;;  %v1443_v63 = vmul.f32 0.5, %v5688_v24 }
 0x399   : > { %v2786_v10 = vadd.f32 1.0, %v3190_v45  ;;  %v5829_v46 = vadd.f32 1.0, %v2622_v36  ;;  %v3191_v17 = vclamps-f32 %v2558_v11, 1.0  ;;  %v2650_v7 = vadd.f32 0.18741608, %v2649_v40 }
 0x39a   : > { %v2662_v2 = vmul.f32 %v2661_v19, %v5765_v18  ;;  %v2592_v50 = vsel %vm2591_vm13, %v3464_v4, %v2588_v27  ;;  %v1444_v51 = vmul.f32 0.5, %v5696_v30  ;;  %v2612_v23 = vadd.f32 1.1283791, %v2611_v60 }
 0x39b   : > { %v2818_v9 = vmul.f32 %v2786_v10, %v1442_v59  ;;  %3465 = vrcp.f32 %v5829_v46  ;;  %v2596_v59 = vor.u32 1.1754944e-38, %v2595_v5  ;;  %v2787_v43 = vadd.f32 1.0, %v3191_v17 }
 0x39c   : > { %v2663_v20 = vadd.f32 1.0, %v2662_v2  ;;  %v2635_v10 = vand.u32 2147483648, %v5829_v46  ;;  %v2633_v12 = vand.u32 2147483647, %v5829_v46  ;;  %vm2629_vm1 = vweird.f32 %v5829_v46 }
 0x39d   : > { %v2837_v52 = vpack.c.bf16 %v2818_v9, %v2817_v48  ;;  %v2597_v28 = vsel %vm2594_vm14, %v2596_v59, %v2592_v50  ;;  %v2651_v9 = vmul.f32 %v2650_v7, %v5765_v18  ;;  %v2819_v61 = vmul.f32 %v2787_v43, %v1443_v63  ;;  %v6108_v63 = vld [vmem:[#allocation23_spill] sm:$0xff] }
 0x39e   : > { %v2598_v56 = vmul.f32 %v2597_v28, %v2573_v15  ;;  %3467 = vrcp.f32 %v2663_v20  ;;  %v2636_v25 = vor.u32 1.1754944e-38, %v2635_v10  ;;  %vm2634_vm3 = vcmp.eq.f32.partialorder %v2633_v12, 8.507059e+37  ;;  %v6104_v15 = vld [vmem:[#allocation20_spill] sm:$0xff] }
 0x39f   : > { %2977 = vmatmul.bf16.gmra.mxu2 %v2837_v52  ;;  %v2613_v52 = vmul.f32 %v2612_v23, %v5726_v29  ;;  %v2675_v18 = vand.u32 2147483648, %v2663_v20  ;;  %vm2669_vm5 = vweird.f32 %v2663_v20  ;;  %v1446_v17 = vmul.f32 0.5, %v5739_v57  ;;  %v6106_v57 = vld [vmem:[#allocation24_spill] sm:$0xff] }
 0x3a0   : > { %v2958_v55 = vpop.f32.mrf.mxu2  ;;  %v3192_v37 = vclamps-f32 %v2598_v56, 1.0 }
 0x3a1   : > { %v2959_v41 = vadd.f32 %v5835_v31, %v2958_v55  ;;  %v3466_v14 = vpop.eup %3465 }
 0x3a2   : > { %v2625_v45 = vmul.f32 %v3466_v14, %v5829_v46  ;;  %vm2630_vm15 = vweird.f32 %v3466_v14  ;;  %v2788_v36 = vadd.f32 1.0, %v3192_v37  ;;  %v2652_v46 = vadd.f32 1.1283791, %v2651_v9  ;;  %v6107_v37 = vld [vmem:[#allocation25_spill] sm:$0xff] }
 0x3a3   : > { %v3014_v6 = vadd.f32 %v2959_v41, %v6101_v26  ;;  %vm2631_vm2 = vmor %vm2629_vm1, %vm2630_vm15  ;;  %v2673_v41 = vand.u32 2147483647, %v2663_v20  ;;  %v2676_v26 = vor.u32 1.1754944e-38, %v2675_v18 }
 0x3a4   : > { %v2626_v42 = vsub.f32 1.0, %v2625_v45  ;;  %v3468_v48 = vpop.eup %3467  ;;  %v2820_v21 = vmul.f32 %v2788_v36, %v1444_v51  ;;  %v2653_v29 = vmul.f32 %v2652_v46, %v5748_v49 }
 0x3a5   : > { %3046 = vst.msk [vmem:[%s4908_s16 + $0x80] sm:$0xff] %vm460_vm0, %v3014_v6  ;;  %v2665_v24 = vmul.f32 %v3468_v48, %v2663_v20  ;;  %vm2670_vm4 = vweird.f32 %v3468_v48  ;;  %vm2674_vm7 = vcmp.eq.f32.partialorder %v2673_v41, 8.507059e+37 }
 0x3a6   : > { %v2627_v13 = vmul.f32 %v3466_v14, %v2626_v42  ;;  %v2838_v30 = vpack.c.bf16 %v2820_v21, %v2819_v61  ;;  %vm2671_vm6 = vmor %vm2669_vm5, %vm2670_vm4 }
 0x3a7   : > { %v2666_v32 = vsub.f32 1.0, %v2665_v24 }
 0x3a8   : > { %v2960_v38 = vpop.f32.mrf.mxu2  ;;  %v2628_v4 = vadd.f32 %v3466_v14, %v2627_v13 }
 0x3a9   : > { %v2961_v34 = vadd.f32 %v5835_v31, %v2960_v38  ;;  %v2667_v22 = vmul.f32 %v3468_v48, %v2666_v32 }
 0x3aa   : > { %v2632_v54 = vsel %vm2631_vm2, %v3466_v14, %v2628_v4  ;;  %v1445_v14 = vmul.f32 0.5, %v5720_v47 }
 0x3ab   : > { %v3015_v0 = vadd.f32 %v2961_v34, %v6102_v58  ;;  %v2637_v55 = vsel %vm2634_vm3, %v2636_v25, %v2632_v54  ;;  %v2668_v5 = vadd.f32 %v3468_v48, %v2667_v22  ;;  %v6105_v34 = vld [vmem:[#allocation22_spill] sm:$0xff] }
 0x3ac   : > { %v2638_v39 = vmul.f32 %v2637_v55, %v2613_v52 }
 0x3ad   : > { %3047 = vst.msk [vmem:[%s4908_s16 + $0x88] sm:$0xff] %vm460_vm0, %v3015_v0  ;;  %v2672_v11 = vsel %vm2671_vm6, %v3468_v48, %v2668_v5 }
 0x3ae   : > { %v3193_v6 = vclamps-f32 %v2638_v39, 1.0  ;;  %v2677_v19 = vsel %vm2674_vm7, %v2676_v26, %v2672_v11 }
 0x3af   : > { %2982 = vmatmul.bf16.gmra.mxu2 %v2838_v30  ;;  %v2678_v2 = vmul.f32 %v2677_v19, %v2653_v29 }
 0x3b0   : > { %v2789_v59 = vadd.f32 1.0, %v3193_v6 }
 0x3b1   : > { %v3194_v40 = vclamps-f32 %v2678_v2, 1.0 }
 0x3b2   : > { %v2963_v1 = vpop.f32.mrf.mxu2  ;;  %v2821_v50 = vmul.f32 %v2789_v59, %v1445_v14 }
 0x3b3   : > { %v2964_v8 = vadd.f32 %v5835_v31, %v2963_v1  ;;  %v2790_v49 = vadd.f32 1.0, %v3194_v40 }
 0x3b5   : > { %v3016_v53 = vadd.f32 %v2964_v8, %v6103_v16  ;;  %v2822_v20 = vmul.f32 %v2790_v49, %v1446_v17 }
 0x3b7   : > { %3048 = vst.msk [vmem:[%s4908_s16 + $0x90] sm:$0xff] %vm460_vm0, %v3016_v53  ;;  %v2839_v45 = vpack.c.bf16 %v2822_v20, %v2821_v50 }
 0x3ba   : > { %v2965_v62 = vpop.f32.mrf.mxu2 }
 0x3bb   : > { %v2966_v27 = vadd.f32 %v5835_v31, %v2965_v62 }
 0x3bd   : > { %v3017_v44 = vadd.f32 %v2966_v27, %v6104_v15 }
 0x3bf   : > { %3049 = vst.msk [vmem:[%s4908_s16 + $0x98] sm:$0xff] %vm460_vm0, %v3017_v44  ;;  %2987 = vmatmul.bf16.gmra.mxu2 %v2839_v45 }
 0x3c3   : > { %v2968_v38 = vpop.f32.mrf.mxu2 }
 0x3c4   : > { %v2969_v28 = vadd.f32 %v5835_v31, %v2968_v38 }
 0x3c6   : > { %v3018_v56 = vadd.f32 %v2969_v28, %v6105_v34 }
 0x3c8   : > { %3050 = vst.msk [vmem:[%s4908_s16 + $0xa0] sm:$0xff] %vm460_vm0, %v3018_v56 }
 0x3cb   : > { %v2970_v60 = vpop.f32.mrf.mxu2 }
 0x3cc   : > { %v2971_v47 = vadd.f32 %v5835_v31, %v2970_v60 }
 0x3ce   : > { %v3019_v7 = vadd.f32 %v2971_v47, %v6106_v57 }
 0x3cf   : > { %v1412_v0 = vpop.f32.mrf.mxu3 }
 0x3d0   : > { %3051 = vst.msk [vmem:[%s4908_s16 + $0xa8] sm:$0xff] %vm460_vm0, %v3019_v7  ;;  %v5886_v12 = vadd.f32 %v5665_v35, %v1412_v0 }
 0x3d2   : > { %v5892_v23 = vmul.f32 0.70710677, %v5886_v12 }
 0x3d3   : > { %v2973_v42 = vpop.f32.mrf.mxu2 }
 0x3d4   : > { %v2974_v58 = vadd.f32 %v5835_v31, %v2973_v42  ;;  %v2681_v48 = vmul.f32 %v5892_v23, %v5892_v23 }
 0x3d6   : > { %v3020_v43 = vadd.f32 %v2974_v58, %v6107_v37  ;;  %v2682_v61 = vmin.f32 %v2681_v48, 16.0 }
 0x3d7   : > { %v1414_v36 = vpop.f32.mrf.mxu3 }
 0x3d8   : > { %3052 = vst.msk [vmem:[%s4908_s16 + $0xb0] sm:$0xff] %vm460_vm0, %v3020_v43  ;;  %v5895_v4 = vadd.f32 %v5665_v35, %v1414_v36  ;;  %v2683_v25 = vmul.f32 2.1237322e-06, %v2682_v61  ;;  %v2694_v24 = vmul.f32 3.8918573e-05, %v2682_v61 }
 0x3da   : > { %v5900_v9 = vmul.f32 0.70710677, %v5895_v4  ;;  %v2684_v1 = vadd.f32 0.00028619796, %v2683_v25  ;;  %v2695_v30 = vadd.f32 0.001143296, %v2694_v24 }
 0x3db   : > { %v2975_v10 = vpop.f32.mrf.mxu2 }
 0x3dc   : > { %v2976_v13 = vadd.f32 %v5835_v31, %v2975_v10  ;;  %v2721_v21 = vmul.f32 %v5900_v9, %v5900_v9  ;;  %v2696_v52 = vmul.f32 %v2695_v30, %v2682_v61  ;;  %v2685_v8 = vmul.f32 %v2684_v1, %v2682_v61 }
 0x3de   : > { %v3021_v51 = vadd.f32 %v2976_v13, %v6108_v63  ;;  %v2722_v54 = vmin.f32 %v2721_v21, 16.0  ;;  %v2697_v35 = vadd.f32 0.014752088, %v2696_v52  ;;  %v2686_v18 = vadd.f32 0.0036580483, %v2685_v8 }
 0x3e0   : > { %3053 = vst.msk [vmem:[%s4908_s16 + $0xb8] sm:$0xff] %vm460_vm0, %v3021_v51  ;;  %v2723_v55 = vmul.f32 2.1237322e-06, %v2722_v54  ;;  %v2698_v46 = vmul.f32 %v2697_v35, %v2682_v61  ;;  %v2734_v41 = vmul.f32 3.8918573e-05, %v2722_v54  ;;  %v2687_v26 = vmul.f32 %v2686_v18, %v2682_v61 }
 0x3e2   : > { %v2724_v32 = vadd.f32 0.00028619796, %v2723_v55  ;;  %v2699_v16 = vadd.f32 0.112945676, %v2698_v46  ;;  %v2735_v53 = vadd.f32 0.001143296, %v2734_v41 }
 0x3e3   : > { %v2688_v27 = vadd.f32 0.05243302, %v2687_v26  ;;  %v1447_v46 = vmul.f32 0.5, %v5886_v12  ;;  %v1448_v41 = vmul.f32 0.5, %v5895_v4 }
 0x3e4   : > { %v2725_v39 = vmul.f32 %v2724_v32, %v2722_v54  ;;  %v2700_v22 = vmul.f32 %v2699_v16, %v2682_v61  ;;  %v2736_v5 = vmul.f32 %v2735_v53, %v2722_v54 }
 0x3e5   : > { %v2689_v59 = vmul.f32 %v2688_v27, %v2682_v61 }
 0x3e6   : > { %v2701_v29 = vadd.f32 0.4994258, %v2700_v22  ;;  %v2737_v6 = vadd.f32 0.014752088, %v2736_v5  ;;  %v2726_v11 = vadd.f32 0.0036580483, %v2725_v39 }
 0x3e7   : > { %v2690_v20 = vadd.f32 0.18741608, %v2689_v59  ;;  %v6112_v59 = vld [vmem:[#allocation30_spill] sm:$0xff] }
 0x3e8   : > { %v2702_v62 = vmul.f32 %v2701_v29, %v2682_v61  ;;  %v2738_v19 = vmul.f32 %v2737_v6, %v2722_v54  ;;  %v2727_v44 = vmul.f32 %v2726_v11, %v2722_v54  ;;  %v6109_v29 = vld [vmem:[#allocation26_spill] sm:$0xff] }
 0x3e9   : > { %v2691_v56 = vmul.f32 %v2690_v20, %v2682_v61 }
 0x3ea   : > { %v2703_v2 = vadd.f32 1.0, %v2702_v62  ;;  %v2739_v15 = vadd.f32 0.112945676, %v2738_v19  ;;  %v2728_v14 = vadd.f32 0.05243302, %v2727_v44  ;;  %v6110_v62 = vld [vmem:[#allocation27_spill] sm:$0xff] }
 0x3eb   : > { %v2692_v58 = vadd.f32 1.1283791, %v2691_v56 }
 0x3ec   : > { %3469 = vrcp.f32 %v2703_v2  ;;  %v2740_v40 = vmul.f32 %v2739_v15, %v2722_v54  ;;  %v2729_v38 = vmul.f32 %v2728_v14, %v2722_v54  ;;  %v2715_v57 = vand.u32 2147483648, %v2703_v2 }
 0x3ed   : > { %v2713_v7 = vand.u32 2147483647, %v2703_v2  ;;  %vm2709_vm9 = vweird.f32 %v2703_v2  ;;  %v2693_v51 = vmul.f32 %v2692_v58, %v5892_v23 }
 0x3ee   : > { %v2741_v17 = vadd.f32 0.4994258, %v2740_v40  ;;  %v2730_v60 = vadd.f32 0.18741608, %v2729_v38  ;;  %v2716_v10 = vor.u32 1.1754944e-38, %v2715_v57 }
 0x3ef   : > { %vm2714_vm11 = vcmp.eq.f32.partialorder %v2713_v7, 8.507059e+37 }
 0x3f0   : > { %v2742_v49 = vmul.f32 %v2741_v17, %v2722_v54  ;;  %v2731_v37 = vmul.f32 %v2730_v60, %v2722_v54 }
 0x3f2   : > { %v3470_v50 = vpop.eup %3469  ;;  %v2743_v45 = vadd.f32 1.0, %v2742_v49  ;;  %v2732_v48 = vadd.f32 1.1283791, %v2731_v37 }
 0x3f3   : > { %v2705_v28 = vmul.f32 %v3470_v50, %v2703_v2  ;;  %vm2710_vm8 = vweird.f32 %v3470_v50  ;;  %v6111_v2 = vld [vmem:[#allocation28_spill] sm:$0xff] }
 0x3f4   : > { %3471 = vrcp.f32 %v2743_v45  ;;  %vm2711_vm10 = vmor %vm2709_vm9, %vm2710_vm8  ;;  %v2755_v61 = vand.u32 2147483648, %v2743_v45  ;;  %v2753_v24 = vand.u32 2147483647, %v2743_v45  ;;  %vm2749_vm13 = vweird.f32 %v2743_v45 }
 0x3f5   : > { %v2706_v34 = vsub.f32 1.0, %v2705_v28  ;;  %v2733_v54 = vmul.f32 %v2732_v48, %v5900_v9 }
 0x3f6   : > { %v2756_v30 = vor.u32 1.1754944e-38, %v2755_v61  ;;  %vm2754_vm15 = vcmp.eq.f32.partialorder %v2753_v24, 8.507059e+37 }
 0x3f7   : > { %v2707_v47 = vmul.f32 %v3470_v50, %v2706_v34 }
 0x3f9   : > { %v2708_v42 = vadd.f32 %v3470_v50, %v2707_v47 }
 0x3fa   : > { %v3472_v0 = vpop.eup %3471 }
 0x3fb   : > { %v2712_v43 = vsel %vm2711_vm10, %v3470_v50, %v2708_v42  ;;  %v2745_v13 = vmul.f32 %v3472_v0, %v2743_v45  ;;  %vm2750_vm12 = vweird.f32 %v3472_v0  ;;  %v6113_v50 = vld [vmem:[#allocation31_spill] sm:$0xff]  ;;  %v6114_v45 = vld [vmem:[#allocation32_spill] sm:$0xff] }
 0x3fc   : > { %v2717_v63 = vsel %vm2714_vm11, %v2716_v10, %v2712_v43  ;;  %vm2751_vm14 = vmor %vm2749_vm13, %vm2750_vm12 }
 0x3fd   : > { %v2746_v36 = vsub.f32 1.0, %v2745_v13  ;;  %v2718_v21 = vmul.f32 %v2717_v63, %v2693_v51 }
 0x3ff   : > { %v2747_v25 = vmul.f32 %v3472_v0, %v2746_v36  ;;  %v3195_v55 = vclamps-f32 %v2718_v21, 1.0 }
 0x401   : > { %v2748_v1 = vadd.f32 %v3472_v0, %v2747_v25  ;;  %v2791_v32 = vadd.f32 1.0, %v3195_v55 }
 0x403   : > { %v2752_v52 = vsel %vm2751_vm14, %v3472_v0, %v2748_v1  ;;  %v2823_v16 = vmul.f32 %v2791_v32, %v1447_v46 }
 0x404   : > { %v2757_v8 = vsel %vm2754_vm15, %v2756_v30, %v2752_v52 }
 0x405   : > { %v2758_v35 = vmul.f32 %v2757_v8, %v2733_v54 }
 0x407   : > { %v3196_v23 = vclamps-f32 %v2758_v35, 1.0 }
 0x409   : > { %v2792_v18 = vadd.f32 1.0, %v3196_v23 }
 0x40b   : > { %v2824_v53 = vmul.f32 %v2792_v18, %v1448_v41 }
 0x40d   : > { %v2840_v39 = vpack.c.bf16 %v2824_v53, %v2823_v16 }
 0x40f   : > { %2992 = vmatmul.bf16.gmra.mxu2 %v2840_v39 }
 0x422   : > { %v2978_v9 = vpop.f32.mrf.mxu2 }
 0x423   : > { %v2979_v22 = vadd.f32 %v5835_v31, %v2978_v9 }
 0x425   : > { %v3022_v5 = vadd.f32 %v2979_v22, %v4068_v33 }
 0x427   : > { %3054 = vst.msk [vmem:[%s4908_s16 + $0xc0] sm:$0xff] %vm460_vm0, %v3022_v5 }
 0x42a   : > { %v2980_v26 = vpop.f32.mrf.mxu2 }
 0x42b   : > { %v2981_v12 = vadd.f32 %v5835_v31, %v2980_v26 }
 0x42d   : > { %v3023_v4 = vadd.f32 %v2981_v12, %v6109_v29 }
 0x42f   : > { %3055 = vst.msk [vmem:[%s4908_s16 + $0xc8] sm:$0xff] %vm460_vm0, %v3023_v4 }
 0x432   : > { %v2983_v6 = vpop.f32.mrf.mxu2 }
 0x433   : > { %v2984_v11 = vadd.f32 %v5835_v31, %v2983_v6 }
 0x435   : > { %v3024_v19 = vadd.f32 %v2984_v11, %v6110_v62 }
 0x437   : > { %3056 = vst.msk [vmem:[%s4908_s16 + $0xd0] sm:$0xff] %vm460_vm0, %v3024_v19 }
 0x43a   : > { %v2985_v33 = vpop.f32.mrf.mxu2 }
 0x43b   : > { %v2986_v27 = vadd.f32 %v5835_v31, %v2985_v33 }
 0x43d   : > { %v3025_v15 = vadd.f32 %v2986_v27, %v6111_v2 }
 0x43f   : > { %3057 = vst.msk [vmem:[%s4908_s16 + $0xd8] sm:$0xff] %vm460_vm0, %v3025_v15 }
 0x442   : > { %v2988_v44 = vpop.f32.mrf.mxu2 }
 0x443   : > { %v2989_v40 = vadd.f32 %v5835_v31, %v2988_v44 }
 0x445   : > { %v3026_v14 = vadd.f32 %v2989_v40, %v6112_v59 }
 0x447   : > { %3058 = vst.msk [vmem:[%s4908_s16 + $0xe0] sm:$0xff] %vm460_vm0, %v3026_v14 }
 0x44a   : > { %v2990_v17 = vpop.f32.mrf.mxu2 }
 0x44b   : > { %v2991_v49 = vadd.f32 %v5835_v31, %v2990_v17 }
 0x44d   : > { %v3027_v20 = vadd.f32 %v2991_v49, %v6113_v50 }
 0x44f   : > { %3059 = vst.msk [vmem:[%s4908_s16 + $0xe8] sm:$0xff] %vm460_vm0, %v3027_v20 }
 0x492   : > { %v2993_v38 = vpop.f32.mrf.mxu2 }
 0x493   : > { %v2994_v28 = vadd.f32 %v5835_v31, %v2993_v38 }
 0x495   : > { %v3028_v34 = vadd.f32 %v2994_v28, %v6114_v45 }
 0x497   : > { %3060 = vst.msk [vmem:[%s4908_s16 + $0xf0] sm:$0xff] %vm460_vm0, %v3028_v34 }
 0x49a   : > { %v2995_v56 = vpop.f32.mrf.mxu2 }
 0x49b   : > { %v2996_v60 = vadd.f32 %v5835_v31, %v2995_v56 }
 0x49d   : > { %v3029_v47 = vadd.f32 %v2996_v60, %v4606_v3 }
 0x49f   : > { %3061 = vst.msk [vmem:[%s4908_s16 + $0xf8] sm:$0xff] %vm460_vm0, %v3029_v47 }
 0x4a0 PF: > { %s18_s27 = sadd.s32 1, %s3490_s27  }
 0x4a1   : > { %p15_p4 = scmp.ge.s32.totalorder %s18_s27, 4  }
 0x4a3   :  { %17 = sbr.rel (!%p15_p4) target bundleno = 1 (0x1), region = 85 }

// kernel: _swin_block_forward.2
= control target key start
LH: loop header
LB: loop body
LE: loop exit
PB: predicated region body
PF: predicated region fallthrough
CT: control target
= control target key end

     0   :  { %s4780_s24 = smov 0   ;;  %s4782_s25 = smov 0   ;;  %s6572_s0 = inlined_call_operand.vmem [shape: f32[2,4,8,8,32], index: 0, kind: input, shape index: {}]   ;;  %s6573_s1 = inlined_call_operand.vmem [shape: f32[1,32], index: 1, kind: input, shape index: {}]   ;;  %s6574_s2 = inlined_call_operand.vmem [shape: f32[1,32], index: 2, kind: input, shape index: {}]   ;;  %s6575_s3 = inlined_call_operand.vmem [shape: bf16[32,96], index: 3, kind: input, shape index: {}]   ;;  %s6576_s4 = inlined_call_operand.vmem [shape: f32[64,96], index: 4, kind: input, shape index: {}]   ;;  %s6577_s5 = inlined_call_operand.vmem [shape: bf16[32,32], index: 5, kind: input, shape index: {}]   ;;  %s6578_s6 = inlined_call_operand.vmem [shape: f32[1,32], index: 6, kind: input, shape index: {}]   ;;  %s6579_s7 = inlined_call_operand.vmem [shape: bf16[2,4,8,8,32], index: 7, kind: output, shape index: {}]  }
   0x1   :  { %s4784_s26 = smov 0   ;;  %s4786_s27 = smov 0  }
   0x2   :  { %s4788_s28 = smov 0   ;;  %s4790_s29 = smov 0  }
   0x3   :  { %s4792_s30 = smov 0  }
   0x4 LB: > { %s29_s8 = sadd.s32 1, %s4716_s28  ;;  %s36_s9 = sadd.s32 1, %s4720_s29  ;;  %s4724_s30 = sphi %s4792_s30, %s17_s30   ;;  %s4720_s29 = sphi %s4790_s29, %s6602_s29   ;;  %s4716_s28 = sphi %s4788_s28, %s6601_s28   ;;  %s4712_s27 = sphi %s4786_s27, %s6600_s27   ;;  %s4708_s26 = sphi %s4784_s26, %s6599_s26   ;;  %s4704_s25 = sphi %s4782_s25, %s6598_s25   ;;  %s4700_s24 = sphi %s4780_s24, %s6597_s24  }
   0x5   : > { %p30_p0 = scmp.ge.s32.totalorder %s29_s8, 2  ;;  %s4168_s10 = sadd.s32 4294967295, %s4724_s30  }
   0x6   : > { %p54_p1 = scmp.ne.s32.totalorder %s4704_s25, %s4700_s24  ;;  %p55_p2 = scmp.eq.s32.totalorder %s4724_s30, 0 }
   0x7   : > { %s6604_s8 = smov (%p30_p0, %s29_s8), 0  ;;  %s6606_s9 = smov (!%p30_p0, %s36_s9), %s4720_s29 }
   0x8   : > { %p38_p3 = scmp.ge.s32.totalorder %s6606_s9, 2  ;;  %p214_p4 = scmp.eq.s32.totalorder %s4168_s10, 3 }
   0x9   : > { %s43_s11 = ssub.s32 %s4716_s28, %s6604_s8  ;;  %p56_p5 = por %p55_p2, %p54_p1 }
   0xa   : > { %s6608_s9 = smov (%p38_p3, %s6606_s9), 0  ;;  %p4828_p6 = por %p214_p4, %p54_p1 }
   0xb   : > { %s40_s13 = ssub.s32 %s4720_s29, %s6608_s9  ;;  %s47_s15 = sadd.s32 1, %s4704_s25 }
   0xc   : > { %s44_s14 = sor.u32 %s43_s11, %s40_s13  ;;  %p4171_p8 = scmp.ge.s32.totalorder %s4724_s30, 4 }
   0xd   : > { %p45_p7 = scmp.eq.s32.totalorder %s44_s14, 0 }
   0xe   : > { %254 = sbr.rel (%p4171_p8) target bundleno = 42 (0x2a), region = 40 }
   0xf   : > { %s4836_s16 = scalar_select %p45_p7, %s4704_s25, %s47_s15  }
  0x13   : > { %257 = sbr.rel (!%p56_p5) target bundleno = 42 (0x2a), region = 44  ;;  %s259_s17 = sand.u32 (%p56_p5), 1, %s4704_s25  }
  0x14   : > { %s4173_s18 = sshll.u32 (%p56_p5), %s4716_s28, 2  ;;  %s4172_s19 = sshll.u32 (%p56_p5), %s259_s17, 7 }
  0x15   : > { %s4174_s20 = sshll.u32 (%p56_p5), %s4720_s29, 5  ;;  %s261_s13 = scalar_lea.vmem (%p56_p5), [#allocation2], %s4172_s19 }
  0x16   : > { %s267_s21 = sadd.s32 (%p56_p5), %s4174_s20, %s4173_s18 }
  0x17   : > { %s4175_s22 = sshll.u32 (%p56_p5), %s267_s21, 3 }
  0x18   : > { %s4845_s11 = scalar_lea.vmem %s6572_s0, %s4175_s22 }
  0x19   : > { %v328_v0 = vld [vmem:[%s4845_s11] sm:$0xff]  ;;  %v330_v1 = vld [vmem:[%s4845_s11 + $0x8] sm:$0xff]  ;;  %v332_v2 = vld [vmem:[%s4845_s11 + $0x10] sm:$0xff] }
  0x1a   : > { %329 = vst [vmem:[%s261_s13] sm:$0xff] %v328_v0  ;;  %v334_v3 = vld [vmem:[%s4845_s11 + $0x18] sm:$0xff]  ;;  %v336_v4 = vld [vmem:[%s4845_s11 + $0x40] sm:$0xff]  ;;  %v338_v5 = vld [vmem:[%s4845_s11 + $0x48] sm:$0xff] }
  0x1b   : > { %331 = vst [vmem:[%s261_s13 + $0x8] sm:$0xff] %v330_v1  ;;  %v340_v6 = vld [vmem:[%s4845_s11 + $0x50] sm:$0xff]  ;;  %v342_v7 = vld [vmem:[%s4845_s11 + $0x58] sm:$0xff]  ;;  %v344_v8 = vld [vmem:[%s4845_s11 + $0x80] sm:$0xff] }
  0x1c   : > { %333 = vst [vmem:[%s261_s13 + $0x10] sm:$0xff] %v332_v2  ;;  %v346_v9 = vld [vmem:[%s4845_s11 + $0x88] sm:$0xff]  ;;  %v348_v10 = vld [vmem:[%s4845_s11 + $0x90] sm:$0xff]  ;;  %v350_v11 = vld [vmem:[%s4845_s11 + $0x98] sm:$0xff] }
  0x1d   : > { %335 = vst [vmem:[%s261_s13 + $0x18] sm:$0xff] %v334_v3  ;;  %v352_v12 = vld [vmem:[%s4845_s11 + $0xc0] sm:$0xff]  ;;  %v354_v13 = vld [vmem:[%s4845_s11 + $0xc8] sm:$0xff]  ;;  %v356_v14 = vld [vmem:[%s4845_s11 + $0xd0] sm:$0xff] }
  0x1e   : > { %337 = vst [vmem:[%s261_s13 + $0x20] sm:$0xff] %v336_v4  ;;  %v358_v15 = vld [vmem:[%s4845_s11 + $0xd8] sm:$0xff] }
  0x1f   : > { %339 = vst [vmem:[%s261_s13 + $0x28] sm:$0xff] %v338_v5 }
  0x20   : > { %341 = vst [vmem:[%s261_s13 + $0x30] sm:$0xff] %v340_v6 }
  0x21   : > { %343 = vst [vmem:[%s261_s13 + $0x38] sm:$0xff] %v342_v7 }
  0x22   : > { %345 = vst [vmem:[%s261_s13 + $0x40] sm:$0xff] %v344_v8 }
  0x23   : > { %347 = vst [vmem:[%s261_s13 + $0x48] sm:$0xff] %v346_v9 }
  0x24   : > { %349 = vst [vmem:[%s261_s13 + $0x50] sm:$0xff] %v348_v10 }
  0x25   : > { %351 = vst [vmem:[%s261_s13 + $0x58] sm:$0xff] %v350_v11 }
  0x26   : > { %353 = vst [vmem:[%s261_s13 + $0x60] sm:$0xff] %v352_v12 }
  0x27   : > { %355 = vst [vmem:[%s261_s13 + $0x68] sm:$0xff] %v354_v13 }
  0x28   : > { %357 = vst [vmem:[%s261_s13 + $0x70] sm:$0xff] %v356_v14 }
  0x29   : > { %359 = vst [vmem:[%s261_s13 + $0x78] sm:$0xff] %v358_v15 }
  0x2a PF: > { %p4176_p9 = scmp.ge.s32.totalorder %s4724_s30, 1  ;;  %p364_p10 = scmp.lt.s32.totalorder %s4724_s30, 5 }
  0x2c   : > { %p365_p11 = pnand %p4176_p9, %p364_p10 }
  0x2d   : > { %s371_s14 = sand.u32 (!%p365_p11), 1, %s4700_s24   ;;  %s4729_s19 = smov (!%p365_p11), 96  }
  0x2e   : > { %368 = sbr.rel (%p365_p11) target bundleno = 1809 (0x711), region = 82  ;;  %s4177_s15 = sshll.u32 (!%p365_p11), %s371_s14, 7 }
  0x2f   : > { %s4868_s17 = scalar_lea.vmem (!%p365_p11), [#allocation2], %s4177_s15  ;;  %s4730_s22 = smov (!%p365_p11), 88  }
  0x30   : > { %s4731_s23 = smov (!%p365_p11), 120   ;;  %s4732_s10 = smov (!%p365_p11), 64  }
  0x31   : > { %s4734_s11 = smov (!%p365_p11), 80   ;;  %s4735_s13 = smov (!%p365_p11), 112  }
  0x32   : > { %s4736_s15 = smov (!%p365_p11), 72   ;;  %s4737_s20 = smov (!%p365_p11), 48  }
  0x33   : > { %v4871_v16 = vld [vmem:[%s4868_s17] sm:$0xff]  ;;  %v4874_v17 = vld [vmem:[%s4868_s17 + $0x8] sm:$0xff]  ;;  %v4885_v20 = vld [vmem:[%s4868_s17 + $0x10] sm:$0xff]  ;;  %vm541_vm0 = vcmask 261120   ;;  %v4726_v1 = vmov 32.0   ;;  %s4738_s21 = smov 104  }
  0x34   : > { %v4877_v18 = vld [vmem:[%s4868_s17 + $0x20] sm:$0xff]  ;;  %470 = vst [vmem:[#allocation1] ss:$2 sm:$0xff] %v4871_v16  ;;  %v4881_v19 = vld [vmem:[%s4868_s17 + $0x28] sm:$0xff]  ;;  %v4889_v21 = vld [vmem:[%s4868_s17 + $0x18] sm:$0xff]  ;;  %v438_v38 = vrot.slane %v4871_v16, 4  ;;  %4380 = vrcp.f32 %v4726_v1 }
  0x35   : > { %472 = vst [vmem:[#allocation1 + $0x1] ss:$2 sm:$0xff] %v4874_v17  ;;  %v4893_v22 = vld [vmem:[%s4868_s17 + $0x30] sm:$0xff]  ;;  %v4897_v23 = vld [vmem:[%s4868_s17 + $0x38] sm:$0xff]  ;;  %v4902_v24 = vld [vmem:[%s4868_s17 + $0x40] sm:$0xff]  ;;  %v439_v40 = vrot.slane %v4874_v17, 4 }
  0x36   : > { %478 = vst [vmem:[#allocation1 + $0x20] ss:$2 sm:$0xff] %v4877_v18  ;;  %v4906_v25 = vld [vmem:[%s4868_s17 + $0x48] sm:$0xff]  ;;  %v4909_v27 = vld [vmem:[%s4868_s17 + $0x60] sm:$0xff]  ;;  %v4918_v31 = vld [vmem:[%s4868_s17 + $0x50] sm:$0xff]  ;;  %v442_v41 = vrot.slane %v4877_v18, 4 }
  0x37   : > { %480 = vst [vmem:[#allocation1 + $0x21] ss:$2 sm:$0xff] %v4881_v19  ;;  %v4913_v29 = vld [vmem:[%s4868_s17 + $0x68] sm:$0xff]  ;;  %v4923_v33 = vld [vmem:[%s4868_s17 + $0x58] sm:$0xff]  ;;  %v4927_v35 = vld [vmem:[%s4868_s17 + $0x70] sm:$0xff]  ;;  %v443_v44 = vrot.slane %v4881_v19, 4 }
  0x38   : > { %474 = vst [vmem:[#allocation1 + $0x10] ss:$2 sm:$0xff] %v4885_v20  ;;  %v4930_v36 = vld [vmem:[%s4868_s17 + $0x78] sm:$0xff]  ;;  %v440_v46 = vrot.slane %v4885_v20, 4  ;;  %v441_v48 = vrot.slane %v4889_v21, 4  ;;  %v446_v52 = vrot.slane %v4902_v24, 4 }
  0x39   : > { %476 = vst [vmem:[#allocation1 + $0x11] ss:$2 sm:$0xff] %v4889_v21  ;;  %v447_v54 = vrot.slane %v4906_v25, 4  ;;  %v448_v57 = vrot.slane %v4918_v31, 4  ;;  %v449_v58 = vrot.slane %v4923_v33, 4  ;;  %v6581_v2 = vrot.slane %v4909_v27, 4 }
  0x3a   : > { %482 = vst [vmem:[#allocation1 + $0x30] ss:$2 sm:$0xff] %v4893_v22  ;;  %v6580_v3 = vrot.slane %v4913_v29, 4  ;;  %v6583_v4 = vrot.slane %v4893_v22, 4  ;;  %v6582_v5 = vrot.slane %v4897_v23, 4  ;;  %v4381_v6 = vpop.eup %4380  ;;  %v452_v8 = vrot.slane %v4927_v35, 4 }
  0x3b   : > { %484 = vst [vmem:[#allocation1 + $0x31] ss:$2 sm:$0xff] %v4897_v23  ;;  %v591_v7 = vmul.f32 32.0, %v4381_v6  ;;  %v6584_v10 = vrot.slane %v4930_v36, 4  ;;  %vm595_vm1 = vweird.f32 %v4381_v6  ;;  %v4727_v14 = vmov 839922192  }
  0x3c   : > { %v485_v26 = vld.sshfl [vmem:[#allocation1] sm:$0xff pattern:$0x75316420]  ;;  %v630_v15 = vunpack.c.l.s4 %v4727_v14 }
  0x3d   : > { %v542_v28 = vsel %vm541_vm0, %v485_v26, 0.0  ;;  %489 = vst [vmem:[#allocation1] ss:$2 sm:$0xff] %v4902_v24  ;;  %v592_v9 = vsub.f32 1.0, %v591_v7  ;;  %v4728_v26 = vmov 1985246804  }
  0x3e   : > { %543 = vadd.xlane.f32.xlu0 %v542_v28  ;;  %v487_v30 = vld.sshfl [vmem:[#allocation1 + $0x20] sm:$0xff pattern:$0x75316420]  ;;  %490 = vst [vmem:[#allocation1 + $0x1] ss:$2 sm:$0xff] %v4906_v25  ;;  %v634_v28 = vunpack.c.l.s4 %v4728_v26 }
  0x3f   : > { %v548_v32 = vsel %vm541_vm0, %v487_v30, 0.0  ;;  %493 = vst [vmem:[#allocation1 + $0x20] ss:$2 sm:$0xff] %v4909_v27  ;;  %v593_v12 = vmul.f32 %v4381_v6, %v592_v9 }
  0x40   : > { %549 = vadd.xlane.f32.xlu1 %v548_v32  ;;  %v486_v34 = vld.sshfl [vmem:[#allocation1 + $0x10] sm:$0xff pattern:$0x75316420]  ;;  %494 = vst [vmem:[#allocation1 + $0x21] ss:$2 sm:$0xff] %v4913_v29 }
  0x41   : > { %491 = vst [vmem:[#allocation1 + $0x10] ss:$2 sm:$0xff] %v4918_v31  ;;  %v545_v39 = vsel %vm541_vm0, %v486_v34, 0.0  ;;  %v594_v13 = vadd.f32 %v4381_v6, %v593_v12 }
  0x42   : > { %v488_v37 = vld.sshfl [vmem:[#allocation1 + $0x30] sm:$0xff pattern:$0x75316420]  ;;  %492 = vst [vmem:[#allocation1 + $0x11] ss:$2 sm:$0xff] %v4923_v33 }
  0x43   : > { %495 = vst [vmem:[#allocation1 + $0x30] ss:$2 sm:$0xff] %v4927_v35  ;;  %v551_v42 = vsel %vm541_vm0, %v488_v37, 0.0  ;;  %v4997_v32 = vsel %vm595_vm1, %v4381_v6, %v594_v13  ;;  %v5000_v37 = vunpack.c.0.s8 %v630_v15 }
  0x44   : > { %496 = vst [vmem:[#allocation1 + $0x31] ss:$2 sm:$0xff] %v4930_v36 }
  0x45   : > { %v497_v43 = vld.sshfl [vmem:[#allocation1] sm:$0xff pattern:$0x75316420] }
  0x46   : > { %546 = vadd.xlane.f32.xlu0 %v545_v39  ;;  %v554_v45 = vsel %vm541_vm0, %v497_v43, 0.0  ;;  %501 = vst [vmem:[#allocation1] ss:$2 sm:$0xff] %v438_v38  ;;  %v5002_v39 = vunpack.c.0.s8 %v634_v28 }
  0x47   : > { %v499_v47 = vld.sshfl [vmem:[#allocation1 + $0x20] sm:$0xff pattern:$0x75316420]  ;;  %555 = vadd.xlane.f32.xlu2 %v554_v45  ;;  %502 = vst [vmem:[#allocation1 + $0x1] ss:$2 sm:$0xff] %v439_v40 }
  0x48   : > { %552 = vadd.xlane.f32.xlu1 %v551_v42  ;;  %505 = vst [vmem:[#allocation1 + $0x20] ss:$2 sm:$0xff] %v442_v41  ;;  %v560_v50 = vsel %vm541_vm0, %v499_v47, 0.0 }
  0x49   : > { %v498_v49 = vld.sshfl [vmem:[#allocation1 + $0x10] sm:$0xff pattern:$0x75316420]  ;;  %506 = vst [vmem:[#allocation1 + $0x21] ss:$2 sm:$0xff] %v443_v44 }
  0x4a   : > { %503 = vst [vmem:[#allocation1 + $0x10] ss:$2 sm:$0xff] %v440_v46  ;;  %v557_v53 = vsel %vm541_vm0, %v498_v49, 0.0 }
  0x4b   : > { %v500_v51 = vld.sshfl [vmem:[#allocation1 + $0x30] sm:$0xff pattern:$0x75316420]  ;;  %504 = vst [vmem:[#allocation1 + $0x11] ss:$2 sm:$0xff] %v441_v48 }
  0x4c   : > { %v563_v55 = vsel %vm541_vm0, %v500_v51, 0.0  ;;  %507 = vst [vmem:[#allocation1 + $0x30] ss:$2 sm:$0xff] %v6583_v4 }
  0x4d   : > { %508 = vst [vmem:[#allocation1 + $0x31] ss:$2 sm:$0xff] %v6582_v5 }
  0x4e   : > { %561 = vadd.xlane.f32.xlu0 %v560_v50  ;;  %v509_v56 = vld.sshfl [vmem:[#allocation1] sm:$0xff pattern:$0x75316420] }
  0x4f   : > { %558 = vadd.xlane.f32.xlu2 %v557_v53  ;;  %513 = vst [vmem:[#allocation1] ss:$2 sm:$0xff] %v446_v52  ;;  %v566_v60 = vsel %vm541_vm0, %v509_v56, 0.0 }
  0x50   : > { %564 = vadd.xlane.f32.xlu1 %v563_v55  ;;  %514 = vst [vmem:[#allocation1 + $0x1] ss:$2 sm:$0xff] %v447_v54  ;;  %v511_v63 = vld.sshfl [vmem:[#allocation1 + $0x20] sm:$0xff pattern:$0x75316420] }
  0x51   : > { %v572_v0 = vsel %vm541_vm0, %v511_v63, 0.0  ;;  %517 = vst [vmem:[#allocation1 + $0x20] ss:$2 sm:$0xff] %v6581_v2 }
  0x52   : > { %v4968_v59 = vld.sshfl [vmem:[#allocation1 + $0x10] sm:$0xff pattern:$0x75316420]  ;;  %518 = vst [vmem:[#allocation1 + $0x21] ss:$2 sm:$0xff] %v6580_v3 }
  0x53   : > { %515 = vst [vmem:[#allocation1 + $0x10] ss:$2 sm:$0xff] %v448_v57 }
  0x54   : > { %516 = vst [vmem:[#allocation1 + $0x11] ss:$2 sm:$0xff] %v449_v58  ;;  %v4991_v11 = vld.sshfl [vmem:[#allocation1 + $0x30] sm:$0xff pattern:$0x75316420] }
  0x55   : > { %519 = vst [vmem:[#allocation1 + $0x30] ss:$2 sm:$0xff] %v452_v8 }
  0x56   : > { %520 = vst [vmem:[#allocation1 + $0x31] ss:$2 sm:$0xff] %v6584_v10 }
  0x58   : > { %567 = vadd.xlane.f32.xlu1 %v566_v60  ;;  %v5016_v60 = vld.sshfl [vmem:[#allocation1] sm:$0xff pattern:$0x75316420] }
  0x59   : > { %v5028_v1 = vld.sshfl [vmem:[#allocation1 + $0x20] sm:$0xff pattern:$0x75316420] }
  0x5b   : > { %v522_v61 = vld.sshfl [vmem:[#allocation1 + $0x10] sm:$0xff pattern:$0x75316420] }
  0x5c   : > { %v581_v62 = vsel %vm541_vm0, %v522_v61, 0.0 }
  0x5d   : > { %v524_v30 = vld.sshfl [vmem:[#allocation1 + $0x30] sm:$0xff pattern:$0x75316420] }
  0x5e   : > { %v587_v34 = vsel %vm541_vm0, %v524_v30, 0.0 }
  0x60   : > { %582 = vadd.xlane.f32.xlu1 %v581_v62 }
  0x68   : > { %573 = vadd.xlane.f32.xlu1 %v572_v0 }
  0x70   : > { %588 = vadd.xlane.f32.xlu1 %v587_v34 }
  0xb1   : > { %v544_v42 = vpop.xlane.xlu0 %543 }
  0xb2   : > { %v597_v43 = vmul.f32 %v4997_v32, %v544_v42 }
  0xb3   : > { %v550_v45 = vpop.xlane.xlu1 %549 }
  0xb4   : > { %v632_v47 = vperm.slane %v597_v43, %v5000_v37  ;;  %v636_v49 = vperm.slane %v597_v43, %v5002_v39  ;;  %v599_v50 = vmul.f32 %v4997_v32, %v550_v45 }
  0xb6   : > { %v5009_v51 = vsub.f32 %v4871_v16, %v632_v47  ;;  %v5012_v53 = vsub.f32 %v4874_v17, %v636_v49  ;;  %v648_v55 = vperm.slane %v599_v50, %v5000_v37  ;;  %v652_v56 = vperm.slane %v599_v50, %v5002_v39 }
  0xb7   : > { %v575_v17 = vsel %vm541_vm0, %v4991_v11, 0.0 }
  0xb8   : > { %v821_v61 = vmul.f32 %v5009_v51, %v5009_v51  ;;  %v822_v62 = vmul.f32 %v5012_v53, %v5012_v53  ;;  %v5023_v63 = vsub.f32 %v4877_v18, %v648_v55  ;;  %v5026_v0 = vsub.f32 %v4881_v19, %v652_v56 }
  0xb9   : > { %v547_v6 = vpop.xlane.xlu0 %546 }
  0xba   : > { %885 = vst [vmem:[#allocation1] ss:$2 sm:$0xff] %v821_v61  ;;  %v825_v7 = vmul.f32 %v5023_v63, %v5023_v63  ;;  %v826_v9 = vmul.f32 %v5026_v0, %v5026_v0  ;;  %v598_v12 = vmul.f32 %v4997_v32, %v547_v6  ;;  %v556_v13 = vpop.xlane.xlu2 %555 }
  0xbb   : > { %887 = vst [vmem:[#allocation1 + $0x1] ss:$2 sm:$0xff] %v822_v62  ;;  %v553_v14 = vpop.xlane.xlu1 %552  ;;  %v601_v15 = vmul.f32 %v4997_v32, %v556_v13 }
  0xbc   : > { %893 = vst [vmem:[#allocation1 + $0x20] ss:$2 sm:$0xff] %v825_v7  ;;  %v640_v26 = vperm.slane %v598_v12, %v5000_v37  ;;  %v644_v28 = vperm.slane %v598_v12, %v5002_v39  ;;  %v600_v30 = vmul.f32 %v4997_v32, %v553_v14 }
  0xbd   : > { %895 = vst [vmem:[#allocation1 + $0x21] ss:$2 sm:$0xff] %v826_v9  ;;  %v664_v34 = vperm.slane %v601_v15, %v5000_v37  ;;  %v668_v42 = vperm.slane %v601_v15, %v5002_v39 }
  0xbe   : > { %v5042_v43 = vsub.f32 %v4885_v20, %v640_v26  ;;  %v5045_v45 = vsub.f32 %v4889_v21, %v644_v28  ;;  %v656_v47 = vperm.slane %v600_v30, %v5000_v37  ;;  %v660_v49 = vperm.slane %v600_v30, %v5002_v39  ;;  %v5191_v20 = vld [vmem:[%s6574_s2] ss:$0 sm:$0xff] }
  0xbf   : > { %v5050_v50 = vsub.f32 %v4902_v24, %v664_v34  ;;  %v5053_v55 = vsub.f32 %v4906_v25, %v668_v42 }
  0xc0   : > { %v823_v56 = vmul.f32 %v5042_v43, %v5042_v43  ;;  %v824_v61 = vmul.f32 %v5045_v45, %v5045_v45  ;;  %v5060_v62 = vsub.f32 %v4893_v22, %v656_v47  ;;  %v5063_v6 = vsub.f32 %v4897_v23, %v660_v49 }
  0xc1   : > { %v562_v7 = vpop.xlane.xlu0 %561  ;;  %v829_v15 = vmul.f32 %v5050_v50, %v5050_v50  ;;  %v830_v34 = vmul.f32 %v5053_v55, %v5053_v55 }
  0xc2   : > { %v900_v9 = vld.sshfl [vmem:[#allocation1] sm:$0xff pattern:$0x75316420]  ;;  %889 = vst [vmem:[#allocation1 + $0x10] ss:$2 sm:$0xff] %v823_v56  ;;  %v827_v12 = vmul.f32 %v5060_v62, %v5060_v62  ;;  %v828_v13 = vmul.f32 %v5063_v6, %v5063_v6  ;;  %v603_v14 = vmul.f32 %v4997_v32, %v562_v7  ;;  %v559_v26 = vpop.xlane.xlu2 %558 }
  0xc3   : > { %891 = vst [vmem:[#allocation1 + $0x11] ss:$2 sm:$0xff] %v824_v61  ;;  %v956_v28 = vsel %vm541_vm0, %v900_v9, 0.0  ;;  %v565_v30 = vpop.xlane.xlu1 %564  ;;  %v602_v42 = vmul.f32 %v4997_v32, %v559_v26 }
  0xc4   : > { %897 = vst [vmem:[#allocation1 + $0x30] ss:$2 sm:$0xff] %v827_v12  ;;  %v680_v47 = vperm.slane %v603_v14, %v5000_v37  ;;  %v684_v49 = vperm.slane %v603_v14, %v5002_v39  ;;  %957 = vadd.xlane.f32.xlu2 %v956_v28  ;;  %v604_v56 = vmul.f32 %v4997_v32, %v565_v30  ;;  %v902_v14 = vld.sshfl [vmem:[#allocation1 + $0x20] sm:$0xff pattern:$0x75316420] }
  0xc5   : > { %899 = vst [vmem:[#allocation1 + $0x31] ss:$2 sm:$0xff] %v828_v13  ;;  %v672_v7 = vperm.slane %v602_v42, %v5000_v37  ;;  %v676_v61 = vperm.slane %v602_v42, %v5002_v39 }
  0xc6   : > { %v5082_v9 = vsub.f32 %v4909_v27, %v680_v47  ;;  %v5085_v3 = vsub.f32 %v4913_v29, %v684_v49  ;;  %v688_v12 = vperm.slane %v604_v56, %v5000_v37  ;;  %v692_v26 = vperm.slane %v604_v56, %v5002_v39  ;;  %904 = vst [vmem:[#allocation1] ss:$2 sm:$0xff] %v829_v15 }
  0xc7   : > { %905 = vst [vmem:[#allocation1 + $0x1] ss:$2 sm:$0xff] %v830_v34  ;;  %v5090_v28 = vsub.f32 %v4918_v31, %v672_v7  ;;  %v5093_v13 = vsub.f32 %v4923_v33, %v676_v61  ;;  %v569_v15 = vsel %vm541_vm0, %v4968_v59, 0.0 }
  0xc8   : > { %v833_v30 = vmul.f32 %v5082_v9, %v5082_v9  ;;  %v834_v42 = vmul.f32 %v5085_v3, %v5085_v3  ;;  %v5100_v47 = vsub.f32 %v4927_v35, %v688_v12  ;;  %v5103_v49 = vsub.f32 %v4930_v36, %v692_v26 }
  0xc9   : > { %v831_v34 = vmul.f32 %v5090_v28, %v5090_v28  ;;  %v832_v26 = vmul.f32 %v5093_v13, %v5093_v13 }
  0xca   : > { %v901_v56 = vld.sshfl [vmem:[#allocation1 + $0x10] sm:$0xff pattern:$0x75316420]  ;;  %908 = vst [vmem:[#allocation1 + $0x20] ss:$2 sm:$0xff] %v833_v30  ;;  %v835_v7 = vmul.f32 %v5100_v47, %v5100_v47  ;;  %v836_v61 = vmul.f32 %v5103_v49, %v5103_v49 }
  0xcb   : > { %909 = vst [vmem:[#allocation1 + $0x21] ss:$2 sm:$0xff] %v834_v42  ;;  %v959_v12 = vsel %vm541_vm0, %v901_v56, 0.0  ;;  %v568_v2 = vpop.xlane.xlu1 %567 }
  0xcc   : > { %v903_v5 = vld.sshfl [vmem:[#allocation1 + $0x30] sm:$0xff pattern:$0x75316420]  ;;  %960 = vadd.xlane.f32.xlu0 %v959_v12  ;;  %570 = vadd.xlane.f32.xlu2 %v569_v15  ;;  %v605_v59 = vmul.f32 %v4997_v32, %v568_v2  ;;  %906 = vst [vmem:[#allocation1 + $0x10] ss:$2 sm:$0xff] %v831_v34  ;;  %v962_v15 = vsel %vm541_vm0, %v902_v14, 0.0 }
  0xcd   : > { %910 = vst [vmem:[#allocation1 + $0x30] ss:$2 sm:$0xff] %v835_v7  ;;  %v578_v7 = vsel %vm541_vm0, %v5016_v60, 0.0 }
  0xce   : > { %911 = vst [vmem:[#allocation1 + $0x31] ss:$2 sm:$0xff] %v836_v61  ;;  %v696_v30 = vperm.slane %v605_v59, %v5000_v37  ;;  %v700_v4 = vperm.slane %v605_v59, %v5002_v39  ;;  %v912_v61 = vld.sshfl [vmem:[#allocation1] sm:$0xff pattern:$0x75316420] }
  0xcf   : > { %907 = vst [vmem:[#allocation1 + $0x11] ss:$2 sm:$0xff] %v832_v26  ;;  %v968_v11 = vsel %vm541_vm0, %v912_v61, 0.0 }
  0xd0   : > { %v5121_v42 = vsub.f32 %v438_v38, %v696_v30  ;;  %v5125_v56 = vsub.f32 %v439_v40, %v700_v4  ;;  %v965_v40 = vsel %vm541_vm0, %v903_v5, 0.0 }
  0xd2   : > { %v914_v12 = vld.sshfl [vmem:[#allocation1 + $0x20] sm:$0xff pattern:$0x75316420]  ;;  %v837_v2 = vmul.f32 %v5121_v42, %v5121_v42  ;;  %v838_v34 = vmul.f32 %v5125_v56, %v5125_v56 }
  0xd3   : > { %v974_v16 = vsel %vm541_vm0, %v914_v12, 0.0  ;;  %v583_v38 = vpop.xlane.xlu1 %582  ;;  %v584_v12 = vsel %vm541_vm0, %v5028_v1, 0.0 }
  0xd4   : > { %916 = vst [vmem:[#allocation1] ss:$2 sm:$0xff] %v837_v2  ;;  %975 = vadd.xlane.f32.xlu1 %v974_v16  ;;  %963 = vadd.xlane.f32.xlu2 %v962_v15 }
  0xd5   : > { %917 = vst [vmem:[#allocation1 + $0x1] ss:$2 sm:$0xff] %v838_v34  ;;  %579 = vadd.xlane.f32.xlu0 %v578_v7  ;;  %v915_v18 = vld.sshfl [vmem:[#allocation1 + $0x30] sm:$0xff pattern:$0x75316420] }
  0xd6   : > { %v977_v19 = vsel %vm541_vm0, %v915_v18, 0.0 }
  0xdb   : > { %v574_v4 = vpop.xlane.xlu1 %573 }
  0xdc   : > { %576 = vadd.xlane.f32.xlu2 %v575_v17  ;;  %v607_v14 = vmul.f32 %v4997_v32, %v574_v4  ;;  %v924_v34 = vld.sshfl [vmem:[#allocation1] sm:$0xff pattern:$0x75316420]  ;;  %v610_v4 = vmul.f32 %v4997_v32, %v583_v38 }
  0xdd   : > { %966 = vadd.xlane.f32.xlu0 %v965_v40  ;;  %v980_v61 = vsel %vm541_vm0, %v924_v34, 0.0  ;;  %v5182_v34 = vld [vmem:[%s6573_s1] ss:$0 sm:$0xff] }
  0xde   : > { %v712_v60 = vperm.slane %v607_v14, %v5000_v37  ;;  %v716_v26 = vperm.slane %v607_v14, %v5002_v39 }
  0xe0   : > { %v5143_v59 = vsub.f32 %v442_v41, %v712_v60  ;;  %v5147_v30 = vsub.f32 %v443_v44, %v716_v26  ;;  %v913_v41 = vld.sshfl [vmem:[#allocation1 + $0x10] sm:$0xff pattern:$0x75316420] }
  0xe1   : > { %v971_v44 = vsel %vm541_vm0, %v913_v41, 0.0 }
  0xe2   : > { %v841_v5 = vmul.f32 %v5143_v59, %v5143_v59  ;;  %v842_v15 = vmul.f32 %v5147_v30, %v5147_v30 }
  0xe3   : > { %v589_v40 = vpop.xlane.xlu1 %588 }
  0xe4   : > { %920 = vst [vmem:[#allocation1 + $0x20] ss:$2 sm:$0xff] %v841_v5  ;;  %969 = vadd.xlane.f32.xlu2 %v968_v11  ;;  %v612_v31 = vmul.f32 %v4997_v32, %v589_v40 }
  0xe5   : > { %921 = vst [vmem:[#allocation1 + $0x21] ss:$2 sm:$0xff] %v842_v15  ;;  %585 = vadd.xlane.f32.xlu0 %v584_v12  ;;  %v736_v15 = vperm.slane %v610_v4, %v5000_v37 }
  0xec   : > { %978 = vadd.xlane.f32.xlu2 %v977_v19  ;;  %v926_v2 = vld.sshfl [vmem:[#allocation1 + $0x20] sm:$0xff pattern:$0x75316420] }
  0xed   : > { %972 = vadd.xlane.f32.xlu0 %v971_v44  ;;  %v986_v7 = vsel %vm541_vm0, %v926_v2, 0.0  ;;  %v740_v44 = vperm.slane %v610_v4, %v5002_v39 }
  0xef   : > { %v5199_v4 = vsub.f32 %v449_v58, %v740_v44  ;;  %v5211_v58 = vrot.slane %v5191_v20, 4 }
  0xf4   : > { %987 = vadd.xlane.f32.xlu2 %v986_v7 }
  0xf5   : > { %981 = vadd.xlane.f32.xlu0 %v980_v61  ;;  %v5186_v61 = vsub.f32 %v448_v57, %v736_v15 }
  0xf7   : > { %v847_v33 = vmul.f32 %v5186_v61, %v5186_v61 }
 0x137   : > { %v958_v1 = vpop.xlane.xlu2 %957 }
 0x138   : > { %v1004_v16 = vmul.f32 %v958_v1, %v4997_v32 }
 0x13a   : > { %v1020_v17 = vadd.f32 1e-05, %v1004_v16 }
 0x13c   : > { %4382 = vrsqrt.f32 %v1020_v17  ;;  %vm1042_vm3 = vweird.f32 %v1020_v17 }
 0x13f   : > { %v961_v14 = vpop.xlane.xlu0 %960  ;;  %v571_v60 = vpop.xlane.xlu2 %570 }
 0x140   : > { %v1005_v26 = vmul.f32 %v961_v14, %v4997_v32  ;;  %v606_v11 = vmul.f32 %v4997_v32, %v571_v60 }
 0x142   : > { %v4383_v5 = vpop.eup %4382  ;;  %v5165_v12 = vadd.f32 1e-05, %v1005_v26  ;;  %v704_v18 = vperm.slane %v606_v11, %v5000_v37  ;;  %v708_v41 = vperm.slane %v606_v11, %v5002_v39  ;;  %v5205_v26 = vrot.slane %v5182_v34, 4 }
 0x143   : > { %v1037_v19 = vmul.f32 %v4383_v5, %v1020_v17  ;;  %vm1043_vm2 = vweird.f32 %v4383_v5 }
 0x144   : > { %4384 = vrsqrt.f32 %v5165_v12  ;;  %v5173_v38 = vsub.f32 %v440_v46, %v704_v18  ;;  %v5177_v2 = vsub.f32 %v441_v48, %v708_v41  ;;  %vm1044_vm4 = vmor %vm1042_vm3, %vm1043_vm2  ;;  %vm1052_vm5 = vweird.f32 %v5165_v12 }
 0x145   : > { %v1038_v7 = vmul.f32 %v4383_v5, %v1037_v19 }
 0x146   : > { %v839_v21 = vmul.f32 %v5173_v38, %v5173_v38  ;;  %v840_v46 = vmul.f32 %v5177_v2, %v5177_v2 }
 0x147   : > { %v1039_v48 = vmul.f32 0.5, %v1038_v7  ;;  %v976_v1 = vpop.xlane.xlu1 %975  ;;  %v964_v16 = vpop.xlane.xlu2 %963 }
 0x148   : > { %918 = vst [vmem:[#allocation1 + $0x10] ss:$2 sm:$0xff] %v839_v21  ;;  %v1010_v57 = vmul.f32 %v976_v1, %v4997_v32  ;;  %v1006_v14 = vmul.f32 %v964_v16, %v4997_v32  ;;  %v580_v60 = vpop.xlane.xlu0 %579  ;;  %v4298_v21 = vld [vmem:[%s6575_s3 + $0x8] sm:$0xff] }
 0x149   : > { %v1040_v11 = vsub.f32 1.5, %v1039_v48  ;;  %919 = vst [vmem:[#allocation1 + $0x11] ss:$2 sm:$0xff] %v840_v46  ;;  %v609_v15 = vmul.f32 %v4997_v32, %v580_v60  ;;  %v848_v46 = vmul.f32 %v5199_v4, %v5199_v4  ;;  %v752_v48 = vperm.slane %v612_v31, %v5000_v37  ;;  %1685 = vmatpush.bf16.msra.mxu0 %v4298_v21 }
 0x14a   : > { %v4385_v18 = vpop.eup %4384  ;;  %v5213_v40 = vadd.f32 1e-05, %v1010_v57  ;;  %v5215_v41 = vadd.f32 1e-05, %v1006_v14 }
 0x14b   : > { %v1041_v19 = vmul.f32 %v4383_v5, %v1040_v11  ;;  %v1047_v44 = vmul.f32 %v4385_v18, %v5165_v12  ;;  %v728_v7 = vperm.slane %v609_v15, %v5000_v37  ;;  %v732_v1 = vperm.slane %v609_v15, %v5002_v39 }
 0x14c   : > { %4386 = vrsqrt.f32 %v5213_v40  ;;  %v756_v11 = vperm.slane %v612_v31, %v5002_v39  ;;  %vm1053_vm6 = vweird.f32 %v4385_v18  ;;  %vm1102_vm8 = vweird.f32 %v5213_v40 }
 0x14d   : > { %v1045_v16 = vsel %vm1044_vm4, %v4383_v5, %v1041_v19  ;;  %v1048_v17 = vmul.f32 %v4385_v18, %v1047_v44  ;;  %4388 = vrsqrt.f32 %v5215_v41  ;;  %v5230_v57 = vsub.f32 %v446_v52, %v728_v7  ;;  %v4297_v5 = vld [vmem:[%s6575_s3] sm:$0xff]  ;;  %vm5261_vm7 = vmor %vm1052_vm5, %vm1053_vm6 }
 0x14e   : > { %v1215_v14 = vperm.slane %v1045_v16, %v5000_v37  ;;  %v1219_v60 = vperm.slane %v1045_v16, %v5002_v39  ;;  %v5237_v10 = vsub.f32 %v447_v54, %v732_v1  ;;  %v5252_v1 = vsub.f32 %v452_v8, %v752_v48  ;;  %1686 = vmatpush.bf16.msra.mxu0 %v4297_v5 }
 0x14f   : > { %v1049_v15 = vmul.f32 0.5, %v1048_v17  ;;  %v845_v24 = vmul.f32 %v5230_v57, %v5230_v57  ;;  %v577_v52 = vpop.xlane.xlu2 %576  ;;  %vm1062_vm10 = vweird.f32 %v5215_v41 }
 0x150   : > { %v1372_v19 = vmul.f32 %v1215_v14, %v5009_v51  ;;  %v1373_v31 = vmul.f32 %v1219_v60, %v5012_v53  ;;  %v925_v44 = vld.sshfl [vmem:[#allocation1 + $0x10] sm:$0xff pattern:$0x75316420]  ;;  %v846_v25 = vmul.f32 %v5237_v10, %v5237_v10  ;;  %v608_v54 = vmul.f32 %v4997_v32, %v577_v52  ;;  %v967_v7 = vpop.xlane.xlu0 %966 }
 0x151   : > { %v1050_v21 = vsub.f32 1.5, %v1049_v15  ;;  %930 = vst [vmem:[#allocation1 + $0x10] ss:$2 sm:$0xff] %v847_v33  ;;  %v1007_v16 = vmul.f32 %v967_v7, %v4997_v32  ;;  %v983_v17 = vsel %vm541_vm0, %v925_v44, 0.0  ;;  %v6588_v14 = vrot.slane %v4930_v36, 4 }
 0x152   : > { %v5256_v51 = vpop.eup %4386  ;;  %931 = vst [vmem:[#allocation1 + $0x11] ss:$2 sm:$0xff] %v848_v46  ;;  %v720_v8 = vperm.slane %v608_v54, %v5000_v37  ;;  %v724_v33 = vperm.slane %v608_v54, %v5002_v39  ;;  %v1410_v60 = vmul.f32 %v5182_v34, %v1372_v19  ;;  %984 = vadd.xlane.f32.xlu1 %v983_v17  ;;  %v6589_v19 = vrot.slane %v4893_v22, 4 }
 0x153   : > { %v5267_v35 = vsub.f32 %v6588_v14, %v756_v11  ;;  %v4389_v48 = vpop.eup %4388  ;;  %v1051_v15 = vmul.f32 %v4385_v18, %v1050_v21  ;;  %v1097_v12 = vmul.f32 %v5256_v51, %v5213_v40  ;;  %928 = vst [vmem:[#allocation1] ss:$2 sm:$0xff] %v845_v24  ;;  %v5275_v52 = vadd.f32 1e-05, %v1007_v16 }
 0x154   : > { %v1411_v36 = vmul.f32 %v5205_v26, %v1373_v31  ;;  %vm1103_vm9 = vweird.f32 %v5256_v51  ;;  %v1057_v46 = vmul.f32 %v4389_v48, %v5215_v41  ;;  %929 = vst [vmem:[#allocation1 + $0x1] ss:$2 sm:$0xff] %v846_v25  ;;  %v5286_v24 = vsub.f32 %v6589_v19, %v720_v8 }
 0x155   : > { %v1055_v11 = vsel %vm5261_vm7, %v4385_v18, %v1051_v15  ;;  %v1098_v5 = vmul.f32 %v5256_v51, %v1097_v12  ;;  %v6590_v44 = vrot.slane %v4897_v23, 4  ;;  %4390 = vrsqrt.f32 %v5275_v52  ;;  %vm5319_vm12 = vmor %vm1102_vm8, %vm1103_vm9 }
 0x156   : > { %v1223_v31 = vperm.slane %v1055_v11, %v5000_v37  ;;  %v1227_v7 = vperm.slane %v1055_v11, %v5002_v39  ;;  %v1058_v21 = vmul.f32 %v4389_v48, %v1057_v46  ;;  %v1448_v25 = vadd.f32 %v5191_v20, %v1410_v60 }
 0x157   : > { %v5290_v54 = vsub.f32 %v6590_v44, %v724_v33  ;;  %v1099_v18 = vmul.f32 0.5, %v1098_v5  ;;  %v843_v16 = vmul.f32 %v5286_v24, %v5286_v24  ;;  %v970_v17 = vpop.xlane.xlu2 %969  ;;  %v1449_v15 = vadd.f32 %v5211_v58, %v1411_v36 }
 0x158   : > { %v1374_v23 = vmul.f32 %v1223_v31, %v5042_v43  ;;  %v1375_v53 = vmul.f32 %v1227_v7, %v5045_v45  ;;  %v1059_v14 = vmul.f32 0.5, %v1058_v21  ;;  %v1008_v8 = vmul.f32 %v970_v17, %v4997_v32  ;;  %v586_v33 = vpop.xlane.xlu0 %585 }
 0x159   : > { %v844_v22 = vmul.f32 %v5290_v54, %v5290_v54  ;;  %v1100_v12 = vsub.f32 1.5, %v1099_v18  ;;  %vm1063_vm11 = vweird.f32 %v4389_v48  ;;  %922 = vst [vmem:[#allocation1 + $0x30] ss:$2 sm:$0xff] %v843_v16  ;;  %v611_v60 = vmul.f32 %v4997_v32, %v586_v33  ;;  %v937_v46 = vld.sshfl [vmem:[#allocation1 + $0x10] sm:$0xff pattern:$0x75316420] }
 0x15a   : > { %v1412_v11 = vmul.f32 %v5182_v34, %v1374_v23  ;;  %v1413_v5 = vmul.f32 %v5205_v26, %v1375_v53  ;;  %v1060_v19 = vsub.f32 1.5, %v1059_v14  ;;  %v5307_v43 = vadd.f32 1e-05, %v1008_v8  ;;  %vm1064_vm13 = vmor %vm1062_vm10, %vm1063_vm11 }
 0x15b   : > { %923 = vst [vmem:[#allocation1 + $0x31] ss:$2 sm:$0xff] %v844_v22  ;;  %v1101_v45 = vmul.f32 %v5256_v51, %v1100_v12  ;;  %v744_v44 = vperm.slane %v611_v60, %v5000_v37  ;;  %v748_v36 = vperm.slane %v611_v60, %v5002_v39  ;;  %v995_v31 = vsel %vm541_vm0, %v937_v46, 0.0  ;;  %v936_v7 = vld.sshfl [vmem:[#allocation1] sm:$0xff pattern:$0x75316420]  ;;  %v4391_v21 = vpop.eup %4390 }
 0x15c   : > { %v1450_v18 = vadd.f32 %v5191_v20, %v1412_v11  ;;  %v1451_v16 = vadd.f32 %v5211_v58, %v1413_v5  ;;  %v1061_v17 = vmul.f32 %v4389_v48, %v1060_v19  ;;  %4392 = vrsqrt.f32 %v5307_v43  ;;  %996 = vadd.xlane.f32.xlu2 %v995_v31  ;;  %1512 = vst [vmem:[#allocation1] ss:$2 sm:$0xff] %v1448_v25 }
 0x15d   : > { %v851_v23 = vmul.f32 %v5252_v1, %v5252_v1  ;;  %v1067_v53 = vmul.f32 %v4391_v21, %v5275_v52  ;;  %1514 = vst [vmem:[#allocation1 + $0x1] ss:$2 sm:$0xff] %v1449_v15  ;;  %v852_v40 = vmul.f32 %v5267_v35, %v5267_v35  ;;  %vm1072_vm14 = vweird.f32 %v5275_v52 }
 0x15e   : > { %v1065_v14 = vsel %vm1064_vm13, %v4389_v48, %v1061_v17  ;;  %v6593_v8 = vrot.slane %v4909_v27, 4  ;;  %1516 = vst [vmem:[#allocation1 + $0x10] ss:$2 sm:$0xff] %v1450_v18  ;;  %v6594_v60 = vrot.slane %v4913_v29, 4  ;;  %v5346_v48 = vsel %vm5319_vm12, %v5256_v51, %v1101_v45 }
 0x15f   : > { %v1231_v25 = vperm.slane %v1065_v14, %v5000_v37  ;;  %v1235_v12 = vperm.slane %v1065_v14, %v5002_v39  ;;  %v1068_v41 = vmul.f32 %v4391_v21, %v1067_v53  ;;  %1518 = vst [vmem:[#allocation1 + $0x11] ss:$2 sm:$0xff] %v1451_v16  ;;  %v979_v15 = vpop.xlane.xlu2 %978  ;;  %vm1073_vm15 = vweird.f32 %v4391_v21 }
 0x160   : > { %v5335_v33 = vsub.f32 %v6593_v8, %v744_v44  ;;  %v5341_v46 = vsub.f32 %v6594_v60, %v748_v36  ;;  %v992_v11 = vsel %vm541_vm0, %v936_v7, 0.0  ;;  %v973_v5 = vpop.xlane.xlu0 %972  ;;  %v1011_v51 = vmul.f32 %v979_v15, %v4997_v32  ;;  %vm1074_vm1 = vmor %vm1072_vm14, %vm1073_vm15 }
 0x161   : > { %v1376_v19 = vmul.f32 %v1231_v25, %v5023_v63  ;;  %v1377_v29 = vmul.f32 %v1235_v12, %v5026_v0  ;;  %v1069_v36 = vmul.f32 0.5, %v1068_v41  ;;  %993 = vadd.xlane.f32.xlu1 %v992_v11  ;;  %v1009_v45 = vmul.f32 %v973_v5, %v4997_v32 }
 0x162   : > { %v849_v27 = vmul.f32 %v5335_v33, %v5335_v33  ;;  %v927_v44 = vld.sshfl [vmem:[#allocation1 + $0x30] sm:$0xff pattern:$0x75316420]  ;;  %v850_v31 = vmul.f32 %v5341_v46, %v5341_v46  ;;  %v4393_v18 = vpop.eup %4392  ;;  %v1263_v63 = vperm.slane %v5346_v48, %v5000_v37  ;;  %v1267_v0 = vperm.slane %v5346_v48, %v5002_v39 }
 0x163   : > { %934 = vst [vmem:[#allocation1 + $0x30] ss:$2 sm:$0xff] %v851_v23  ;;  %v1070_v16 = vsub.f32 1.5, %v1069_v36  ;;  %v1077_v7 = vmul.f32 %v4393_v18, %v5307_v43  ;;  %vm1082_vm2 = vweird.f32 %v5307_v43  ;;  %v5366_v22 = vadd.f32 1e-05, %v1011_v51 }
 0x164   : > { %935 = vst [vmem:[#allocation1 + $0x31] ss:$2 sm:$0xff] %v852_v40  ;;  %v1414_v17 = vmul.f32 %v5182_v34, %v1376_v19  ;;  %v1415_v23 = vmul.f32 %v5205_v26, %v1377_v29  ;;  %v1527_v14 = vld.sshfl [vmem:[#allocation1] sm:$0xff pattern:$0x75316420]  ;;  %vm1083_vm3 = vweird.f32 %v4393_v18  ;;  %v989_v52 = vsel %vm541_vm0, %v927_v44, 0.0 }
 0x165   : > { %932 = vst [vmem:[#allocation1 + $0x20] ss:$2 sm:$0xff] %v849_v27  ;;  %v1071_v53 = vmul.f32 %v4391_v21, %v1070_v16  ;;  %v1078_v40 = vmul.f32 %v4393_v18, %v1077_v7  ;;  %4394 = vrsqrt.f32 %v5366_v22  ;;  %v5371_v8 = vadd.f32 1e-05, %v1009_v45  ;;  %990 = vadd.xlane.f32.xlu0 %v989_v52  ;;  %vm1084_vm4 = vmor %vm1082_vm2, %vm1083_vm3 }
 0x166   : > { %933 = vst [vmem:[#allocation1 + $0x21] ss:$2 sm:$0xff] %v850_v31  ;;  %v1528_v25 = vld.sshfl [vmem:[#allocation1 + $0x10] sm:$0xff pattern:$0x75316420]  ;;  %v1583_v15 = vpack.c.bf16 %v1527_v14, %v1527_v14  ;;  %v1384_v27 = vmul.f32 %v1263_v63, %v5082_v9  ;;  %v1452_v29 = vadd.f32 %v5191_v20, %v1414_v17  ;;  %v1453_v7 = vadd.f32 %v5211_v58, %v1415_v23 }
 0x167   : > { %v1075_v12 = vsel %vm1074_vm1, %v4391_v21, %v1071_v53  ;;  %v1079_v41 = vmul.f32 0.5, %v1078_v40  ;;  %v988_v60 = vpop.xlane.xlu2 %987  ;;  %v1584_v48 = vpack.c.bf16 %v1528_v25, %v1528_v25  ;;  %4396 = vrsqrt.f32 %v5371_v8 }
 0x168   : > { %v1239_v11 = vperm.slane %v1075_v12, %v5000_v37  ;;  %v1243_v5 = vperm.slane %v1075_v12, %v5002_v39  ;;  %v982_v19 = vpop.xlane.xlu0 %981  ;;  %v1014_v44 = vmul.f32 %v988_v60, %v4997_v32  ;;  %v1619_v9 = vunpack.c.l.b16 %v1583_v15 }
 0x169   : > { %v1080_v36 = vsub.f32 1.5, %v1079_v41  ;;  %v1012_v21 = vmul.f32 %v982_v19, %v4997_v32  ;;  %v1620_v16 = vunpack.c.l.b16 %v1584_v48  ;;  %v1385_v25 = vmul.f32 %v1267_v0, %v5085_v3 }
 0x16a   : > { %v1378_v51 = vmul.f32 %v1239_v11, %v5060_v62  ;;  %v1379_v45 = vmul.f32 %v1243_v5, %v5063_v6  ;;  %v5387_v17 = vadd.f32 1e-05, %v1014_v44  ;;  %v1422_v5 = vmul.f32 %v5182_v34, %v1384_v27 }
 0x16b   : > { %v939_v31 = vld.sshfl [vmem:[#allocation1 + $0x30] sm:$0xff pattern:$0x75316420]  ;;  %v1081_v63 = vmul.f32 %v4393_v18, %v1080_v36  ;;  %v4395_v40 = vpop.eup %4394  ;;  %v5392_v52 = vadd.f32 1e-05, %v1012_v21  ;;  %v1635_v43 = vpack.c.b16 %v1620_v16, %v1619_v9  ;;  %vm1112_vm5 = vweird.f32 %v5366_v22 }
 0x16c   : > { %v1001_v53 = vsel %vm541_vm0, %v939_v31, 0.0  ;;  %v1416_v14 = vmul.f32 %v5182_v34, %v1378_v51  ;;  %v1417_v62 = vmul.f32 %v5205_v26, %v1379_v45  ;;  %v1107_v23 = vmul.f32 %v4395_v40, %v5366_v22 }
 0x16d   : > { %1002 = vadd.xlane.f32.xlu1 %v1001_v53  ;;  %v938_v6 = vld.sshfl [vmem:[#allocation1 + $0x20] sm:$0xff pattern:$0x75316420]  ;;  %v1085_v12 = vsel %vm1084_vm4, %v4393_v18, %v1081_v63  ;;  %4398 = vrsqrt.f32 %v5387_v17  ;;  %v4397_v41 = vpop.eup %4396  ;;  %4187 = vmatmul.msk.bf16.vlgmr.msra.gmra.mxu0 %vm541_vm0, %v1635_v43  ;;  %vm1113_vm6 = vweird.f32 %v4395_v40  ;;  %v1423_v44 = vmul.f32 %v5205_v26, %v1385_v25 }
 0x16e   : > { %1520 = vst [vmem:[#allocation1 + $0x20] ss:$2 sm:$0xff] %v1452_v29  ;;  %v1454_v60 = vadd.f32 %v5191_v20, %v1416_v14  ;;  %v1455_v15 = vadd.f32 %v5211_v58, %v1417_v62  ;;  %v1247_v48 = vperm.slane %v1085_v12, %v5000_v37  ;;  %v1251_v11 = vperm.slane %v1085_v12, %v5002_v39  ;;  %vm1114_vm9 = vmor %vm1112_vm5, %vm1113_vm6 }
 0x16f   : > { %1522 = vst [vmem:[#allocation1 + $0x21] ss:$2 sm:$0xff] %v1453_v7  ;;  %v1108_v19 = vmul.f32 %v4395_v40, %v1107_v23  ;;  %v1087_v3 = vmul.f32 %v4397_v41, %v5371_v8  ;;  %4400 = vrsqrt.f32 %v5392_v52  ;;  %v998_v27 = vsel %vm541_vm0, %v938_v6, 0.0 }
 0x170   : > { %1524 = vst [vmem:[#allocation1 + $0x30] ss:$2 sm:$0xff] %v1454_v60  ;;  %v1380_v18 = vmul.f32 %v1247_v48, %v5050_v50  ;;  %v1381_v0 = vmul.f32 %v1251_v11, %v5053_v55  ;;  %999 = vadd.xlane.f32.xlu0 %v998_v27  ;;  %vm1092_vm7 = vweird.f32 %v5371_v8  ;;  %vm1093_vm8 = vweird.f32 %v4397_v41 }
 0x171   : > { %1526 = vst [vmem:[#allocation1 + $0x31] ss:$2 sm:$0xff] %v1455_v15  ;;  %v1109_v29 = vmul.f32 0.5, %v1108_v19  ;;  %v1088_v36 = vmul.f32 %v4397_v41, %v1087_v3  ;;  %v1460_v7 = vadd.f32 %v5191_v20, %v1422_v5  ;;  %v1461_v6 = vadd.f32 %v5211_v58, %v1423_v44  ;;  %vm5420_vm10 = vmor %vm1092_vm7, %vm1093_vm8 }
 0x172   : > { %v1418_v21 = vmul.f32 %v5182_v34, %v1380_v18  ;;  %v1419_v31 = vmul.f32 %v5205_v26, %v1381_v0  ;;  %vm1142_vm11 = vweird.f32 %v5387_v17  ;;  %vm1122_vm12 = vweird.f32 %v5392_v52 }
 0x173   : > { %v4399_v50 = vpop.eup %4398  ;;  %v1110_v51 = vsub.f32 1.5, %v1109_v29  ;;  %v1089_v55 = vmul.f32 0.5, %v1088_v36 }
 0x174   : > { %v1456_v45 = vadd.f32 %v5191_v20, %v1418_v21  ;;  %v1457_v9 = vadd.f32 %v5211_v58, %v1419_v31  ;;  %v1137_v16 = vmul.f32 %v4399_v50, %v5387_v17  ;;  %vm1143_vm13 = vweird.f32 %v4399_v50 }
 0x175   : > { %v1111_v63 = vmul.f32 %v4395_v40, %v1110_v51  ;;  %v1090_v53 = vsub.f32 1.5, %v1089_v55  ;;  %v4401_v62 = vpop.eup %4400  ;;  %vm1144_vm15 = vmor %vm1142_vm11, %vm1143_vm13 }
 0x176   : > { %v1529_v14 = vld.sshfl [vmem:[#allocation1 + $0x20] sm:$0xff pattern:$0x75316420]  ;;  %v1138_v43 = vmul.f32 %v4399_v50, %v1137_v16  ;;  %1531 = vst [vmem:[#allocation1] ss:$2 sm:$0xff] %v1456_v45  ;;  %v1117_v12 = vmul.f32 %v4401_v62, %v5392_v52  ;;  %vm1123_vm14 = vweird.f32 %v4401_v62 }
 0x177   : > { %v1115_v22 = vsel %vm1114_vm9, %v4395_v40, %v1111_v63  ;;  %v1091_v25 = vmul.f32 %v4397_v41, %v1090_v53  ;;  %1532 = vst [vmem:[#allocation1 + $0x1] ss:$2 sm:$0xff] %v1457_v9  ;;  %v1585_v23 = vpack.c.bf16 %v1529_v14, %v1529_v14  ;;  %vm1124_vm1 = vmor %vm1122_vm12, %vm1123_vm14 }
 0x178   : > { %v1271_v60 = vperm.slane %v1115_v22, %v5000_v37  ;;  %v1275_v15 = vperm.slane %v1115_v22, %v5002_v39  ;;  %v1139_v48 = vmul.f32 0.5, %v1138_v43  ;;  %v1530_v11 = vld.sshfl [vmem:[#allocation1 + $0x30] sm:$0xff pattern:$0x75316420]  ;;  %1535 = vst [vmem:[#allocation1 + $0x20] ss:$2 sm:$0xff] %v1460_v7  ;;  %v1118_v19 = vmul.f32 %v4401_v62, %v1117_v12 }
 0x179   : > { %v1095_v5 = vsel %vm5420_vm10, %v4397_v41, %v1091_v25  ;;  %v1586_v3 = vpack.c.bf16 %v1530_v11, %v1530_v11  ;;  %1536 = vst [vmem:[#allocation1 + $0x21] ss:$2 sm:$0xff] %v1461_v6  ;;  %v1621_v44 = vunpack.c.l.b16 %v1585_v23 }
 0x17a   : > { %v1386_v40 = vmul.f32 %v1271_v60, %v5100_v47  ;;  %v1387_v18 = vmul.f32 %v1275_v15, %v5103_v49  ;;  %v1255_v0 = vperm.slane %v1095_v5, %v5000_v37  ;;  %v1259_v29 = vperm.slane %v1095_v5, %v5002_v39 }
 0x17b   : > { %v1140_v36 = vsub.f32 1.5, %v1139_v48  ;;  %v1119_v27 = vmul.f32 0.5, %v1118_v19  ;;  %v1622_v21 = vunpack.c.l.b16 %v1586_v3 }
 0x17c   : > { %v1424_v31 = vmul.f32 %v5182_v34, %v1386_v40  ;;  %v1425_v41 = vmul.f32 %v5205_v26, %v1387_v18  ;;  %v1382_v51 = vmul.f32 %v1255_v0, %v5090_v28  ;;  %v1383_v55 = vmul.f32 %v1259_v29, %v5093_v13 }
 0x17d   : > { %v1141_v47 = vmul.f32 %v4399_v50, %v1140_v36  ;;  %v1120_v49 = vsub.f32 1.5, %v1119_v27  ;;  %v1636_v45 = vpack.c.b16 %v1622_v21, %v1621_v44 }
 0x17e   : > { %v1462_v9 = vadd.f32 %v5191_v20, %v1424_v31  ;;  %v1463_v16 = vadd.f32 %v5211_v58, %v1425_v41  ;;  %v1420_v7 = vmul.f32 %v5182_v34, %v1382_v51  ;;  %v1421_v63 = vmul.f32 %v5205_v26, %v1383_v55  ;;  %v1539_v48 = vld.sshfl [vmem:[#allocation1] sm:$0xff pattern:$0x75316420] }
 0x17f   : > { %v1145_v28 = vsel %vm1144_vm15, %v4399_v50, %v1141_v47  ;;  %v1121_v13 = vmul.f32 %v4401_v62, %v1120_v49  ;;  %4188 = vmatmul.msk.bf16.gmra.mxu0 %vm541_vm0, %v1636_v45  ;;  %v1587_v3 = vpack.c.bf16 %v1539_v48, %v1539_v48 }
 0x180   : > { %v1458_v17 = vadd.f32 %v5191_v20, %v1420_v7  ;;  %v1459_v53 = vadd.f32 %v5211_v58, %v1421_v63  ;;  %v1295_v14 = vperm.slane %v1145_v28, %v5000_v37  ;;  %v1299_v6 = vperm.slane %v1145_v28, %v5002_v39  ;;  %1537 = vst [vmem:[#allocation1 + $0x30] ss:$2 sm:$0xff] %v1462_v9  ;;  %v1541_v11 = vld.sshfl [vmem:[#allocation1 + $0x20] sm:$0xff pattern:$0x75316420] }
 0x181   : > { %v1125_v8 = vsel %vm1124_vm1, %v4401_v62, %v1121_v13  ;;  %1538 = vst [vmem:[#allocation1 + $0x31] ss:$2 sm:$0xff] %v1463_v16  ;;  %v1623_v40 = vunpack.c.l.b16 %v1587_v3  ;;  %v1589_v27 = vpack.c.bf16 %v1541_v11, %v1541_v11 }
 0x182   : > { %v1392_v43 = vmul.f32 %v1295_v14, %v5143_v59  ;;  %v1393_v52 = vmul.f32 %v1299_v6, %v5147_v30  ;;  %v1279_v50 = vperm.slane %v1125_v8, %v5000_v37  ;;  %v1283_v22 = vperm.slane %v1125_v8, %v5002_v39  ;;  %1533 = vst [vmem:[#allocation1 + $0x10] ss:$2 sm:$0xff] %v1458_v17 }
 0x183   : > { %1534 = vst [vmem:[#allocation1 + $0x11] ss:$2 sm:$0xff] %v1459_v53  ;;  %v1625_v21 = vunpack.c.l.b16 %v1589_v27 }
 0x184   : > { %v1430_v25 = vmul.f32 %v5182_v34, %v1392_v43  ;;  %v1431_v12 = vmul.f32 %v5205_v26, %v1393_v52  ;;  %v1388_v23 = vmul.f32 %v1279_v50, %v5121_v42  ;;  %v1389_v60 = vmul.f32 %v1283_v22, %v5125_v56 }
 0x186   : > { %v1468_v62 = vadd.f32 %v5191_v20, %v1430_v25  ;;  %v1469_v59 = vadd.f32 %v5211_v58, %v1431_v12  ;;  %v1426_v30 = vmul.f32 %v5182_v34, %v1388_v23  ;;  %v1427_v15 = vmul.f32 %v5205_v26, %v1389_v60 }
 0x188   : > { %v1464_v5 = vadd.f32 %v5191_v20, %v1426_v30  ;;  %v1465_v19 = vadd.f32 %v5211_v58, %v1427_v15  ;;  %1547 = vst [vmem:[#allocation1 + $0x20] ss:$2 sm:$0xff] %v1468_v62  ;;  %v1542_v29 = vld.sshfl [vmem:[#allocation1 + $0x30] sm:$0xff pattern:$0x75316420] }
 0x189   : > { %1548 = vst [vmem:[#allocation1 + $0x21] ss:$2 sm:$0xff] %v1469_v59  ;;  %v1590_v36 = vpack.c.bf16 %v1542_v29, %v1542_v29 }
 0x18a   : > { %v1540_v42 = vld.sshfl [vmem:[#allocation1 + $0x10] sm:$0xff pattern:$0x75316420]  ;;  %1543 = vst [vmem:[#allocation1] ss:$2 sm:$0xff] %v1464_v5 }
 0x18b   : > { %v1588_v56 = vpack.c.bf16 %v1540_v42, %v1540_v42  ;;  %1544 = vst [vmem:[#allocation1 + $0x1] ss:$2 sm:$0xff] %v1465_v19  ;;  %v1626_v44 = vunpack.c.l.b16 %v1590_v36 }
 0x18d   : > { %v1624_v18 = vunpack.c.l.b16 %v1588_v56  ;;  %v1638_v31 = vpack.c.b16 %v1626_v44, %v1625_v21 }
 0x18f   : > { %v1637_v0 = vpack.c.b16 %v1624_v18, %v1623_v40 }
 0x191   : > { %4189 = vmatmul.msk.bf16.gmra.mxu0 %vm541_vm0, %v1637_v0 }
 0x1a1   : > { %4190 = vmatmul.msk.bf16.gmra.mxu0 %vm541_vm0, %v1638_v31 }
 0x1c5   : > { %v985_v41 = vpop.xlane.xlu1 %984 }
 0x1c6   : > { %v1013_v51 = vmul.f32 %v985_v41, %v4997_v32  ;;  %v1551_v41 = vld.sshfl [vmem:[#allocation1] sm:$0xff pattern:$0x75316420] }
 0x1c8   : > { %v1029_v55 = vadd.f32 1e-05, %v1013_v51 }
 0x1ca   : > { %4402 = vrsqrt.f32 %v1029_v55  ;;  %vm1132_vm3 = vweird.f32 %v1029_v55 }
 0x1cf   : > { %v997_v47 = vpop.xlane.xlu2 %996 }
 0x1d0   : > { %v1017_v49 = vmul.f32 %v997_v47, %v4997_v32  ;;  %v4403_v45 = vpop.eup %4402 }
 0x1d1   : > { %v1127_v9 = vmul.f32 %v4403_v45, %v1029_v55  ;;  %vm1133_vm2 = vweird.f32 %v4403_v45 }
 0x1d2   : > { %v1033_v16 = vadd.f32 1e-05, %v1017_v49  ;;  %vm1134_vm4 = vmor %vm1132_vm3, %vm1133_vm2 }
 0x1d3   : > { %v1128_v7 = vmul.f32 %v4403_v45, %v1127_v9 }
 0x1d4   : > { %4404 = vrsqrt.f32 %v1033_v16  ;;  %v994_v63 = vpop.xlane.xlu1 %993  ;;  %vm1172_vm6 = vweird.f32 %v1033_v16 }
 0x1d5   : > { %v1016_v28 = vmul.f32 %v994_v63, %v4997_v32  ;;  %v1129_v13 = vmul.f32 0.5, %v1128_v7 }
 0x1d7   : > { %v1032_v17 = vadd.f32 1e-05, %v1016_v28  ;;  %v1130_v53 = vsub.f32 1.5, %v1129_v13 }
 0x1d8   : > { %v991_v8 = vpop.xlane.xlu0 %990 }
 0x1d9   : > { %4406 = vrsqrt.f32 %v1032_v17  ;;  %v1131_v6 = vmul.f32 %v4403_v45, %v1130_v53  ;;  %v1015_v52 = vmul.f32 %v991_v8, %v4997_v32  ;;  %vm1162_vm8 = vweird.f32 %v1032_v17 }
 0x1da   : > { %v4405_v14 = vpop.eup %4404 }
 0x1db   : > { %v1167_v43 = vmul.f32 %v4405_v14, %v1033_v16  ;;  %v1135_v50 = vsel %vm1134_vm4, %v4403_v45, %v1131_v6  ;;  %v5476_v23 = vadd.f32 1e-05, %v1015_v52  ;;  %vm1173_vm5 = vweird.f32 %v4405_v14 }
 0x1dc   : > { %v1287_v22 = vperm.slane %v1135_v50, %v5000_v37  ;;  %v1291_v25 = vperm.slane %v1135_v50, %v5002_v39  ;;  %vm1174_vm7 = vmor %vm1172_vm6, %vm1173_vm5  ;;  %v1591_v16 = vpack.c.bf16 %v1551_v41, %v1551_v41  ;;  %vm1963_vm5 = vcmask 523264  }
 0x1dd   : > { %v1168_v12 = vmul.f32 %v4405_v14, %v1167_v43  ;;  %4408 = vrsqrt.f32 %v5476_v23  ;;  %vm1152_vm12 = vweird.f32 %v5476_v23  ;;  %vm2660_vm6 = vcmask 1043456  }
 0x1de   : > { %v1390_v62 = vmul.f32 %v1287_v22, %v5173_v38  ;;  %v1391_v59 = vmul.f32 %v1291_v25, %v5177_v2 }
 0x1df   : > { %v4407_v60 = vpop.eup %4406  ;;  %v1169_v30 = vmul.f32 0.5, %v1168_v12 }
 0x1e0   : > { %v1003_v15 = vpop.xlane.xlu1 %1002  ;;  %v1157_v48 = vmul.f32 %v4407_v60, %v1032_v17  ;;  %v1428_v5 = vmul.f32 %v5182_v34, %v1390_v62  ;;  %v1429_v19 = vmul.f32 %v5205_v26, %v1391_v59  ;;  %vm1163_vm9 = vweird.f32 %v4407_v60 }
 0x1e1   : > { %v1019_v11 = vmul.f32 %v1003_v15, %v4997_v32  ;;  %v1170_v3 = vsub.f32 1.5, %v1169_v30  ;;  %vm1164_vm10 = vmor %vm1162_vm8, %vm1163_vm9  ;;  %v1627_v30 = vunpack.c.l.b16 %v1591_v16  ;;  %v1553_v16 = vld.sshfl [vmem:[#allocation1 + $0x20] sm:$0xff pattern:$0x75316420] }
 0x1e2   : > { %v1158_v42 = vmul.f32 %v4407_v60, %v1157_v48  ;;  %v1466_v38 = vadd.f32 %v5191_v20, %v1428_v5  ;;  %v1467_v2 = vadd.f32 %v5211_v58, %v1429_v19 }
 0x1e3   : > { %v5484_v56 = vadd.f32 1e-05, %v1019_v11  ;;  %v1171_v40 = vmul.f32 %v4405_v14, %v1170_v3  ;;  %v4409_v0 = vpop.eup %4408  ;;  %v1000_v36 = vpop.xlane.xlu0 %999 }
 0x1e4   : > { %v1159_v18 = vmul.f32 0.5, %v1158_v42  ;;  %1545 = vst [vmem:[#allocation1 + $0x10] ss:$2 sm:$0xff] %v1466_v38  ;;  %v1147_v31 = vmul.f32 %v4409_v0, %v5476_v23  ;;  %v1018_v51 = vmul.f32 %v1000_v36, %v4997_v32  ;;  %vm1153_vm11 = vweird.f32 %v4409_v0 }
 0x1e5   : > { %4410 = vrsqrt.f32 %v5484_v56  ;;  %v1175_v29 = vsel %vm1174_vm7, %v4405_v14, %v1171_v40  ;;  %1546 = vst [vmem:[#allocation1 + $0x11] ss:$2 sm:$0xff] %v1467_v2  ;;  %vm1154_vm13 = vmor %vm1152_vm12, %vm1153_vm11  ;;  %vm1192_vm14 = vweird.f32 %v5484_v56  ;;  %vm3954_vm7 = vcmask 257024  }
 0x1e6   : > { %v1319_v27 = vperm.slane %v1175_v29, %v5000_v37  ;;  %v1323_v44 = vperm.slane %v1175_v29, %v5002_v39  ;;  %v1160_v21 = vsub.f32 1.5, %v1159_v18  ;;  %v1148_v45 = vmul.f32 %v4409_v0, %v1147_v31 }
 0x1e7   : > { %v5495_v9 = vadd.f32 1e-05, %v1018_v51 }
 0x1e8   : > { %v1398_v55 = vmul.f32 %v1319_v27, %v5186_v61  ;;  %v1399_v47 = vmul.f32 %v1323_v44, %v5199_v4  ;;  %v1161_v49 = vmul.f32 %v4407_v60, %v1160_v21  ;;  %v1149_v17 = vmul.f32 0.5, %v1148_v45 }
 0x1e9   : > { %4412 = vrsqrt.f32 %v5495_v9  ;;  %vm1182_vm2 = vweird.f32 %v5495_v9 }
 0x1ea   : > { %v1436_v63 = vmul.f32 %v5182_v34, %v1398_v55  ;;  %v1437_v28 = vmul.f32 %v5205_v26, %v1399_v47  ;;  %v1165_v13 = vsel %vm1164_vm10, %v4407_v60, %v1161_v49  ;;  %v1150_v6 = vsub.f32 1.5, %v1149_v17  ;;  %v5505_v8 = vpop.f32.mrf.mxu0 }
 0x1eb   : > { %v4411_v7 = vpop.eup %4410  ;;  %v1311_v53 = vperm.slane %v1165_v13, %v5000_v37  ;;  %v1315_v32 = vperm.slane %v1165_v13, %v5002_v39  ;;  %v1593_v13 = vpack.c.bf16 %v1553_v16, %v1553_v16 }
 0x1ec   : > { %v1187_v61 = vmul.f32 %v4411_v7, %v5484_v56  ;;  %v1474_v4 = vadd.f32 %v5191_v20, %v1436_v63  ;;  %v1475_v14 = vadd.f32 %v5211_v58, %v1437_v28  ;;  %v1552_v22 = vld.sshfl [vmem:[#allocation1 + $0x10] sm:$0xff pattern:$0x75316420]  ;;  %v1151_v25 = vmul.f32 %v4409_v0, %v1150_v6 }
 0x1ed   : > { %v1396_v43 = vmul.f32 %v1311_v53, %v5230_v57  ;;  %v1397_v52 = vmul.f32 %v1315_v32, %v5237_v10  ;;  %v1592_v12 = vpack.c.bf16 %v1552_v22, %v1552_v22  ;;  %vm1193_vm15 = vweird.f32 %v4411_v7 }
 0x1ee   : > { %v1188_v50 = vmul.f32 %v4411_v7, %v1187_v61  ;;  %1557 = vst [vmem:[#allocation1 + $0x10] ss:$2 sm:$0xff] %v1474_v4  ;;  %v1155_v15 = vsel %vm1154_vm13, %v4409_v0, %v1151_v25  ;;  %vm1194_vm1 = vmor %vm1192_vm14, %vm1193_vm15  ;;  %v5550_v4 = vld [vmem:[%s6576_s4 + $0x18] sm:$0xff] }
 0x1ef   : > { %v1434_v60 = vmul.f32 %v5182_v34, %v1396_v43  ;;  %v1435_v62 = vmul.f32 %v5205_v26, %v1397_v52  ;;  %1558 = vst [vmem:[#allocation1 + $0x11] ss:$2 sm:$0xff] %v1475_v14  ;;  %v1628_v10 = vunpack.c.l.b16 %v1592_v12  ;;  %v1303_v48 = vperm.slane %v1155_v15, %v5000_v37  ;;  %v4413_v5 = vpop.eup %4412 }
 0x1f0   : > { %v1189_v59 = vmul.f32 0.5, %v1188_v50  ;;  %v1307_v11 = vperm.slane %v1155_v15, %v5002_v39  ;;  %v1177_v56 = vmul.f32 %v4413_v5, %v5495_v9  ;;  %vm1183_vm3 = vweird.f32 %v4413_v5  ;;  %v5539_v9 = vld [vmem:[%s6576_s4 + $0x10] sm:$0xff]  ;;  %v5565_v15 = vld [vmem:[%s6576_s4 + $0x20] sm:$0xff] }
 0x1f1   : > { %v1472_v57 = vadd.f32 %v5191_v20, %v1434_v60  ;;  %v1473_v23 = vadd.f32 %v5211_v58, %v1435_v62  ;;  %v1639_v3 = vpack.c.b16 %v1628_v10, %v1627_v30  ;;  %v1394_v42 = vmul.f32 %v1303_v48, %v5286_v24  ;;  %vm1184_vm4 = vmor %vm1182_vm2, %vm1183_vm3  ;;  %v5571_v48 = vld [vmem:[%s6576_s4 + $0x28] sm:$0xff] }
 0x1f2   : > { %v1190_v19 = vsub.f32 1.5, %v1189_v59  ;;  %v1395_v38 = vmul.f32 %v1307_v11, %v5290_v54  ;;  %v5521_v40 = vpop.f32.mrf.mxu0  ;;  %v1178_v29 = vmul.f32 %v4413_v5, %v1177_v56  ;;  %v1629_v43 = vunpack.c.l.b16 %v1593_v13 }
 0x1f3   : > { %1555 = vst [vmem:[#allocation1] ss:$2 sm:$0xff] %v1472_v57  ;;  %4191 = vmatmul.msk.bf16.gmra.mxu0 %vm541_vm0, %v1639_v3  ;;  %v1432_v18 = vmul.f32 %v5182_v34, %v1394_v42 }
 0x1f4   : > { %v1191_v2 = vmul.f32 %v4411_v7, %v1190_v19  ;;  %1556 = vst [vmem:[#allocation1 + $0x1] ss:$2 sm:$0xff] %v1473_v23  ;;  %v1433_v0 = vmul.f32 %v5205_v26, %v1395_v38  ;;  %v1179_v21 = vmul.f32 0.5, %v1178_v29 }
 0x1f5   : > { %v1470_v24 = vadd.f32 %v5191_v20, %v1432_v18 }
 0x1f6   : > { %v1195_v36 = vsel %vm1194_vm1, %v4411_v7, %v1191_v2  ;;  %v1471_v54 = vadd.f32 %v5211_v58, %v1433_v0  ;;  %v1180_v51 = vsub.f32 1.5, %v1179_v21  ;;  %v1564_v59 = vld.sshfl [vmem:[#allocation1 + $0x10] sm:$0xff pattern:$0x75316420] }
 0x1f7   : > { %v1335_v27 = vperm.slane %v1195_v36, %v5000_v37  ;;  %v1339_v44 = vperm.slane %v1195_v36, %v5002_v39  ;;  %1549 = vst [vmem:[#allocation1 + $0x30] ss:$2 sm:$0xff] %v1470_v24  ;;  %v1596_v30 = vpack.c.bf16 %v1564_v59, %v1564_v59 }
 0x1f8   : > { %1550 = vst [vmem:[#allocation1 + $0x31] ss:$2 sm:$0xff] %v1471_v54  ;;  %v1181_v49 = vmul.f32 %v4413_v5, %v1180_v51  ;;  %v5582_v54 = vld [vmem:[%s6576_s4 + $0x30] sm:$0xff] }
 0x1f9   : > { %v1402_v31 = vmul.f32 %v1335_v27, %v5252_v1  ;;  %v1403_v41 = vmul.f32 %v1339_v44, %v5267_v35  ;;  %v1632_v57 = vunpack.c.l.b16 %v1596_v30 }
 0x1fa   : > { %v1185_v63 = vsel %vm1184_vm4, %v4413_v5, %v1181_v49 }
 0x1fb   : > { %v1440_v55 = vmul.f32 %v5182_v34, %v1402_v31  ;;  %v1441_v47 = vmul.f32 %v5205_v26, %v1403_v41  ;;  %v1327_v35 = vperm.slane %v1185_v63, %v5000_v37  ;;  %v1331_v28 = vperm.slane %v1185_v63, %v5002_v39  ;;  %v1563_v62 = vld.sshfl [vmem:[#allocation1] sm:$0xff pattern:$0x75316420]  ;;  %v5588_v31 = vld [vmem:[%s6576_s4 + $0x38] sm:$0xff]  ;;  %v5593_v41 = vld [vmem:[%s6576_s4 + $0x8] sm:$0xff] }
 0x1fc   : > { %v1693_v45 = vpop.f32.mrf.mxu0  ;;  %v1737_v16 = vadd.f32 %v5593_v41, %v5521_v40 }
 0x1fd   : > { %v1478_v7 = vadd.f32 %v5191_v20, %v1440_v55  ;;  %v1479_v1 = vadd.f32 %v5211_v58, %v1441_v47  ;;  %v1400_v17 = vmul.f32 %v1327_v35, %v5335_v33  ;;  %v1401_v53 = vmul.f32 %v1331_v28, %v5341_v46 }
 0x1fe   : > { %v1738_v32 = vadd.f32 %v5539_v9, %v1693_v45  ;;  %v5599_v45 = vld [vmem:[%s6576_s4] sm:$0xff]  ;;  %v1753_v28 = vpack.c.bf16 %v1737_v16, %v1737_v16 }
 0x1ff   : > { %v1554_v61 = vld.sshfl [vmem:[#allocation1 + $0x30] sm:$0xff pattern:$0x75316420]  ;;  %v1438_v6 = vmul.f32 %v5182_v34, %v1400_v17  ;;  %v1439_v37 = vmul.f32 %v5205_v26, %v1401_v53  ;;  %v1736_v63 = vadd.f32 %v5599_v45, %v5505_v8 }
 0x200   : > { %v1594_v14 = vpack.c.bf16 %v1554_v61, %v1554_v61  ;;  %1561 = vst [vmem:[#allocation1 + $0x30] ss:$2 sm:$0xff] %v1478_v7  ;;  %v1754_v50 = vpack.c.bf16 %v1738_v32, %v1738_v32  ;;  %v1777_v53 = vunpack.c.l.b16 %v1753_v28 }
 0x201   : > { %1562 = vst [vmem:[#allocation1 + $0x31] ss:$2 sm:$0xff] %v1479_v1  ;;  %v1476_v46 = vadd.f32 %v5191_v20, %v1438_v6  ;;  %v1477_v52 = vadd.f32 %v5211_v58, %v1439_v37  ;;  %v1595_v58 = vpack.c.bf16 %v1563_v62, %v1563_v62  ;;  %v1752_v17 = vpack.c.bf16 %v1736_v63, %v1736_v63 }
 0x202   : > { %v1630_v33 = vunpack.c.l.b16 %v1594_v14  ;;  %v1778_v34 = vunpack.c.l.b16 %v1754_v50 }
 0x203   : > { %1559 = vst [vmem:[#allocation1 + $0x20] ss:$2 sm:$0xff] %v1476_v46  ;;  %v1631_v10 = vunpack.c.l.b16 %v1595_v58  ;;  %v1776_v32 = vunpack.c.l.b16 %v1752_v17 }
 0x204   : > { %v1695_v39 = vpop.f32.mrf.mxu0  ;;  %v1640_v25 = vpack.c.b16 %v1630_v33, %v1629_v43  ;;  %1560 = vst [vmem:[#allocation1 + $0x21] ss:$2 sm:$0xff] %v1477_v52 }
 0x205   : > { %v1739_v22 = vadd.f32 %v5550_v4, %v1695_v39  ;;  %v1641_v5 = vpack.c.b16 %v1632_v57, %v1631_v10  ;;  %v5610_v61 = vpack.c.b16 %v1777_v53, %v1776_v32 }
 0x206   : > { %4192 = vmatmul.msk.bf16.gmra.mxu0 %vm541_vm0, %v1640_v25 }
 0x207   : > { %v1755_v12 = vpack.c.bf16 %v1739_v22, %v1739_v22 }
 0x208   : > { %v1566_v18 = vld.sshfl [vmem:[#allocation1 + $0x30] sm:$0xff pattern:$0x75316420] }
 0x209   : > { %v1779_v60 = vunpack.c.l.b16 %v1755_v12  ;;  %v1598_v24 = vpack.c.bf16 %v1566_v18, %v1566_v18 }
 0x20b   : > { %v5558_v26 = vpack.c.b16 %v1779_v60, %v1778_v34  ;;  %v1565_v2 = vld.sshfl [vmem:[#allocation1 + $0x20] sm:$0xff pattern:$0x75316420]  ;;  %v1634_v44 = vunpack.c.l.b16 %v1598_v24 }
 0x20c   : > { %v1597_v36 = vpack.c.bf16 %v1565_v2, %v1565_v2 }
 0x20d   : > { %1790 = vrot.lane.b32.xlu1 %v5558_v26, %s4729_s19 }
 0x20e   : > { %v1698_v20 = vpop.f32.mrf.mxu0  ;;  %v1633_v27 = vunpack.c.l.b16 %v1597_v36 }
 0x20f   : > { %v1740_v23 = vadd.f32 %v5565_v15, %v1698_v20 }
 0x210   : > { %v1642_v55 = vpack.c.b16 %v1634_v44, %v1633_v27 }
 0x211   : > { %v1756_v19 = vpack.c.bf16 %v1740_v23, %v1740_v23 }
 0x213   : > { %v1780_v38 = vunpack.c.l.b16 %v1756_v19 }
 0x216   : > { %v1700_v11 = vpop.f32.mrf.mxu0  ;;  %4193 = vmatmul.msk.bf16.gmra.mxu0 %vm541_vm0, %v1641_v5 }
 0x217   : > { %v1741_v3 = vadd.f32 %v5571_v48, %v1700_v11 }
 0x219   : > { %v1757_v42 = vpack.c.bf16 %v1741_v3, %v1741_v3 }
 0x21b   : > { %v1781_v56 = vunpack.c.l.b16 %v1757_v42 }
 0x21d   : > { %v5575_v0 = vpack.c.b16 %v1781_v56, %v1780_v38 }
 0x21e   : > { %v1703_v29 = vpop.f32.mrf.mxu0 }
 0x21f   : > { %1792 = vrot.lane.b32.xlu0 %v5575_v0, %s4729_s19  ;;  %v1742_v21 = vadd.f32 %v5582_v54, %v1703_v29 }
 0x221   : > { %v1758_v47 = vpack.c.bf16 %v1742_v21, %v1742_v21 }
 0x223   : > { %v1782_v1 = vunpack.c.l.b16 %v1758_v47 }
 0x226   : > { %v1705_v51 = vpop.f32.mrf.mxu0  ;;  %4194 = vmatmul.msk.bf16.gmra.mxu0 %vm541_vm0, %v1642_v55  ;;  %vm1796_vm0 = vcmask 64512  }
 0x227   : > { %v1743_v49 = vadd.f32 %v5588_v31, %v1705_v51 }
 0x229   : > { %v1759_v7 = vpack.c.bf16 %v1743_v49, %v1743_v49 }
 0x22b   : > { %v1783_v35 = vunpack.c.l.b16 %v1759_v7 }
 0x22d   : > { %v5606_v13 = vpack.c.b16 %v1783_v35, %v1782_v1 }
 0x22f   : > { %1794 = vrot.lane.b32.xlu2 %v5606_v13, %s4729_s19 }
 0x237   : > { %1788 = vrot.lane.b32.xlu2 %v5610_v61, %s4729_s19 }
 0x270   : > { %v1708_v40 = vpop.f32.mrf.mxu0 }
 0x271   : > { %v1744_v29 = vadd.f32 %v5599_v45, %v1708_v40 }
 0x278   : > { %v1710_v14 = vpop.f32.mrf.mxu0 }
 0x279   : > { %v1745_v56 = vadd.f32 %v5593_v41, %v1710_v14 }
 0x27b   : > { %v1761_v24 = vpack.c.bf16 %v1745_v56, %v1745_v56 }
 0x27d   : > { %v1859_v27 = vunpack.c.l.b16 %v1761_v24 }
 0x283   : > { %v1713_v6 = vpop.f32.mrf.mxu0 }
 0x284   : > { %v1746_v37 = vadd.f32 %v5539_v9, %v1713_v6  ;;  %v1791_v9 = vpop.permute.xlu1 %1790 }
 0x285   : > { %v1813_v59 = vsel %vm1796_vm0, %v1791_v9, 0 }
 0x286   : > { %v1762_v33 = vpack.c.bf16 %v1746_v37, %v1746_v37 }
 0x288   : > { %v1860_v22 = vunpack.c.l.b16 %v1762_v33 }
 0x289   : > { %v1795_v8 = vpop.permute.xlu2 %1794 }
 0x28a   : > { %v1819_v39 = vsel %vm1796_vm0, %v1795_v8, 0 }
 0x28b   : > { %1825 = vmatpush.bf16.xpose.msra.mxu1 %v1819_v39  ;;  %v1715_v43 = vpop.f32.mrf.mxu0 }
 0x28c   : > { %v1747_v46 = vadd.f32 %v5550_v4, %v1715_v43 }
 0x28e   : > { %v1763_v52 = vpack.c.bf16 %v1747_v46, %v1747_v46 }
 0x290   : > { %v1861_v25 = vunpack.c.l.b16 %v1763_v52 }
 0x291   : > { %v1793_v50 = vpop.permute.xlu0 %1792  ;;  %v1789_v30 = vpop.permute.xlu2 %1788 }
 0x292   : > { %v1816_v12 = vsel %vm1796_vm0, %v1793_v50, 0  ;;  %v5618_v34 = vpack.c.b16 %v1861_v25, %v1860_v22  ;;  %v1810_v11 = vsel %vm1796_vm0, %v1789_v30, 0 }
 0x293   : > { %1826 = vmatpush.bf16.xpose.msra.mxu1 %v1816_v12  ;;  %v1718_v60 = vpop.f32.mrf.mxu0 }
 0x294   : > { %1872 = vrot.lane.b32.xlu1 %v5618_v34, %s4729_s19  ;;  %v1748_v62 = vadd.f32 %v5565_v15, %v1718_v60 }
 0x296   : > { %v1764_v20 = vpack.c.bf16 %v1748_v62, %v1748_v62 }
 0x298   : > { %v1862_v57 = vunpack.c.l.b16 %v1764_v20 }
 0x29b   : > { %1827 = vmatpush.bf16.xpose.msra.mxu1 %v1813_v59  ;;  %v1720_v4 = vpop.f32.mrf.mxu0 }
 0x29c   : > { %v1749_v58 = vadd.f32 %v5571_v48, %v1720_v4  ;;  %2227 = vrot.lane.b32.xlu1 %v5575_v0, %s4730_s22 }
 0x29e   : > { %v1765_v10 = vpack.c.bf16 %v1749_v58, %v1749_v58 }
 0x2a0   : > { %v1863_v23 = vunpack.c.l.b16 %v1765_v10 }
 0x2a2   : > { %v5628_v5 = vpack.c.b16 %v1863_v23, %v1862_v57 }
 0x2a3   : > { %1828 = vmatpush.bf16.xpose.msra.mxu1 %v1810_v11  ;;  %v1723_v15 = vpop.f32.mrf.mxu0 }
 0x2a4   : > { %2215 = vrot.lane.b32.xlu1 %v5610_v61, %s4731_s23  ;;  %1874 = vrot.lane.b32.xlu2 %v5628_v5, %s4729_s19  ;;  %v1750_v48 = vadd.f32 %v5582_v54, %v1723_v15  ;;  %v1760_v54 = vpack.c.bf16 %v1744_v29, %v1744_v29 }
 0x2a6   : > { %v1766_v3 = vpack.c.bf16 %v1750_v48, %v1750_v48  ;;  %v1858_v44 = vunpack.c.l.b16 %v1760_v54 }
 0x2a8   : > { %v1864_v2 = vunpack.c.l.b16 %v1766_v3  ;;  %v5654_v21 = vpack.c.b16 %v1859_v27, %v1858_v44 }
 0x2aa   : > { %4195 = vmatmul.msk.bf16.vlgmr.msra.gmra.mxu1 %vm1796_vm0, %v5610_v61 }
 0x2ab   : > { %v1725_v19 = vpop.f32.mrf.mxu0 }
 0x2ac   : > { %v1751_v42 = vadd.f32 %v5588_v31, %v1725_v19  ;;  %2052 = vrot.lane.b32.xlu1 %v5575_v0, %s4732_s10  ;;  %2229 = vrot.lane.b32.xlu2 %v5606_v13, %s4730_s22 }
 0x2ae   : > { %v1767_v38 = vpack.c.bf16 %v1751_v42, %v1751_v42 }
 0x2b0   : > { %v1865_v18 = vunpack.c.l.b16 %v1767_v38 }
 0x2b2   : > { %v5644_v36 = vpack.c.b16 %v1865_v18, %v1864_v2 }
 0x2b4   : > { %2219 = vrot.lane.b32.xlu1 %v5575_v0, %s4731_s23  ;;  %2223 = vrot.lane.b32.xlu2 %v5610_v61, %s4730_s22 }
 0x2b5   : > { %1876 = vrot.lane.b32.xlu0 %v5644_v36, %s4729_s19 }
 0x2ba   : > { %4196 = vmatmul.msk.bf16.gmra.mxu1 %vm1796_vm0, %v5558_v26 }
 0x2bc   : > { %2294 = vrot.lane.b32.xlu1 %v5618_v34, %s4730_s22  ;;  %2054 = vrot.lane.b32.xlu2 %v5606_v13, %s4732_s10 }
 0x2bd   : > { %1870 = vrot.lane.b32.xlu0 %v5654_v21, %s4729_s19  ;;  %s4733_s19 = smov 56  }
 0x2c4   : > { %2284 = vrot.lane.b32.xlu1 %v5654_v21, %s4731_s23  ;;  %2050 = vrot.lane.b32.xlu2 %v5558_v26, %s4732_s10 }
 0x2c5   : > { %2225 = vrot.lane.b32.xlu0 %v5558_v26, %s4730_s22 }
 0x2ca   : > { %4197 = vmatmul.msk.bf16.gmra.mxu1 %vm1796_vm0, %v5575_v0 }
 0x2cc   : > { %2125 = vrot.lane.b32.xlu1 %v5628_v5, %s4732_s10  ;;  %2296 = vrot.lane.b32.xlu2 %v5628_v5, %s4730_s22 }
 0x2cd   : > { %2217 = vrot.lane.b32.xlu0 %v5558_v26, %s4731_s23 }
 0x2d4   : > { %2121 = vrot.lane.b32.xlu1 %v5654_v21, %s4732_s10  ;;  %2292 = vrot.lane.b32.xlu2 %v5654_v21, %s4730_s22 }
 0x2d5   : > { %2298 = vrot.lane.b32.xlu0 %v5644_v36, %s4730_s22  ;;  %s4739_s22 = smov 40  }
 0x2da   : > { %4198 = vmatmul.msk.bf16.gmra.mxu1 %vm1796_vm0, %v5606_v13 }
 0x2dc   : > { %2473 = vrot.lane.b32.xlu1 %v5575_v0, %s4733_s19  ;;  %2123 = vrot.lane.b32.xlu2 %v5618_v34, %s4732_s10 }
 0x2dd   : > { %2048 = vrot.lane.b32.xlu0 %v5610_v61, %s4732_s10 }
 0x2e4   : > { %2803 = vrot.lane.b32.xlu1 %v5606_v13, %s4734_s11  ;;  %2127 = vrot.lane.b32.xlu2 %v5644_v36, %s4732_s10 }
 0x2e5   : > { %2221 = vrot.lane.b32.xlu0 %v5606_v13, %s4731_s23 }
 0x2ec   : > { %2797 = vrot.lane.b32.xlu1 %v5610_v61, %s4734_s11  ;;  %2475 = vrot.lane.b32.xlu2 %v5606_v13, %s4733_s19 }
 0x2ed   : > { %2286 = vrot.lane.b32.xlu0 %v5618_v34, %s4731_s23 }
 0x2f4   : > { %2795 = vrot.lane.b32.xlu1 %v5606_v13, %s4735_s13  ;;  %2469 = vrot.lane.b32.xlu2 %v5610_v61, %s4733_s19 }
 0x2f5   : > { %2288 = vrot.lane.b32.xlu0 %v5628_v5, %s4731_s23 }
 0x2fc   : > { %2868 = vrot.lane.b32.xlu1 %v5618_v34, %s4734_s11  ;;  %2799 = vrot.lane.b32.xlu2 %v5558_v26, %s4734_s11 }
 0x2fd   : > { %2471 = vrot.lane.b32.xlu0 %v5558_v26, %s4733_s19 }
 0x2fe   : > { %v1875_v31 = vpop.permute.xlu2 %1874 }
 0x2ff   : > { %v1897_v33 = vsel %vm1796_vm0, %v1875_v31, 0 }
 0x304   : > { %2860 = vrot.lane.b32.xlu1 %v5618_v34, %s4735_s13  ;;  %2789 = vrot.lane.b32.xlu2 %v5610_v61, %s4735_s13 }
 0x305   : > { %2801 = vrot.lane.b32.xlu0 %v5575_v0, %s4734_s11 }
 0x306   : > { %v1873_v41 = vpop.permute.xlu1 %1872  ;;  %v2230_v51 = vpop.permute.xlu2 %2229 }
 0x307   : > { %v2253_v55 = vsel %vm1796_vm0, %v2230_v51, 0  ;;  %v1894_v25 = vsel %vm1796_vm0, %v1873_v41, 0 }
 0x308   : > { %2259 = vmatpush.bf16.xpose.msrb.mxu1 %v2253_v55 }
 0x30c   : > { %2546 = vrot.lane.b32.xlu2 %v5628_v5, %s4733_s19 }
 0x30d   : > { %2290 = vrot.lane.b32.xlu0 %v5644_v36, %s4731_s23 }
 0x30e   : > { %v2228_v47 = vpop.permute.xlu1 %2227  ;;  %v2224_v49 = vpop.permute.xlu2 %2223 }
 0x30f   : > { %v2250_v45 = vsel %vm1796_vm0, %v2228_v47, 0  ;;  %v2244_v30 = vsel %vm1796_vm0, %v2224_v49, 0 }
 0x310   : > { %2260 = vmatpush.bf16.xpose.msrb.mxu1 %v2250_v45 }
 0x314   : > { %2544 = vrot.lane.b32.xlu2 %v5618_v34, %s4733_s19 }
 0x315   : > { %2793 = vrot.lane.b32.xlu0 %v5575_v0, %s4735_s13 }
 0x316   : > { %v5730_v16 = vpop.permute.xlu1 %2215  ;;  %v2055_v7 = vpop.permute.xlu2 %2054 }
 0x317   : > { %2076 = vmatpush.bf16.msra.mxu3 %v2055_v7 }
 0x31c   : > { %2542 = vrot.lane.b32.xlu2 %v5654_v21, %s4733_s19 }
 0x31d   : > { %2866 = vrot.lane.b32.xlu0 %v5654_v21, %s4734_s11 }
 0x31e   : > { %v2053_v63 = vpop.permute.xlu1 %2052  ;;  %v2051_v1 = vpop.permute.xlu2 %2050 }
 0x31f   : > { %2077 = vmatpush.bf16.msra.mxu3 %v2053_v63 }
 0x323   : > { %2078 = vmatpush.bf16.msra.mxu3 %v2051_v1 }
 0x324   : > { %2791 = vrot.lane.b32.xlu2 %v5558_v26, %s4735_s13 }
 0x325   : > { %2858 = vrot.lane.b32.xlu0 %v5654_v21, %s4735_s13 }
 0x326   : > { %v5740_v28 = vpop.permute.xlu1 %2219  ;;  %v5742_v17 = vpop.permute.xlu2 %2296 }
 0x327   : > { %v1830_v35 = vpop.f32.mrf.mxu1  ;;  %v1877_v32 = vpop.permute.xlu0 %1876  ;;  %v2319_v51 = vsel %vm1796_vm0, %v5742_v17, 0 }
 0x328   : > { %v1931_v53 = vmul.f32 1.442695, %v1830_v35  ;;  %v1900_v40 = vsel %vm1796_vm0, %v1877_v32, 0 }
 0x329   : > { %1906 = vmatpush.bf16.xpose.msra.mxu2 %v1900_v40 }
 0x32a   : > { %4414 = vpow2.f32 %v1931_v53 }
 0x32c   : > { %2870 = vrot.lane.b32.xlu2 %v5628_v5, %s4734_s11 }
 0x32d   : > { %2548 = vrot.lane.b32.xlu0 %v5644_v36, %s4733_s19 }
 0x32e   : > { %v5749_v8 = vpop.permute.xlu1 %2294  ;;  %v5751_v37 = vpop.permute.xlu2 %2292 }
 0x32f   : > { %v1832_v14 = vpop.f32.mrf.mxu1  ;;  %v1871_v39 = vpop.permute.xlu0 %1870  ;;  %v2316_v35 = vsel %vm1796_vm0, %v5749_v8, 0 }
 0x330   : > { %v4415_v6 = vpop.eup %4414  ;;  %v1933_v60 = vmul.f32 1.442695, %v1832_v14  ;;  %v1891_v58 = vsel %vm1796_vm0, %v1871_v39, 0 }
 0x331   : > { %v1964_v43 = vsel %vm1963_vm5, %v4415_v6, 0.0  ;;  %1907 = vmatpush.bf16.xpose.msra.mxu2 %v1897_v33  ;;  %v2012_v56 = vpack.c.bf16 %v4415_v6, %v4415_v6 }
 0x332   : > { %1965 = vadd.xlane.f32.xlu1 %v1964_v43  ;;  %4416 = vpow2.f32 %v1933_v60 }
 0x333   : > { %v2036_v41 = vunpack.c.l.b16 %v2012_v56 }
 0x334   : > { %2862 = vrot.lane.b32.xlu2 %v5628_v5, %s4735_s13 }
 0x335   : > { %2872 = vrot.lane.b32.xlu0 %v5644_v36, %s4734_s11 }
 0x336   : > { %v5759_v52 = vpop.permute.xlu1 %2284  ;;  %v5761_v50 = vpop.permute.xlu2 %2123 }
 0x337   : > { %v1835_v46 = vpop.f32.mrf.mxu1  ;;  %v2226_v22 = vpop.permute.xlu0 %2225 }
 0x338   : > { %v2247_v12 = vsel %vm1796_vm0, %v2226_v22, 0  ;;  %v4417_v10 = vpop.eup %4416  ;;  %v1935_v24 = vmul.f32 1.442695, %v1835_v46  ;;  %v2313_v46 = vsel %vm1796_vm0, %v5751_v37, 0 }
 0x339   : > { %1908 = vmatpush.bf16.xpose.msra.mxu2 %v1894_v25  ;;  %2261 = vmatpush.bf16.xpose.msrb.mxu1 %v2247_v12  ;;  %v2013_v38 = vpack.c.bf16 %v4417_v10, %v4417_v10  ;;  %v1967_v39 = vsel %vm1963_vm5, %v4417_v10, 0.0 }
 0x33b   : > { %v2037_v18 = vunpack.c.l.b16 %v2013_v38 }
 0x33d   : > { %v2044_v55 = vpack.c.b16 %v2037_v18, %v2036_v41 }
 0x33e   : > { %v2126_v62 = vpop.permute.xlu1 %2125  ;;  %v2128_v59 = vpop.permute.xlu2 %2127 }
 0x33f   : > { %v1837_v9 = vpop.f32.mrf.mxu1  ;;  %v2218_v20 = vpop.permute.xlu0 %2217 }
 0x340   : > { %v1937_v4 = vmul.f32 1.442695, %v1837_v9 }
 0x341   : > { %1909 = vmatpush.bf16.xpose.msra.mxu2 %v1891_v58  ;;  %2262 = vmatpush.bf16.xpose.msrb.mxu1 %v2244_v30 }
 0x342   : > { %4418 = vpow2.f32 %v1937_v4 }
 0x346   : > { %v2122_v11 = vpop.permute.xlu1 %2121  ;;  %v2476_v15 = vpop.permute.xlu2 %2475 }
 0x347   : > { %v1840_v57 = vpop.f32.mrf.mxu1  ;;  %v2299_v19 = vpop.permute.xlu0 %2298 }
 0x348   : > { %v4419_v23 = vpop.eup %4418  ;;  %v1939_v48 = vmul.f32 1.442695, %v1840_v57  ;;  %4199 = vmatmul.msk.bf16.vlgmr.msra.gmra.mxu2 %vm1796_vm0, %v5654_v21  ;;  %4211 = vmatmul.msk.bf16.vlgmr.msrb.gmra.mxu1 %vm1796_vm0, %v5730_v16  ;;  %v2322_v42 = vsel %vm1796_vm0, %v2299_v19, 0 }
 0x349   : > { %2497 = vmatpush.bf16.msra.mxu1 %v2476_v15  ;;  %v1973_v3 = vsel %vm1963_vm5, %v4419_v23, 0.0  ;;  %2328 = vmatpush.bf16.xpose.msrb.mxu2 %v2322_v42  ;;  %v2015_v53 = vpack.c.bf16 %v4419_v23, %v4419_v23 }
 0x34a   : > { %4420 = vpow2.f32 %v1939_v48  ;;  %1974 = vadd.xlane.f32.xlu1 %v1973_v3 }
 0x34b   : > { %v2039_v6 = vunpack.c.l.b16 %v2015_v53 }
 0x34e   : > { %v2474_v54 = vpop.permute.xlu1 %2473  ;;  %v2470_v25 = vpop.permute.xlu2 %2469 }
 0x34f   : > { %v1842_v2 = vpop.f32.mrf.mxu1  ;;  %v2049_v44 = vpop.permute.xlu0 %2048  ;;  %2498 = vmatpush.bf16.msra.mxu1 %v2474_v54 }
 0x350   : > { %v5773_v29 = vpop.eup %4420  ;;  %v1941_v27 = vmul.f32 1.442695, %v1842_v2  ;;  %2079 = vmatpush.bf16.msra.mxu3 %v2049_v44 }
 0x351   : > { %v1976_v31 = vsel %vm1963_vm5, %v5773_v29, 0.0  ;;  %2329 = vmatpush.bf16.xpose.msrb.mxu2 %v2319_v51 }
 0x352   : > { %4422 = vpow2.f32 %v1941_v27  ;;  %1977 = vadd.xlane.f32.xlu1 %v1976_v31 }
 0x353   : > { %4424 = vpow2.f32 %v1935_v24  ;;  %4203 = vmatmul.msk.bf16.vlgmr.msra.gmra.mxu3 %vm1963_vm5, %v2044_v55  ;;  %v2214_v55 = vld [vmem:[%s6577_s5] sm:$0xf] }
 0x354   : > { %2149 = vmatpush.bf16.msrb.mxu3 %v2128_v59  ;;  %v2016_v59 = vpack.c.bf16 %v5773_v29, %v5773_v29 }
 0x356   : > { %v2804_v45 = vpop.permute.xlu1 %2803  ;;  %v2800_v4 = vpop.permute.xlu2 %2799  ;;  %v2040_v30 = vunpack.c.l.b16 %v2016_v59 }
 0x357   : > { %v1845_v47 = vpop.f32.mrf.mxu1  ;;  %v2222_v16 = vpop.permute.xlu0 %2221  ;;  %v2827_v7 = vsel %vm1796_vm0, %v2804_v45, 0  ;;  %v2821_v3 = vsel %vm1796_vm0, %v2800_v4, 0 }
 0x358   : > { %2150 = vmatpush.bf16.msrb.mxu3 %v2126_v62  ;;  %v4423_v49 = vpop.eup %4422  ;;  %4200 = vmatmul.msk.bf16.gmra.mxu2 %vm1796_vm0, %v5618_v34  ;;  %v1943_v17 = vmul.f32 1.442695, %v1845_v47  ;;  %v2738_v47 = vsel %vm2660_vm6, %v2214_v55, 0 }
 0x359   : > { %v1979_v63 = vsel %vm1963_vm5, %v4423_v49, 0.0  ;;  %v4425_v1 = vpop.eup %4424  ;;  %4212 = vmatmul.msk.bf16.gmra.mxu1 %vm1796_vm0, %v2218_v20  ;;  %2330 = vmatpush.bf16.xpose.msrb.mxu2 %v2316_v35  ;;  %v2017_v37 = vpack.c.bf16 %v4423_v49, %v4423_v49 }
 0x35a   : > { %2833 = vmatpush.bf16.xpose.msrb.mxu0 %v2827_v7  ;;  %1980 = vadd.xlane.f32.xlu1 %v1979_v63  ;;  %v2014_v32 = vpack.c.bf16 %v4425_v1, %v4425_v1  ;;  %v1970_v40 = vsel %vm1963_vm5, %v4425_v1, 0.0  ;;  %4426 = vpow2.f32 %v1943_v17 }
 0x35b   : > { %v2041_v20 = vunpack.c.l.b16 %v2017_v37 }
 0x35c   : > { %2151 = vmatpush.bf16.msrb.mxu3 %v5761_v50  ;;  %v2038_v33 = vunpack.c.l.b16 %v2014_v32 }
 0x35d   : > { %1971 = vadd.xlane.f32.xlu2 %v1970_v40  ;;  %v2046_v10 = vpack.c.b16 %v2041_v20, %v2040_v30 }
 0x35e   : > { %v2045_v50 = vpack.c.b16 %v2039_v6, %v2038_v33  ;;  %v2790_v57 = vpop.permute.xlu2 %2789  ;;  %v2798_v56 = vpop.permute.xlu1 %2797 }
 0x35f   : > { %v1847_v14 = vpop.f32.mrf.mxu1  ;;  %1968 = vadd.xlane.f32.xlu0 %v1967_v39  ;;  %v2287_v8 = vpop.permute.xlu0 %2286  ;;  %v2818_v2 = vsel %vm1796_vm0, %v2798_v56, 0 }
 0x360   : > { %2152 = vmatpush.bf16.msrb.mxu3 %v2122_v11  ;;  %v1945_v43 = vmul.f32 1.442695, %v1847_v14  ;;  %v4427_v22 = vpop.eup %4426 }
 0x361   : > { %2331 = vmatpush.bf16.xpose.msrb.mxu2 %v2313_v46  ;;  %v1982_v60 = vsel %vm1963_vm5, %v4427_v22, 0.0 }
 0x362   : > { %4428 = vpow2.f32 %v1945_v43 }
 0x363   : > { %4204 = vmatmul.msk.bf16.gmra.mxu3 %vm1963_vm5, %v2045_v50 }
 0x364   : > { %4299 = vmatpush.bf16.msra.mxu3 %v2476_v15  ;;  %v2018_v15 = vpack.c.bf16 %v4427_v22, %v4427_v22 }
 0x366   : > { %v2042_v19 = vunpack.c.l.b16 %v2018_v15  ;;  %v5809_v42 = vpop.permute.xlu2 %2546 }
 0x367   : > { %1983 = vadd.xlane.f32.xlu0 %v1982_v60  ;;  %v2289_v9 = vpop.permute.xlu0 %2288 }
 0x368   : > { %4300 = vmatpush.bf16.msra.mxu3 %v2474_v54  ;;  %v4429_v12 = vpop.eup %4428  ;;  %4201 = vmatmul.msk.bf16.gmra.mxu2 %vm1796_vm0, %v5628_v5 }
 0x369   : > { %v1985_v62 = vsel %vm1963_vm5, %v4429_v12, 0.0  ;;  %4213 = vmatmul.msk.bf16.gmra.mxu1 %vm1796_vm0, %v5740_v28  ;;  %v2019_v11 = vpack.c.bf16 %v4429_v12, %v4429_v12  ;;  %2747 = vmatpush.bf16.msra.mxu2 %v2738_v47 }
 0x36a   : > { %1986 = vadd.xlane.f32.xlu2 %v1985_v62 }
 0x36b   : > { %v2043_v48 = vunpack.c.l.b16 %v2019_v11 }
 0x36d   : > { %v2047_v38 = vpack.c.b16 %v2043_v48, %v2042_v19 }
 0x36e   : > { %v5815_v18 = vpop.permute.xlu2 %2544 }
 0x36f   : > { %v2472_v58 = vpop.permute.xlu0 %2471 }
 0x370   : > { %2499 = vmatpush.bf16.msra.mxu1 %v2472_v58  ;;  %4301 = vmatpush.bf16.msra.mxu3 %v2472_v58 }
 0x373   : > { %4205 = vmatmul.msk.bf16.gmra.mxu3 %vm1963_vm5, %v2046_v10 }
 0x374   : > { %2500 = vmatpush.bf16.msra.mxu1 %v2470_v25  ;;  %4302 = vmatpush.bf16.msra.mxu3 %v2470_v25 }
 0x376   : > { %v5818_v29 = vpop.permute.xlu2 %2542 }
 0x377   : > { %v2802_v23 = vpop.permute.xlu0 %2801 }
 0x378   : > { %4202 = vmatmul.msk.bf16.gmra.mxu2 %vm1796_vm0, %v5644_v36  ;;  %v2824_v28 = vsel %vm1796_vm0, %v2802_v23, 0 }
 0x379   : > { %4214 = vmatmul.msk.bf16.gmra.mxu1 %vm1796_vm0, %v2222_v16  ;;  %2834 = vmatpush.bf16.xpose.msrb.mxu0 %v2824_v28 }
 0x37b   : > { %3314 = vrot.lane.b32.xlu0 %v5575_v0, %s4736_s15 }
 0x37e   : > { %v2792_v54 = vpop.permute.xlu2 %2791 }
 0x37f   : > { %v2291_v24 = vpop.permute.xlu0 %2290 }
 0x381   : > { %2835 = vmatpush.bf16.xpose.msrb.mxu0 %v2821_v3 }
 0x383   : > { %4206 = vmatmul.msk.bf16.gmra.mxu3 %vm1963_vm5, %v2047_v38 }
 0x386   : > { %v5842_v32 = vpop.permute.xlu2 %2870 }
 0x387   : > { %v2794_v27 = vpop.permute.xlu0 %2793 }
 0x388   : > { %4215 = vmatmul.msk.bf16.vlgmr.msrb.gmra.mxu2 %vm1796_vm0, %v5759_v52  ;;  %v2796_v52 = vpop.permute.xlu1 %2795 }
 0x389   : > { %2836 = vmatpush.bf16.xpose.msrb.mxu0 %v2818_v2 }
 0x38e   : > { %v5851_v20 = vpop.permute.xlu2 %2862 }
 0x38f   : > { %v5823_v44 = vpop.permute.xlu0 %2866 }
 0x390   : > { %4243 = vmatmul.msk.bf16.vlgmr.msrb.gmra.mxu0 %vm1796_vm0, %v2790_v57  ;;  %v5830_v41 = vpop.permute.xlu1 %2868 }
 0x397   : > { %v5827_v31 = vpop.permute.xlu0 %2858 }
 0x398   : > { %4216 = vmatmul.msk.bf16.gmra.mxu2 %vm1796_vm0, %v2287_v8  ;;  %v5836_v7 = vpop.permute.xlu1 %2860 }
 0x39f   : > { %v2549_v51 = vpop.permute.xlu0 %2548 }
 0x3a0   : > { %4244 = vmatmul.msk.bf16.gmra.mxu0 %vm1796_vm0, %v2792_v54 }
 0x3a5   : > { %v1966_v6 = vpop.xlane.xlu1 %1965 }
 0x3a7   : > { %v5838_v1 = vpop.permute.xlu0 %2872 }
 0x3a8   : > { %4217 = vmatmul.msk.bf16.gmra.mxu2 %vm1796_vm0, %v2289_v9 }
 0x3b0   : > { %4245 = vmatmul.msk.bf16.gmra.mxu0 %vm1796_vm0, %v2794_v27 }
 0x3b8   : > { %4218 = vmatmul.msk.bf16.gmra.mxu2 %vm1796_vm0, %v2291_v24 }
 0x3bd   : > { %v1975_v48 = vpop.xlane.xlu1 %1974 }
 0x3c0   : > { %4246 = vmatmul.msk.bf16.gmra.mxu0 %vm1796_vm0, %v2796_v52 }
 0x3c5   : > { %v2264_v49 = vpop.f32.mrf.mxu1  ;;  %v1978_v52 = vpop.xlane.xlu1 %1977 }
 0x3c6   : > { %v2353_v45 = vmul.f32 1.442695, %v2264_v49 }
 0x3c8   : > { %4430 = vpow2.f32 %v2353_v45 }
 0x3cb   : > { %v1911_v16 = vpop.f32.mrf.mxu2 }
 0x3cc   : > { %v1947_v63 = vmul.f32 1.442695, %v1911_v16 }
 0x3cd   : > { %v2266_v35 = vpop.f32.mrf.mxu1 }
 0x3ce   : > { %4432 = vpow2.f32 %v1947_v63  ;;  %v2355_v17 = vmul.f32 1.442695, %v2266_v35  ;;  %v5840_v53 = vpop.eup %4430 }
 0x3cf   : > { %v2433_v43 = vpack.c.bf16 %v5840_v53, %v5840_v53 }
 0x3d0   : > { %4434 = vpow2.f32 %v2355_v17  ;;  %v1972_v24 = vpop.xlane.xlu2 %1971 }
 0x3d1   : > { %v2457_v25 = vunpack.c.l.b16 %v2433_v43 }
 0x3d2   : > { %v1969_v8 = vpop.xlane.xlu0 %1968 }
 0x3d3   : > { %v1913_v40 = vpop.f32.mrf.mxu2 }
 0x3d4   : > { %v4433_v14 = vpop.eup %4432  ;;  %v1949_v39 = vmul.f32 1.442695, %v1913_v40 }
 0x3d5   : > { %v1988_v33 = vsel %vm1963_vm5, %v4433_v14, 0.0  ;;  %v2020_v60 = vpack.c.bf16 %v4433_v14, %v4433_v14 }
 0x3d6   : > { %v5847_v46 = vpop.eup %4434  ;;  %4436 = vpow2.f32 %v1949_v39  ;;  %1989 = vadd.xlane.f32.xlu1 %v1988_v33  ;;  %v2081_v50 = vpop.f32.mrf.mxu3 }
 0x3d7   : > { %4438 = vrcp.f32 %v1966_v6  ;;  %v2434_v22 = vpack.c.bf16 %v5847_v46, %v5847_v46  ;;  %v2109_v23 = vunpack.c.l.b16 %v2020_v60  ;;  %v1981_v33 = vpop.xlane.xlu1 %1980 }
 0x3d8   : > { %4440 = vrcp.f32 %v1969_v8 }
 0x3d9   : > { %v2458_v12 = vunpack.c.l.b16 %v2434_v22  ;;  %v2269_v22 = vpop.f32.mrf.mxu1 }
 0x3db   : > { %v2465_v9 = vpack.c.b16 %v2458_v12, %v2457_v25  ;;  %v1916_v62 = vpop.f32.mrf.mxu2 }
 0x3dc   : > { %v4437_v37 = vpop.eup %4436  ;;  %v1951_v59 = vmul.f32 1.442695, %v1916_v62 }
 0x3dd   : > { %v4439_v4 = vpop.eup %4438  ;;  %v2021_v58 = vpack.c.bf16 %v4437_v37, %v4437_v37  ;;  %4219 = vmatmul.msk.bf16.vlgmr.msra.gmra.mxu1 %vm1963_vm5, %v2465_v9  ;;  %v1991_v30 = vsel %vm1963_vm5, %v4437_v37, 0.0 }
 0x3de   : > { %v4441_v10 = vpop.eup %4440  ;;  %4442 = vpow2.f32 %v1951_v59  ;;  %1992 = vadd.xlane.f32.xlu2 %v1991_v30  ;;  %v2083_v57 = vpop.f32.mrf.mxu3  ;;  %v2190_v28 = vmul.f32 %v4439_v4, %v2081_v50 }
 0x3df   : > { %v2191_v11 = vmul.f32 %v4441_v10, %v2083_v57  ;;  %v2110_v15 = vunpack.c.l.b16 %v2021_v58 }
 0x3e1   : > { %v2206_v19 = vpack.c.bf16 %v2191_v11, %v2190_v28  ;;  %v2117_v3 = vpack.c.b16 %v2110_v15, %v2109_v23  ;;  %v2271_v23 = vpop.f32.mrf.mxu1 }
 0x3e3   : > { %v1918_v38 = vpop.f32.mrf.mxu2  ;;  %4207 = vmatmul.msk.bf16.vlgmr.msrb.gmra.mxu3 %vm1963_vm5, %v2117_v3  ;;  %4235 = vmatmul.msk.bf16.vlgmr.msra.gmra.mxu2 %vm1796_vm0, %v2206_v19  ;;  %v1987_v3 = vpop.xlane.xlu2 %1986 }
 0x3e4   : > { %v4443_v56 = vpop.eup %4442  ;;  %v1953_v2 = vmul.f32 1.442695, %v1918_v38  ;;  %2570 = vmatpush.bf16.msrb.mxu3 %v2549_v51 }
 0x3e5   : > { %v1994_v54 = vsel %vm1963_vm5, %v4443_v56, 0.0  ;;  %v2022_v47 = vpack.c.bf16 %v4443_v56, %v4443_v56 }
 0x3e6   : > { %4444 = vpow2.f32 %v1953_v2  ;;  %1995 = vadd.xlane.f32.xlu1 %v1994_v54  ;;  %v2086_v27 = vpop.f32.mrf.mxu3 }
 0x3e7   : > { %4446 = vrcp.f32 %v1975_v48  ;;  %v2111_v6 = vunpack.c.l.b16 %v2022_v47  ;;  %v1984_v48 = vpop.xlane.xlu0 %1983 }
 0x3e8   : > { %4448 = vrcp.f32 %v1972_v24  ;;  %2571 = vmatpush.bf16.msrb.mxu3 %v5809_v42 }
 0x3e9   : > { %v2274_v2 = vpop.f32.mrf.mxu1 }
 0x3eb   : > { %v1921_v55 = vpop.f32.mrf.mxu2 }
 0x3ec   : > { %v4445_v49 = vpop.eup %4444  ;;  %2572 = vmatpush.bf16.msrb.mxu3 %v5815_v18  ;;  %v1955_v35 = vmul.f32 1.442695, %v1921_v55 }
 0x3ed   : > { %v4447_v45 = vpop.eup %4446  ;;  %v1997_v16 = vsel %vm1963_vm5, %v4445_v49, 0.0  ;;  %v2023_v51 = vpack.c.bf16 %v4445_v49, %v4445_v49  ;;  %v2357_v49 = vmul.f32 1.442695, %v2269_v22 }
 0x3ee   : > { %v4449_v63 = vpop.eup %4448  ;;  %1998 = vadd.xlane.f32.xlu0 %v1997_v16  ;;  %v2088_v17 = vpop.f32.mrf.mxu3  ;;  %4450 = vpow2.f32 %v1955_v35 }
 0x3ef   : > { %v2192_v40 = vmul.f32 %v4449_v63, %v2086_v27  ;;  %v2193_v14 = vmul.f32 %v4447_v45, %v2088_v17  ;;  %v2112_v39 = vunpack.c.l.b16 %v2023_v51  ;;  %v2359_v27 = vmul.f32 1.442695, %v2271_v23 }
 0x3f0   : > { %2573 = vmatpush.bf16.msrb.mxu3 %v5818_v29 }
 0x3f1   : > { %v2207_v42 = vpack.c.bf16 %v2193_v14, %v2192_v40  ;;  %v2118_v43 = vpack.c.b16 %v2112_v39, %v2111_v6  ;;  %v2276_v14 = vpop.f32.mrf.mxu1 }
 0x3f3   : > { %v1923_v8 = vpop.f32.mrf.mxu2  ;;  %4208 = vmatmul.msk.bf16.gmra.mxu3 %vm1963_vm5, %v2118_v43  ;;  %4236 = vmatmul.msk.bf16.gmra.mxu2 %vm1796_vm0, %v2207_v42 }
 0x3f4   : > { %v1957_v18 = vmul.f32 1.442695, %v1923_v8  ;;  %v5866_v25 = vpop.eup %4450  ;;  %v2363_v8 = vmul.f32 1.442695, %v2276_v14 }
 0x3f5   : > { %v2024_v12 = vpack.c.bf16 %v5866_v25, %v5866_v25 }
 0x3f6   : > { %4452 = vpow2.f32 %v1957_v18  ;;  %2864 = vrot.lane.b32.xlu2 %v5644_v36, %s4735_s13  ;;  %v2091_v50 = vpop.f32.mrf.mxu3 }
 0x3f7   : > { %4454 = vrcp.f32 %v1978_v52  ;;  %v2113_v10 = vunpack.c.l.b16 %v2024_v12 }
 0x3f8   : > { %4456 = vrcp.f32 %v1981_v33  ;;  %v2361_v33 = vmul.f32 1.442695, %v2274_v2 }
 0x3f9   : > { %v2279_v22 = vpop.f32.mrf.mxu1 }
 0x3fb   : > { %v1926_v29 = vpop.f32.mrf.mxu2 }
 0x3fc   : > { %v5870_v60 = vpop.eup %4452  ;;  %v1959_v59 = vmul.f32 1.442695, %v1926_v29 }
 0x3fd   : > { %v4455_v9 = vpop.eup %4454  ;;  %v2025_v62 = vpack.c.bf16 %v5870_v60, %v5870_v60 }
 0x3fe   : > { %v4457_v37 = vpop.eup %4456  ;;  %3312 = vrot.lane.b32.xlu2 %v5558_v26, %s4736_s15  ;;  %v2093_v4 = vpop.f32.mrf.mxu3  ;;  %v2194_v58 = vmul.f32 %v4455_v9, %v2091_v50  ;;  %4458 = vpow2.f32 %v1959_v59  ;;  %v2896_v9 = vsel %vm1796_vm0, %v5838_v1, 0 }
 0x3ff   : > { %v2195_v30 = vmul.f32 %v4457_v37, %v2093_v4  ;;  %3316 = vrot.lane.b32.xlu1 %v5606_v13, %s4736_s15  ;;  %v2114_v57 = vunpack.c.l.b16 %v2025_v62 }
 0x401   : > { %v2208_v28 = vpack.c.bf16 %v2195_v30, %v2194_v58  ;;  %v2119_v11 = vpack.c.b16 %v2114_v57, %v2113_v10  ;;  %v2281_v4 = vpop.f32.mrf.mxu1  ;;  %v2893_v30 = vsel %vm1796_vm0, %v5842_v32, 0  ;;  %v2890_v32 = vsel %vm1796_vm0, %v5830_v41, 0 }
 0x402   : > { %3310 = vrot.lane.b32.xlu0 %v5610_v61, %s4736_s15  ;;  %v2367_v57 = vmul.f32 1.442695, %v2281_v4 }
 0x403   : > { %v1928_v15 = vpop.f32.mrf.mxu2  ;;  %4209 = vmatmul.msk.bf16.gmra.mxu3 %vm1963_vm5, %v2119_v11  ;;  %4237 = vmatmul.msk.bf16.gmra.mxu2 %vm1796_vm0, %v2208_v28  ;;  %v2365_v11 = vmul.f32 1.442695, %v2279_v22 }
 0x404   : > { %v1961_v19 = vmul.f32 1.442695, %v1928_v15  ;;  %v4459_v56 = vpop.eup %4458  ;;  %v2000_v15 = vsel %vm1963_vm5, %v5866_v25, 0.0 }
 0x405   : > { %v2026_v24 = vpack.c.bf16 %v4459_v56, %v4459_v56  ;;  %v2006_v59 = vsel %vm1963_vm5, %v4459_v56, 0.0  ;;  %v2003_v56 = vsel %vm1963_vm5, %v5870_v60, 0.0 }
 0x406   : > { %4460 = vpow2.f32 %v1961_v19  ;;  %3049 = vrot.lane.b32.xlu2 %v5606_v13, %s4737_s20  ;;  %v2096_v38 = vpop.f32.mrf.mxu3 }
 0x407   : > { %4462 = vrcp.f32 %v1984_v48  ;;  %v2115_v63 = vunpack.c.l.b16 %v2026_v24  ;;  %v2887_v24 = vsel %vm1796_vm0, %v5823_v44, 0 }
 0x408   : > { %4464 = vrcp.f32 %v1987_v3 }
 0x409   : > { %4466 = vpow2.f32 %v2359_v27 }
 0x40a   : > { %4468 = vpow2.f32 %v2357_v49 }
 0x40b   : > { %4470 = vpow2.f32 %v2363_v8  ;;  %v2333_v12 = vpop.f32.mrf.mxu2 }
 0x40c   : > { %v4461_v54 = vpop.eup %4460  ;;  %4472 = vpow2.f32 %v2361_v33 }
 0x40d   : > { %v4463_v52 = vpop.eup %4462  ;;  %v2027_v55 = vpack.c.bf16 %v4461_v54, %v4461_v54  ;;  %v2009_v10 = vsel %vm1963_vm5, %v4461_v54, 0.0  ;;  %4474 = vpow2.f32 %v2367_v57 }
 0x40e   : > { %v4465_v47 = vpop.eup %4464  ;;  %v2098_v45 = vpop.f32.mrf.mxu3  ;;  %v2196_v16 = vmul.f32 %v4463_v52, %v2096_v38  ;;  %4476 = vpow2.f32 %v2365_v11  ;;  %v2369_v52 = vmul.f32 1.442695, %v2333_v12 }
 0x40f   : > { %v2197_v51 = vmul.f32 %v4465_v47, %v2098_v45  ;;  %v2116_v35 = vunpack.c.l.b16 %v2027_v55  ;;  %v5886_v6 = vpop.eup %4466 }
 0x410   : > { %v5888_v39 = vpop.eup %4468  ;;  %v2436_v42 = vpack.c.bf16 %v5886_v6, %v5886_v6 }
 0x411   : > { %v2209_v17 = vpack.c.bf16 %v2197_v51, %v2196_v16  ;;  %v2120_v40 = vpack.c.b16 %v2116_v35, %v2115_v63  ;;  %v2435_v43 = vpack.c.bf16 %v5888_v39, %v5888_v39  ;;  %v5897_v62 = vpop.eup %4470 }
 0x412   : > { %v2460_v18 = vunpack.c.l.b16 %v2436_v42  ;;  %v5899_v37 = vpop.eup %4472  ;;  %v2438_v58 = vpack.c.bf16 %v5897_v62, %v5897_v62 }
 0x413   : > { %4210 = vmatmul.msk.bf16.gmra.mxu3 %vm1963_vm5, %v2120_v40  ;;  %4238 = vmatmul.msk.bf16.gmra.mxu2 %vm1796_vm0, %v2209_v17  ;;  %v2459_v50 = vunpack.c.l.b16 %v2435_v43  ;;  %v2437_v1 = vpack.c.bf16 %v5899_v37, %v5899_v37  ;;  %v2335_v23 = vpop.f32.mrf.mxu2  ;;  %v5914_v3 = vpop.eup %4474 }
 0x414   : > { %v2462_v28 = vunpack.c.l.b16 %v2438_v58  ;;  %v5918_v2 = vpop.eup %4476  ;;  %v2440_v25 = vpack.c.bf16 %v5914_v3, %v5914_v3  ;;  %v2371_v54 = vmul.f32 1.442695, %v2335_v23 }
 0x415   : > { %v2466_v29 = vpack.c.b16 %v2460_v18, %v2459_v50  ;;  %v2461_v48 = vunpack.c.l.b16 %v2437_v1  ;;  %v2439_v41 = vpack.c.bf16 %v5918_v2, %v5918_v2 }
 0x416   : > { %v2464_v27 = vunpack.c.l.b16 %v2440_v25  ;;  %4478 = vpow2.f32 %v2371_v54 }
 0x417   : > { %v2467_v19 = vpack.c.b16 %v2462_v28, %v2461_v48  ;;  %v2463_v55 = vunpack.c.l.b16 %v2439_v41  ;;  %4480 = vpow2.f32 %v2369_v52 }
 0x419   : > { %v2468_v60 = vpack.c.b16 %v2464_v27, %v2463_v55 }
 0x41b   : > { %v2338_v38 = vpop.f32.mrf.mxu2 }
 0x41c   : > { %v5931_v44 = vpop.eup %4478  ;;  %v2373_v17 = vmul.f32 1.442695, %v2338_v38 }
 0x41d   : > { %v5933_v49 = vpop.eup %4480  ;;  %v2442_v45 = vpack.c.bf16 %v5931_v44, %v5931_v44 }
 0x41e   : > { %v2441_v51 = vpack.c.bf16 %v5933_v49, %v5933_v49 }
 0x41f   : > { %v2531_v35 = vunpack.c.l.b16 %v2442_v45 }
 0x420   : > { %v2530_v40 = vunpack.c.l.b16 %v2441_v51 }
 0x422   : > { %v2538_v14 = vpack.c.b16 %v2531_v35, %v2530_v40 }
 0x423   : > { %4220 = vmatmul.msk.bf16.vlgmr.msra.gmra.mxu3 %vm1963_vm5, %v2466_v29  ;;  %v2340_v47 = vpop.f32.mrf.mxu2 }
 0x424   : > { %2902 = vmatpush.bf16.xpose.msra.mxu3 %v2896_v9  ;;  %v2375_v63 = vmul.f32 1.442695, %v2340_v47 }
 0x426   : > { %4482 = vpow2.f32 %v2375_v63 }
 0x427   : > { %4484 = vpow2.f32 %v2373_v17 }
 0x429   : > { %2007 = vadd.xlane.f32.xlu1 %v2006_v59 }
 0x42b   : > { %v2343_v16 = vpop.f32.mrf.mxu2 }
 0x42c   : > { %2903 = vmatpush.bf16.xpose.msra.mxu3 %v2893_v30  ;;  %2010 = vadd.xlane.f32.xlu0 %v2009_v10  ;;  %v5950_v8 = vpop.eup %4482  ;;  %v2377_v9 = vmul.f32 1.442695, %v2343_v16 }
 0x42d   : > { %v5954_v18 = vpop.eup %4484  ;;  %v2444_v33 = vpack.c.bf16 %v5950_v8, %v5950_v8 }
 0x42e   : > { %v2443_v22 = vpack.c.bf16 %v5954_v18, %v5954_v18 }
 0x42f   : > { %2001 = vadd.xlane.f32.xlu2 %v2000_v15  ;;  %v2533_v12 = vunpack.c.l.b16 %v2444_v33 }
 0x430   : > { %v2532_v4 = vunpack.c.l.b16 %v2443_v22 }
 0x432   : > { %v2539_v10 = vpack.c.b16 %v2533_v12, %v2532_v4 }
 0x433   : > { %4221 = vmatmul.msk.bf16.gmra.mxu3 %vm1963_vm5, %v2467_v19  ;;  %v2345_v43 = vpop.f32.mrf.mxu2 }
 0x434   : > { %2904 = vmatpush.bf16.xpose.msra.mxu3 %v2890_v32  ;;  %v2379_v29 = vmul.f32 1.442695, %v2345_v43 }
 0x436   : > { %4486 = vpow2.f32 %v2379_v29 }
 0x437   : > { %2004 = vadd.xlane.f32.xlu2 %v2003_v56  ;;  %4488 = vpow2.f32 %v2377_v9  ;;  %v3315_v56 = vpop.permute.xlu0 %3314 }
 0x438   : > { %v3337_v40 = vsel %vm1796_vm0, %v3315_v56, 0 }
 0x43b   : > { %v2348_v59 = vpop.f32.mrf.mxu2 }
 0x43c   : > { %2905 = vmatpush.bf16.xpose.msra.mxu3 %v2887_v24  ;;  %v5975_v1 = vpop.eup %4486  ;;  %v2381_v41 = vmul.f32 1.442695, %v2348_v59 }
 0x43d   : > { %v5979_v23 = vpop.eup %4488  ;;  %v2446_v11 = vpack.c.bf16 %v5975_v1, %v5975_v1 }
 0x43e   : > { %v2445_v19 = vpack.c.bf16 %v5979_v23, %v5979_v23 }
 0x43f   : > { %v2535_v25 = vunpack.c.l.b16 %v2446_v11 }
 0x440   : > { %3045 = vrot.lane.b32.xlu0 %v5558_v26, %s4737_s20  ;;  %v2534_v27 = vunpack.c.l.b16 %v2445_v19 }
 0x442   : > { %3302 = vrot.lane.b32.xlu1 %v5610_v61, %s4738_s21 }
 0x443   : > { %4222 = vmatmul.msk.bf16.gmra.mxu3 %vm1963_vm5, %v2468_v60  ;;  %v2350_v28 = vpop.f32.mrf.mxu2  ;;  %v2540_v60 = vpack.c.b16 %v2535_v25, %v2534_v27  ;;  %v2394_v25 = vsel %vm1963_vm5, %v5886_v6, 0.0 }
 0x444   : > { %v2383_v32 = vmul.f32 1.442695, %v2350_v28  ;;  %v2838_v28 = vpop.f32.mrf.mxu0 }
 0x448   : > { %3304 = vrot.lane.b32.xlu0 %v5558_v26, %s4738_s21 }
 0x449   : > { %v1990_v58 = vpop.xlane.xlu1 %1989 }
 0x44a   : > { %3381 = vrot.lane.b32.xlu1 %v5618_v34, %s4736_s15  ;;  %4490 = vrcp.f32 %v1990_v58 }
 0x44f   : > { %3047 = vrot.lane.b32.xlu2 %v5575_v0, %s4737_s20 }
 0x450   : > { %3385 = vrot.lane.b32.xlu0 %v5644_v36, %s4736_s15  ;;  %v4491_v38 = vpop.eup %4490 }
 0x451   : > { %v1993_v42 = vpop.xlane.xlu2 %1992 }
 0x452   : > { %3122 = vrot.lane.b32.xlu1 %v5644_v36, %s4737_s20  ;;  %4492 = vrcp.f32 %v1993_v42 }
 0x453   : > { %4223 = vmatmul.msk.bf16.vlgmr.msrb.gmra.mxu3 %vm1963_vm5, %v2538_v14  ;;  %4494 = vpow2.f32 %v2383_v32 }
 0x454   : > { %4496 = vpow2.f32 %v2381_v41 }
 0x457   : > { %3043 = vrot.lane.b32.xlu2 %v5610_v61, %s4737_s20 }
 0x458   : > { %3308 = vrot.lane.b32.xlu0 %v5606_v13, %s4738_s21  ;;  %v4493_v24 = vpop.eup %4492 }
 0x459   : > { %v5960_v50 = vpop.permute.xlu2 %2864  ;;  %v1996_v15 = vpop.xlane.xlu1 %1995 }
 0x45a   : > { %3373 = vrot.lane.b32.xlu1 %v5618_v34, %s4738_s21  ;;  %v5996_v51 = vpop.eup %4494  ;;  %4498 = vrcp.f32 %v1996_v15 }
 0x45b   : > { %v6000_v35 = vpop.eup %4496  ;;  %v2448_v17 = vpack.c.bf16 %v5996_v51, %v5996_v51 }
 0x45c   : > { %v2447_v14 = vpack.c.bf16 %v6000_v35, %v6000_v35 }
 0x45d   : > { %v2537_v43 = vunpack.c.l.b16 %v2448_v17 }
 0x45e   : > { %v2536_v29 = vunpack.c.l.b16 %v2447_v14 }
 0x45f   : > { %3306 = vrot.lane.b32.xlu2 %v5575_v0, %s4738_s21 }
 0x460   : > { %3371 = vrot.lane.b32.xlu0 %v5654_v21, %s4738_s21  ;;  %v4499_v42 = vpop.eup %4498  ;;  %v2541_v59 = vpack.c.b16 %v2537_v43, %v2536_v29 }
 0x461   : > { %v5970_v30 = vpop.permute.xlu2 %3312  ;;  %v1999_v16 = vpop.xlane.xlu0 %1998 }
 0x462   : > { %3377 = vrot.lane.b32.xlu1 %v5644_v36, %s4738_s21  ;;  %4500 = vrcp.f32 %v1999_v16  ;;  %v3334_v4 = vsel %vm1796_vm0, %v5970_v30, 0  ;;  %v2388_v30 = vsel %vm1963_vm5, %v5847_v46, 0.0 }
 0x463   : > { %4224 = vmatmul.msk.bf16.gmra.mxu3 %vm1963_vm5, %v2539_v10 }
 0x466   : > { %v2154_v57 = vpop.f32.mrf.mxu3 }
 0x467   : > { %3383 = vrot.lane.b32.xlu2 %v5628_v5, %s4736_s15  ;;  %v2198_v52 = vmul.f32 %v4491_v38, %v2154_v57 }
 0x468   : > { %3118 = vrot.lane.b32.xlu0 %v5618_v34, %s4737_s20  ;;  %v4501_v33 = vpop.eup %4500 }
 0x469   : > { %v3050_v48 = vpop.permute.xlu2 %3049 }
 0x46a   : > { %3558 = vrot.lane.b32.xlu1 %v5558_v26, %s4739_s22  ;;  %3071 = vmatpush.bf16.msra.mxu0 %v3050_v48  ;;  %v2840_v48 = vpop.f32.mrf.mxu0 }
 0x46b   : > { %v2929_v46 = vmul.f32 1.442695, %v2840_v48 }
 0x46e   : > { %v2156_v54 = vpop.f32.mrf.mxu3 }
 0x46f   : > { %v2199_v55 = vmul.f32 %v4493_v24, %v2156_v54  ;;  %3379 = vrot.lane.b32.xlu2 %v5654_v21, %s4736_s15 }
 0x470   : > { %3375 = vrot.lane.b32.xlu0 %v5628_v5, %s4738_s21  ;;  %s4293_s21 = sshll.u32 (%p4828_p6), %s4712_s27, 5 }
 0x471   : > { %v2210_v26 = vpack.c.bf16 %v2199_v55, %v2198_v52  ;;  %v3317_v47 = vpop.permute.xlu1 %3316 }
 0x472   : > { %v3340_v45 = vsel %vm1796_vm0, %v3317_v47, 0  ;;  %v2843_v32 = vpop.f32.mrf.mxu0 }
 0x473   : > { %4225 = vmatmul.msk.bf16.gmra.mxu3 %vm1963_vm5, %v2540_v60  ;;  %4239 = vmatmul.msk.bf16.gmra.mxu2 %vm1796_vm0, %v2210_v26 }
 0x474   : > { %3346 = vmatpush.bf16.xpose.msrb.mxu2 %v3340_v45  ;;  %v3311_v10 = vpop.permute.xlu0 %3310 }
 0x475   : > { %v3331_v57 = vsel %vm1796_vm0, %v3311_v10, 0  ;;  %v2397_v10 = vsel %vm1963_vm5, %v5899_v37, 0.0 }
 0x476   : > { %v2159_v63 = vpop.f32.mrf.mxu3 }
 0x477   : > { %3120 = vrot.lane.b32.xlu2 %v5628_v5, %s4737_s20  ;;  %v2200_v12 = vmul.f32 %v4499_v42, %v2159_v63 }
 0x478   : > { %3560 = vrot.lane.b32.xlu0 %v5575_v0, %s4739_s22 }
 0x47a   : > { %v2845_v41 = vpop.f32.mrf.mxu0 }
 0x47b   : > { %v2933_v42 = vmul.f32 1.442695, %v2845_v41 }
 0x47c   : > { %3347 = vmatpush.bf16.xpose.msrb.mxu2 %v3337_v40 }
 0x47e   : > { %v2161_v22 = vpop.f32.mrf.mxu3 }
 0x47f   : > { %v2201_v9 = vmul.f32 %v4501_v33, %v2161_v22  ;;  %3116 = vrot.lane.b32.xlu2 %v5654_v21, %s4737_s20  ;;  %v2931_v33 = vmul.f32 1.442695, %v2843_v32  ;;  %v6083_v32 = vpop.f32.mrf.mxu2  ;;  %s4178_s20 = sshll.u32 %s371_s14, 6  ;;  %s4292_s14 = sshll.u32 (%p4828_p6), %s4708_s26, 2 }
 0x480   : > { %s6467_s24 = scalar_lea.vmem [#allocation3], %s4178_s20 }
 0x481   : > { %v2211_v0 = vpack.c.bf16 %v2201_v9, %v2200_v12 }
 0x482   : > { %v2848_v17 = vpop.f32.mrf.mxu0 }
 0x483   : > { %4226 = vmatmul.msk.bf16.gmra.mxu3 %vm1963_vm5, %v2541_v59  ;;  %4240 = vmatmul.msk.bf16.gmra.mxu2 %vm1796_vm0, %v2211_v0 }
 0x484   : > { %3348 = vmatpush.bf16.xpose.msrb.mxu2 %v3334_v4 }
 0x486   : > { %v2164_v58 = vpop.f32.mrf.mxu3 }
 0x487   : > { %3562 = vrot.lane.b32.xlu2 %v5606_v13, %s4739_s22  ;;  %v2400_v13 = vsel %vm1963_vm5, %v5897_v62, 0.0  ;;  %v2927_v62 = vmul.f32 1.442695, %v2838_v28 }
 0x48c   : > { %3349 = vmatpush.bf16.xpose.msrb.mxu2 %v3331_v57 }
 0x48e   : > { %v2166_v11 = vpop.f32.mrf.mxu3 }
 0x48f   : > { %3556 = vrot.lane.b32.xlu2 %v5610_v61, %s4739_s22  ;;  %v2385_v61 = vsel %vm1963_vm5, %v5840_v53, 0.0 }
 0x493   : > { %4247 = vmatmul.msk.bf16.vlgmr.msra.gmra.mxu3 %vm1796_vm0, %v5827_v31  ;;  %v2406_v31 = vsel %vm1963_vm5, %v5914_v3, 0.0 }
 0x494   : > { %2389 = vadd.xlane.f32.xlu1 %v2388_v30 }
 0x496   : > { %v6024_v15 = vpop.f32.mrf.mxu3 }
 0x49c   : > { %2401 = vadd.xlane.f32.xlu1 %v2400_v13  ;;  %v2008_v54 = vpop.xlane.xlu1 %2007 }
 0x49e   : > { %v6028_v19 = vpop.f32.mrf.mxu3 }
 0x49f   : > { %v2011_v24 = vpop.xlane.xlu0 %2010 }
 0x4a2   : > { %v2002_v38 = vpop.xlane.xlu2 %2001  ;;  %2386 = vadd.xlane.f32.xlu0 %v2385_v61 }
 0x4a3   : > { %4248 = vmatmul.msk.bf16.gmra.mxu3 %vm1796_vm0, %v5836_v7  ;;  %4502 = vrcp.f32 %v2002_v38  ;;  %v2403_v38 = vsel %vm1963_vm5, %v5918_v2, 0.0  ;;  %v6100_v2 = vpop.f32.mrf.mxu2 }
 0x4a4   : > { %2407 = vadd.xlane.f32.xlu1 %v2406_v31  ;;  %4504 = vpow2.f32 %v2929_v46  ;;  %v2935_v46 = vmul.f32 1.442695, %v2848_v17 }
 0x4a6   : > { %v6036_v56 = vpop.f32.mrf.mxu3 }
 0x4a9   : > { %v4503_v3 = vpop.eup %4502 }
 0x4aa   : > { %v2005_v53 = vpop.xlane.xlu2 %2004  ;;  %2395 = vadd.xlane.f32.xlu0 %v2394_v25  ;;  %v6042_v27 = vpop.eup %4504  ;;  %v2202_v55 = vmul.f32 %v4503_v3, %v2164_v58 }
 0x4ab   : > { %4506 = vrcp.f32 %v2005_v53  ;;  %v3008_v6 = vpack.c.bf16 %v6042_v27, %v6042_v27  ;;  %v2850_v58 = vpop.f32.mrf.mxu0 }
 0x4ac   : > { %4508 = vpow2.f32 %v2927_v62 }
 0x4ad   : > { %4510 = vrcp.f32 %v2011_v24  ;;  %v3032_v43 = vunpack.c.l.b16 %v3008_v6 }
 0x4ae   : > { %v6040_v7 = vpop.f32.mrf.mxu3  ;;  %4512 = vrcp.f32 %v2008_v54 }
 0x4af   : > { %4514 = vpow2.f32 %v2933_v42 }
 0x4b0   : > { %4516 = vpow2.f32 %v2931_v33 }
 0x4b1   : > { %v4507_v52 = vpop.eup %4506 }
 0x4b2   : > { %v2203_v26 = vmul.f32 %v4507_v52, %v2166_v11  ;;  %v3048_v47 = vpop.permute.xlu2 %3047  ;;  %v3046_v60 = vpop.permute.xlu0 %3045 }
 0x4b3   : > { %v6044_v45 = vpop.eup %4508  ;;  %4249 = vmatmul.msk.bf16.gmra.mxu3 %vm1796_vm0, %v5851_v20  ;;  %3072 = vmatpush.bf16.msra.mxu0 %v3048_v47  ;;  %v2391_v20 = vsel %vm1963_vm5, %v5888_v39, 0.0  ;;  %v2853_v62 = vpop.f32.mrf.mxu0 }
 0x4b4   : > { %v6050_v16 = vpop.permute.xlu1 %3302  ;;  %v2212_v63 = vpack.c.bf16 %v2203_v26, %v2202_v55  ;;  %v3007_v40 = vpack.c.bf16 %v6044_v45, %v6044_v45  ;;  %v4511_v59 = vpop.eup %4510 }
 0x4b5   : > { %v4513_v4 = vpop.eup %4512  ;;  %v2205_v57 = vmul.f32 %v4511_v59, %v6028_v19 }
 0x4b6   : > { %v6054_v14 = vpop.f32.mrf.mxu3  ;;  %4241 = vmatmul.msk.bf16.gmra.mxu2 %vm1796_vm0, %v2212_v63  ;;  %v3031_v22 = vunpack.c.l.b16 %v3007_v40  ;;  %v6071_v28 = vpop.eup %4514  ;;  %v2204_v11 = vmul.f32 %v4513_v4, %v6024_v15 }
 0x4b7   : > { %3073 = vmatpush.bf16.msra.mxu0 %v3046_v60  ;;  %v3010_v37 = vpack.c.bf16 %v6071_v28, %v6071_v28 }
 0x4b8   : > { %2392 = vadd.xlane.f32.xlu2 %v2391_v20  ;;  %v3039_v9 = vpack.c.b16 %v3032_v43, %v3031_v22  ;;  %v2213_v19 = vpack.c.bf16 %v2205_v57, %v2204_v11  ;;  %v2939_v20 = vmul.f32 1.442695, %v2853_v62  ;;  %v6117_v43 = vpop.f32.mrf.mxu2 }
 0x4b9   : > { %v3034_v31 = vunpack.c.l.b16 %v3010_v37 }
 0x4ba   : > { %v3044_v29 = vpop.permute.xlu2 %3043  ;;  %v6059_v12 = vpop.permute.xlu0 %3304 }
 0x4bb   : > { %3074 = vmatpush.bf16.msra.mxu0 %v3044_v29  ;;  %v2855_v6 = vpop.f32.mrf.mxu0 }
 0x4bc   : > { %v3382_v0 = vpop.permute.xlu1 %3381  ;;  %v2941_v40 = vmul.f32 1.442695, %v2855_v6 }
 0x4bd   : > { %3631 = vrot.lane.b32.xlu1 %v5618_v34, %s4739_s22  ;;  %v3403_v47 = vsel %vm1796_vm0, %v3382_v0, 0 }
 0x4be   : > { %3635 = vrot.lane.b32.xlu0 %v5644_v36, %s4739_s22  ;;  %v6065_v39 = vpop.f32.mrf.mxu3  ;;  %4251 = vmatmul.msk.bf16.vlgmr.msra.gmra.mxu0 %vm1963_vm5, %v3039_v9  ;;  %v6076_v36 = vpop.eup %4516 }
 0x4bf   : > { %v3009_v15 = vpack.c.bf16 %v6076_v36, %v6076_v36 }
 0x4c0   : > { %2398 = vadd.xlane.f32.xlu2 %v2397_v10  ;;  %v6129_v57 = vpop.f32.mrf.mxu2 }
 0x4c1   : > { %v3033_v25 = vunpack.c.l.b16 %v3009_v15 }
 0x4c2   : > { %v6074_v34 = vpop.permute.xlu2 %3306  ;;  %v3386_v30 = vpop.permute.xlu0 %3385 }
 0x4c3   : > { %v3409_v48 = vsel %vm1796_vm0, %v3386_v30, 0  ;;  %4250 = vmatmul.msk.bf16.gmra.mxu3 %vm1796_vm0, %v5960_v50  ;;  %v2937_v50 = vmul.f32 1.442695, %v2850_v58 }
 0x4c4   : > { %v3123_v13 = vpop.permute.xlu1 %3122  ;;  %3415 = vmatpush.bf16.xpose.msrb.mxu0 %v3409_v48  ;;  %4303 = vmatpush.bf16.xpose.msra.mxu2 %v3409_v48 }
 0x4c5   : > { %3144 = vmatpush.bf16.msrb.mxu3 %v3123_v13  ;;  %4518 = vpow2.f32 %v2937_v50 }
 0x4c6   : > { %3629 = vrot.lane.b32.xlu0 %v5654_v21, %s4739_s22  ;;  %v6089_v61 = vpop.f32.mrf.mxu3  ;;  %4242 = vmatmul.msk.bf16.gmra.mxu2 %vm1796_vm0, %v2213_v19  ;;  %v3040_v21 = vpack.c.b16 %v3034_v31, %v3033_v25  ;;  %4520 = vpow2.f32 %v2935_v46 }
 0x4c7   : > { %4522 = vpow2.f32 %v2941_v40  ;;  %v2421_v40 = vsel %vm1963_vm5, %v5979_v23, 0.0 }
 0x4c8   : > { %2404 = vadd.xlane.f32.xlu2 %v2403_v38  ;;  %4524 = vpow2.f32 %v2939_v20  ;;  %v6143_v31 = vpop.f32.mrf.mxu2 }
 0x4ca   : > { %v3384_v24 = vpop.permute.xlu2 %3383  ;;  %v6094_v53 = vpop.permute.xlu0 %3308 }
 0x4cb   : > { %v3406_v41 = vsel %vm1796_vm0, %v3384_v24, 0  ;;  %v6102_v3 = vpop.eup %4518 }
 0x4cc   : > { %3416 = vmatpush.bf16.xpose.msrb.mxu0 %v3406_v41  ;;  %4304 = vmatpush.bf16.xpose.msra.mxu2 %v3406_v41  ;;  %v6106_v26 = vpop.eup %4520  ;;  %v3012_v60 = vpack.c.bf16 %v6102_v3, %v6102_v3  ;;  %v3374_v59 = vpop.permute.xlu1 %3373 }
 0x4cd   : > { %v3011_v63 = vpack.c.bf16 %v6106_v26, %v6106_v26 }
 0x4ce   : > { %v6097_v54 = vpop.f32.mrf.mxu3  ;;  %4252 = vmatmul.msk.bf16.gmra.mxu0 %vm1963_vm5, %v3040_v21  ;;  %v3036_v42 = vunpack.c.l.b16 %v3012_v60  ;;  %v2962_v21 = vsel %vm1963_vm5, %v6042_v27, 0.0  ;;  %v2424_v27 = vsel %vm1963_vm5, %v5975_v1, 0.0  ;;  %v2412_v1 = vsel %vm1963_vm5, %v5931_v44, 0.0 }
 0x4cf   : > { %v3035_v33 = vunpack.c.l.b16 %v3011_v63  ;;  %v2430_v44 = vsel %vm1963_vm5, %v5996_v51, 0.0 }
 0x4d1   : > { %v3041_v0 = vpack.c.b16 %v3036_v42, %v3035_v33 }
 0x4d2   : > { %v3380_v52 = vpop.permute.xlu2 %3379  ;;  %v6104_v55 = vpop.permute.xlu0 %3371 }
 0x4d3   : > { %v3400_v9 = vsel %vm1796_vm0, %v3380_v52, 0  ;;  %v6158_v52 = vpop.f32.mrf.mxu2 }
 0x4d4   : > { %3417 = vmatpush.bf16.xpose.msrb.mxu0 %v3403_v47  ;;  %4305 = vmatpush.bf16.xpose.msra.mxu2 %v3403_v47  ;;  %v3378_v13 = vpop.permute.xlu1 %3377  ;;  %v2965_v47 = vsel %vm1963_vm5, %v6076_v36, 0.0  ;;  %v2959_v36 = vsel %vm1963_vm5, %v6044_v45, 0.0 }
 0x4d6   : > { %v6113_v17 = vpop.f32.mrf.mxu3  ;;  %4267 = vmatmul.msk.bf16.vlgmr.msrb.gmra.mxu2 %vm1796_vm0, %v6050_v16  ;;  %v6125_v16 = vpop.eup %4522 }
 0x4d7   : > { %v6127_v10 = vpop.eup %4524  ;;  %v3014_v11 = vpack.c.bf16 %v6125_v16, %v6125_v16 }
 0x4d8   : > { %v3013_v48 = vpack.c.bf16 %v6127_v10, %v6127_v10 }
 0x4d9   : > { %v3038_v19 = vunpack.c.l.b16 %v3014_v11 }
 0x4da   : > { %v3121_v22 = vpop.permute.xlu2 %3120  ;;  %v3119_v29 = vpop.permute.xlu0 %3118  ;;  %v3037_v15 = vunpack.c.l.b16 %v3013_v48 }
 0x4db   : > { %3145 = vmatpush.bf16.msrb.mxu3 %v3121_v22 }
 0x4dc   : > { %3418 = vmatpush.bf16.xpose.msrb.mxu0 %v3400_v9  ;;  %4306 = vmatpush.bf16.xpose.msra.mxu2 %v3400_v9  ;;  %v3042_v38 = vpack.c.b16 %v3038_v19, %v3037_v15  ;;  %v3559_v25 = vpop.permute.xlu1 %3558 }
 0x4de   : > { %v6120_v4 = vpop.f32.mrf.mxu3  ;;  %4253 = vmatmul.msk.bf16.gmra.mxu0 %vm1963_vm5, %v3041_v0 }
 0x4df   : > { %3146 = vmatpush.bf16.msrb.mxu3 %v3119_v29 }
 0x4e0   : > { %3633 = vrot.lane.b32.xlu2 %v5628_v5, %s4739_s22  ;;  %v2415_v5 = vsel %vm1963_vm5, %v5954_v18, 0.0  ;;  %v2409_v18 = vsel %vm1963_vm5, %v5933_v49, 0.0  ;;  %s3983_s22 = sadd.s32 (%p4828_p6), %s4293_s21, %s4292_s14 }
 0x4e1   : > { %s4294_s23 = sshll.u32 (%p4828_p6), %s3983_s22, 2 }
 0x4e2   : > { %v3117_v58 = vpop.permute.xlu2 %3116  ;;  %v6133_v30 = vpop.permute.xlu0 %3375  ;;  %s3985_s12 = scalar_lea.vmem (%p4828_p6), %s6579_s7, %s4294_s23 }
 0x4e3   : > { %3147 = vmatpush.bf16.msrb.mxu3 %v3117_v58 }
 0x4e6   : > { %v6137_v37 = vpop.f32.mrf.mxu3  ;;  %4268 = vmatmul.msk.bf16.gmra.mxu2 %vm1796_vm0, %v6059_v12  ;;  %v2427_v12 = vsel %vm1963_vm5, %v6000_v35, 0.0  ;;  %v2418_v35 = vsel %vm1963_vm5, %v5950_v8, 0.0  ;;  %v2635_v8 = vld [vmem:[%s6577_s5 + $0x4] sm:$0xf] }
 0x4e7   : > { %2416 = vadd.xlane.f32.xlu1 %v2415_v5  ;;  %v2662_v60 = vsel %vm2660_vm6, %v2635_v8, 0 }
 0x4e8   : > { %2671 = vmatpush.bf16.msrb.mxu1 %v2662_v60 }
 0x4ea   : > { %v3563_v50 = vpop.permute.xlu2 %3562  ;;  %v3561_v46 = vpop.permute.xlu0 %3560 }
 0x4eb   : > { %3584 = vmatpush.bf16.msra.mxu3 %v3563_v50 }
 0x4ee   : > { %v6145_v62 = vpop.f32.mrf.mxu3  ;;  %4254 = vmatmul.msk.bf16.gmra.mxu0 %vm1963_vm5, %v3042_v38 }
 0x4ef   : > { %2428 = vadd.xlane.f32.xlu1 %v2427_v12  ;;  %3585 = vmatpush.bf16.msra.mxu3 %v3561_v46 }
 0x4f0   : > { %2410 = vadd.xlane.f32.xlu0 %v2409_v18 }
 0x4f2   : > { %v3557_v24 = vpop.permute.xlu2 %3556 }
 0x4f3   : > { %3586 = vmatpush.bf16.msra.mxu3 %v3559_v25 }
 0x4f6   : > { %v6152_v41 = vpop.f32.mrf.mxu3  ;;  %4269 = vmatmul.msk.bf16.gmra.mxu2 %vm1796_vm0, %v6074_v34  ;;  %v6170_v34 = vpop.f32.mrf.mxu2 }
 0x4f7   : > { %2963 = vadd.xlane.f32.xlu1 %v2962_v21  ;;  %3587 = vmatpush.bf16.msra.mxu3 %v3557_v24 }
 0x4f8   : > { %2419 = vadd.xlane.f32.xlu0 %v2418_v35 }
 0x4fe   : > { %v6162_v49 = vpop.f32.mrf.mxu3  ;;  %4271 = vmatmul.msk.bf16.vlgmr.msrb.gmra.mxu0 %vm1796_vm0, %v6104_v55  ;;  %v6184_v55 = vpop.f32.mrf.mxu2 }
 0x4ff   : > { %2966 = vadd.xlane.f32.xlu1 %v2965_v47 }
 0x500   : > { %2425 = vadd.xlane.f32.xlu0 %v2424_v27 }
 0x506   : > { %v6176_v6 = vpop.f32.mrf.mxu3  ;;  %4270 = vmatmul.msk.bf16.gmra.mxu2 %vm1796_vm0, %v6094_v53  ;;  %v2502_v53 = vpop.f32.mrf.mxu1 }
 0x507   : > { %v2390_v42 = vpop.xlane.xlu1 %2389  ;;  %v6191_v20 = vpop.f32.mrf.mxu2 }
 0x508   : > { %2960 = vadd.xlane.f32.xlu0 %v2959_v36  ;;  %4526 = vrcp.f32 %v2390_v42 }
 0x509   : > { %2413 = vadd.xlane.f32.xlu2 %v2412_v1 }
 0x50e   : > { %v6186_v63 = vpop.f32.mrf.mxu3  ;;  %4272 = vmatmul.msk.bf16.gmra.mxu0 %vm1796_vm0, %v3374_v59  ;;  %v4527_v29 = vpop.eup %4526 }
 0x50f   : > { %v2504_v0 = vpop.f32.mrf.mxu1  ;;  %v6196_v23 = vpop.f32.mrf.mxu2 }
 0x510   : > { %v2612_v59 = vmul.f32 %v4527_v29, %v2504_v0 }
 0x511   : > { %2422 = vadd.xlane.f32.xlu2 %v2421_v40 }
 0x515   : > { %v2387_v45 = vpop.xlane.xlu0 %2386 }
 0x516   : > { %4528 = vrcp.f32 %v2387_v45  ;;  %v2907_v33 = vpop.f32.mrf.mxu3  ;;  %4274 = vmatmul.msk.bf16.vlgmr.msra.gmra.mxu2 %vm1796_vm0, %v3378_v13 }
 0x517   : > { %v2943_v22 = vmul.f32 1.442695, %v2907_v33  ;;  %v6207_v50 = vpop.f32.mrf.mxu2 }
 0x519   : > { %2431 = vadd.xlane.f32.xlu2 %v2430_v44  ;;  %4530 = vpow2.f32 %v2943_v22 }
 0x51c   : > { %v4529_v9 = vpop.eup %4528 }
 0x51d   : > { %v2611_v58 = vmul.f32 %v4529_v9, %v2502_v53  ;;  %v2396_v38 = vpop.xlane.xlu0 %2395  ;;  %v2402_v53 = vpop.xlane.xlu1 %2401 }
 0x51e   : > { %v2909_v11 = vpop.f32.mrf.mxu3  ;;  %4273 = vmatmul.msk.bf16.gmra.mxu0 %vm1796_vm0, %v6133_v30 }
 0x51f   : > { %v2627_v48 = vpack.c.bf16 %v2612_v59, %v2611_v58  ;;  %v2945_v5 = vmul.f32 1.442695, %v2909_v11  ;;  %v6201_v51 = vpop.eup %4530  ;;  %v6212_v8 = vpop.f32.mrf.mxu2 }
 0x520   : > { %v3015_v13 = vpack.c.bf16 %v6201_v51, %v6201_v51 }
 0x521   : > { %4532 = vpow2.f32 %v2945_v5  ;;  %4227 = vmatmul.msk.bf16.vlgmr.msrb.gmra.mxu1 %vm1796_vm0, %v2627_v48 }
 0x522   : > { %v3104_v12 = vunpack.c.l.b16 %v3015_v13  ;;  %4534 = vrcp.f32 %v2396_v38 }
 0x525   : > { %v2408_v13 = vpop.xlane.xlu1 %2407 }
 0x526   : > { %v2912_v19 = vpop.f32.mrf.mxu3 }
 0x527   : > { %v6205_v15 = vpop.eup %4532  ;;  %v2947_v30 = vmul.f32 1.442695, %v2912_v19 }
 0x528   : > { %v3016_v46 = vpack.c.bf16 %v6205_v15, %v6205_v15  ;;  %v4535_v47 = vpop.eup %4534 }
 0x529   : > { %v2614_v42 = vmul.f32 %v4535_v47, %v6040_v7 }
 0x52a   : > { %v3105_v18 = vunpack.c.l.b16 %v3016_v46 }
 0x52b   : > { %v2393_v25 = vpop.xlane.xlu2 %2392 }
 0x52c   : > { %v3112_v24 = vpack.c.b16 %v3105_v18, %v3104_v12  ;;  %4536 = vrcp.f32 %v2393_v25 }
 0x52d   : > { %4538 = vpow2.f32 %v2947_v30 }
 0x52e   : > { %v2914_v21 = vpop.f32.mrf.mxu3  ;;  %4255 = vmatmul.msk.bf16.vlgmr.msrb.gmra.mxu3 %vm1963_vm5, %v3112_v24 }
 0x52f   : > { %v2949_v35 = vmul.f32 1.442695, %v2914_v21 }
 0x530   : > { %v3636_v27 = vpop.permute.xlu0 %3635 }
 0x531   : > { %4540 = vpow2.f32 %v2949_v35  ;;  %3657 = vmatpush.bf16.msrb.mxu2 %v3636_v27 }
 0x532   : > { %v4537_v60 = vpop.eup %4536 }
 0x533   : > { %v6214_v36 = vpop.eup %4538  ;;  %v2399_v1 = vpop.xlane.xlu2 %2398  ;;  %v2613_v40 = vmul.f32 %v4537_v60, %v6036_v56 }
 0x534   : > { %v3017_v33 = vpack.c.bf16 %v6214_v36, %v6214_v36  ;;  %4542 = vrcp.f32 %v2399_v1  ;;  %v3632_v60 = vpop.permute.xlu1 %3631 }
 0x535   : > { %v2628_v45 = vpack.c.bf16 %v2614_v42, %v2613_v40  ;;  %4544 = vrcp.f32 %v2402_v53 }
 0x536   : > { %v2917_v44 = vpop.f32.mrf.mxu3  ;;  %v3106_v56 = vunpack.c.l.b16 %v3017_v33 }
 0x537   : > { %v6220_v22 = vpop.eup %4540  ;;  %4228 = vmatmul.msk.bf16.gmra.mxu1 %vm1796_vm0, %v2628_v45  ;;  %v2951_v9 = vmul.f32 1.442695, %v2917_v44 }
 0x538   : > { %v3018_v29 = vpack.c.bf16 %v6220_v22, %v6220_v22  ;;  %v3630_v53 = vpop.permute.xlu0 %3629 }
 0x539   : > { %v6225_v0 = vpop.f32.mrf.mxu2  ;;  %4546 = vpow2.f32 %v2951_v9 }
 0x53a   : > { %v3107_v7 = vunpack.c.l.b16 %v3018_v29  ;;  %v4543_v48 = vpop.eup %4542 }
 0x53b   : > { %v2405_v59 = vpop.xlane.xlu2 %2404  ;;  %v6227_v58 = vpop.f32.mrf.mxu0  ;;  %v2615_v30 = vmul.f32 %v4543_v48, %v6054_v14 }
 0x53c   : > { %v3113_v11 = vpack.c.b16 %v3107_v7, %v3106_v56  ;;  %v4545_v38 = vpop.eup %4544 }
 0x53d   : > { %v2616_v24 = vmul.f32 %v4545_v38, %v6065_v39 }
 0x53e   : > { %v2919_v5 = vpop.f32.mrf.mxu3  ;;  %4256 = vmatmul.msk.bf16.gmra.mxu3 %vm1963_vm5, %v3113_v11 }
 0x53f   : > { %v2953_v19 = vmul.f32 1.442695, %v2919_v5  ;;  %v6233_v12 = vpop.eup %4546  ;;  %v2629_v21 = vpack.c.bf16 %v2616_v24, %v2615_v30 }
 0x540   : > { %v3019_v35 = vpack.c.bf16 %v6233_v12, %v6233_v12 }
 0x541   : > { %4548 = vpow2.f32 %v2953_v19  ;;  %v6230_v46 = vpop.f32.mrf.mxu2 }
 0x542   : > { %4550 = vrcp.f32 %v2405_v59  ;;  %v3108_v39 = vunpack.c.l.b16 %v3019_v35 }
 0x543   : > { %v3634_v18 = vpop.permute.xlu2 %3633  ;;  %v6235_v25 = vpop.f32.mrf.mxu0  ;;  %4552 = vrcp.f32 %v2408_v13 }
 0x544   : > { %3658 = vmatpush.bf16.msrb.mxu2 %v3634_v18 }
 0x546   : > { %v2922_v47 = vpop.f32.mrf.mxu3 }
 0x547   : > { %v6240_v27 = vpop.eup %4548  ;;  %4229 = vmatmul.msk.bf16.gmra.mxu1 %vm1796_vm0, %v2629_v21  ;;  %v2955_v1 = vmul.f32 1.442695, %v2922_v47 }
 0x548   : > { %v3020_v14 = vpack.c.bf16 %v6240_v27, %v6240_v27  ;;  %3659 = vmatpush.bf16.msrb.mxu2 %v3632_v60  ;;  %v4551_v44 = vpop.eup %4550 }
 0x549   : > { %v6245_v40 = vpop.f32.mrf.mxu2  ;;  %4554 = vpow2.f32 %v2955_v1  ;;  %v4553_v56 = vpop.eup %4552  ;;  %v2617_v7 = vmul.f32 %v4551_v44, %v6089_v61 }
 0x54a   : > { %v3109_v42 = vunpack.c.l.b16 %v3020_v14  ;;  %v2618_v48 = vmul.f32 %v4553_v56, %v6097_v54  ;;  %v2968_v56 = vsel %vm1963_vm5, %v6071_v28, 0.0 }
 0x54b   : > { %v6247_v45 = vpop.f32.mrf.mxu0 }
 0x54c   : > { %3660 = vmatpush.bf16.msrb.mxu2 %v3630_v53  ;;  %v3114_v33 = vpack.c.b16 %v3109_v42, %v3108_v39  ;;  %v2630_v13 = vpack.c.bf16 %v2618_v48, %v2617_v7 }
 0x54e   : > { %v2924_v29 = vpop.f32.mrf.mxu3  ;;  %4257 = vmatmul.msk.bf16.gmra.mxu3 %vm1963_vm5, %v3114_v33 }
 0x54f   : > { %v2957_v9 = vmul.f32 1.442695, %v2924_v29  ;;  %v6253_v11 = vpop.eup %4554 }
 0x550   : > { %v3021_v19 = vpack.c.bf16 %v6253_v11, %v6253_v11 }
 0x551   : > { %4556 = vpow2.f32 %v2957_v9  ;;  %v6251_v59 = vpop.f32.mrf.mxu2 }
 0x552   : > { %v3110_v18 = vunpack.c.l.b16 %v3021_v19 }
 0x553   : > { %v6256_v5 = vpop.f32.mrf.mxu0 }
 0x557   : > { %v6260_v38 = vpop.eup %4556  ;;  %4230 = vmatmul.msk.bf16.gmra.mxu1 %vm1796_vm0, %v2630_v13 }
 0x558   : > { %v3022_v61 = vpack.c.bf16 %v6260_v38, %v6260_v38 }
 0x559   : > { %v3351_v30 = vpop.f32.mrf.mxu2 }
 0x55a   : > { %v3111_v24 = vunpack.c.l.b16 %v3022_v61  ;;  %v3440_v21 = vmul.f32 1.442695, %v3351_v30 }
 0x55b   : > { %v6265_v35 = vpop.f32.mrf.mxu0 }
 0x55c   : > { %4558 = vpow2.f32 %v3440_v21  ;;  %v3115_v54 = vpack.c.b16 %v3111_v24, %v3110_v18  ;;  %v2971_v21 = vsel %vm1963_vm5, %v6106_v26, 0.0 }
 0x55e   : > { %4258 = vmatmul.msk.bf16.gmra.mxu3 %vm1963_vm5, %v3115_v54 }
 0x561   : > { %v3353_v47 = vpop.f32.mrf.mxu2 }
 0x562   : > { %v4559_v60 = vpop.eup %4558  ;;  %v3442_v14 = vmul.f32 1.442695, %v3353_v47 }
 0x563   : > { %v6268_v1 = vpop.f32.mrf.mxu0  ;;  %v3472_v39 = vsel %vm1963_vm5, %v4559_v60, 0.0  ;;  %v3520_v42 = vpack.c.bf16 %v4559_v60, %v4559_v60 }
 0x564   : > { %4560 = vpow2.f32 %v3442_v14  ;;  %3473 = vadd.xlane.f32.xlu2 %v3472_v39  ;;  %v2411_v14 = vpop.xlane.xlu0 %2410 }
 0x565   : > { %v3544_v48 = vunpack.c.l.b16 %v3520_v42 }
 0x569   : > { %v3356_v53 = vpop.f32.mrf.mxu2 }
 0x56a   : > { %v4561_v33 = vpop.eup %4560  ;;  %v3444_v44 = vmul.f32 1.442695, %v3356_v53 }
 0x56b   : > { %v3521_v29 = vpack.c.bf16 %v4561_v33, %v4561_v33  ;;  %v6271_v9 = vpop.f32.mrf.mxu0  ;;  %v3475_v7 = vsel %vm1963_vm5, %v4561_v33, 0.0  ;;  %v2974_v33 = vsel %vm1963_vm5, %v6102_v3, 0.0 }
 0x56c   : > { %4562 = vpow2.f32 %v3444_v44  ;;  %2969 = vadd.xlane.f32.xlu2 %v2968_v56  ;;  %3476 = vadd.xlane.f32.xlu0 %v3475_v7 }
 0x56d   : > { %v3545_v13 = vunpack.c.l.b16 %v3521_v29 }
 0x56f   : > { %v3552_v19 = vpack.c.b16 %v3545_v13, %v3544_v48 }
 0x571   : > { %v3358_v61 = vpop.f32.mrf.mxu2  ;;  %4275 = vmatmul.msk.bf16.vlgmr.msra.gmra.mxu3 %vm1963_vm5, %v3552_v19 }
 0x572   : > { %v4563_v30 = vpop.eup %4562  ;;  %v3446_v18 = vmul.f32 1.442695, %v3358_v61 }
 0x573   : > { %v6277_v24 = vpop.f32.mrf.mxu0  ;;  %v3478_v28 = vsel %vm1963_vm5, %v4563_v30, 0.0  ;;  %v3522_v54 = vpack.c.bf16 %v4563_v30, %v4563_v30 }
 0x574   : > { %4564 = vpow2.f32 %v3446_v18  ;;  %2972 = vadd.xlane.f32.xlu2 %v2971_v21  ;;  %3479 = vadd.xlane.f32.xlu0 %v3478_v28  ;;  %v2977_v18 = vsel %vm1963_vm5, %v6127_v10, 0.0 }
 0x575   : > { %v3546_v26 = vunpack.c.l.b16 %v3522_v54 }
 0x579   : > { %v3361_v47 = vpop.f32.mrf.mxu2 }
 0x57a   : > { %v4565_v60 = vpop.eup %4564  ;;  %v3448_v39 = vmul.f32 1.442695, %v3361_v47 }
 0x57b   : > { %v3523_v42 = vpack.c.bf16 %v4565_v60, %v4565_v60  ;;  %v3420_v53 = vpop.f32.mrf.mxu0  ;;  %v3481_v44 = vsel %vm1963_vm5, %v4565_v60, 0.0 }
 0x57c   : > { %4566 = vpow2.f32 %v3448_v39  ;;  %v2414_v29 = vpop.xlane.xlu2 %2413  ;;  %2975 = vadd.xlane.f32.xlu0 %v2974_v33  ;;  %3482 = vadd.xlane.f32.xlu1 %v3481_v44  ;;  %v3456_v7 = vmul.f32 1.442695, %v3420_v53 }
 0x57d   : > { %4568 = vrcp.f32 %v2411_v14  ;;  %v3547_v56 = vunpack.c.l.b16 %v3523_v42  ;;  %v3209_v14 = vld [vmem:[%s6577_s5 + $0x8] sm:$0xf]  ;;  %v2420_v42 = vpop.xlane.xlu0 %2419 }
 0x57e   : > { %4570 = vrcp.f32 %v2414_v29  ;;  %v3235_v53 = vsel %vm2660_vm6, %v3209_v14, 0 }
 0x57f   : > { %v3553_v48 = vpack.c.b16 %v3547_v56, %v3546_v26  ;;  %4572 = vpow2.f32 %v3456_v7  ;;  %3244 = vmatpush.bf16.msra.mxu1 %v3235_v53  ;;  %v2417_v26 = vpop.xlane.xlu1 %2416 }
 0x581   : > { %v3363_v13 = vpop.f32.mrf.mxu2  ;;  %4276 = vmatmul.msk.bf16.gmra.mxu3 %vm1963_vm5, %v3553_v48 }
 0x582   : > { %v4567_v19 = vpop.eup %4566  ;;  %v3450_v61 = vmul.f32 1.442695, %v3363_v13 }
 0x583   : > { %v4569_v30 = vpop.eup %4568  ;;  %v3422_v3 = vpop.f32.mrf.mxu0  ;;  %v3484_v21 = vsel %vm1963_vm5, %v4567_v19, 0.0  ;;  %v3524_v33 = vpack.c.bf16 %v4567_v19, %v4567_v19 }
 0x584   : > { %4574 = vpow2.f32 %v3450_v61  ;;  %v3458_v28 = vmul.f32 1.442695, %v3422_v3  ;;  %2978 = vadd.xlane.f32.xlu0 %v2977_v18  ;;  %3485 = vadd.xlane.f32.xlu1 %v3484_v21  ;;  %v4571_v54 = vpop.eup %4570  ;;  %v2619_v47 = vmul.f32 %v4569_v30, %v6113_v17 }
 0x585   : > { %v2620_v60 = vmul.f32 %v4571_v54, %v6120_v4  ;;  %v6294_v39 = vpop.eup %4572  ;;  %v2980_v4 = vsel %vm1963_vm5, %v6125_v16, 0.0  ;;  %v3548_v19 = vunpack.c.l.b16 %v3524_v33  ;;  %v2983_v33 = vsel %vm1963_vm5, %v6201_v51, 0.0 }
 0x586   : > { %4576 = vpow2.f32 %v3458_v28  ;;  %v3528_v56 = vpack.c.bf16 %v6294_v39, %v6294_v39  ;;  %v2986_v51 = vsel %vm1963_vm5, %v6205_v15, 0.0 }
 0x587   : > { %v2631_v10 = vpack.c.bf16 %v2620_v60, %v2619_v47  ;;  %4578 = vrcp.f32 %v2420_v42 }
 0x588   : > { %v3617_v21 = vunpack.c.l.b16 %v3528_v56  ;;  %v2423_v56 = vpop.xlane.xlu2 %2422 }
 0x589   : > { %v3366_v44 = vpop.f32.mrf.mxu2  ;;  %4231 = vmatmul.msk.bf16.gmra.mxu1 %vm1796_vm0, %v2631_v10 }
 0x58a   : > { %v4575_v29 = vpop.eup %4574  ;;  %v3452_v17 = vmul.f32 1.442695, %v3366_v44 }
 0x58b   : > { %v3525_v7 = vpack.c.bf16 %v4575_v29, %v4575_v29  ;;  %v3425_v48 = vpop.f32.mrf.mxu0  ;;  %v3487_v13 = vsel %vm1963_vm5, %v4575_v29, 0.0 }
 0x58c   : > { %v4577_v61 = vpop.eup %4576  ;;  %4580 = vpow2.f32 %v3452_v17  ;;  %2981 = vadd.xlane.f32.xlu1 %v2980_v4  ;;  %3488 = vadd.xlane.f32.xlu2 %v3487_v13  ;;  %v3460_v18 = vmul.f32 1.442695, %v3425_v48 }
 0x58d   : > { %4582 = vrcp.f32 %v2417_v26  ;;  %v3549_v30 = vunpack.c.l.b16 %v3525_v7  ;;  %v3529_v3 = vpack.c.bf16 %v4577_v61, %v4577_v61  ;;  %v4579_v54 = vpop.eup %4578 }
 0x58e   : > { %4584 = vpow2.f32 %v3460_v18  ;;  %v2622_v29 = vmul.f32 %v4579_v54, %v6145_v62 }
 0x58f   : > { %v3618_v28 = vunpack.c.l.b16 %v3529_v3  ;;  %v3554_v16 = vpack.c.b16 %v3549_v30, %v3548_v19  ;;  %v2426_v19 = vpop.xlane.xlu0 %2425 }
 0x591   : > { %v3625_v47 = vpack.c.b16 %v3618_v28, %v3617_v21  ;;  %v3368_v60 = vpop.f32.mrf.mxu2  ;;  %4277 = vmatmul.msk.bf16.gmra.mxu3 %vm1963_vm5, %v3554_v16 }
 0x592   : > { %v4581_v14 = vpop.eup %4580  ;;  %v3454_v42 = vmul.f32 1.442695, %v3368_v60 }
 0x593   : > { %v4583_v10 = vpop.eup %4582  ;;  %v3427_v53 = vpop.f32.mrf.mxu0  ;;  %4279 = vmatmul.msk.bf16.vlgmr.msrb.gmra.mxu2 %vm1963_vm5, %v3625_v47  ;;  %v3490_v44 = vsel %vm1963_vm5, %v4581_v14, 0.0  ;;  %v3526_v48 = vpack.c.bf16 %v4581_v14, %v4581_v14 }
 0x594   : > { %4586 = vpow2.f32 %v3454_v42  ;;  %v3462_v26 = vmul.f32 1.442695, %v3427_v53  ;;  %2984 = vadd.xlane.f32.xlu1 %v2983_v33  ;;  %3491 = vadd.xlane.f32.xlu2 %v3490_v44  ;;  %v2621_v17 = vmul.f32 %v4583_v10, %v6137_v37  ;;  %v4585_v4 = vpop.eup %4584  ;;  %v3499_v37 = vsel %vm1963_vm5, %v4577_v61, 0.0 }
 0x595   : > { %v3530_v62 = vpack.c.bf16 %v4585_v4, %v4585_v4  ;;  %v3550_v28 = vunpack.c.l.b16 %v3526_v48  ;;  %v2989_v61 = vsel %vm1963_vm5, %v6214_v36, 0.0 }
 0x596   : > { %4588 = vpow2.f32 %v3462_v26  ;;  %v2632_v7 = vpack.c.bf16 %v2622_v29, %v2621_v17  ;;  %v3496_v29 = vsel %vm1963_vm5, %v6294_v39, 0.0 }
 0x597   : > { %4590 = vrcp.f32 %v2423_v56  ;;  %v3619_v60 = vunpack.c.l.b16 %v3530_v62  ;;  %v3502_v56 = vsel %vm1963_vm5, %v4585_v4, 0.0  ;;  %v2429_v62 = vpop.xlane.xlu1 %2428 }
 0x598   : > { %4592 = vrcp.f32 %v2426_v19 }
 0x599   : > { %4232 = vmatmul.msk.bf16.gmra.mxu1 %vm1796_vm0, %v2632_v7  ;;  %v3435_v15 = vpop.f32.mrf.mxu2 }
 0x59a   : > { %v4587_v13 = vpop.eup %4586 }
 0x59b   : > { %v3527_v30 = vpack.c.bf16 %v4587_v13, %v4587_v13  ;;  %v3430_v3 = vpop.f32.mrf.mxu0  ;;  %v3493_v18 = vsel %vm1963_vm5, %v4587_v13, 0.0  ;;  %v2432_v13 = vpop.xlane.xlu2 %2431 }
 0x59c   : > { %v4589_v21 = vpop.eup %4588  ;;  %2987 = vadd.xlane.f32.xlu2 %v2986_v51  ;;  %3494 = vadd.xlane.f32.xlu0 %v3493_v18  ;;  %v3464_v47 = vmul.f32 1.442695, %v3430_v3  ;;  %v3468_v18 = vmul.f32 1.442695, %v3435_v15 }
 0x59d   : > { %v3551_v16 = vunpack.c.l.b16 %v3527_v30  ;;  %v3531_v54 = vpack.c.bf16 %v4589_v21, %v4589_v21  ;;  %3500 = vadd.xlane.f32.xlu1 %v3499_v37  ;;  %v4591_v10 = vpop.eup %4590  ;;  %v3505_v39 = vsel %vm1963_vm5, %v4589_v21, 0.0 }
 0x59e   : > { %4594 = vpow2.f32 %v3464_v47  ;;  %v4593_v33 = vpop.eup %4592  ;;  %v2623_v26 = vmul.f32 %v4591_v10, %v6152_v41  ;;  %v2992_v41 = vsel %vm1963_vm5, %v6220_v22, 0.0  ;;  %v2995_v47 = vsel %vm1963_vm5, %v6233_v12, 0.0 }
 0x59f   : > { %v3620_v14 = vunpack.c.l.b16 %v3531_v54  ;;  %v3555_v42 = vpack.c.b16 %v3551_v16, %v3550_v28  ;;  %v2624_v7 = vmul.f32 %v4593_v33, %v6162_v49  ;;  %v2998_v49 = vsel %vm1963_vm5, %v6240_v27, 0.0  ;;  %v2964_v12 = vpop.xlane.xlu1 %2963 }
 0x5a1   : > { %4278 = vmatmul.msk.bf16.gmra.mxu3 %vm1963_vm5, %v3555_v42  ;;  %v3626_v53 = vpack.c.b16 %v3620_v14, %v3619_v60  ;;  %v2633_v19 = vpack.c.bf16 %v2624_v7, %v2623_v26  ;;  %v3437_v51 = vpop.f32.mrf.mxu2  ;;  %v3001_v14 = vsel %vm1963_vm5, %v6253_v11, 0.0  ;;  %v6347_v7 = vpop.f32.mrf.mxu1 }
 0x5a2   : > { %v3470_v4 = vmul.f32 1.442695, %v3437_v51 }
 0x5a3   : > { %v3432_v44 = vpop.f32.mrf.mxu0  ;;  %4280 = vmatmul.msk.bf16.gmra.mxu2 %vm1963_vm5, %v3626_v53  ;;  %v2961_v53 = vpop.xlane.xlu0 %2960 }
 0x5a4   : > { %v3466_v17 = vmul.f32 1.442695, %v3432_v44  ;;  %2990 = vadd.xlane.f32.xlu2 %v2989_v61  ;;  %3497 = vadd.xlane.f32.xlu0 %v3496_v29  ;;  %v4595_v48 = vpop.eup %4594  ;;  %v3004_v29 = vsel %vm1963_vm5, %v6260_v38, 0.0 }
 0x5a5   : > { %3503 = vadd.xlane.f32.xlu1 %v3502_v56  ;;  %v3532_v36 = vpack.c.bf16 %v4595_v48, %v4595_v48  ;;  %v3508_v27 = vsel %vm1963_vm5, %v4595_v48, 0.0 }
 0x5a6   : > { %4596 = vpow2.f32 %v3466_v17 }
 0x5a7   : > { %4598 = vrcp.f32 %v2432_v13  ;;  %v3621_v37 = vunpack.c.l.b16 %v3532_v36 }
 0x5a8   : > { %4600 = vrcp.f32 %v2429_v62 }
 0x5a9   : > { %4233 = vmatmul.msk.bf16.gmra.mxu1 %vm1796_vm0, %v2633_v19  ;;  %4602 = vpow2.f32 %v3470_v4 }
 0x5aa   : > { %4604 = vpow2.f32 %v3468_v18  ;;  %v2967_v18 = vpop.xlane.xlu1 %2966 }
 0x5ab   : > { %4606 = vrcp.f32 %v2961_v53 }
 0x5ac   : > { %v4597_v30 = vpop.eup %4596  ;;  %2993 = vadd.xlane.f32.xlu0 %v2992_v41  ;;  %3506 = vadd.xlane.f32.xlu2 %v3505_v39  ;;  %4608 = vrcp.f32 %v2964_v12  ;;  %v6358_v39 = vpop.f32.mrf.mxu1 }
 0x5ad   : > { %v3533_v3 = vpack.c.bf16 %v4597_v30, %v4597_v30  ;;  %2999 = vadd.xlane.f32.xlu1 %v2998_v49  ;;  %v4599_v16 = vpop.eup %4598  ;;  %v3511_v11 = vsel %vm1963_vm5, %v4597_v30, 0.0  ;;  %v3722_v30 = vld [vmem:[%s6577_s5 + $0xc] sm:$0xf]  ;;  %4610 = vrcp.f32 %v2967_v18 }
 0x5ae   : > { %v4601_v21 = vpop.eup %4600  ;;  %v2626_v60 = vmul.f32 %v4599_v16, %v6186_v63  ;;  %v3748_v4 = vsel %vm2660_vm6, %v3722_v30, 0 }
 0x5af   : > { %v3622_v28 = vunpack.c.l.b16 %v3533_v3  ;;  %v4603_v15 = vpop.eup %4602  ;;  %v2625_v42 = vmul.f32 %v4601_v21, %v6176_v6  ;;  %3757 = vmatpush.bf16.msra.mxu0 %v3748_v4 }
 0x5b0   : > { %v4605_v10 = vpop.eup %4604  ;;  %v3535_v44 = vpack.c.bf16 %v4603_v15, %v4603_v15  ;;  %v3517_v26 = vsel %vm1963_vm5, %v4603_v15, 0.0 }
 0x5b1   : > { %v6330_v54 = vpop.f32.mrf.mxu3  ;;  %v3627_v22 = vpack.c.b16 %v3622_v28, %v3621_v37  ;;  %v2634_v33 = vpack.c.bf16 %v2626_v60, %v2625_v42  ;;  %v3534_v63 = vpack.c.bf16 %v4605_v10, %v4605_v10  ;;  %v4607_v56 = vpop.eup %4606  ;;  %v3514_v38 = vsel %vm1963_vm5, %v4605_v10, 0.0 }
 0x5b2   : > { %v3624_v6 = vunpack.c.l.b16 %v3535_v44  ;;  %v4609_v19 = vpop.eup %4608  ;;  %v3185_v51 = vmul.f32 %v4607_v56, %v6227_v58 }
 0x5b3   : > { %4281 = vmatmul.msk.bf16.gmra.mxu2 %vm1963_vm5, %v3627_v22  ;;  %v3623_v17 = vunpack.c.l.b16 %v3534_v63  ;;  %v3186_v62 = vmul.f32 %v4609_v19, %v6235_v25  ;;  %v4611_v21 = vpop.eup %4610 }
 0x5b4   : > { %2996 = vadd.xlane.f32.xlu0 %v2995_v47  ;;  %3509 = vadd.xlane.f32.xlu2 %v3508_v27  ;;  %v6366_v58 = vpop.f32.mrf.mxu1  ;;  %v3187_v27 = vmul.f32 %v4611_v21, %v6247_v45 }
 0x5b5   : > { %3002 = vadd.xlane.f32.xlu1 %v3001_v14  ;;  %v3628_v13 = vpack.c.b16 %v3624_v6, %v3623_v17  ;;  %v3201_v36 = vpack.c.bf16 %v3186_v62, %v3185_v51 }
 0x5b9   : > { %v6340_v61 = vpop.f32.mrf.mxu3  ;;  %4234 = vmatmul.msk.bf16.gmra.mxu1 %vm1796_vm0, %v2634_v33 }
 0x5bc   : > { %3005 = vadd.xlane.f32.xlu2 %v3004_v29  ;;  %3512 = vadd.xlane.f32.xlu0 %v3511_v11  ;;  %v6370_v37 = vpop.f32.mrf.mxu1 }
 0x5bd   : > { %3518 = vadd.xlane.f32.xlu1 %v3517_v26 }
 0x5c1   : > { %v6349_v48 = vpop.f32.mrf.mxu3 }
 0x5c3   : > { %4282 = vmatmul.msk.bf16.gmra.mxu2 %vm1963_vm5, %v3628_v13 }
 0x5c4   : > { %3515 = vadd.xlane.f32.xlu0 %v3514_v38  ;;  %v6375_v60 = vpop.f32.mrf.mxu1 }
 0x5c9   : > { %v6355_v41 = vpop.f32.mrf.mxu3  ;;  %4259 = vmatmul.msk.bf16.vlgmr.msra.gmra.mxu1 %vm1796_vm0, %v3201_v36 }
 0x5cc   : > { %v6381_v12 = vpop.f32.mrf.mxu1 }
 0x5d1   : > { %v6364_v49 = vpop.f32.mrf.mxu3 }
 0x5d4   : > { %v6385_v56 = vpop.f32.mrf.mxu1 }
 0x5d7   : > { %v3474_v3 = vpop.xlane.xlu2 %3473 }
 0x5d9   : > { %v6368_v25 = vpop.f32.mrf.mxu3 }
 0x5df   : > { %v2970_v28 = vpop.xlane.xlu2 %2969  ;;  %v3477_v16 = vpop.xlane.xlu0 %3476 }
 0x5e0   : > { %4612 = vrcp.f32 %v2970_v28 }
 0x5e1   : > { %v6372_v22 = vpop.f32.mrf.mxu3 }
 0x5e6   : > { %v4613_v47 = vpop.eup %4612 }
 0x5e7   : > { %v3188_v14 = vmul.f32 %v4613_v47, %v6256_v5  ;;  %v3480_v15 = vpop.xlane.xlu0 %3479  ;;  %v2973_v10 = vpop.xlane.xlu2 %2972 }
 0x5e8   : > { %4614 = vrcp.f32 %v2973_v10 }
 0x5e9   : > { %v3202_v42 = vpack.c.bf16 %v3188_v14, %v3187_v27  ;;  %v6379_v53 = vpop.f32.mrf.mxu3 }
 0x5eb   : > { %4260 = vmatmul.msk.bf16.gmra.mxu1 %vm1796_vm0, %v3202_v42 }
 0x5ee   : > { %v4615_v29 = vpop.eup %4614 }
 0x5ef   : > { %v3483_v33 = vpop.xlane.xlu1 %3482  ;;  %v2976_v44 = vpop.xlane.xlu0 %2975  ;;  %v3189_v5 = vmul.f32 %v4615_v29, %v6265_v35 }
 0x5f0   : > { %4616 = vrcp.f32 %v2976_v44 }
 0x5f1   : > { %4618 = vrcp.f32 %v3474_v3  ;;  %v6389_v3 = vpop.f32.mrf.mxu1 }
 0x5f2   : > { %4620 = vrcp.f32 %v3477_v16 }
 0x5f4   : > { %v3589_v63 = vpop.f32.mrf.mxu3 }
 0x5f6   : > { %v4617_v45 = vpop.eup %4616 }
 0x5f7   : > { %v3486_v11 = vpop.xlane.xlu1 %3485  ;;  %v3190_v26 = vmul.f32 %v4617_v45, %v6268_v1  ;;  %v4619_v17 = vpop.eup %4618 }
 0x5f8   : > { %v2979_v13 = vpop.xlane.xlu0 %2978  ;;  %v4621_v19 = vpop.eup %4620  ;;  %v3698_v51 = vmul.f32 %v4619_v17, %v3589_v63 }
 0x5f9   : > { %v3203_v6 = vpack.c.bf16 %v3190_v26, %v3189_v5  ;;  %4622 = vrcp.f32 %v2979_v13 }
 0x5fb   : > { %4261 = vmatmul.msk.bf16.gmra.mxu1 %vm1796_vm0, %v3203_v6 }
 0x5fc   : > { %v3591_v38 = vpop.f32.mrf.mxu3 }
 0x5fd   : > { %v3699_v62 = vmul.f32 %v4621_v19, %v3591_v38 }
 0x5ff   : > { %v3714_v36 = vpack.c.bf16 %v3699_v62, %v3698_v51  ;;  %v2982_v30 = vpop.xlane.xlu1 %2981  ;;  %v3489_v4 = vpop.xlane.xlu2 %3488 }
 0x600   : > { %4624 = vrcp.f32 %v2982_v30  ;;  %v4623_v35 = vpop.eup %4622 }
 0x601   : > { %4283 = vmatmul.msk.bf16.vlgmr.msra.gmra.mxu0 %vm1796_vm0, %v3714_v36  ;;  %4626 = vrcp.f32 %v3480_v15  ;;  %v3191_v28 = vmul.f32 %v4623_v35, %v6271_v9 }
 0x602   : > { %4628 = vrcp.f32 %v3483_v33 }
 0x604   : > { %v3594_v1 = vpop.f32.mrf.mxu3 }
 0x606   : > { %v4625_v18 = vpop.eup %4624  ;;  %v6394_v63 = vpop.f32.mrf.mxu1 }
 0x607   : > { %v3192_v16 = vmul.f32 %v4625_v18, %v6277_v24  ;;  %v3492_v21 = vpop.xlane.xlu2 %3491  ;;  %v4627_v27 = vpop.eup %4626 }
 0x608   : > { %v4629_v14 = vpop.eup %4628  ;;  %v2985_v42 = vpop.xlane.xlu1 %2984  ;;  %v3700_v44 = vmul.f32 %v4627_v27, %v3594_v1 }
 0x609   : > { %v3204_v47 = vpack.c.bf16 %v3192_v16, %v3191_v28  ;;  %4630 = vrcp.f32 %v2985_v42 }
 0x60b   : > { %4262 = vmatmul.msk.bf16.gmra.mxu1 %vm1796_vm0, %v3204_v47 }
 0x60c   : > { %v3596_v10 = vpop.f32.mrf.mxu3 }
 0x60d   : > { %v3701_v29 = vmul.f32 %v4629_v14, %v3596_v10 }
 0x60e   : > { %v6397_v26 = vpop.f32.mrf.mxu1 }
 0x60f   : > { %v3715_v15 = vpack.c.bf16 %v3701_v29, %v3700_v44  ;;  %v3495_v45 = vpop.xlane.xlu0 %3494  ;;  %v2988_v33 = vpop.xlane.xlu2 %2987 }
 0x610   : > { %4632 = vrcp.f32 %v2988_v33  ;;  %v4631_v24 = vpop.eup %4630  ;;  %v3501_v19 = vpop.xlane.xlu1 %3500 }
 0x611   : > { %4284 = vmatmul.msk.bf16.gmra.mxu0 %vm1796_vm0, %v3715_v15  ;;  %4634 = vrcp.f32 %v3486_v11  ;;  %v3193_v17 = vmul.f32 %v4631_v24, %v6330_v54 }
 0x612   : > { %4636 = vrcp.f32 %v3489_v4 }
 0x614   : > { %v3599_v9 = vpop.f32.mrf.mxu3 }
 0x616   : > { %v4633_v5 = vpop.eup %4632  ;;  %v6402_v18 = vpop.f32.mrf.mxu1 }
 0x617   : > { %v3498_v6 = vpop.xlane.xlu0 %3497  ;;  %v3194_v13 = vmul.f32 %v4633_v5, %v6340_v61  ;;  %v4635_v51 = vpop.eup %4634 }
 0x618   : > { %v2991_v62 = vpop.xlane.xlu2 %2990  ;;  %v4637_v36 = vpop.eup %4636  ;;  %v3702_v35 = vmul.f32 %v4635_v51, %v3599_v9 }
 0x619   : > { %v3205_v38 = vpack.c.bf16 %v3194_v13, %v3193_v17  ;;  %4638 = vrcp.f32 %v2991_v62  ;;  %v3662_v28 = vpop.f32.mrf.mxu2  ;;  %v3504_v54 = vpop.xlane.xlu1 %3503 }
 0x61b   : > { %4263 = vmatmul.msk.bf16.gmra.mxu1 %vm1796_vm0, %v3205_v38 }
 0x61c   : > { %v3601_v30 = vpop.f32.mrf.mxu3 }
 0x61d   : > { %v3703_v1 = vmul.f32 %v4637_v36, %v3601_v30 }
 0x61e   : > { %v6407_v15 = vpop.f32.mrf.mxu1 }
 0x61f   : > { %v3716_v11 = vpack.c.bf16 %v3703_v1, %v3702_v35  ;;  %v2994_v4 = vpop.xlane.xlu0 %2993  ;;  %v4639_v61 = vpop.eup %4638 }
 0x620   : > { %4640 = vrcp.f32 %v2994_v4  ;;  %v3507_v27 = vpop.xlane.xlu2 %3506  ;;  %v3195_v14 = vmul.f32 %v4639_v61, %v6349_v48 }
 0x621   : > { %4285 = vmatmul.msk.bf16.gmra.mxu0 %vm1796_vm0, %v3716_v11  ;;  %4642 = vrcp.f32 %v3492_v21  ;;  %v3664_v33 = vpop.f32.mrf.mxu2  ;;  %v3000_v24 = vpop.xlane.xlu1 %2999 }
 0x622   : > { %4644 = vrcp.f32 %v3495_v45 }
 0x624   : > { %v3604_v16 = vpop.f32.mrf.mxu3 }
 0x626   : > { %v4641_v47 = vpop.eup %4640  ;;  %v6411_v38 = vpop.f32.mrf.mxu1 }
 0x627   : > { %v3196_v42 = vmul.f32 %v4641_v47, %v6355_v41  ;;  %v2997_v44 = vpop.xlane.xlu0 %2996  ;;  %v4643_v29 = vpop.eup %4642 }
 0x628   : > { %v4645_v9 = vpop.eup %4644  ;;  %v3704_v17 = vmul.f32 %v4643_v29, %v3604_v16  ;;  %4646 = vrcp.f32 %v2997_v44  ;;  %v3510_v13 = vpop.xlane.xlu2 %3509 }
 0x629   : > { %v3206_v10 = vpack.c.bf16 %v3196_v42, %v3195_v14  ;;  %4648 = vrcp.f32 %v3000_v24  ;;  %v3667_v51 = vpop.f32.mrf.mxu2  ;;  %v3003_v16 = vpop.xlane.xlu1 %3002 }
 0x62a   : > { %4650 = vrcp.f32 %v3498_v6 }
 0x62b   : > { %4264 = vmatmul.msk.bf16.gmra.mxu1 %vm1796_vm0, %v3206_v10  ;;  %4652 = vrcp.f32 %v3501_v19 }
 0x62c   : > { %v3606_v5 = vpop.f32.mrf.mxu3 }
 0x62d   : > { %v3705_v21 = vmul.f32 %v4645_v9, %v3606_v5 }
 0x62e   : > { %v4647_v48 = vpop.eup %4646  ;;  %v6416_v19 = vpop.f32.mrf.mxu1 }
 0x62f   : > { %v3717_v45 = vpack.c.bf16 %v3705_v21, %v3704_v17  ;;  %v4649_v41 = vpop.eup %4648  ;;  %v3197_v62 = vmul.f32 %v4647_v48, %v6364_v49  ;;  %v3513_v17 = vpop.xlane.xlu0 %3512 }
 0x630   : > { %v4651_v36 = vpop.eup %4650  ;;  %v3198_v30 = vmul.f32 %v4649_v41, %v6368_v25  ;;  %v3006_v1 = vpop.xlane.xlu2 %3005 }
 0x631   : > { %4286 = vmatmul.msk.bf16.gmra.mxu0 %vm1796_vm0, %v3717_v45  ;;  %v4653_v35 = vpop.eup %4652  ;;  %v3706_v4 = vmul.f32 %v4651_v36, %v3662_v28  ;;  %4654 = vrcp.f32 %v3006_v1  ;;  %v3669_v47 = vpop.f32.mrf.mxu2 }
 0x632   : > { %v3207_v11 = vpack.c.bf16 %v3198_v30, %v3197_v62  ;;  %v3707_v61 = vmul.f32 %v4653_v35, %v3664_v33  ;;  %4656 = vrcp.f32 %v3003_v16  ;;  %v3519_v36 = vpop.xlane.xlu1 %3518 }
 0x633   : > { %4658 = vrcp.f32 %v3507_v27 }
 0x634   : > { %v3718_v6 = vpack.c.bf16 %v3707_v61, %v3706_v4  ;;  %4660 = vrcp.f32 %v3504_v54 }
 0x635   : > { %4662 = vrcp.f32 %v3513_v17 }
 0x636   : > { %v6421_v10 = vpop.f32.mrf.mxu1  ;;  %4664 = vrcp.f32 %v3510_v13 }
 0x637   : > { %v4655_v49 = vpop.eup %4654  ;;  %4666 = vrcp.f32 %v3519_v36  ;;  %v2770_v36 = vadd.f32 %v6191_v20, %v6394_v63 }
 0x638   : > { %v4657_v14 = vpop.eup %4656  ;;  %v3200_v25 = vmul.f32 %v4655_v49, %v6379_v53 }
 0x639   : > { %v3199_v28 = vmul.f32 %v4657_v14, %v6372_v22  ;;  %v4659_v42 = vpop.eup %4658  ;;  %v3672_v44 = vpop.f32.mrf.mxu2  ;;  %v6434_v14 = vld [vmem:[%s6578_s6] ss:$0 sm:$0xff] }
 0x63a   : > { %v3709_v33 = vmul.f32 %v4659_v42, %v3669_v47  ;;  %v4661_v9 = vpop.eup %4660  ;;  %v2750_v47 = vadd.f32 %v6083_v32, %v6347_v7 }
 0x63b   : > { %4265 = vmatmul.msk.bf16.gmra.mxu1 %vm1796_vm0, %v3207_v11  ;;  %v3208_v29 = vpack.c.bf16 %v3200_v25, %v3199_v28  ;;  %v3708_v24 = vmul.f32 %v4661_v9, %v3667_v51  ;;  %v4663_v22 = vpop.eup %4662  ;;  %v3516_v51 = vpop.xlane.xlu0 %3515 }
 0x63c   : > { %v4665_v21 = vpop.eup %4664  ;;  %4668 = vrcp.f32 %v3516_v51 }
 0x63d   : > { %v3719_v5 = vpack.c.bf16 %v3709_v33, %v3708_v24  ;;  %v3710_v45 = vmul.f32 %v4665_v21, %v3672_v44  ;;  %v4667_v1 = vpop.eup %4666  ;;  %v2752_v44 = vadd.f32 %v6100_v2, %v6358_v39 }
 0x63e   : > { %v6425_v54 = vpop.f32.mrf.mxu1 }
 0x641   : > { %4287 = vmatmul.msk.bf16.gmra.mxu0 %vm1796_vm0, %v3718_v6  ;;  %v3674_v53 = vpop.f32.mrf.mxu2 }
 0x642   : > { %v3711_v27 = vmul.f32 %v4663_v22, %v3674_v53  ;;  %v4669_v4 = vpop.eup %4668 }
 0x644   : > { %v3720_v62 = vpack.c.bf16 %v3711_v27, %v3710_v45 }
 0x646   : > { %v3246_v48 = vpop.f32.mrf.mxu1 }
 0x647   : > { %v3286_v49 = vadd.f32 %v3246_v48, %v2750_v47 }
 0x649   : > { %v3677_v41 = vpop.f32.mrf.mxu2 }
 0x64a   : > { %v3712_v61 = vmul.f32 %v4669_v4, %v3677_v41 }
 0x64b   : > { %4266 = vmatmul.msk.bf16.gmra.mxu1 %vm1796_vm0, %v3208_v29 }
 0x64e   : > { %v3248_v30 = vpop.f32.mrf.mxu1 }
 0x64f   : > { %v3287_v9 = vadd.f32 %v3248_v30, %v2752_v44 }
 0x651   : > { %4288 = vmatmul.msk.bf16.gmra.mxu0 %vm1796_vm0, %v3719_v5  ;;  %v3679_v35 = vpop.f32.mrf.mxu2 }
 0x652   : > { %v3713_v11 = vmul.f32 %v4667_v1, %v3679_v35  ;;  %v2755_v35 = vadd.f32 %v6117_v43, %v6366_v58  ;;  %v2757_v58 = vadd.f32 %v6129_v57, %v6370_v37 }
 0x654   : > { %v3721_v13 = vpack.c.bf16 %v3713_v11, %v3712_v61 }
 0x661   : > { %4289 = vmatmul.msk.bf16.gmra.mxu0 %vm1796_vm0, %v3720_v62 }
 0x668   : > { %v3251_v16 = vpop.f32.mrf.mxu1 }
 0x669   : > { %v3288_v4 = vadd.f32 %v3251_v16, %v2755_v35 }
 0x670   : > { %v3253_v6 = vpop.f32.mrf.mxu1 }
 0x671   : > { %4290 = vmatmul.msk.bf16.gmra.mxu0 %vm1796_vm0, %v3721_v13  ;;  %v2772_v13 = vadd.f32 %v6196_v23, %v6397_v26  ;;  %v2775_v23 = vadd.f32 %v6207_v50, %v6402_v18  ;;  %v2760_v50 = vadd.f32 %v6143_v31, %v6375_v60 }
 0x678   : > { %v3256_v33 = vpop.f32.mrf.mxu1 }
 0x67e   : > { %v3759_v25 = vpop.f32.mrf.mxu0 }
 0x67f   : > { %v3799_v28 = vadd.f32 %v3759_v25, %v3286_v49 }
 0x680   : > { %v6440_v17 = vpop.f32.mrf.mxu1 }
 0x681   : > { %v3819_v42 = vadd.f32 %v6434_v14, %v3799_v28 }
 0x683   : > { %v3851_v29 = vrot.slane %v3819_v42, 4  ;;  %3867 = vst [vmem:[#allocation1] ss:$2 sm:$0xff] %v3819_v42 }
 0x685   : > { %3872 = vst [vmem:[#allocation1 + $0x10] ss:$2 sm:$0xff] %v3851_v29  ;;  %v3289_v29 = vadd.f32 %v3253_v6, %v2757_v58  ;;  %v3290_v6 = vadd.f32 %v3256_v33, %v2760_v50 }
 0x686   : > { %v3761_v24 = vpop.f32.mrf.mxu0 }
 0x687   : > { %v3800_v32 = vadd.f32 %v3761_v24, %v3287_v9 }
 0x688   : > { %v6442_v27 = vpop.f32.mrf.mxu1 }
 0x689   : > { %v3820_v7 = vadd.f32 %v6434_v14, %v3800_v32 }
 0x68b   : > { %v3852_v5 = vrot.slane %v3820_v7, 4  ;;  %3877 = vst [vmem:[#allocation1 + $0x20] ss:$2 sm:$0xff] %v3820_v7 }
 0x68d   : > { %3882 = vst [vmem:[#allocation1 + $0x30] ss:$2 sm:$0xff] %v3852_v5 }
 0x68e   : > { %v3764_v53 = vpop.f32.mrf.mxu0 }
 0x68f   : > { %v3801_v47 = vadd.f32 %v3764_v53, %v3288_v4 }
 0x690   : > { %v6444_v2 = vpop.f32.mrf.mxu1 }
 0x691   : > { %v3821_v63 = vadd.f32 %v6434_v14, %v3801_v47 }
 0x693   : > { %v3853_v26 = vrot.slane %v3821_v63, 4 }
 0x696   : > { %v3766_v22 = vpop.f32.mrf.mxu0 }
 0x697   : > { %v3802_v57 = vadd.f32 %v3766_v22, %v3289_v29 }
 0x698   : > { %v3266_v45 = vpop.f32.mrf.mxu1 }
 0x699   : > { %v3294_v51 = vadd.f32 %v3266_v45, %v2770_v36  ;;  %v3822_v53 = vadd.f32 %v6434_v14, %v3802_v57  ;;  %v2777_v45 = vadd.f32 %v6212_v8, %v6407_v15  ;;  %v2762_v15 = vadd.f32 %v6158_v52, %v6381_v12 }
 0x69a   : > { %v2785_v57 = vadd.f32 %v6245_v40, %v6421_v10 }
 0x69e   : > { %v3769_v21 = vpop.f32.mrf.mxu0 }
 0x6a0   : > { %v3268_v41 = vpop.f32.mrf.mxu1 }
 0x6a1   : > { %v3295_v25 = vadd.f32 %v3268_v41, %v2772_v13  ;;  %v3803_v41 = vadd.f32 %v3769_v21, %v3290_v6 }
 0x6a3   : > { %v3823_v35 = vadd.f32 %v6434_v14, %v3803_v41 }
 0x6a5   : > { %v3855_v13 = vrot.slane %v3823_v35, 4 }
 0x6a6   : > { %v6446_v39 = vpop.f32.mrf.mxu0 }
 0x6a8   : > { %v3271_v11 = vpop.f32.mrf.mxu1 }
 0x6a9   : > { %v3296_v32 = vadd.f32 %v3271_v11, %v2775_v23 }
 0x6ae   : > { %v6448_v48 = vpop.f32.mrf.mxu0 }
 0x6b0   : > { %v3273_v16 = vpop.f32.mrf.mxu1 }
 0x6b1   : > { %v3297_v60 = vadd.f32 %v3273_v16, %v2777_v45 }
 0x6b6   : > { %v6450_v62 = vpop.f32.mrf.mxu0 }
 0x6be   : > { %v3779_v30 = vpop.f32.mrf.mxu0 }
 0x6bf   : > { %v3807_v1 = vadd.f32 %v3779_v30, %v3294_v51  ;;  %v3276_v51 = vpop.f32.mrf.mxu1  ;;  %v3854_v30 = vrot.slane %v3822_v53, 4 }
 0x6c1   : > { %v3827_v61 = vadd.f32 %v6434_v14, %v3807_v1 }
 0x6c3   : > { %v3859_v49 = vrot.slane %v3827_v61, 4  ;;  %3869 = vst [vmem:[#allocation1 + $0x1] ss:$2 sm:$0xff] %v3827_v61  ;;  %v2780_v61 = vadd.f32 %v6225_v0, %v6411_v38  ;;  %v2765_v0 = vadd.f32 %v6170_v34, %v6385_v56 }
 0x6c5   : > { %3874 = vst [vmem:[#allocation1 + $0x11] ss:$2 sm:$0xff] %v3859_v49  ;;  %v3291_v49 = vadd.f32 %v6440_v17, %v2762_v15  ;;  %v3292_v17 = vadd.f32 %v6442_v27, %v2765_v0 }
 0x6c6   : > { %v3781_v20 = vpop.f32.mrf.mxu0 }
 0x6c7   : > { %v3808_v28 = vadd.f32 %v3781_v20, %v3295_v25  ;;  %v3804_v52 = vadd.f32 %v6446_v39, %v3291_v49  ;;  %v3278_v12 = vpop.f32.mrf.mxu1  ;;  %v2782_v39 = vadd.f32 %v6230_v46, %v6416_v19 }
 0x6c9   : > { %v3828_v43 = vadd.f32 %v6434_v14, %v3808_v28  ;;  %v3824_v16 = vadd.f32 %v6434_v14, %v3804_v52  ;;  %v3299_v56 = vadd.f32 %v3278_v12, %v2782_v39 }
 0x6ca   : > { %v3870_v42 = vld.sshfl [vmem:[#allocation1] sm:$0xff pattern:$0x75316420] }
 0x6cb   : > { %v3938_v44 = vpack.c.bf16 %v3870_v42, %v3870_v42  ;;  %3886 = vst [vmem:[#allocation1] ss:$2 sm:$0xff] %v3821_v63  ;;  %v3860_v24 = vrot.slane %v3828_v43, 4  ;;  %v3298_v63 = vadd.f32 %v3276_v51, %v2780_v61  ;;  %v3805_v42 = vadd.f32 %v6448_v48, %v3292_v17 }
 0x6cc   : > { %v3875_v9 = vld.sshfl [vmem:[#allocation1 + $0x10] sm:$0xff pattern:$0x75316420]  ;;  %3879 = vst [vmem:[#allocation1 + $0x21] ss:$2 sm:$0xff] %v3828_v43  ;;  %v2767_v48 = vadd.f32 %v6184_v55, %v6389_v3 }
 0x6cd   : > { %v3939_v7 = vpack.c.bf16 %v3875_v9, %v3875_v9  ;;  %3955 = vst.msk [vmem:[%s6467_s24] sm:$0xf] %vm3954_vm7, %v3938_v44  ;;  %v3856_v44 = vrot.slane %v3824_v16, 4  ;;  %v3825_v29 = vadd.f32 %v6434_v14, %v3805_v42 }
 0x6ce   : > { %3889 = vst [vmem:[#allocation1 + $0x10] ss:$2 sm:$0xff] %v3853_v26  ;;  %v3784_v37 = vpop.f32.mrf.mxu0 }
 0x6cf   : > { %3956 = vst.msk [vmem:[%s6467_s24 + $0x4] sm:$0xf] %vm3954_vm7, %v3939_v7  ;;  %v3809_v18 = vadd.f32 %v3784_v37, %v3296_v32  ;;  %v3281_v32 = vpop.f32.mrf.mxu1  ;;  %v3857_v37 = vrot.slane %v3825_v29, 4 }
 0x6d0   : > { %3884 = vst [vmem:[#allocation1 + $0x31] ss:$2 sm:$0xff] %v3860_v24 }
 0x6d1   : > { %v3829_v5 = vadd.f32 %v6434_v14, %v3809_v18  ;;  %v3293_v18 = vadd.f32 %v6444_v2, %v2767_v48 }
 0x6d3   : > { %v3880_v22 = vld.sshfl [vmem:[#allocation1 + $0x20] sm:$0xff pattern:$0x75316420]  ;;  %v3861_v36 = vrot.slane %v3829_v5, 4  ;;  %3887 = vst [vmem:[#allocation1 + $0x1] ss:$2 sm:$0xff] %v3829_v5  ;;  %v3806_v55 = vadd.f32 %v6450_v62, %v3293_v18 }
 0x6d4   : > { %v3940_v31 = vpack.c.bf16 %v3880_v22, %v3880_v22  ;;  %3892 = vst [vmem:[#allocation1 + $0x20] ss:$2 sm:$0xff] %v3822_v53  ;;  %v3300_v53 = vadd.f32 %v3281_v32, %v2785_v57  ;;  %v2787_v22 = vadd.f32 %v6251_v59, %v6425_v54 }
 0x6d5   : > { %3890 = vst [vmem:[#allocation1 + $0x11] ss:$2 sm:$0xff] %v3861_v36  ;;  %v3826_v2 = vadd.f32 %v6434_v14, %v3806_v55 }
 0x6d6   : > { %3957 = vst.msk [vmem:[%s6467_s24 + $0x8] sm:$0xf] %vm3954_vm7, %v3940_v31  ;;  %v3786_v33 = vpop.f32.mrf.mxu0 }
 0x6d7   : > { %v3885_v1 = vld.sshfl [vmem:[#allocation1 + $0x30] sm:$0xff pattern:$0x75316420]  ;;  %v3810_v11 = vadd.f32 %v3786_v33, %v3297_v60  ;;  %v3283_v41 = vpop.f32.mrf.mxu1  ;;  %v3858_v60 = vrot.slane %v3826_v2, 4 }
 0x6d8   : > { %v3941_v4 = vpack.c.bf16 %v3885_v1, %v3885_v1  ;;  %3895 = vst [vmem:[#allocation1 + $0x30] ss:$2 sm:$0xff] %v3854_v30  ;;  %v3301_v31 = vadd.f32 %v3283_v41, %v2787_v22 }
 0x6d9   : > { %v3830_v8 = vadd.f32 %v6434_v14, %v3810_v11 }
 0x6da   : > { %3958 = vst.msk [vmem:[%s6467_s24 + $0xc] sm:$0xf] %vm3954_vm7, %v3941_v4  ;;  %v3888_v21 = vld.sshfl [vmem:[#allocation1] sm:$0xff pattern:$0x75316420] }
 0x6db   : > { %v3942_v47 = vpack.c.bf16 %v3888_v21, %v3888_v21  ;;  %3898 = vst [vmem:[#allocation1] ss:$2 sm:$0xff] %v3823_v35  ;;  %v3862_v20 = vrot.slane %v3830_v8, 4 }
 0x6dc   : > { %v3891_v25 = vld.sshfl [vmem:[#allocation1 + $0x10] sm:$0xff pattern:$0x75316420]  ;;  %3893 = vst [vmem:[#allocation1 + $0x21] ss:$2 sm:$0xff] %v3830_v8 }
 0x6dd   : > { %v3943_v28 = vpack.c.bf16 %v3891_v25, %v3891_v25  ;;  %3959 = vst.msk [vmem:[%s6467_s24 + $0x10] sm:$0xf] %vm3954_vm7, %v3942_v47  ;;  %v4002_v47 = vld [vmem:[%s6467_s24] sm:$0xff] (%p4828_p6)  }
 0x6de   : > { %3901 = vst [vmem:[#allocation1 + $0x10] ss:$2 sm:$0xff] %v3855_v13  ;;  %v3789_v43 = vpop.f32.mrf.mxu0 }
 0x6df   : > { %3960 = vst.msk [vmem:[%s6467_s24 + $0x14] sm:$0xf] %vm3954_vm7, %v3943_v28  ;;  %v3811_v38 = vadd.f32 %v3789_v43, %v3298_v63 }
 0x6e0   : > { %3896 = vst [vmem:[#allocation1 + $0x31] ss:$2 sm:$0xff] %v3862_v20 }
 0x6e1   : > { %v3831_v58 = vadd.f32 %v6434_v14, %v3811_v38  ;;  %v4006_v49 = vld [vmem:[%s6467_s24 + $0x8] sm:$0xff] (%p4828_p6)   ;;  %4003 = vst [vmem:[%s3985_s12] sm:$0xff] (%p4828_p6), %v4002_v47  }
 0x6e2   : > { %4007 = vst [vmem:[%s3985_s12 + $0x8] sm:$0xff] (%p4828_p6), %v4006_v49  }
 0x6e3   : > { %v3894_v23 = vld.sshfl [vmem:[#allocation1 + $0x20] sm:$0xff pattern:$0x75316420]  ;;  %v3863_v26 = vrot.slane %v3831_v58, 4  ;;  %3899 = vst [vmem:[#allocation1 + $0x1] ss:$2 sm:$0xff] %v3831_v58 }
 0x6e4   : > { %v3944_v34 = vpack.c.bf16 %v3894_v23, %v3894_v23  ;;  %3904 = vst [vmem:[#allocation1 + $0x20] ss:$2 sm:$0xff] %v3824_v16 }
 0x6e5   : > { %3902 = vst [vmem:[#allocation1 + $0x11] ss:$2 sm:$0xff] %v3863_v26 }
 0x6e6   : > { %3961 = vst.msk [vmem:[%s6467_s24 + $0x18] sm:$0xf] %vm3954_vm7, %v3944_v34  ;;  %v3791_v27 = vpop.f32.mrf.mxu0  ;;  %v4010_v25 = vld [vmem:[%s6467_s24 + $0x10] sm:$0xff] (%p4828_p6)  }
 0x6e7   : > { %v3897_v9 = vld.sshfl [vmem:[#allocation1 + $0x30] sm:$0xff pattern:$0x75316420]  ;;  %v3812_v24 = vadd.f32 %v3791_v27, %v3299_v56  ;;  %4011 = vst [vmem:[%s3985_s12 + $0x20] sm:$0xff] (%p4828_p6), %v4010_v25  }
 0x6e8   : > { %v3945_v46 = vpack.c.bf16 %v3897_v9, %v3897_v9  ;;  %3907 = vst [vmem:[#allocation1 + $0x30] ss:$2 sm:$0xff] %v3856_v44 }
 0x6e9   : > { %v3832_v19 = vadd.f32 %v6434_v14, %v3812_v24 }
 0x6ea   : > { %3962 = vst.msk [vmem:[%s6467_s24 + $0x1c] sm:$0xf] %vm3954_vm7, %v3945_v46  ;;  %v3900_v7 = vld.sshfl [vmem:[#allocation1] sm:$0xff pattern:$0x75316420] }
 0x6eb   : > { %v3946_v50 = vpack.c.bf16 %v3900_v7, %v3900_v7  ;;  %3910 = vst [vmem:[#allocation1] ss:$2 sm:$0xff] %v3825_v29  ;;  %v3864_v5 = vrot.slane %v3832_v19, 4 }
 0x6ec   : > { %v3903_v6 = vld.sshfl [vmem:[#allocation1 + $0x10] sm:$0xff pattern:$0x75316420]  ;;  %3905 = vst [vmem:[#allocation1 + $0x21] ss:$2 sm:$0xff] %v3832_v19 }
 0x6ed   : > { %v3947_v45 = vpack.c.bf16 %v3903_v6, %v3903_v6  ;;  %3963 = vst.msk [vmem:[%s6467_s24 + $0x20] sm:$0xf] %vm3954_vm7, %v3946_v50 }
 0x6ee   : > { %3913 = vst [vmem:[#allocation1 + $0x10] ss:$2 sm:$0xff] %v3857_v37  ;;  %v3794_v3 = vpop.f32.mrf.mxu0 }
 0x6ef   : > { %3964 = vst.msk [vmem:[%s6467_s24 + $0x24] sm:$0xf] %vm3954_vm7, %v3947_v45  ;;  %v3813_v40 = vadd.f32 %v3794_v3, %v3300_v53 }
 0x6f0   : > { %3908 = vst [vmem:[#allocation1 + $0x31] ss:$2 sm:$0xff] %v3864_v5 }
 0x6f1   : > { %v3833_v10 = vadd.f32 %v6434_v14, %v3813_v40  ;;  %v4014_v20 = vld [vmem:[%s6467_s24 + $0x18] sm:$0xff] (%p4828_p6)  }
 0x6f2   : > { %4015 = vst [vmem:[%s3985_s12 + $0x28] sm:$0xff] (%p4828_p6), %v4014_v20  }
 0x6f3   : > { %v3906_v36 = vld.sshfl [vmem:[#allocation1 + $0x20] sm:$0xff pattern:$0x75316420]  ;;  %v3865_v51 = vrot.slane %v3833_v10, 4  ;;  %3911 = vst [vmem:[#allocation1 + $0x1] ss:$2 sm:$0xff] %v3833_v10 }
 0x6f4   : > { %v3948_v62 = vpack.c.bf16 %v3906_v36, %v3906_v36  ;;  %3916 = vst [vmem:[#allocation1 + $0x20] ss:$2 sm:$0xff] %v3826_v2 }
 0x6f5   : > { %3914 = vst [vmem:[#allocation1 + $0x11] ss:$2 sm:$0xff] %v3865_v51 }
 0x6f6   : > { %3965 = vst.msk [vmem:[%s6467_s24 + $0x28] sm:$0xf] %vm3954_vm7, %v3948_v62  ;;  %v3796_v30 = vpop.f32.mrf.mxu0  ;;  %v4018_v63 = vld [vmem:[%s6467_s24 + $0x20] sm:$0xff] (%p4828_p6)  }
 0x6f7   : > { %v3909_v33 = vld.sshfl [vmem:[#allocation1 + $0x30] sm:$0xff pattern:$0x75316420]  ;;  %v3814_v35 = vadd.f32 %v3796_v30, %v3301_v31  ;;  %4019 = vst [vmem:[%s3985_s12 + $0x40] sm:$0xff] (%p4828_p6), %v4018_v63  }
 0x6f8   : > { %v3949_v1 = vpack.c.bf16 %v3909_v33, %v3909_v33  ;;  %3919 = vst [vmem:[#allocation1 + $0x30] ss:$2 sm:$0xff] %v3858_v60 }
 0x6f9   : > { %v3834_v59 = vadd.f32 %v6434_v14, %v3814_v35 }
 0x6fa   : > { %3966 = vst.msk [vmem:[%s6467_s24 + $0x2c] sm:$0xf] %vm3954_vm7, %v3949_v1  ;;  %v3912_v54 = vld.sshfl [vmem:[#allocation1] sm:$0xff pattern:$0x75316420] }
 0x6fb   : > { %v3950_v11 = vpack.c.bf16 %v3912_v54, %v3912_v54  ;;  %v3866_v4 = vrot.slane %v3834_v59, 4  ;;  %3917 = vst [vmem:[#allocation1 + $0x21] ss:$2 sm:$0xff] %v3834_v59 }
 0x6fc   : > { %v3915_v8 = vld.sshfl [vmem:[#allocation1 + $0x10] sm:$0xff pattern:$0x75316420] }
 0x6fd   : > { %v3951_v15 = vpack.c.bf16 %v3915_v8, %v3915_v8  ;;  %3967 = vst.msk [vmem:[%s6467_s24 + $0x30] sm:$0xf] %vm3954_vm7, %v3950_v11 }
 0x6fe   : > { %3920 = vst [vmem:[#allocation1 + $0x31] ss:$2 sm:$0xff] %v3866_v4 }
 0x6ff   : > { %3968 = vst.msk [vmem:[%s6467_s24 + $0x34] sm:$0xf] %vm3954_vm7, %v3951_v15 }
 0x701   : > { %v4022_v28 = vld [vmem:[%s6467_s24 + $0x28] sm:$0xff] (%p4828_p6)  }
 0x702   : > { %v3918_v21 = vld.sshfl [vmem:[#allocation1 + $0x20] sm:$0xff pattern:$0x75316420]  ;;  %4023 = vst [vmem:[%s3985_s12 + $0x48] sm:$0xff] (%p4828_p6), %v4022_v28  }
 0x703   : > { %v3952_v61 = vpack.c.bf16 %v3918_v21, %v3918_v21 }
 0x704   : > { %3977 = sbr.rel (!%p4828_p6) target bundleno = 1809 (0x711), region = 90 }
 0x705   : > { %v3921_v13 = vld.sshfl [vmem:[#allocation1 + $0x30] sm:$0xff pattern:$0x75316420]  ;;  %3969 = vst.msk [vmem:[%s6467_s24 + $0x38] sm:$0xf] %vm3954_vm7, %v3952_v61 }
 0x706   : > { %v3953_v14 = vpack.c.bf16 %v3921_v13, %v3921_v13  ;;  %v4026_v52 = vld [vmem:[%s6467_s24 + $0x30] sm:$0xff] (%p4828_p6)  }
 0x707   : > { %4027 = vst [vmem:[%s3985_s12 + $0x60] sm:$0xff] (%p4828_p6), %v4026_v52  }
 0x708   : > { %3970 = vst.msk [vmem:[%s6467_s24 + $0x3c] sm:$0xf] %vm3954_vm7, %v3953_v14 }
 0x70f   : > { %v4030_v12 = vld [vmem:[%s6467_s24 + $0x38] sm:$0xff]  }
 0x710   : > { %4031 = vst [vmem:[%s3985_s12 + $0x68] sm:$0xff] %v4030_v12  }
 0x711 PF: > { %s17_s30 = sadd.s32 1, %s4724_s30   ;;  %s6597_s24 = smov %s4704_s25 }
 0x712   : > { %p14_p12 = scmp.ge.s32.totalorder %s17_s30, 6   ;;  %s6598_s25 = smov %s4836_s16 }
 0x713   : > { %s6599_s26 = smov %s4716_s28  ;;  %s6600_s27 = smov %s4720_s29 }
 0x714   : > { %s6601_s28 = smov %s6604_s8  ;;  %s6602_s29 = smov %s6608_s9 }
 0x715   :  { %16 = sbr.rel (!%p14_p12) target bundleno = 4 (0x4), region = 190 }

</bundles_post_ra>
